<compile_context>
chip_gen: v7x
topology: tpu7x:2x2x1
jax: 0.10.0
libtpu: 0.0.40
codegen_flags: <defaults>
</compile_context>

<pallas_src>
import functools
import math

import jax
import jax.numpy as jnp
from jax.experimental import pallas as pl
from jax.experimental.pallas import tpu as pltpu

BN_EPS = 1e-5
LANE = 128                    # channel padding target (lane-dense)
TM_CONV = 128                 # output-row tile of the fused conv kernels
TM_STATS = 512                # row tile of the BN statistics reduction
VMEM_LIMIT = 32 * 1024 * 1024


# ----------------------------- small helpers --------------------------------

def _round_up(x, m):
    return ((x + m - 1) // m) * m


def _pad_axis(a, axis, new_size):
    pad = [(0, 0)] * a.ndim
    pad[axis] = (0, new_size - a.shape[axis])
    return jnp.pad(a, pad)


def _layout_consts(hh, ww):
    """Row layout for the flattened, spatially zero-padded (hh+2, ww+2) grid."""
    mpad = (hh + 2) * (ww + 2)
    guard = ww + 3                       # max |row offset| of a 3x3 tap
    nrt = pl.cdiv(mpad, TM_CONV)
    rows_out = nrt * TM_CONV             # output rows (padded coords, aligned)
    rows_in = rows_out + 2 * guard       # input rows incl. guard rows
    return mpad, guard, nrt, rows_out, rows_in


def _flatten_guarded(x_nhwc, guard, rows_in):
    """NHWC -> zero ring pad -> flatten (H+2)(W+2) -> add guard/alignment rows."""
    n, hh, ww, c = x_nhwc.shape
    xp = jnp.pad(x_nhwc, ((0, 0), (1, 1), (1, 1), (0, 0)))
    xf = xp.reshape(n, (hh + 2) * (ww + 2), c)
    return jnp.pad(xf, ((0, 0), (guard, rows_in - guard - xf.shape[1]), (0, 0)))


def _interior_mask(hh, ww, guard, rows_in):
    """1.0 on rows that are real pixels, 0.0 on the zero ring / guard rows."""
    q = jnp.arange(rows_in) - guard
    rr = q // (ww + 2)
    cc = q % (ww + 2)
    valid = (q >= 0) & (rr >= 1) & (rr <= hh) & (cc >= 1) & (cc <= ww)
    return valid.astype(jnp.float32).reshape(rows_in, 1)


def _extract_interior(flat, hh, ww):
    """Inverse of the padded-flat layout: keep only real pixels."""
    n = flat.shape[0]
    c = flat.shape[-1]
    g = flat[:, :(hh + 2) * (ww + 2), :].reshape(n, hh + 2, ww + 2, c)
    return g[:, 1:hh + 1, 1:ww + 1, :]


# ----------------------------- Pallas kernels -------------------------------

def _bn_stats_kernel(x_ref, o_ref, *, tile_m, total_rows):
    # Tiled per-channel sum / sum-of-squares reduction ('arbitrary' M axis).
    i = pl.program_id(0)

    @pl.when(i == 0)
    def _init():
        o_ref[...] = jnp.zeros_like(o_ref)

    x = x_ref[...]
    rows = jax.lax.broadcasted_iota(jnp.int32, x.shape, 0) + i * tile_m
    x = jnp.where(rows < total_rows, x, 0.0)          # mask the cdiv tail block
    o_ref[0:1, :] += jnp.sum(x, axis=0, keepdims=True)
    o_ref[1:2, :] += jnp.sum(x * x, axis=0, keepdims=True)


def _tap_matmuls(a, w_ref, tm, guard, rs):
    """9 shifted-view matmuls of a 3x3 conv on the flattened padded grid."""
    acc = None
    for t in range(9):
        off = guard + (t // 3 - 1) * rs + (t % 3 - 1)  # static row offset
        v = a[off:off + tm, :]
        d = jnp.dot(v, w_ref[t], preferred_element_type=jnp.float32)
        acc = d if acc is None else acc + d
    return acc


def _conv1_kernel(x_ref, m_ref, sc_ref, sh_ref, w_ref, b_ref, ws_ref, bs_ref,
                  h_ref, s_ref, *, tm, guard, rs):
    # Fused BN1+ReLU + nearest-upsample + conv3x3 (parity-packed 4*Cout output)
    # + shortcut 1x1 conv on the raw (pre-upsample) input.
    r = pl.program_id(1)
    start = pl.multiple_of(r * tm, tm)
    win = tm + 2 * guard
    xw = x_ref[0, pl.ds(start, win), :]                # raw input window
    mw = m_ref[pl.ds(start, win), :]
    a = jnp.maximum(xw * sc_ref[...] + sh_ref[...], 0.0) * mw   # BN+ReLU, ring->0
    acc = _tap_matmuls(a, w_ref, tm, guard, rs)        # (tm, 4*Cout)
    h_ref[0] = (acc + b_ref[...]).astype(h_ref.dtype)
    xc = xw[guard:guard + tm, :]                       # center rows, raw x
    s = jnp.dot(xc, ws_ref[...], preferred_element_type=jnp.float32)
    s_ref[0] = (s + bs_ref[...]).astype(s_ref.dtype)


def _conv2_kernel(x_ref, m_ref, sc_ref, sh_ref, w_ref, b_ref, res_ref,
                  o_ref, *, tm, guard, rs):
    # Fused BN2+ReLU + conv3x3 + shortcut residual add.
    r = pl.program_id(1)
    start = pl.multiple_of(r * tm, tm)
    win = tm + 2 * guard
    xw = x_ref[0, pl.ds(start, win), :]
    mw = m_ref[pl.ds(start, win), :]
    a = jnp.maximum(xw * sc_ref[...] + sh_ref[...], 0.0) * mw
    acc = _tap_matmuls(a, w_ref, tm, guard, rs)
    o_ref[0] = (acc + b_ref[...] + res_ref[0]).astype(o_ref.dtype)


# ------------------------------ wrappers -------------------------------------

def bn_batch_stats(x2d, count):
    """mean / rstd per channel over `count` real rows (zero rows are harmless)."""
    m, c = x2d.shape
    sums = pl.pallas_call(
        functools.partial(_bn_stats_kernel, tile_m=TM_STATS, total_rows=m),
        out_shape=jax.ShapeDtypeStruct((2, c), jnp.float32),
        grid=(pl.cdiv(m, TM_STATS),),
        in_specs=[pl.BlockSpec((TM_STATS, c), lambda i: (i, 0))],
        out_specs=pl.BlockSpec((2, c), lambda i: (0, 0)),
        compiler_params=pltpu.CompilerParams(
            dimension_semantics=("arbitrary",),
            vmem_limit_bytes=VMEM_LIMIT),
    )(x2d)
    mean = sums[0] / count
    var = jnp.maximum(sums[1] / count - mean * mean, 0.0)   # biased (PyTorch train)
    return mean, jax.lax.rsqrt(var + BN_EPS)


def resgen_block_forward(x_nchw, p):
    x = jnp.transpose(x_nchw, (0, 2, 3, 1)).astype(jnp.float32)   # NCHW -> NHWC
    n, hh, ww, cin = x.shape
    cout = p["conv1_w"].shape[0]
    cpi = _round_up(cin, LANE)
    cpo = _round_up(cout, LANE)
    h2, w2 = 2 * hh, 2 * ww

    # ---------------- parameter prep (channel pad + layout) ------------------
    g1p = _pad_axis(p["bn1_gamma"], 0, cpi)
    be1p = _pad_axis(p["bn1_beta"], 0, cpi)
    g2p = _pad_axis(p["bn2_gamma"], 0, cpo)
    be2p = _pad_axis(p["bn2_beta"], 0, cpo)

    # conv1: fold nearest-upsample into the weights (parity decomposition).
    # sel[py, dy_idx, ky] == 1 iff original tap ky maps to row offset dy_idx-1
    # on the pre-upsample grid for output row parity py.
    w1p = _pad_axis(_pad_axis(p["conv1_w"], 0, cpo), 1, cpi)        # (cpo,cpi,3,3)
    sel = jnp.array([[[1, 0, 0], [0, 1, 1], [0, 0, 0]],
                     [[0, 0, 0], [1, 1, 0], [0, 0, 1]]], jnp.float32)
    wc = jnp.einsum("pak,qbl,oikl->abipqo", sel, sel, w1p)
    wc = wc.reshape(9, cpi, 4 * cpo)                 # tap, cin, (py,px,cout)
    b1p = jnp.tile(_pad_axis(p["conv1_b"], 0, cpo), 4).reshape(1, 4 * cpo)

    w2p = _pad_axis(_pad_axis(p["conv2_w"], 0, cpo), 1, cpo)        # (cpo,cpo,3,3)
    w2t = jnp.transpose(w2p, (2, 3, 1, 0)).reshape(9, cpo, cpo)
    b2p = _pad_axis(p["conv2_b"], 0, cpo).reshape(1, cpo)

    wsp = _pad_axis(_pad_axis(p["convs_w"], 0, cpo), 1, cpi).reshape(cpo, cpi).T
    bsp = _pad_axis(p["convs_b"], 0, cpo).reshape(1, cpo)

    # ---------------- stage 1: BN1 stats + fused conv1 / shortcut ------------
    xpad = _pad_axis(x, 3, cpi)
    mpad1, guard1, nrt1, rows_out1, rows_in1 = _layout_consts(hh, ww)
    x_ext = _flatten_guarded(xpad, guard1, rows_in1)                # (n,R1,cpi)
    mask1 = _interior_mask(hh, ww, guard1, rows_in1)
    mean1, rstd1 = bn_batch_stats(x_ext.reshape(n * rows_in1, cpi), n * hh * ww)
    sc1 = (g1p * rstd1).reshape(1, cpi)
    sh1 = (be1p - mean1 * g1p * rstd1).reshape(1, cpi)

    kern1 = functools.partial(_conv1_kernel, tm=TM_CONV, guard=guard1, rs=ww + 2)
    hpk, s = pl.pallas_call(
        kern1,
        out_shape=(jax.ShapeDtypeStruct((n, rows_out1, 4 * cpo), jnp.float32),
                   jax.ShapeDtypeStruct((n, rows_out1, cpo), jnp.float32)),
        grid=(n, nrt1),
        in_specs=[
            pl.BlockSpec((1, rows_in1, cpi), lambda b, r: (b, 0, 0)),
            pl.BlockSpec((rows_in1, 1), lambda b, r: (0, 0)),
            pl.BlockSpec((1, cpi), lambda b, r: (0, 0)),
            pl.BlockSpec((1, cpi), lambda b, r: (0, 0)),
            pl.BlockSpec((9, cpi, 4 * cpo), lambda b, r: (0, 0, 0)),
            pl.BlockSpec((1, 4 * cpo), lambda b, r: (0, 0)),
            pl.BlockSpec((cpi, cpo), lambda b, r: (0, 0)),
            pl.BlockSpec((1, cpo), lambda b, r: (0, 0)),
        ],
        out_specs=(pl.BlockSpec((1, TM_CONV, 4 * cpo), lambda b, r: (b, r, 0)),
                   pl.BlockSpec((1, TM_CONV, cpo), lambda b, r: (b, r, 0))),
        compiler_params=pltpu.CompilerParams(
            dimension_semantics=("parallel", "parallel"),
            vmem_limit_bytes=VMEM_LIMIT),
    )(x_ext, mask1, sc1, sh1, wc, b1p, wsp, bsp)

    # Un-pack parity-packed conv1 output into the 2x-upsampled image and build
    # the upsampled shortcut.  (Pure layout plumbing kept in XLA.)
    # TODO(synk): fold the parity un-pack / residual replication into the conv2
    # BlockSpecs to avoid these extra XLA passes over the activation.
    hp = _extract_interior(hpk, hh, ww)                             # (n,h,w,4cpo)
    hp = hp.reshape(n, hh, ww, 2, 2, cpo).transpose(0, 1, 3, 2, 4, 5)
    hup = hp.reshape(n, h2, w2, cpo)
    sv = _extract_interior(s, hh, ww)                               # (n,h,w,cpo)
    sup = jnp.repeat(jnp.repeat(sv, 2, axis=1), 2, axis=2)          # (n,2h,2w,cpo)

    # ---------------- stage 2: BN2 stats + fused conv2 + residual add --------
    mpad2, guard2, nrt2, rows_out2, rows_in2 = _layout_consts(h2, w2)
    h_ext = _flatten_guarded(hup, guard2, rows_in2)                 # (n,R2,cpo)
    mask2 = _interior_mask(h2, w2, guard2, rows_in2)
    mean2, rstd2 = bn_batch_stats(h_ext.reshape(n * rows_in2, cpo), n * h2 * w2)
    sc2 = (g2p * rstd2).reshape(1, cpo)
    sh2 = (be2p - mean2 * g2p * rstd2).reshape(1, cpo)

    s_res = jnp.pad(sup, ((0, 0), (1, 1), (1, 1), (0, 0))).reshape(n, mpad2, cpo)
    s_res = jnp.pad(s_res, ((0, 0), (0, rows_out2 - mpad2), (0, 0)))

    kern2 = functools.partial(_conv2_kernel, tm=TM_CONV, guard=guard2, rs=w2 + 2)
    o_ext = pl.pallas_call(
        kern2,
        out_shape=jax.ShapeDtypeStruct((n, rows_out2, cpo), jnp.float32),
        grid=(n, nrt2),
        in_specs=[
            pl.BlockSpec((1, rows_in2, cpo), lambda b, r: (b, 0, 0)),
            pl.BlockSpec((rows_in2, 1), lambda b, r: (0, 0)),
            pl.BlockSpec((1, cpo), lambda b, r: (0, 0)),
            pl.BlockSpec((1, cpo), lambda b, r: (0, 0)),
            pl.BlockSpec((9, cpo, cpo), lambda b, r: (0, 0, 0)),
            pl.BlockSpec((1, cpo), lambda b, r: (0, 0)),
            pl.BlockSpec((1, TM_CONV, cpo), lambda b, r: (b, r, 0)),
        ],
        out_specs=pl.BlockSpec((1, TM_CONV, cpo), lambda b, r: (b, r, 0)),
        compiler_params=pltpu.CompilerParams(
            dimension_semantics=("parallel", "parallel"),
            vmem_limit_bytes=VMEM_LIMIT),
    )(h_ext, mask2, sc2, sh2, w2t, b2p, s_res)

    out = _extract_interior(o_ext, h2, w2)[..., :cout]              # (n,2h,2w,cout)
    return jnp.transpose(out, (0, 3, 1, 2))                         # -> NCHW


# --------------------------- params & reference -----------------------------

def init_params(key, cin, cout):
    ks = jax.random.split(key, 6)

    def conv_init(kw, kb, shape):
        fan_in = shape[1] * shape[2] * shape[3]
        bound = 1.0 / math.sqrt(fan_in)            # PyTorch default conv init
        w = jax.random.uniform(kw, shape, jnp.float32, -bound, bound)
        b = jax.random.uniform(kb, (shape[0],), jnp.float32, -bound, bound)
        return w, b

    c1w, c1b = conv_init(ks[0], ks[1], (cout, cin, 3, 3))
    c2w, c2b = conv_init(ks[2], ks[3], (cout, cout, 3, 3))
    csw, csb = conv_init(ks[4], ks[5], (cout, cin, 1, 1))
    return {
        "bn1_gamma": jnp.ones((cin,), jnp.float32),
        "bn1_beta": jnp.zeros((cin,), jnp.float32),
        "conv1_w": c1w, "conv1_b": c1b,
        "bn2_gamma": jnp.ones((cout,), jnp.float32),
        "bn2_beta": jnp.zeros((cout,), jnp.float32),
        "conv2_w": c2w, "conv2_b": c2b,
        "convs_w": csw, "convs_b": csb,
    }


def reference_forward(x, p):
    def bn(x, g, b):
        mean = x.mean(axis=(0, 2, 3), keepdims=True)
        var = jnp.square(x - mean).mean(axis=(0, 2, 3), keepdims=True)
        return (x - mean) / jnp.sqrt(var + BN_EPS) * g.reshape(1, -1, 1, 1) \
               + b.reshape(1, -1, 1, 1)

    def up(x):
        return jnp.repeat(jnp.repeat(x, 2, axis=2), 2, axis=3)

    def conv(x, w, b, pad):
        y = jax.lax.conv_general_dilated(
            x, w, (1, 1), [(pad, pad), (pad, pad)],
            dimension_numbers=("NCHW", "OIHW", "NCHW"),
            precision=jax.lax.Precision.HIGHEST)
        return y + b.reshape(1, -1, 1, 1)

    r = jax.nn.relu(bn(x, p["bn1_gamma"], p["bn1_beta"]))
    r = conv(up(r), p["conv1_w"], p["conv1_b"], 1)
    r = jax.nn.relu(bn(r, p["bn2_gamma"], p["bn2_beta"]))
    r = conv(r, p["conv2_w"], p["conv2_b"], 1)
    s = conv(up(x), p["convs_w"], p["convs_b"], 0)
    return r + s


if __name__ == "__main__":
    key = jax.random.PRNGKey(0)
    kx, kp = jax.random.split(key)
    N, Cin, Cout, H, W = 2, 4, 8, 16, 16
    x = jax.random.normal(kx, (N, Cin, H, W), jnp.float32)
    params = init_params(kp, Cin, Cout)

    out = jax.jit(resgen_block_forward)(x, params)
    out = jax.block_until_ready(out)

    ref = reference_forward(x, params)
    assert out.shape == (N, Cout, 2 * H, 2 * W), out.shape
    # kernels use default MXU precision (bf16 inputs, f32 accumulate) per the
    # perf review; reference stays full f32, so tolerance is loosened.
    err = float(jnp.max(jnp.abs(out - ref)))
    assert jnp.allclose(out, ref, atol=5e-2, rtol=5e-2), err

    print("KERNEL_OK")
</pallas_src>

<mosaic_0001>
module attributes {stable_mosaic.version = 11 : i64} {
  func.func @_bn_stats_kernel(%arg0: i32, %arg1: memref<512x128xf32, #tpu.memory_space<vmem>>, %arg2: memref<2x128xf32, #tpu.memory_space<vmem>>) attributes {dimension_semantics = [#tpu.dimension_semantics<arbitrary>], iteration_bounds = array<i64: 2>, scalar_prefetch = 0 : i64, scratch_operands = 0 : i64, tpu.core_type = #tpu.core_type<tc>, window_params = [{transform_indices = @transform_0, window_bounds = array<i64: 512, 128>}, {pipeline_mode = #tpu.pipeline_mode<synchronous>, transform_indices = @transform_1, window_bounds = array<i64: 2, 128>}]} {
    %c0_i32 = arith.constant 0 : i32
    %0 = arith.cmpi eq, %arg0, %c0_i32 : i32
    %1 = arith.extui %0 : i1 to i32
    %c0_i32_0 = arith.constant 0 : i32
    %2 = arith.cmpi ne, %1, %c0_i32_0 : i32
    scf.if %2 {
      %cst_11 = arith.constant 0.000000e+00 : f32
      %23 = vector.broadcast %cst_11 : f32 to vector<2x128xf32>
      %c0_12 = arith.constant 0 : index
      %c0_13 = arith.constant 0 : index
      %24 = vector.load %arg2[%c0_12, %c0_13] : memref<2x128xf32, #tpu.memory_space<vmem>>, vector<2x128xf32>
      tpu.vector_store %arg2[%c0_12, %c0_13], %23 {strides = array<i32>} : memref<2x128xf32, #tpu.memory_space<vmem>>, vector<2x128xf32>,
    } else {
    }
    %c0 = arith.constant 0 : index
    %c0_1 = arith.constant 0 : index
    %3 = vector.load %arg1[%c0, %c0_1] : memref<512x128xf32, #tpu.memory_space<vmem>>, vector<512x128xf32>
    %4 = tpu.iota {dimensions = array<i32: 0>} : vector<512x128xi32>
    %c512_i32 = arith.constant 512 : i32
    %5 = arith.muli %arg0, %c512_i32 : i32
    %6 = vector.broadcast %5 : i32 to vector<512x128xi32>
    %7 = arith.addi %4, %6 : vector<512x128xi32>
    %c844_i32 = arith.constant 844 : i32
    %8 = vector.broadcast %c844_i32 : i32 to vector<512x128xi32>
    %9 = arith.cmpi slt, %7, %8 : vector<512x128xi32>
    %cst = arith.constant 0.000000e+00 : f32
    %10 = vector.broadcast %cst : f32 to vector<512x128xf32>
    %11 = arith.select %9, %3, %10 : vector<512x128xi1>, vector<512x128xf32>
    %c0_2 = arith.constant 0 : index
    %c0_3 = arith.constant 0 : index
    %12 = vector.load %arg2[%c0_2, %c0_3] : memref<2x128xf32, #tpu.memory_space<vmem>>, vector<1x128xf32>
    %cst_4 = arith.constant dense<0.000000e+00> : vector<128xf32>
    %13 = vector.multi_reduction <add>, %11, %cst_4 [0] : vector<512x128xf32> to vector<128xf32>
    %14 = vector.shape_cast %13 : vector<128xf32> to vector<1x128xf32>
    %15 = arith.addf %12, %14 : vector<1x128xf32>
    %c0_5 = arith.constant 0 : index
    %c0_6 = arith.constant 0 : index
    %16 = vector.load %arg2[%c0_5, %c0_6] : memref<2x128xf32, #tpu.memory_space<vmem>>, vector<1x128xf32>
    tpu.vector_store %arg2[%c0_5, %c0_6], %15 {strides = array<i32>} : memref<2x128xf32, #tpu.memory_space<vmem>>, vector<1x128xf32>,
    %c1 = arith.constant 1 : index
    %c0_7 = arith.constant 0 : index
    %17 = vector.load %arg2[%c1, %c0_7] : memref<2x128xf32, #tpu.memory_space<vmem>>, vector<1x128xf32>
    %18 = arith.mulf %11, %11 : vector<512x128xf32>
    %cst_8 = arith.constant dense<0.000000e+00> : vector<128xf32>
    %19 = vector.multi_reduction <add>, %18, %cst_8 [0] : vector<512x128xf32> to vector<128xf32>
    %20 = vector.shape_cast %19 : vector<128xf32> to vector<1x128xf32>
    %21 = arith.addf %17, %20 : vector<1x128xf32>
    %c1_9 = arith.constant 1 : index
    %c0_10 = arith.constant 0 : index
    %22 = vector.load %arg2[%c1_9, %c0_10] : memref<2x128xf32, #tpu.memory_space<vmem>>, vector<1x128xf32>
    tpu.vector_store %arg2[%c1_9, %c0_10], %21 {strides = array<i32>} : memref<2x128xf32, #tpu.memory_space<vmem>>, vector<1x128xf32>,
    return
  }
  func.func @transform_0(%arg0: i32) -> (i32, i32) {
    %c0_i32 = arith.constant 0 : i32
    %c0_i32_0 = arith.constant 0 : i32
    return %arg0, %c0_i32 : i32, i32
  }
  func.func @transform_1(%arg0: i32) -> (i32, i32) {
    %c0_i32 = arith.constant 0 : i32
    %c0_i32_0 = arith.constant 0 : i32
    %c0_i32_1 = arith.constant 0 : i32
    return %c0_i32, %c0_i32_0 : i32, i32
  }
}

module attributes {stable_mosaic.version = 11 : i64} {
  func.func @_conv1_kernel(%arg0: i32, %arg1: i32, %arg2: memref<1x422x128xf32, #tpu.memory_space<vmem>>, %arg3: memref<422x1xf32, #tpu.memory_space<vmem>>, %arg4: memref<1x128xf32, #tpu.memory_space<vmem>>, %arg5: memref<1x128xf32, #tpu.memory_space<vmem>>, %arg6: memref<9x128x512xf32, #tpu.memory_space<vmem>>, %arg7: memref<1x512xf32, #tpu.memory_space<vmem>>, %arg8: memref<128x128xf32, #tpu.memory_space<vmem>>, %arg9: memref<1x128xf32, #tpu.memory_space<vmem>>, %arg10: memref<1x128x512xf32, #tpu.memory_space<vmem>>, %arg11: memref<1x128x128xf32, #tpu.memory_space<vmem>>) attributes {dimension_semantics = [#tpu.dimension_semantics<parallel>, #tpu.dimension_semantics<parallel>], iteration_bounds = array<i64: 2, 3>, scalar_prefetch = 0 : i64, scratch_operands = 0 : i64, tpu.core_type = #tpu.core_type<tc>, window_params = [{transform_indices = @transform_0, window_bounds = array<i64: 1, 422, 128>}, {pipeline_mode = #tpu.pipeline_mode<synchronous>, transform_indices = @transform_1, window_bounds = array<i64: 422, 1>}, {pipeline_mode = #tpu.pipeline_mode<synchronous>, transform_indices = @transform_2, window_bounds = array<i64: 1, 128>}, {pipeline_mode = #tpu.pipeline_mode<synchronous>, transform_indices = @transform_3, window_bounds = array<i64: 1, 128>}, {pipeline_mode = #tpu.pipeline_mode<synchronous>, transform_indices = @transform_4, window_bounds = array<i64: 9, 128, 512>}, {pipeline_mode = #tpu.pipeline_mode<synchronous>, transform_indices = @transform_5, window_bounds = array<i64: 1, 512>}, {pipeline_mode = #tpu.pipeline_mode<synchronous>, transform_indices = @transform_6, window_bounds = array<i64: 128, 128>}, {pipeline_mode = #tpu.pipeline_mode<synchronous>, transform_indices = @transform_7, window_bounds = array<i64: 1, 128>}, {transform_indices = @transform_8, window_bounds = array<i64: 1, 128, 512>}, {transform_indices = @transform_9, window_bounds = array<i64: 1, 128, 128>}]} {
    %c128_i32 = arith.constant 128 : i32
    %0 = arith.muli %arg1, %c128_i32 : i32
    %1 = tpu.assume_multiple %0, 128 : i32
    %c0 = arith.constant 0 : index
    %2 = arith.index_cast %1 : i32 to index
    %c0_0 = arith.constant 0 : index
    %3 = vector.load %arg2[%c0, %2, %c0_0] : memref<1x422x128xf32, #tpu.memory_space<vmem>>, vector<1x166x128xf32>
    %4 = vector.shape_cast %3 : vector<1x166x128xf32> to vector<166x128xf32>
    %5 = arith.index_cast %1 : i32 to index
    %c0_1 = arith.constant 0 : index
    %6 = vector.load %arg3[%5, %c0_1] : memref<422x1xf32, #tpu.memory_space<vmem>>, vector<166x1xf32>
    %c0_2 = arith.constant 0 : index
    %c0_3 = arith.constant 0 : index
    %7 = vector.load %arg4[%c0_2, %c0_3] : memref<1x128xf32, #tpu.memory_space<vmem>>, vector<1x128xf32>
    %8 = vector.broadcast %7 : vector<1x128xf32> to vector<166x128xf32>
    %9 = arith.mulf %4, %8 : vector<166x128xf32>
    %c0_4 = arith.constant 0 : index
    %c0_5 = arith.constant 0 : index
    %10 = vector.load %arg5[%c0_4, %c0_5] : memref<1x128xf32, #tpu.memory_space<vmem>>, vector<1x128xf32>
    %11 = vector.broadcast %10 : vector<1x128xf32> to vector<166x128xf32>
    %12 = arith.addf %9, %11 : vector<166x128xf32>
    %cst = arith.constant 0.000000e+00 : f32
    %13 = vector.broadcast %cst : f32 to vector<166x128xf32>
    %14 = arith.maximumf %12, %13 : vector<166x128xf32>
    %15 = vector.broadcast %6 : vector<166x1xf32> to vector<166x128xf32>
    %16 = arith.mulf %14, %15 : vector<166x128xf32>
    %17 = vector.extract_strided_slice %16 {offsets = [0, 0], sizes = [128, 128], strides = [1, 1]} : vector<166x128xf32> to vector<128x128xf32>
    %c0_6 = arith.constant 0 : index
    %c0_7 = arith.constant 0 : index
    %c0_8 = arith.constant 0 : index
    %18 = vector.load %arg6[%c0_6, %c0_7, %c0_8] : memref<9x128x512xf32, #tpu.memory_space<vmem>>, vector<1x128x512xf32>
    %19 = vector.shape_cast %18 : vector<1x128x512xf32> to vector<128x512xf32>
    %cst_9 = arith.constant dense<0.000000e+00> : vector<128x512xf32>
    %20 = tpu.matmul %17, %19, %cst_9 {dimension_numbers = #tpu.dot_dimension_numbers<[1], [0], [0], [1], [0, 0, 1, 1], [], []>} : vector<128x128xf32>, vector<128x512xf32>, vector<128x512xf32> -> vector<128x512xf32>
    %21 = vector.extract_strided_slice %16 {offsets = [1, 0], sizes = [128, 128], strides = [1, 1]} : vector<166x128xf32> to vector<128x128xf32>
    %c1 = arith.constant 1 : index
    %c0_10 = arith.constant 0 : index
    %c0_11 = arith.constant 0 : index
    %22 = vector.load %arg6[%c1, %c0_10, %c0_11] : memref<9x128x512xf32, #tpu.memory_space<vmem>>, vector<1x128x512xf32>
    %23 = vector.shape_cast %22 : vector<1x128x512xf32> to vector<128x512xf32>
    %cst_12 = arith.constant dense<0.000000e+00> : vector<128x512xf32>
    %24 = tpu.matmul %21, %23, %cst_12 {dimension_numbers = #tpu.dot_dimension_numbers<[1], [0], [0], [1], [0, 0, 1, 1], [], []>} : vector<128x128xf32>, vector<128x512xf32>, vector<128x512xf32> -> vector<128x512xf32>
    %25 = arith.addf %20, %24 : vector<128x512xf32>
    %26 = vector.extract_strided_slice %16 {offsets = [2, 0], sizes = [128, 128], strides = [1, 1]} : vector<166x128xf32> to vector<128x128xf32>
    %c2 = arith.constant 2 : index
    %c0_13 = arith.constant 0 : index
    %c0_14 = arith.constant 0 : index
    %27 = vector.load %arg6[%c2, %c0_13, %c0_14] : memref<9x128x512xf32, #tpu.memory_space<vmem>>, vector<1x128x512xf32>
    %28 = vector.shape_cast %27 : vector<1x128x512xf32> to vector<128x512xf32>
    %cst_15 = arith.constant dense<0.000000e+00> : vector<128x512xf32>
    %29 = tpu.matmul %26, %28, %cst_15 {dimension_numbers = #tpu.dot_dimension_numbers<[1], [0], [0], [1], [0, 0, 1, 1], [], []>} : vector<128x128xf32>, vector<128x512xf32>, vector<128x512xf32> -> vector<128x512xf32>
    %30 = arith.addf %25, %29 : vector<128x512xf32>
    %31 = vector.extract_strided_slice %16 {offsets = [18, 0], sizes = [128, 128], strides = [1, 1]} : vector<166x128xf32> to vector<128x128xf32>
    %c3 = arith.constant 3 : index
    %c0_16 = arith.constant 0 : index
    %c0_17 = arith.constant 0 : index
    %32 = vector.load %arg6[%c3, %c0_16, %c0_17] : memref<9x128x512xf32, #tpu.memory_space<vmem>>, vector<1x128x512xf32>
    %33 = vector.shape_cast %32 : vector<1x128x512xf32> to vector<128x512xf32>
    %cst_18 = arith.constant dense<0.000000e+00> : vector<128x512xf32>
    %34 = tpu.matmul %31, %33, %cst_18 {dimension_numbers = #tpu.dot_dimension_numbers<[1], [0], [0], [1], [0, 0, 1, 1], [], []>} : vector<128x128xf32>, vector<128x512xf32>, vector<128x512xf32> -> vector<128x512xf32>
    %35 = arith.addf %30, %34 : vector<128x512xf32>
    %36 = vector.extract_strided_slice %16 {offsets = [19, 0], sizes = [128, 128], strides = [1, 1]} : vector<166x128xf32> to vector<128x128xf32>
    %c4 = arith.constant 4 : index
    %c0_19 = arith.constant 0 : index
    %c0_20 = arith.constant 0 : index
    %37 = vector.load %arg6[%c4, %c0_19, %c0_20] : memref<9x128x512xf32, #tpu.memory_space<vmem>>, vector<1x128x512xf32>
    %38 = vector.shape_cast %37 : vector<1x128x512xf32> to vector<128x512xf32>
    %cst_21 = arith.constant dense<0.000000e+00> : vector<128x512xf32>
    %39 = tpu.matmul %36, %38, %cst_21 {dimension_numbers = #tpu.dot_dimension_numbers<[1], [0], [0], [1], [0, 0, 1, 1], [], []>} : vector<128x128xf32>, vector<128x512xf32>, vector<128x512xf32> -> vector<128x512xf32>
    %40 = arith.addf %35, %39 : vector<128x512xf32>
    %41 = vector.extract_strided_slice %16 {offsets = [20, 0], sizes = [128, 128], strides = [1, 1]} : vector<166x128xf32> to vector<128x128xf32>
    %c5 = arith.constant 5 : index
    %c0_22 = arith.constant 0 : index
    %c0_23 = arith.constant 0 : index
    %42 = vector.load %arg6[%c5, %c0_22, %c0_23] : memref<9x128x512xf32, #tpu.memory_space<vmem>>, vector<1x128x512xf32>
    %43 = vector.shape_cast %42 : vector<1x128x512xf32> to vector<128x512xf32>
    %cst_24 = arith.constant dense<0.000000e+00> : vector<128x512xf32>
    %44 = tpu.matmul %41, %43, %cst_24 {dimension_numbers = #tpu.dot_dimension_numbers<[1], [0], [0], [1], [0, 0, 1, 1], [], []>} : vector<128x128xf32>, vector<128x512xf32>, vector<128x512xf32> -> vector<128x512xf32>
    %45 = arith.addf %40, %44 : vector<128x512xf32>
    %46 = vector.extract_strided_slice %16 {offsets = [36, 0], sizes = [128, 128], strides = [1, 1]} : vector<166x128xf32> to vector<128x128xf32>
    %c6 = arith.constant 6 : index
    %c0_25 = arith.constant 0 : index
    %c0_26 = arith.constant 0 : index
    %47 = vector.load %arg6[%c6, %c0_25, %c0_26] : memref<9x128x512xf32, #tpu.memory_space<vmem>>, vector<1x128x512xf32>
    %48 = vector.shape_cast %47 : vector<1x128x512xf32> to vector<128x512xf32>
    %cst_27 = arith.constant dense<0.000000e+00> : vector<128x512xf32>
    %49 = tpu.matmul %46, %48, %cst_27 {dimension_numbers = #tpu.dot_dimension_numbers<[1], [0], [0], [1], [0, 0, 1, 1], [], []>} : vector<128x128xf32>, vector<128x512xf32>, vector<128x512xf32> -> vector<128x512xf32>
    %50 = arith.addf %45, %49 : vector<128x512xf32>
    %51 = vector.extract_strided_slice %16 {offsets = [37, 0], sizes = [128, 128], strides = [1, 1]} : vector<166x128xf32> to vector<128x128xf32>
    %c7 = arith.constant 7 : index
    %c0_28 = arith.constant 0 : index
    %c0_29 = arith.constant 0 : index
    %52 = vector.load %arg6[%c7, %c0_28, %c0_29] : memref<9x128x512xf32, #tpu.memory_space<vmem>>, vector<1x128x512xf32>
    %53 = vector.shape_cast %52 : vector<1x128x512xf32> to vector<128x512xf32>
    %cst_30 = arith.constant dense<0.000000e+00> : vector<128x512xf32>
    %54 = tpu.matmul %51, %53, %cst_30 {dimension_numbers = #tpu.dot_dimension_numbers<[1], [0], [0], [1], [0, 0, 1, 1], [], []>} : vector<128x128xf32>, vector<128x512xf32>, vector<128x512xf32> -> vector<128x512xf32>
    %55 = arith.addf %50, %54 : vector<128x512xf32>
    %56 = vector.extract_strided_slice %16 {offsets = [38, 0], sizes = [128, 128], strides = [1, 1]} : vector<166x128xf32> to vector<128x128xf32>
    %c8 = arith.constant 8 : index
    %c0_31 = arith.constant 0 : index
    %c0_32 = arith.constant 0 : index
    %57 = vector.load %arg6[%c8, %c0_31, %c0_32] : memref<9x128x512xf32, #tpu.memory_space<vmem>>, vector<1x128x512xf32>
    %58 = vector.shape_cast %57 : vector<1x128x512xf32> to vector<128x512xf32>
    %cst_33 = arith.constant dense<0.000000e+00> : vector<128x512xf32>
    %59 = tpu.matmul %56, %58, %cst_33 {dimension_numbers = #tpu.dot_dimension_numbers<[1], [0], [0], [1], [0, 0, 1, 1], [], []>} : vector<128x128xf32>, vector<128x512xf32>, vector<128x512xf32> -> vector<128x512xf32>
    %60 = arith.addf %55, %59 : vector<128x512xf32>
    %c0_34 = arith.constant 0 : index
    %c0_35 = arith.constant 0 : index
    %61 = vector.load %arg7[%c0_34, %c0_35] : memref<1x512xf32, #tpu.memory_space<vmem>>, vector<1x512xf32>
    %62 = vector.broadcast %61 : vector<1x512xf32> to vector<128x512xf32>
    %63 = arith.addf %60, %62 : vector<128x512xf32>
    %c0_36 = arith.constant 0 : index
    %c0_37 = arith.constant 0 : index
    %c0_38 = arith.constant 0 : index
    %64 = vector.load %arg10[%c0_36, %c0_37, %c0_38] : memref<1x128x512xf32, #tpu.memory_space<vmem>>, vector<1x128x512xf32>
    %65 = vector.shape_cast %64 : vector<1x128x512xf32> to vector<128x512xf32>
    %66 = vector.shape_cast %63 : vector<128x512xf32> to vector<1x128x512xf32>
    tpu.vector_store %arg10[%c0_36, %c0_37, %c0_38], %66 {strides = array<i32>} : memref<1x128x512xf32, #tpu.memory_space<vmem>>, vector<1x128x512xf32>,
    %67 = vector.extract_strided_slice %4 {offsets = [19, 0], sizes = [128, 128], strides = [1, 1]} : vector<166x128xf32> to vector<128x128xf32>
    %c0_39 = arith.constant 0 : index
    %c0_40 = arith.constant 0 : index
    %68 = vector.load %arg8[%c0_39, %c0_40] : memref<128x128xf32, #tpu.memory_space<vmem>>, vector<128x128xf32>
    %cst_41 = arith.constant dense<0.000000e+00> : vector<128x128xf32>
    %69 = tpu.matmul %67, %68, %cst_41 {dimension_numbers = #tpu.dot_dimension_numbers<[1], [0], [0], [1], [0, 0, 1, 1], [], []>} : vector<128x128xf32>, vector<128x128xf32>, vector<128x128xf32> -> vector<128x128xf32>
    %c0_42 = arith.constant 0 : index
    %c0_43 = arith.constant 0 : index
    %70 = vector.load %arg9[%c0_42, %c0_43] : memref<1x128xf32, #tpu.memory_space<vmem>>, vector<1x128xf32>
    %71 = vector.broadcast %70 : vector<1x128xf32> to vector<128x128xf32>
    %72 = arith.addf %69, %71 : vector<128x128xf32>
    %c0_44 = arith.constant 0 : index
    %c0_45 = arith.constant 0 : index
    %c0_46 = arith.constant 0 : index
    %73 = vector.load %arg11[%c0_44, %c0_45, %c0_46] : memref<1x128x128xf32, #tpu.memory_space<vmem>>, vector<1x128x128xf32>
    %74 = vector.shape_cast %73 : vector<1x128x128xf32> to vector<128x128xf32>
    %75 = vector.shape_cast %72 : vector<128x128xf32> to vector<1x128x128xf32>
    tpu.vector_store %arg11[%c0_44, %c0_45, %c0_46], %75 {strides = array<i32>} : memref<1x128x128xf32, #tpu.memory_space<vmem>>, vector<1x128x128xf32>,
    return
  }
  func.func @transform_0(%arg0: i32, %arg1: i32) -> (i32, i32, i32) {
    %c0_i32 = arith.constant 0 : i32
    %c0_i32_0 = arith.constant 0 : i32
    %c0_i32_1 = arith.constant 0 : i32
    return %arg0, %c0_i32, %c0_i32_0 : i32, i32, i32
  }
  func.func @transform_1(%arg0: i32, %arg1: i32) -> (i32, i32) {
    %c0_i32 = arith.constant 0 : i32
    %c0_i32_0 = arith.constant 0 : i32
    %c0_i32_1 = arith.constant 0 : i32
    return %c0_i32, %c0_i32_0 : i32, i32
  }
  func.func @transform_2(%arg0: i32, %arg1: i32) -> (i32, i32) {
    %c0_i32 = arith.constant 0 : i32
    %c0_i32_0 = arith.constant 0 : i32
    %c0_i32_1 = arith.constant 0 : i32
    return %c0_i32, %c0_i32_0 : i32, i32
  }
  func.func @transform_3(%arg0: i32, %arg1: i32) -> (i32, i32) {
    %c0_i32 = arith.constant 0 : i32
    %c0_i32_0 = arith.constant 0 : i32
    %c0_i32_1 = arith.constant 0 : i32
    return %c0_i32, %c0_i32_0 : i32, i32
  }
  func.func @transform_4(%arg0: i32, %arg1: i32) -> (i32, i32, i32) {
    %c0_i32 = arith.constant 0 : i32
    %c0_i32_0 = arith.constant 0 : i32
    %c0_i32_1 = arith.constant 0 : i32
    %c0_i32_2 = arith.constant 0 : i32
    return %c0_i32, %c0_i32_0, %c0_i32_1 : i32, i32, i32
  }
  func.func @transform_5(%arg0: i32, %arg1: i32) -> (i32, i32) {
    %c0_i32 = arith.constant 0 : i32
    %c0_i32_0 = arith.constant 0 : i32
    %c0_i32_1 = arith.constant 0 : i32
    return %c0_i32, %c0_i32_0 : i32, i32
  }
  func.func @transform_6(%arg0: i32, %arg1: i32) -> (i32, i32) {
    %c0_i32 = arith.constant 0 : i32
    %c0_i32_0 = arith.constant 0 : i32
    %c0_i32_1 = arith.constant 0 : i32
    return %c0_i32, %c0_i32_0 : i32, i32
  }
  func.func @transform_7(%arg0: i32, %arg1: i32) -> (i32, i32) {
    %c0_i32 = arith.constant 0 : i32
    %c0_i32_0 = arith.constant 0 : i32
    %c0_i32_1 = arith.constant 0 : i32
    return %c0_i32, %c0_i32_0 : i32, i32
  }
  func.func @transform_8(%arg0: i32, %arg1: i32) -> (i32, i32, i32) {
    %c0_i32 = arith.constant 0 : i32
    %c0_i32_0 = arith.constant 0 : i32
    return %arg0, %arg1, %c0_i32 : i32, i32, i32
  }
  func.func @transform_9(%arg0: i32, %arg1: i32) -> (i32, i32, i32) {
    %c0_i32 = arith.constant 0 : i32
    %c0_i32_0 = arith.constant 0 : i32
    return %arg0, %arg1, %c0_i32 : i32, i32, i32
  }
}

module attributes {stable_mosaic.version = 11 : i64} {
  func.func @_bn_stats_kernel(%arg0: i32, %arg1: memref<512x128xf32, #tpu.memory_space<vmem>>, %arg2: memref<2x128xf32, #tpu.memory_space<vmem>>) attributes {dimension_semantics = [#tpu.dimension_semantics<arbitrary>], iteration_bounds = array<i64: 6>, scalar_prefetch = 0 : i64, scratch_operands = 0 : i64, tpu.core_type = #tpu.core_type<tc>, window_params = [{transform_indices = @transform_0, window_bounds = array<i64: 512, 128>}, {pipeline_mode = #tpu.pipeline_mode<synchronous>, transform_indices = @transform_1, window_bounds = array<i64: 2, 128>}]} {
    %c0_i32 = arith.constant 0 : i32
    %0 = arith.cmpi eq, %arg0, %c0_i32 : i32
    %1 = arith.extui %0 : i1 to i32
    %c0_i32_0 = arith.constant 0 : i32
    %2 = arith.cmpi ne, %1, %c0_i32_0 : i32
    scf.if %2 {
      %cst_11 = arith.constant 0.000000e+00 : f32
      %23 = vector.broadcast %cst_11 : f32 to vector<2x128xf32>
      %c0_12 = arith.constant 0 : index
      %c0_13 = arith.constant 0 : index
      %24 = vector.load %arg2[%c0_12, %c0_13] : memref<2x128xf32, #tpu.memory_space<vmem>>, vector<2x128xf32>
      tpu.vector_store %arg2[%c0_12, %c0_13], %23 {strides = array<i32>} : memref<2x128xf32, #tpu.memory_space<vmem>>, vector<2x128xf32>,
    } else {
    }
    %c0 = arith.constant 0 : index
    %c0_1 = arith.constant 0 : index
    %3 = vector.load %arg1[%c0, %c0_1] : memref<512x128xf32, #tpu.memory_space<vmem>>, vector<512x128xf32>
    %4 = tpu.iota {dimensions = array<i32: 0>} : vector<512x128xi32>
    %c512_i32 = arith.constant 512 : i32
    %5 = arith.muli %arg0, %c512_i32 : i32
    %6 = vector.broadcast %5 : i32 to vector<512x128xi32>
    %7 = arith.addi %4, %6 : vector<512x128xi32>
    %c2700_i32 = arith.constant 2700 : i32
    %8 = vector.broadcast %c2700_i32 : i32 to vector<512x128xi32>
    %9 = arith.cmpi slt, %7, %8 : vector<512x128xi32>
    %cst = arith.constant 0.000000e+00 : f32
    %10 = vector.broadcast %cst : f32 to vector<512x128xf32>
    %11 = arith.select %9, %3, %10 : vector<512x128xi1>, vector<512x128xf32>
    %c0_2 = arith.constant 0 : index
    %c0_3 = arith.constant 0 : index
    %12 = vector.load %arg2[%c0_2, %c0_3] : memref<2x128xf32, #tpu.memory_space<vmem>>, vector<1x128xf32>
    %cst_4 = arith.constant dense<0.000000e+00> : vector<128xf32>
    %13 = vector.multi_reduction <add>, %11, %cst_4 [0] : vector<512x128xf32> to vector<128xf32>
    %14 = vector.shape_cast %13 : vector<128xf32> to vector<1x128xf32>
    %15 = arith.addf %12, %14 : vector<1x128xf32>
    %c0_5 = arith.constant 0 : index
    %c0_6 = arith.constant 0 : index
    %16 = vector.load %arg2[%c0_5, %c0_6] : memref<2x128xf32, #tpu.memory_space<vmem>>, vector<1x128xf32>
    tpu.vector_store %arg2[%c0_5, %c0_6], %15 {strides = array<i32>} : memref<2x128xf32, #tpu.memory_space<vmem>>, vector<1x128xf32>,
    %c1 = arith.constant 1 : index
    %c0_7 = arith.constant 0 : index
    %17 = vector.load %arg2[%c1, %c0_7] : memref<2x128xf32, #tpu.memory_space<vmem>>, vector<1x128xf32>
    %18 = arith.mulf %11, %11 : vector<512x128xf32>
    %cst_8 = arith.constant dense<0.000000e+00> : vector<128xf32>
    %19 = vector.multi_reduction <add>, %18, %cst_8 [0] : vector<512x128xf32> to vector<128xf32>
    %20 = vector.shape_cast %19 : vector<128xf32> to vector<1x128xf32>
    %21 = arith.addf %17, %20 : vector<1x128xf32>
    %c1_9 = arith.constant 1 : index
    %c0_10 = arith.constant 0 : index
    %22 = vector.load %arg2[%c1_9, %c0_10] : memref<2x128xf32, #tpu.memory_space<vmem>>, vector<1x128xf32>
    tpu.vector_store %arg2[%c1_9, %c0_10], %21 {strides = array<i32>} : memref<2x128xf32, #tpu.memory_space<vmem>>, vector<1x128xf32>,
    return
  }
  func.func @transform_0(%arg0: i32) -> (i32, i32) {
    %c0_i32 = arith.constant 0 : i32
    %c0_i32_0 = arith.constant 0 : i32
    return %arg0, %c0_i32 : i32, i32
  }
  func.func @transform_1(%arg0: i32) -> (i32, i32) {
    %c0_i32 = arith.constant 0 : i32
    %c0_i32_0 = arith.constant 0 : i32
    %c0_i32_1 = arith.constant 0 : i32
    return %c0_i32, %c0_i32_0 : i32, i32
  }
}

module attributes {stable_mosaic.version = 11 : i64} {
  func.func @_conv2_kernel(%arg0: i32, %arg1: i32, %arg2: memref<1x1350x128xf32, #tpu.memory_space<vmem>>, %arg3: memref<1350x1xf32, #tpu.memory_space<vmem>>, %arg4: memref<1x128xf32, #tpu.memory_space<vmem>>, %arg5: memref<1x128xf32, #tpu.memory_space<vmem>>, %arg6: memref<9x128x128xf32, #tpu.memory_space<vmem>>, %arg7: memref<1x128xf32, #tpu.memory_space<vmem>>, %arg8: memref<1x128x128xf32, #tpu.memory_space<vmem>>, %arg9: memref<1x128x128xf32, #tpu.memory_space<vmem>>) attributes {dimension_semantics = [#tpu.dimension_semantics<parallel>, #tpu.dimension_semantics<parallel>], iteration_bounds = array<i64: 2, 10>, scalar_prefetch = 0 : i64, scratch_operands = 0 : i64, tpu.core_type = #tpu.core_type<tc>, window_params = [{transform_indices = @transform_0, window_bounds = array<i64: 1, 1350, 128>}, {pipeline_mode = #tpu.pipeline_mode<synchronous>, transform_indices = @transform_1, window_bounds = array<i64: 1350, 1>}, {pipeline_mode = #tpu.pipeline_mode<synchronous>, transform_indices = @transform_2, window_bounds = array<i64: 1, 128>}, {pipeline_mode = #tpu.pipeline_mode<synchronous>, transform_indices = @transform_3, window_bounds = array<i64: 1, 128>}, {pipeline_mode = #tpu.pipeline_mode<synchronous>, transform_indices = @transform_4, window_bounds = array<i64: 9, 128, 128>}, {pipeline_mode = #tpu.pipeline_mode<synchronous>, transform_indices = @transform_5, window_bounds = array<i64: 1, 128>}, {transform_indices = @transform_6, window_bounds = array<i64: 1, 128, 128>}, {transform_indices = @transform_7, window_bounds = array<i64: 1, 128, 128>}]} {
    %c128_i32 = arith.constant 128 : i32
    %0 = arith.muli %arg1, %c128_i32 : i32
    %1 = tpu.assume_multiple %0, 128 : i32
    %c0 = arith.constant 0 : index
    %2 = arith.index_cast %1 : i32 to index
    %c0_0 = arith.constant 0 : index
    %3 = vector.load %arg2[%c0, %2, %c0_0] : memref<1x1350x128xf32, #tpu.memory_space<vmem>>, vector<1x198x128xf32>
    %4 = vector.shape_cast %3 : vector<1x198x128xf32> to vector<198x128xf32>
    %5 = arith.index_cast %1 : i32 to index
    %c0_1 = arith.constant 0 : index
    %6 = vector.load %arg3[%5, %c0_1] : memref<1350x1xf32, #tpu.memory_space<vmem>>, vector<198x1xf32>
    %c0_2 = arith.constant 0 : index
    %c0_3 = arith.constant 0 : index
    %7 = vector.load %arg4[%c0_2, %c0_3] : memref<1x128xf32, #tpu.memory_space<vmem>>, vector<1x128xf32>
    %8 = vector.broadcast %7 : vector<1x128xf32> to vector<198x128xf32>
    %9 = arith.mulf %4, %8 : vector<198x128xf32>
    %c0_4 = arith.constant 0 : index
    %c0_5 = arith.constant 0 : index
    %10 = vector.load %arg5[%c0_4, %c0_5] : memref<1x128xf32, #tpu.memory_space<vmem>>, vector<1x128xf32>
    %11 = vector.broadcast %10 : vector<1x128xf32> to vector<198x128xf32>
    %12 = arith.addf %9, %11 : vector<198x128xf32>
    %cst = arith.constant 0.000000e+00 : f32
    %13 = vector.broadcast %cst : f32 to vector<198x128xf32>
    %14 = arith.maximumf %12, %13 : vector<198x128xf32>
    %15 = vector.broadcast %6 : vector<198x1xf32> to vector<198x128xf32>
    %16 = arith.mulf %14, %15 : vector<198x128xf32>
    %17 = vector.extract_strided_slice %16 {offsets = [0, 0], sizes = [128, 128], strides = [1, 1]} : vector<198x128xf32> to vector<128x128xf32>
    %c0_6 = arith.constant 0 : index
    %c0_7 = arith.constant 0 : index
    %c0_8 = arith.constant 0 : index
    %18 = vector.load %arg6[%c0_6, %c0_7, %c0_8] : memref<9x128x128xf32, #tpu.memory_space<vmem>>, vector<1x128x128xf32>
    %19 = vector.shape_cast %18 : vector<1x128x128xf32> to vector<128x128xf32>
    %cst_9 = arith.constant dense<0.000000e+00> : vector<128x128xf32>
    %20 = tpu.matmul %17, %19, %cst_9 {dimension_numbers = #tpu.dot_dimension_numbers<[1], [0], [0], [1], [0, 0, 1, 1], [], []>} : vector<128x128xf32>, vector<128x128xf32>, vector<128x128xf32> -> vector<128x128xf32>
    %21 = vector.extract_strided_slice %16 {offsets = [1, 0], sizes = [128, 128], strides = [1, 1]} : vector<198x128xf32> to vector<128x128xf32>
    %c1 = arith.constant 1 : index
    %c0_10 = arith.constant 0 : index
    %c0_11 = arith.constant 0 : index
    %22 = vector.load %arg6[%c1, %c0_10, %c0_11] : memref<9x128x128xf32, #tpu.memory_space<vmem>>, vector<1x128x128xf32>
    %23 = vector.shape_cast %22 : vector<1x128x128xf32> to vector<128x128xf32>
    %cst_12 = arith.constant dense<0.000000e+00> : vector<128x128xf32>
    %24 = tpu.matmul %21, %23, %cst_12 {dimension_numbers = #tpu.dot_dimension_numbers<[1], [0], [0], [1], [0, 0, 1, 1], [], []>} : vector<128x128xf32>, vector<128x128xf32>, vector<128x128xf32> -> vector<128x128xf32>
    %25 = arith.addf %20, %24 : vector<128x128xf32>
    %26 = vector.extract_strided_slice %16 {offsets = [2, 0], sizes = [128, 128], strides = [1, 1]} : vector<198x128xf32> to vector<128x128xf32>
    %c2 = arith.constant 2 : index
    %c0_13 = arith.constant 0 : index
    %c0_14 = arith.constant 0 : index
    %27 = vector.load %arg6[%c2, %c0_13, %c0_14] : memref<9x128x128xf32, #tpu.memory_space<vmem>>, vector<1x128x128xf32>
    %28 = vector.shape_cast %27 : vector<1x128x128xf32> to vector<128x128xf32>
    %cst_15 = arith.constant dense<0.000000e+00> : vector<128x128xf32>
    %29 = tpu.matmul %26, %28, %cst_15 {dimension_numbers = #tpu.dot_dimension_numbers<[1], [0], [0], [1], [0, 0, 1, 1], [], []>} : vector<128x128xf32>, vector<128x128xf32>, vector<128x128xf32> -> vector<128x128xf32>
    %30 = arith.addf %25, %29 : vector<128x128xf32>
    %31 = vector.extract_strided_slice %16 {offsets = [34, 0], sizes = [128, 128], strides = [1, 1]} : vector<198x128xf32> to vector<128x128xf32>
    %c3 = arith.constant 3 : index
    %c0_16 = arith.constant 0 : index
    %c0_17 = arith.constant 0 : index
    %32 = vector.load %arg6[%c3, %c0_16, %c0_17] : memref<9x128x128xf32, #tpu.memory_space<vmem>>, vector<1x128x128xf32>
    %33 = vector.shape_cast %32 : vector<1x128x128xf32> to vector<128x128xf32>
    %cst_18 = arith.constant dense<0.000000e+00> : vector<128x128xf32>
    %34 = tpu.matmul %31, %33, %cst_18 {dimension_numbers = #tpu.dot_dimension_numbers<[1], [0], [0], [1], [0, 0, 1, 1], [], []>} : vector<128x128xf32>, vector<128x128xf32>, vector<128x128xf32> -> vector<128x128xf32>
    %35 = arith.addf %30, %34 : vector<128x128xf32>
    %36 = vector.extract_strided_slice %16 {offsets = [35, 0], sizes = [128, 128], strides = [1, 1]} : vector<198x128xf32> to vector<128x128xf32>
    %c4 = arith.constant 4 : index
    %c0_19 = arith.constant 0 : index
    %c0_20 = arith.constant 0 : index
    %37 = vector.load %arg6[%c4, %c0_19, %c0_20] : memref<9x128x128xf32, #tpu.memory_space<vmem>>, vector<1x128x128xf32>
    %38 = vector.shape_cast %37 : vector<1x128x128xf32> to vector<128x128xf32>
    %cst_21 = arith.constant dense<0.000000e+00> : vector<128x128xf32>
    %39 = tpu.matmul %36, %38, %cst_21 {dimension_numbers = #tpu.dot_dimension_numbers<[1], [0], [0], [1], [0, 0, 1, 1], [], []>} : vector<128x128xf32>, vector<128x128xf32>, vector<128x128xf32> -> vector<128x128xf32>
    %40 = arith.addf %35, %39 : vector<128x128xf32>
    %41 = vector.extract_strided_slice %16 {offsets = [36, 0], sizes = [128, 128], strides = [1, 1]} : vector<198x128xf32> to vector<128x128xf32>
    %c5 = arith.constant 5 : index
    %c0_22 = arith.constant 0 : index
    %c0_23 = arith.constant 0 : index
    %42 = vector.load %arg6[%c5, %c0_22, %c0_23] : memref<9x128x128xf32, #tpu.memory_space<vmem>>, vector<1x128x128xf32>
    %43 = vector.shape_cast %42 : vector<1x128x128xf32> to vector<128x128xf32>
    %cst_24 = arith.constant dense<0.000000e+00> : vector<128x128xf32>
    %44 = tpu.matmul %41, %43, %cst_24 {dimension_numbers = #tpu.dot_dimension_numbers<[1], [0], [0], [1], [0, 0, 1, 1], [], []>} : vector<128x128xf32>, vector<128x128xf32>, vector<128x128xf32> -> vector<128x128xf32>
    %45 = arith.addf %40, %44 : vector<128x128xf32>
    %46 = vector.extract_strided_slice %16 {offsets = [68, 0], sizes = [128, 128], strides = [1, 1]} : vector<198x128xf32> to vector<128x128xf32>
    %c6 = arith.constant 6 : index
    %c0_25 = arith.constant 0 : index
    %c0_26 = arith.constant 0 : index
    %47 = vector.load %arg6[%c6, %c0_25, %c0_26] : memref<9x128x128xf32, #tpu.memory_space<vmem>>, vector<1x128x128xf32>
    %48 = vector.shape_cast %47 : vector<1x128x128xf32> to vector<128x128xf32>
    %cst_27 = arith.constant dense<0.000000e+00> : vector<128x128xf32>
    %49 = tpu.matmul %46, %48, %cst_27 {dimension_numbers = #tpu.dot_dimension_numbers<[1], [0], [0], [1], [0, 0, 1, 1], [], []>} : vector<128x128xf32>, vector<128x128xf32>, vector<128x128xf32> -> vector<128x128xf32>
    %50 = arith.addf %45, %49 : vector<128x128xf32>
    %51 = vector.extract_strided_slice %16 {offsets = [69, 0], sizes = [128, 128], strides = [1, 1]} : vector<198x128xf32> to vector<128x128xf32>
    %c7 = arith.constant 7 : index
    %c0_28 = arith.constant 0 : index
    %c0_29 = arith.constant 0 : index
    %52 = vector.load %arg6[%c7, %c0_28, %c0_29] : memref<9x128x128xf32, #tpu.memory_space<vmem>>, vector<1x128x128xf32>
    %53 = vector.shape_cast %52 : vector<1x128x128xf32> to vector<128x128xf32>
    %cst_30 = arith.constant dense<0.000000e+00> : vector<128x128xf32>
    %54 = tpu.matmul %51, %53, %cst_30 {dimension_numbers = #tpu.dot_dimension_numbers<[1], [0], [0], [1], [0, 0, 1, 1], [], []>} : vector<128x128xf32>, vector<128x128xf32>, vector<128x128xf32> -> vector<128x128xf32>
    %55 = arith.addf %50, %54 : vector<128x128xf32>
    %56 = vector.extract_strided_slice %16 {offsets = [70, 0], sizes = [128, 128], strides = [1, 1]} : vector<198x128xf32> to vector<128x128xf32>
    %c8 = arith.constant 8 : index
    %c0_31 = arith.constant 0 : index
    %c0_32 = arith.constant 0 : index
    %57 = vector.load %arg6[%c8, %c0_31, %c0_32] : memref<9x128x128xf32, #tpu.memory_space<vmem>>, vector<1x128x128xf32>
    %58 = vector.shape_cast %57 : vector<1x128x128xf32> to vector<128x128xf32>
    %cst_33 = arith.constant dense<0.000000e+00> : vector<128x128xf32>
    %59 = tpu.matmul %56, %58, %cst_33 {dimension_numbers = #tpu.dot_dimension_numbers<[1], [0], [0], [1], [0, 0, 1, 1], [], []>} : vector<128x128xf32>, vector<128x128xf32>, vector<128x128xf32> -> vector<128x128xf32>
    %60 = arith.addf %55, %59 : vector<128x128xf32>
    %c0_34 = arith.constant 0 : index
    %c0_35 = arith.constant 0 : index
    %61 = vector.load %arg7[%c0_34, %c0_35] : memref<1x128xf32, #tpu.memory_space<vmem>>, vector<1x128xf32>
    %62 = vector.broadcast %61 : vector<1x128xf32> to vector<128x128xf32>
    %63 = arith.addf %60, %62 : vector<128x128xf32>
    %c0_36 = arith.constant 0 : index
    %c0_37 = arith.constant 0 : index
    %c0_38 = arith.constant 0 : index
    %64 = vector.load %arg8[%c0_36, %c0_37, %c0_38] : memref<1x128x128xf32, #tpu.memory_space<vmem>>, vector<1x128x128xf32>
    %65 = vector.shape_cast %64 : vector<1x128x128xf32> to vector<128x128xf32>
    %66 = arith.addf %63, %65 : vector<128x128xf32>
    %c0_39 = arith.constant 0 : index
    %c0_40 = arith.constant 0 : index
    %c0_41 = arith.constant 0 : index
    %67 = vector.load %arg9[%c0_39, %c0_40, %c0_41] : memref<1x128x128xf32, #tpu.memory_space<vmem>>, vector<1x128x128xf32>
    %68 = vector.shape_cast %67 : vector<1x128x128xf32> to vector<128x128xf32>
    %69 = vector.shape_cast %66 : vector<128x128xf32> to vector<1x128x128xf32>
    tpu.vector_store %arg9[%c0_39, %c0_40, %c0_41], %69 {strides = array<i32>} : memref<1x128x128xf32, #tpu.memory_space<vmem>>, vector<1x128x128xf32>,
    return
  }
  func.func @transform_0(%arg0: i32, %arg1: i32) -> (i32, i32, i32) {
    %c0_i32 = arith.constant 0 : i32
    %c0_i32_0 = arith.constant 0 : i32
    %c0_i32_1 = arith.constant 0 : i32
    return %arg0, %c0_i32, %c0_i32_0 : i32, i32, i32
  }
  func.func @transform_1(%arg0: i32, %arg1: i32) -> (i32, i32) {
    %c0_i32 = arith.constant 0 : i32
    %c0_i32_0 = arith.constant 0 : i32
    %c0_i32_1 = arith.constant 0 : i32
    return %c0_i32, %c0_i32_0 : i32, i32
  }
  func.func @transform_2(%arg0: i32, %arg1: i32) -> (i32, i32) {
    %c0_i32 = arith.constant 0 : i32
    %c0_i32_0 = arith.constant 0 : i32
    %c0_i32_1 = arith.constant 0 : i32
    return %c0_i32, %c0_i32_0 : i32, i32
  }
  func.func @transform_3(%arg0: i32, %arg1: i32) -> (i32, i32) {
    %c0_i32 = arith.constant 0 : i32
    %c0_i32_0 = arith.constant 0 : i32
    %c0_i32_1 = arith.constant 0 : i32
    return %c0_i32, %c0_i32_0 : i32, i32
  }
  func.func @transform_4(%arg0: i32, %arg1: i32) -> (i32, i32, i32) {
    %c0_i32 = arith.constant 0 : i32
    %c0_i32_0 = arith.constant 0 : i32
    %c0_i32_1 = arith.constant 0 : i32
    %c0_i32_2 = arith.constant 0 : i32
    return %c0_i32, %c0_i32_0, %c0_i32_1 : i32, i32, i32
  }
  func.func @transform_5(%arg0: i32, %arg1: i32) -> (i32, i32) {
    %c0_i32 = arith.constant 0 : i32
    %c0_i32_0 = arith.constant 0 : i32
    %c0_i32_1 = arith.constant 0 : i32
    return %c0_i32, %c0_i32_0 : i32, i32
  }
  func.func @transform_6(%arg0: i32, %arg1: i32) -> (i32, i32, i32) {
    %c0_i32 = arith.constant 0 : i32
    %c0_i32_0 = arith.constant 0 : i32
    return %arg0, %arg1, %c0_i32 : i32, i32, i32
  }
  func.func @transform_7(%arg0: i32, %arg1: i32) -> (i32, i32, i32) {
    %c0_i32 = arith.constant 0 : i32
    %c0_i32_0 = arith.constant 0 : i32
    return %arg0, %arg1, %c0_i32 : i32, i32, i32
  }
}

</mosaic_0001>

<bundles_post_ra>
// kernel: resgen_block_forward.4
= control target key start
LH: loop header
LB: loop body
LE: loop exit
PB: predicated region body
PF: predicated region fallthrough
CT: control target
= control target key end

     0   :  { %s726_s6 = smov 0   ;;  %s1046_s0 = inlined_call_operand.vmem [shape: f32[844,128], index: 0, kind: input, shape index: {}]   ;;  %s1047_s1 = inlined_call_operand.vmem [shape: f32[2,128], index: 1, kind: output, shape index: {}]  }
   0x1 LB: > { %s688_s7 = sadd.s32 4294967295, %s713_s6   ;;  %p691_p0 = scmp.ge.s32.totalorder %s713_s6, 1  ;;  %s713_s6 = sphi %s726_s6, %s11_s6  }
   0x2   : > { %p91_p1 = scmp.lt.s32.totalorder %s713_s6, 3 }
   0x4   : > { %p92_p2 = pnand %p691_p0, %p91_p1 }
   0x6   : > { %95 = sbr.rel (%p92_p2) target bundleno = 202 (0xca), region = 24 }
   0xd   : > { %s692_s8 = sshll.u32 %s688_s7, 6  ;;  %p694_p4 = scmp.ne.s32.totalorder %s688_s7, 0 }
   0xe   : > { %p115_p3 = scmp.lt.s32.totalorder %s692_s8, 105  ;;  %v715_v0 = vmov (!%p694_p4), 0.0  }
   0xf   : > { %127 = sbr.rel (%p694_p4) target bundleno = 22 (0x16), region = 28  ;;  %128 = vst [vmem:[%s1047_s1] sm:$0x3] (!%p694_p4), %v715_v0 }
  0x10   : > { %s1051_s8 = smov (!%p115_p3, %s692_s8), 105 }
  0x11   : > { %s693_s9 = sshll.u32 %s1051_s8, 3 }
  0x12   : > { %s737_s12 = scalar_lea.vmem %s1046_s0, %s693_s9 }
  0x16 PF: > { %v193_v1 = vlaneseq  ;;  %s695_s15 = sshll.u32 %s688_s7, 9 }
  0x17   : > { %v746_v5 = vstv %s695_s15 }
  0x18   : > { %v742_v2 = vshrl.u32 %v193_v1, 7 }
  0x1a   : > { %v227_v3 = vadd.s32 264, %v742_v2  ;;  %v228_v4 = vadd.s32 272, %v742_v2  ;;  %v229_v6 = vadd.s32 280, %v742_v2  ;;  %v230_v7 = vadd.s32 288, %v742_v2 }
  0x1b   : > { %v231_v8 = vadd.s32 296, %v742_v2  ;;  %v232_v9 = vadd.s32 304, %v742_v2  ;;  %v233_v10 = vadd.s32 312, %v742_v2  ;;  %v234_v11 = vadd.s32 320, %v742_v2 }
  0x1c   : > { %v235_v12 = vadd.s32 328, %v742_v2  ;;  %v236_v13 = vadd.s32 336, %v742_v2  ;;  %v237_v14 = vadd.s32 344, %v742_v2  ;;  %v238_v15 = vadd.s32 352, %v742_v2 }
  0x1d   : > { %v239_v16 = vadd.s32 360, %v742_v2  ;;  %v240_v17 = vadd.s32 368, %v742_v2  ;;  %v241_v18 = vadd.s32 376, %v742_v2  ;;  %v242_v19 = vadd.s32 384, %v742_v2 }
  0x1e   : > { %v243_v20 = vadd.s32 392, %v742_v2  ;;  %v244_v21 = vadd.s32 400, %v742_v2  ;;  %v245_v22 = vadd.s32 408, %v742_v2  ;;  %v246_v23 = vadd.s32 416, %v742_v2 }
  0x1f   : > { %v247_v24 = vadd.s32 424, %v742_v2  ;;  %v248_v25 = vadd.s32 432, %v742_v2  ;;  %v249_v26 = vadd.s32 440, %v742_v2  ;;  %v250_v27 = vadd.s32 448, %v742_v2 }
  0x20   : > { %v251_v28 = vadd.s32 456, %v742_v2  ;;  %v252_v29 = vadd.s32 464, %v742_v2  ;;  %v253_v30 = vadd.s32 472, %v742_v2  ;;  %v254_v31 = vadd.s32 480, %v742_v2 }
  0x21   : > { %v255_v32 = vadd.s32 488, %v742_v2  ;;  %v256_v33 = vadd.s32 496, %v742_v2  ;;  %v257_v34 = vadd.s32 504, %v742_v2  ;;  %v778_v35 = vadd.s32 %v746_v5, %v227_v3 }
  0x22   : > { %v781_v36 = vadd.s32 %v746_v5, %v228_v4  ;;  %v784_v37 = vadd.s32 %v746_v5, %v229_v6  ;;  %v787_v38 = vadd.s32 %v746_v5, %v230_v7  ;;  %v790_v39 = vadd.s32 %v746_v5, %v231_v8 }
  0x23   : > { %v793_v40 = vadd.s32 %v746_v5, %v232_v9  ;;  %v796_v41 = vadd.s32 %v746_v5, %v233_v10  ;;  %v799_v42 = vadd.s32 %v746_v5, %v234_v11  ;;  %v802_v43 = vadd.s32 %v746_v5, %v235_v12  ;;  %v129_v11 = vld [vmem:[%s737_s12] sm:$0xff]  ;;  %v130_v12 = vld [vmem:[%s737_s12 + $0x8] sm:$0xff] }
  0x24   : > { %v805_v44 = vadd.s32 %v746_v5, %v236_v13  ;;  %v808_v45 = vadd.s32 %v746_v5, %v237_v14  ;;  %v811_v46 = vadd.s32 %v746_v5, %v238_v15  ;;  %v814_v47 = vadd.s32 %v746_v5, %v239_v16  ;;  %v131_v15 = vld [vmem:[%s737_s12 + $0x10] sm:$0xff] }
  0x25   : > { %v817_v48 = vadd.s32 %v746_v5, %v240_v17  ;;  %v820_v49 = vadd.s32 %v746_v5, %v241_v18  ;;  %v823_v50 = vadd.s32 %v746_v5, %v242_v19  ;;  %v826_v51 = vadd.s32 %v746_v5, %v243_v20  ;;  %v132_v20 = vld [vmem:[%s737_s12 + $0x18] sm:$0xff] }
  0x26   : > { %v829_v52 = vadd.s32 %v746_v5, %v244_v21  ;;  %v832_v53 = vadd.s32 %v746_v5, %v245_v22  ;;  %v835_v54 = vadd.s32 %v746_v5, %v246_v23  ;;  %v838_v55 = vadd.s32 %v746_v5, %v247_v24 }
  0x27   : > { %v841_v56 = vadd.s32 %v746_v5, %v248_v25  ;;  %v844_v57 = vadd.s32 %v746_v5, %v249_v26  ;;  %v847_v58 = vadd.s32 %v746_v5, %v250_v27  ;;  %v850_v59 = vadd.s32 %v746_v5, %v251_v28  ;;  %v133_v25 = vld [vmem:[%s737_s12 + $0x20] sm:$0xff] }
  0x28   : > { %v853_v60 = vadd.s32 %v746_v5, %v252_v29  ;;  %v856_v61 = vadd.s32 %v746_v5, %v253_v30  ;;  %v859_v62 = vadd.s32 %v746_v5, %v254_v31  ;;  %v862_v63 = vadd.s32 %v746_v5, %v255_v32  ;;  %v134_v30 = vld [vmem:[%s737_s12 + $0x28] sm:$0xff] }
  0x29   : > { %v865_v0 = vadd.s32 %v746_v5, %v256_v33  ;;  %v868_v1 = vadd.s32 %v746_v5, %v257_v34  ;;  %v195_v3 = vadd.s32 8, %v742_v2  ;;  %v196_v4 = vadd.s32 16, %v742_v2 }
  0x2a   : > { %v197_v6 = vadd.s32 24, %v742_v2  ;;  %v260_v7 = vadd.s32 %v746_v5, %v742_v2  ;;  %v198_v9 = vadd.s32 32, %v742_v2  ;;  %v199_v13 = vadd.s32 40, %v742_v2 }
  0x2b   : > { %1048 = vst [vmem:[#allocation2_spill] sm:$0xff] %v868_v1  ;;  %v261_v8 = vadd.s32 %v746_v5, %v195_v3  ;;  %v262_v10 = vadd.s32 %v746_v5, %v196_v4  ;;  %v200_v16 = vadd.s32 48, %v742_v2  ;;  %v201_v21 = vadd.s32 56, %v742_v2  ;;  %v135_v3 = vld [vmem:[%s737_s12 + $0x30] sm:$0xff] }
  0x2c   : > { %v263_v14 = vadd.s32 %v746_v5, %v197_v6  ;;  %vm324_vm0 = vcmp.lt.s32.totalorder %v260_v7, 844  ;;  %v264_v17 = vadd.s32 %v746_v5, %v198_v9  ;;  %v265_v22 = vadd.s32 %v746_v5, %v199_v13  ;;  %v136_v9 = vld [vmem:[%s737_s12 + $0x38] sm:$0xff] }
  0x2d   : > { %vm325_vm1 = vcmp.lt.s32.totalorder %v261_v8, 844  ;;  %vm326_vm2 = vcmp.lt.s32.totalorder %v262_v10, 844  ;;  %v388_v18 = vsel %vm324_vm0, %v129_v11, 0.0  ;;  %v202_v26 = vadd.s32 64, %v742_v2 }
  0x2e   : > { %v389_v19 = vsel %vm325_vm1, %v130_v12, 0.0  ;;  %vm327_vm3 = vcmp.lt.s32.totalorder %v263_v14, 844  ;;  %v390_v24 = vsel %vm326_vm2, %v131_v15, 0.0  ;;  %v266_v27 = vadd.s32 %v746_v5, %v200_v16  ;;  %v137_v15 = vld [vmem:[%s737_s12 + $0x40] sm:$0xff] }
  0x2f   : > { %v453_v23 = vadd.f32 %v389_v19, %v388_v18  ;;  %vm328_vm4 = vcmp.lt.s32.totalorder %v264_v17, 844  ;;  %v391_v29 = vsel %vm327_vm3, %v132_v20, 0.0  ;;  %v203_v31 = vadd.s32 72, %v742_v2 }
  0x30   : > { %v267_v32 = vadd.s32 %v746_v5, %v201_v21  ;;  %vm329_vm5 = vcmp.lt.s32.totalorder %v265_v22, 844  ;;  %v392_v34 = vsel %vm328_vm4, %v133_v25, 0.0  ;;  %v204_v4 = vadd.s32 80, %v742_v2  ;;  %v138_v21 = vld [vmem:[%s737_s12 + $0x48] sm:$0xff] }
  0x31   : > { %v454_v28 = vadd.f32 %v453_v23, %v390_v24  ;;  %v268_v6 = vadd.s32 %v746_v5, %v202_v26  ;;  %vm330_vm6 = vcmp.lt.s32.totalorder %v266_v27, 844  ;;  %v393_v8 = vsel %vm329_vm5, %v134_v30, 0.0  ;;  %v139_v30 = vld [vmem:[%s737_s12 + $0x50] sm:$0xff] }
  0x32   : > { %v205_v10 = vadd.s32 88, %v742_v2  ;;  %v269_v11 = vadd.s32 %v746_v5, %v203_v31  ;;  %vm331_vm7 = vcmp.lt.s32.totalorder %v267_v32, 844  ;;  %v206_v13 = vadd.s32 96, %v742_v2 }
  0x33   : > { %v455_v33 = vadd.f32 %v454_v28, %v391_v29  ;;  %v394_v14 = vsel %vm330_vm6, %v135_v3, 0.0  ;;  %v270_v16 = vadd.s32 %v746_v5, %v204_v4  ;;  %vm332_vm8 = vcmp.lt.s32.totalorder %v268_v6, 844  ;;  %v140_v6 = vld [vmem:[%s737_s12 + $0x58] sm:$0xff] }
  0x34   : > { %v395_v20 = vsel %vm331_vm7, %v136_v9, 0.0  ;;  %v207_v22 = vadd.s32 104, %v742_v2  ;;  %v271_v23 = vadd.s32 %v746_v5, %v205_v10  ;;  %vm333_vm9 = vcmp.lt.s32.totalorder %v269_v11, 844 }
  0x35   : > { %v456_v7 = vadd.f32 %v455_v33, %v392_v34  ;;  %v208_v26 = vadd.s32 112, %v742_v2  ;;  %v272_v27 = vadd.s32 %v746_v5, %v206_v13  ;;  %v396_v28 = vsel %vm332_vm8, %v137_v15, 0.0  ;;  %v141_v15 = vld [vmem:[%s737_s12 + $0x60] sm:$0xff] }
  0x36   : > { %vm334_vm10 = vcmp.lt.s32.totalorder %v270_v16, 844  ;;  %v525_v32 = vmul.f32 %v388_v18, %v388_v18  ;;  %v526_v33 = vmul.f32 %v389_v19, %v389_v19  ;;  %v209_v3 = vadd.s32 120, %v742_v2 }
  0x37   : > { %v457_v12 = vadd.f32 %v456_v7, %v393_v8  ;;  %v397_v4 = vsel %vm333_vm9, %v138_v21, 0.0  ;;  %v273_v7 = vadd.s32 %v746_v5, %v207_v22  ;;  %vm335_vm11 = vcmp.lt.s32.totalorder %v271_v23, 844  ;;  %v142_v22 = vld [vmem:[%s737_s12 + $0x68] sm:$0xff] }
  0x38   : > { %v527_v10 = vmul.f32 %v390_v24, %v390_v24  ;;  %v210_v11 = vadd.s32 128, %v742_v2  ;;  %v398_v13 = vsel %vm334_vm10, %v139_v30, 0.0  ;;  %vm336_vm12 = vcmp.lt.s32.totalorder %v272_v27, 844  ;;  %v143_v27 = vld [vmem:[%s737_s12 + $0x70] sm:$0xff] }
  0x39   : > { %v458_v17 = vadd.f32 %v457_v12, %v394_v14  ;;  %v274_v12 = vadd.s32 %v746_v5, %v208_v26  ;;  %v528_v19 = vmul.f32 %v391_v29, %v391_v29  ;;  %v589_v16 = vadd.f32 %v526_v33, %v525_v32 }
  0x3a   : > { %v275_v21 = vadd.s32 %v746_v5, %v209_v3  ;;  %vm337_vm13 = vcmp.lt.s32.totalorder %v273_v7, 844  ;;  %v529_v23 = vmul.f32 %v392_v34, %v392_v34  ;;  %v212_v26 = vadd.s32 144, %v742_v2  ;;  %v144_v7 = vld [vmem:[%s737_s12 + $0x78] sm:$0xff] }
  0x3b   : > { %v459_v25 = vadd.f32 %v458_v17, %v395_v20  ;;  %v211_v17 = vadd.s32 136, %v742_v2  ;;  %v276_v30 = vadd.s32 %v746_v5, %v210_v11  ;;  %v400_v1 = vsel %vm336_vm12, %v141_v15, 0.0 }
  0x3c   : > { %vm338_vm14 = vcmp.lt.s32.totalorder %v274_v12, 844  ;;  %v530_v32 = vmul.f32 %v393_v8, %v393_v8  ;;  %v213_v3 = vadd.s32 152, %v742_v2  ;;  %vm339_vm15 = vcmp.lt.s32.totalorder %v275_v21, 844  ;;  %v145_v12 = vld [vmem:[%s737_s12 + $0x80] sm:$0xff]  ;;  %v146_v21 = vld [vmem:[%s737_s12 + $0x88] sm:$0xff] }
  0x3d   : > { %v460_v31 = vadd.f32 %v459_v25, %v396_v28  ;;  %v399_v25 = vsel %vm335_vm11, %v140_v6, 0.0  ;;  %v277_v6 = vadd.s32 %v746_v5, %v211_v17  ;;  %v214_v11 = vadd.s32 160, %v742_v2 }
  0x3e   : > { %v278_v15 = vadd.s32 %v746_v5, %v212_v26  ;;  %vm340_vm0 = vcmp.lt.s32.totalorder %v276_v30, 844  ;;  %v215_v17 = vadd.s32 168, %v742_v2  ;;  %v216_v26 = vadd.s32 176, %v742_v2  ;;  %v147_v30 = vld [vmem:[%s737_s12 + $0x90] sm:$0xff] }
  0x3f   : > { %v461_v9 = vadd.f32 %v460_v31, %v397_v4  ;;  %v590_v31 = vadd.f32 %v589_v16, %v527_v10  ;;  %v531_v10 = vmul.f32 %v394_v14, %v394_v14  ;;  %v402_v16 = vsel %vm338_vm14, %v143_v27, 0.0 }
  0x40   : > { %vm341_vm1 = vcmp.lt.s32.totalorder %v277_v6, 844  ;;  %v280_v27 = vadd.s32 %v746_v5, %v214_v11  ;;  %vm342_vm2 = vcmp.lt.s32.totalorder %v278_v15, 844  ;;  %v148_v6 = vld [vmem:[%s737_s12 + $0x98] sm:$0xff]  ;;  %v218_v11 = vadd.s32 192, %v742_v2  ;;  %v149_v15 = vld [vmem:[%s737_s12 + $0xa0] sm:$0xff] }
  0x41   : > { %v462_v18 = vadd.f32 %v461_v9, %v398_v13  ;;  %v591_v33 = vadd.f32 %v590_v31, %v528_v19  ;;  %v401_v9 = vsel %vm337_vm13, %v142_v22, 0.0  ;;  %v532_v19 = vmul.f32 %v395_v20, %v395_v20 }
  0x42   : > { %v279_v22 = vadd.s32 %v746_v5, %v213_v3  ;;  %v403_v31 = vsel %vm339_vm15, %v144_v7, 0.0  ;;  %v217_v3 = vadd.s32 184, %v742_v2  ;;  %v281_v7 = vadd.s32 %v746_v5, %v215_v17 }
  0x43   : > { %v463_v24 = vadd.f32 %v462_v18, %v399_v25  ;;  %v592_v18 = vadd.f32 %v591_v33, %v529_v23  ;;  %v533_v23 = vmul.f32 %v396_v28, %v396_v28  ;;  %v404_v33 = vsel %vm340_vm0, %v145_v12, 0.0 }
  0x44   : > { %vm343_vm3 = vcmp.lt.s32.totalorder %v279_v22, 844  ;;  %v282_v12 = vadd.s32 %v746_v5, %v216_v26  ;;  %vm344_vm4 = vcmp.lt.s32.totalorder %v280_v27, 844  ;;  %v219_v17 = vadd.s32 200, %v742_v2  ;;  %v150_v22 = vld [vmem:[%s737_s12 + $0xa8] sm:$0xff]  ;;  %v151_v27 = vld [vmem:[%s737_s12 + $0xb0] sm:$0xff] }
  0x45   : > { %v464_v29 = vadd.f32 %v463_v24, %v400_v1  ;;  %v593_v24 = vadd.f32 %v592_v18, %v530_v32  ;;  %v534_v32 = vmul.f32 %v397_v4, %v397_v4  ;;  %v405_v18 = vsel %vm341_vm1, %v146_v21, 0.0 }
  0x46   : > { %v283_v21 = vadd.s32 %v746_v5, %v217_v3  ;;  %vm345_vm5 = vcmp.lt.s32.totalorder %v281_v7, 844  ;;  %v220_v26 = vadd.s32 208, %v742_v2  ;;  %vm346_vm6 = vcmp.lt.s32.totalorder %v282_v12, 844  ;;  %v152_v7 = vld [vmem:[%s737_s12 + $0xb8] sm:$0xff]  ;;  %v153_v12 = vld [vmem:[%s737_s12 + $0xc0] sm:$0xff] }
  0x47   : > { %v465_v34 = vadd.f32 %v464_v29, %v401_v9  ;;  %v594_v29 = vadd.f32 %v593_v24, %v531_v10  ;;  %v535_v10 = vmul.f32 %v398_v13, %v398_v13  ;;  %v406_v24 = vsel %vm342_vm2, %v147_v30, 0.0 }
  0x48   : > { %v284_v30 = vadd.s32 %v746_v5, %v218_v11  ;;  %v221_v3 = vadd.s32 216, %v742_v2  ;;  %vm347_vm7 = vcmp.lt.s32.totalorder %v283_v21, 844  ;;  %v222_v11 = vadd.s32 224, %v742_v2  ;;  %v154_v21 = vld [vmem:[%s737_s12 + $0xc8] sm:$0xff] }
  0x49   : > { %v466_v8 = vadd.f32 %v465_v34, %v402_v16  ;;  %v595_v34 = vadd.f32 %v594_v29, %v532_v19  ;;  %v536_v19 = vmul.f32 %v399_v25, %v399_v25  ;;  %v407_v29 = vsel %vm343_vm3, %v148_v6, 0.0 }
  0x4a   : > { %v285_v6 = vadd.s32 %v746_v5, %v219_v17  ;;  %vm348_vm8 = vcmp.lt.s32.totalorder %v284_v30, 844  ;;  %v223_v17 = vadd.s32 232, %v742_v2  ;;  %v155_v30 = vld [vmem:[%s737_s12 + $0xd0] sm:$0xff]  ;;  %vm357_vm1 = vcmp.lt.s32.totalorder %v778_v35, 844 }
  0x4b   : > { %v467_v14 = vadd.f32 %v466_v8, %v403_v31  ;;  %v596_v8 = vadd.f32 %v595_v34, %v533_v23  ;;  %v537_v23 = vmul.f32 %v400_v1, %v400_v1  ;;  %v408_v34 = vsel %vm344_vm4, %v149_v15, 0.0 }
  0x4c   : > { %v286_v15 = vadd.s32 %v746_v5, %v220_v26  ;;  %vm349_vm9 = vcmp.lt.s32.totalorder %v285_v6, 844  ;;  %v224_v26 = vadd.s32 240, %v742_v2  ;;  %v156_v6 = vld [vmem:[%s737_s12 + $0xd8] sm:$0xff]  ;;  %vm358_vm2 = vcmp.lt.s32.totalorder %v781_v36, 844 }
  0x4d   : > { %v468_v20 = vadd.f32 %v467_v14, %v404_v33  ;;  %v597_v14 = vadd.f32 %v596_v8, %v534_v32  ;;  %v538_v32 = vmul.f32 %v401_v9, %v401_v9  ;;  %v409_v8 = vsel %vm345_vm5, %v150_v22, 0.0 }
  0x4e   : > { %v287_v22 = vadd.s32 %v746_v5, %v221_v3  ;;  %vm350_vm10 = vcmp.lt.s32.totalorder %v286_v15, 844  ;;  %v225_v3 = vadd.s32 248, %v742_v2  ;;  %vm359_vm3 = vcmp.lt.s32.totalorder %v784_v37, 844 }
  0x4f   : > { %v469_v28 = vadd.f32 %v468_v20, %v405_v18  ;;  %v598_v20 = vadd.f32 %v597_v14, %v535_v10  ;;  %v539_v10 = vmul.f32 %v402_v16, %v402_v16  ;;  %v410_v14 = vsel %vm346_vm6, %v151_v27, 0.0 }
  0x50   : > { %v288_v27 = vadd.s32 %v746_v5, %v222_v11  ;;  %vm351_vm11 = vcmp.lt.s32.totalorder %v287_v22, 844  ;;  %v226_v11 = vadd.s32 256, %v742_v2  ;;  %v414_v15 = vsel %vm350_vm10, %v155_v30, 0.0 }
  0x51   : > { %v470_v4 = vadd.f32 %v469_v28, %v406_v24  ;;  %v599_v28 = vadd.f32 %v598_v20, %v536_v19  ;;  %v540_v19 = vmul.f32 %v403_v31, %v403_v31  ;;  %v411_v20 = vsel %vm347_vm7, %v152_v7, 0.0 }
  0x52   : > { %v289_v7 = vadd.s32 %v746_v5, %v223_v17  ;;  %vm352_vm12 = vcmp.lt.s32.totalorder %v288_v27, 844  ;;  %v291_v17 = vadd.s32 %v746_v5, %v225_v3  ;;  %v292_v2 = vadd.s32 %v746_v5, %v226_v11 }
  0x53   : > { %v471_v13 = vadd.f32 %v470_v4, %v407_v29  ;;  %v600_v4 = vadd.f32 %v599_v28, %v537_v23  ;;  %v541_v23 = vmul.f32 %v404_v33, %v404_v33  ;;  %v412_v28 = vsel %vm348_vm8, %v153_v12, 0.0 }
  0x54   : > { %v290_v12 = vadd.s32 %v746_v5, %v224_v26  ;;  %vm353_vm13 = vcmp.lt.s32.totalorder %v289_v7, 844  ;;  %v546_v27 = vmul.f32 %v409_v8, %v409_v8  ;;  %vm355_vm15 = vcmp.lt.s32.totalorder %v291_v17, 844 }
  0x55   : > { %v472_v25 = vadd.f32 %v471_v13, %v408_v34  ;;  %v601_v13 = vadd.f32 %v600_v4, %v538_v32  ;;  %v542_v32 = vmul.f32 %v405_v18, %v405_v18  ;;  %v413_v4 = vsel %vm349_vm9, %v154_v21, 0.0 }
  0x56   : > { %v415_v21 = vsel %vm351_vm11, %v156_v6, 0.0  ;;  %vm354_vm14 = vcmp.lt.s32.totalorder %v290_v12, 844  ;;  %v547_v6 = vmul.f32 %v410_v14, %v410_v14  ;;  %vm356_vm0 = vcmp.lt.s32.totalorder %v292_v2, 844  ;;  %v162_v12 = vld [vmem:[%s737_s12 + $0x108] sm:$0xff] }
  0x57   : > { %v473_v1 = vadd.f32 %v472_v25, %v409_v8  ;;  %v602_v25 = vadd.f32 %v601_v13, %v539_v10  ;;  %v543_v10 = vmul.f32 %v406_v24, %v406_v24  ;;  %v157_v13 = vld [vmem:[%s737_s12 + $0xe0] sm:$0xff]  ;;  %v545_v24 = vmul.f32 %v408_v34, %v408_v34 }
  0x58   : > { %v416_v26 = vsel %vm352_vm12, %v157_v13, 0.0  ;;  %v161_v34 = vld [vmem:[%s737_s12 + $0x100] sm:$0xff]  ;;  %v548_v5 = vmul.f32 %v411_v20, %v411_v20  ;;  %v549_v13 = vmul.f32 %v412_v28, %v412_v28  ;;  %v550_v17 = vmul.f32 %v413_v4, %v413_v4 }
  0x59   : > { %v474_v9 = vadd.f32 %v473_v1, %v410_v14  ;;  %v603_v1 = vadd.f32 %v602_v25, %v540_v19  ;;  %v544_v19 = vmul.f32 %v407_v29, %v407_v29  ;;  %v158_v25 = vld [vmem:[%s737_s12 + $0xe8] sm:$0xff]  ;;  %vm360_vm4 = vcmp.lt.s32.totalorder %v787_v38, 844 }
  0x5a   : > { %vm361_vm5 = vcmp.lt.s32.totalorder %v790_v39, 844  ;;  %vm362_vm6 = vcmp.lt.s32.totalorder %v793_v40, 844  ;;  %vm363_vm7 = vcmp.lt.s32.totalorder %v796_v41, 844  ;;  %vm364_vm8 = vcmp.lt.s32.totalorder %v799_v42, 844 }
  0x5b   : > { %v475_v16 = vadd.f32 %v474_v9, %v411_v20  ;;  %v604_v9 = vadd.f32 %v603_v1, %v541_v23  ;;  %v160_v1 = vld [vmem:[%s737_s12 + $0xf8] sm:$0xff]  ;;  %vm365_vm9 = vcmp.lt.s32.totalorder %v802_v43, 844  ;;  %vm366_vm10 = vcmp.lt.s32.totalorder %v805_v44, 844 }
  0x5c   : > { %v419_v11 = vsel %vm355_vm15, %v160_v1, 0.0  ;;  %v553_v1 = vmul.f32 %v416_v26, %v416_v26  ;;  %vm367_vm11 = vcmp.lt.s32.totalorder %v808_v45, 844  ;;  %vm368_vm12 = vcmp.lt.s32.totalorder %v811_v46, 844 }
  0x5d   : > { %v476_v31 = vadd.f32 %v475_v16, %v412_v28  ;;  %v605_v16 = vadd.f32 %v604_v9, %v542_v32  ;;  %v417_v32 = vsel %vm353_vm13, %v158_v25, 0.0  ;;  %vm369_vm13 = vcmp.lt.s32.totalorder %v814_v47, 844 }
  0x5e   : > { %vm371_vm15 = vcmp.lt.s32.totalorder %v820_v49, 844 }
  0x5f   : > { %v477_v33 = vadd.f32 %v476_v31, %v413_v4  ;;  %v606_v23 = vadd.f32 %v605_v16, %v543_v10  ;;  %v159_v31 = vld [vmem:[%s737_s12 + $0xf0] sm:$0xff] }
  0x60   : > { %v163_v16 = vld [vmem:[%s737_s12 + $0x110] sm:$0xff] }
  0x61   : > { %v478_v18 = vadd.f32 %v477_v33, %v414_v15  ;;  %v607_v29 = vadd.f32 %v606_v23, %v544_v19  ;;  %v418_v33 = vsel %vm354_vm14, %v159_v31, 0.0  ;;  %v420_v19 = vsel %vm356_vm0, %v161_v34, 0.0  ;;  %v165_v31 = vld [vmem:[%s737_s12 + $0x120] sm:$0xff] }
  0x62   : > { %v551_v23 = vmul.f32 %v414_v15, %v414_v15  ;;  %v422_v2 = vsel %vm358_vm2, %v163_v16, 0.0  ;;  %v557_v16 = vmul.f32 %v420_v19, %v420_v19  ;;  %vm370_vm14 = vcmp.lt.s32.totalorder %v817_v48, 844 }
  0x63   : > { %v479_v22 = vadd.f32 %v478_v18, %v415_v21  ;;  %v608_v7 = vadd.f32 %v607_v29, %v545_v24  ;;  %v164_v24 = vld [vmem:[%s737_s12 + $0x118] sm:$0xff]  ;;  %v166_v29 = vld [vmem:[%s737_s12 + $0x128] sm:$0xff]  ;;  %vm372_vm0 = vcmp.lt.s32.totalorder %v823_v50, 844  ;;  %vm374_vm2 = vcmp.lt.s32.totalorder %v829_v52, 844 }
  0x64   : > { %v425_v34 = vsel %vm361_vm5, %v166_v29, 0.0  ;;  %vm377_vm5 = vcmp.lt.s32.totalorder %v838_v55, 844 }
  0x65   : > { %v480_v30 = vadd.f32 %v479_v22, %v416_v26  ;;  %v609_v9 = vadd.f32 %v608_v7, %v546_v27  ;;  %v421_v22 = vsel %vm357_vm1, %v162_v12, 0.0  ;;  %v423_v27 = vsel %vm359_vm3, %v164_v24, 0.0  ;;  %v169_v12 = vld [vmem:[%s737_s12 + $0x140] sm:$0xff] }
  0x66   : > { %v554_v7 = vmul.f32 %v417_v32, %v417_v32  ;;  %vm373_vm1 = vcmp.lt.s32.totalorder %v826_v51, 844  ;;  %vm375_vm3 = vcmp.lt.s32.totalorder %v832_v53, 844 }
  0x67   : > { %v481_v3 = vadd.f32 %v480_v30, %v417_v32  ;;  %v610_v18 = vadd.f32 %v609_v9, %v547_v6  ;;  %v552_v30 = vmul.f32 %v415_v21, %v415_v21  ;;  %v167_v6 = vld [vmem:[%s737_s12 + $0x130] sm:$0xff] }
  0x68   : > { %v426_v9 = vsel %vm362_vm6, %v167_v6, 0.0  ;;  %vm378_vm6 = vcmp.lt.s32.totalorder %v841_v56, 844 }
  0x69   : > { %v482_v10 = vadd.f32 %v481_v3, %v418_v33  ;;  %v611_v25 = vadd.f32 %v610_v18, %v548_v5  ;;  %v424_v3 = vsel %vm360_vm4, %v165_v31, 0.0  ;;  %v555_v5 = vmul.f32 %v418_v33, %v418_v33  ;;  %v170_v18 = vld [vmem:[%s737_s12 + $0x148] sm:$0xff]  ;;  %v173_v31 = vld [vmem:[%s737_s12 + $0x160] sm:$0xff] }
  0x6a   : > { %v429_v24 = vsel %vm365_vm9, %v170_v18, 0.0  ;;  %v561_v29 = vmul.f32 %v424_v3, %v424_v3  ;;  %vm376_vm4 = vcmp.lt.s32.totalorder %v835_v54, 844  ;;  %vm381_vm9 = vcmp.lt.s32.totalorder %v850_v59, 844 }
  0x6b   : > { %v483_v8 = vadd.f32 %v482_v10, %v419_v11  ;;  %v612_v35 = vadd.f32 %v611_v25, %v549_v13  ;;  %v168_v10 = vld [vmem:[%s737_s12 + $0x138] sm:$0xff]  ;;  %v558_v25 = vmul.f32 %v421_v22, %v421_v22 }
  0x6c   : > { %v427_v13 = vsel %vm363_vm7, %v168_v10, 0.0  ;;  %v177_v10 = vld [vmem:[%s737_s12 + $0x180] sm:$0xff]  ;;  %vm379_vm7 = vcmp.lt.s32.totalorder %v844_v57, 844 }
  0x6d   : > { %v484_v14 = vadd.f32 %v483_v8, %v420_v19  ;;  %v613_v36 = vadd.f32 %v612_v35, %v550_v17  ;;  %v556_v8 = vmul.f32 %v419_v11, %v419_v11  ;;  %v171_v17 = vld [vmem:[%s737_s12 + $0x150] sm:$0xff] }
  0x6e   : > { %v430_v35 = vsel %vm366_vm10, %v171_v17, 0.0  ;;  %v181_v17 = vld [vmem:[%s737_s12 + $0x1a0] sm:$0xff]  ;;  %vm382_vm10 = vcmp.lt.s32.totalorder %v853_v60, 844 }
  0x6f   : > { %v485_v20 = vadd.f32 %v484_v14, %v421_v22  ;;  %v614_v37 = vadd.f32 %v613_v36, %v551_v23  ;;  %v428_v14 = vsel %vm364_vm8, %v169_v12, 0.0  ;;  %v559_v23 = vmul.f32 %v422_v2, %v422_v2  ;;  %v174_v36 = vld [vmem:[%s737_s12 + $0x168] sm:$0xff] }
  0x70   : > { %v433_v6 = vsel %vm369_vm13, %v174_v36, 0.0  ;;  %v565_v12 = vmul.f32 %v428_v14, %v428_v14  ;;  %v185_v36 = vld [vmem:[%s737_s12 + $0x1c0] sm:$0xff]  ;;  %vm380_vm8 = vcmp.lt.s32.totalorder %v847_v58, 844  ;;  %vm385_vm13 = vcmp.lt.s32.totalorder %v862_v63, 844 }
  0x71   : > { %v486_v28 = vadd.f32 %v485_v20, %v422_v2  ;;  %v615_v38 = vadd.f32 %v614_v37, %v552_v30  ;;  %v172_v20 = vld [vmem:[%s737_s12 + $0x158] sm:$0xff]  ;;  %v562_v37 = vmul.f32 %v425_v34, %v425_v34 }
  0x72   : > { %v431_v30 = vsel %vm367_vm11, %v172_v20, 0.0  ;;  %vm383_vm11 = vcmp.lt.s32.totalorder %v856_v61, 844 }
  0x73   : > { %v487_v4 = vadd.f32 %v486_v28, %v423_v27  ;;  %v616_v39 = vadd.f32 %v615_v38, %v553_v1  ;;  %v560_v28 = vmul.f32 %v423_v27, %v423_v27  ;;  %v175_v1 = vld [vmem:[%s737_s12 + $0x170] sm:$0xff] }
  0x74   : > { %v434_v38 = vsel %vm370_vm14, %v175_v1, 0.0  ;;  %vm386_vm14 = vcmp.lt.s32.totalorder %v865_v0, 844 }
  0x75   : > { %v488_v15 = vadd.f32 %v487_v4, %v424_v3  ;;  %v617_v40 = vadd.f32 %v616_v39, %v554_v7  ;;  %v432_v4 = vsel %vm368_vm12, %v173_v31, 0.0  ;;  %v563_v7 = vmul.f32 %v426_v9, %v426_v9  ;;  %v178_v39 = vld [vmem:[%s737_s12 + $0x188] sm:$0xff] }
  0x76   : > { %v437_v18 = vsel %vm373_vm1, %v178_v39, 0.0  ;;  %v569_v20 = vmul.f32 %v432_v4, %v432_v4  ;;  %vm384_vm12 = vcmp.lt.s32.totalorder %v859_v62, 844  ;;  %v190_v39 = vld [vmem:[%s737_s12 + $0x1e8] sm:$0xff]  ;;  %v192_v62 = vld [vmem:[%s737_s12 + $0x1f8] sm:$0xff] }
  0x77   : > { %v489_v21 = vadd.f32 %v488_v15, %v425_v34  ;;  %v618_v41 = vadd.f32 %v617_v40, %v555_v5  ;;  %v176_v15 = vld [vmem:[%s737_s12 + $0x178] sm:$0xff]  ;;  %v566_v40 = vmul.f32 %v429_v24, %v429_v24 }
  0x78   : > { %v435_v5 = vsel %vm371_vm15, %v176_v15, 0.0  ;;  %v574_v15 = vmul.f32 %v437_v18, %v437_v18 }
  0x79   : > { %v490_v26 = vadd.f32 %v489_v21, %v426_v9  ;;  %v619_v42 = vadd.f32 %v618_v41, %v556_v8  ;;  %v564_v21 = vmul.f32 %v427_v13, %v427_v13  ;;  %v179_v8 = vld [vmem:[%s737_s12 + $0x190] sm:$0xff] }
  0x7a   : > { %v438_v41 = vsel %vm374_vm2, %v179_v8, 0.0 }
  0x7b   : > { %v491_v32 = vadd.f32 %v490_v26, %v427_v13  ;;  %v620_v43 = vadd.f32 %v619_v42, %v557_v16  ;;  %v436_v26 = vsel %vm372_vm0, %v177_v10, 0.0  ;;  %v567_v16 = vmul.f32 %v430_v35, %v430_v35  ;;  %v182_v42 = vld [vmem:[%s737_s12 + $0x1a8] sm:$0xff] }
  0x7c   : > { %v441_v31 = vsel %vm377_vm5, %v182_v42, 0.0 }
  0x7d   : > { %v492_v33 = vadd.f32 %v491_v32, %v428_v14  ;;  %v621_v44 = vadd.f32 %v620_v43, %v558_v25  ;;  %v180_v32 = vld [vmem:[%s737_s12 + $0x198] sm:$0xff] }
  0x7e   : > { %v439_v25 = vsel %vm375_vm3, %v180_v32, 0.0 }
  0x7f   : > { %v493_v11 = vadd.f32 %v492_v33, %v429_v24  ;;  %v622_v45 = vadd.f32 %v621_v44, %v559_v23  ;;  %v568_v33 = vmul.f32 %v431_v30, %v431_v30  ;;  %v183_v23 = vld [vmem:[%s737_s12 + $0x1b0] sm:$0xff]  ;;  %v571_v44 = vmul.f32 %v434_v38, %v434_v38 }
  0x81   : > { %v494_v19 = vadd.f32 %v493_v11, %v430_v35  ;;  %v623_v46 = vadd.f32 %v622_v45, %v560_v28  ;;  %v440_v11 = vsel %vm376_vm4, %v181_v17, 0.0  ;;  %v570_v35 = vmul.f32 %v433_v6, %v433_v6 }
  0x83   : > { %v495_v22 = vadd.f32 %v494_v19, %v431_v30  ;;  %v624_v47 = vadd.f32 %v623_v46, %v561_v29  ;;  %v184_v19 = vld [vmem:[%s737_s12 + $0x1b8] sm:$0xff]  ;;  %v442_v30 = vsel %vm378_vm6, %v183_v23, 0.0  ;;  %v572_v29 = vmul.f32 %v435_v5, %v435_v5  ;;  %v187_v46 = vld [vmem:[%s737_s12 + $0x1d0] sm:$0xff] }
  0x84   : > { %v443_v45 = vsel %vm379_vm7, %v184_v19, 0.0  ;;  %v446_v10 = vsel %vm382_vm10, %v187_v46, 0.0 }
  0x85   : > { %v496_v2 = vadd.f32 %v495_v22, %v432_v4  ;;  %v625_v48 = vadd.f32 %v624_v47, %v562_v37  ;;  %v186_v4 = vld [vmem:[%s737_s12 + $0x1c8] sm:$0xff]  ;;  %v444_v37 = vsel %vm380_vm8, %v185_v36, 0.0  ;;  %v580_v63 = vmul.f32 %v443_v45, %v443_v45 }
  0x87   : > { %v497_v27 = vadd.f32 %v496_v2, %v433_v6  ;;  %v626_v49 = vadd.f32 %v625_v48, %v563_v7  ;;  %v573_v2 = vmul.f32 %v436_v26, %v436_v26  ;;  %v188_v7 = vld [vmem:[%s737_s12 + $0x1d8] sm:$0xff]  ;;  %v576_v48 = vmul.f32 %v439_v25, %v439_v25 }
  0x89   : > { %v498_v3 = vadd.f32 %v497_v27, %v434_v38  ;;  %v627_v50 = vadd.f32 %v626_v49, %v564_v21  ;;  %v445_v27 = vsel %vm381_vm9, %v186_v4, 0.0  ;;  %v575_v38 = vmul.f32 %v438_v41, %v438_v41 }
  0x8a   : > { %v582_v0 = vmul.f32 %v445_v27, %v445_v27 }
  0x8b   : > { %v499_v34 = vadd.f32 %v498_v3, %v435_v5  ;;  %v628_v51 = vadd.f32 %v627_v50, %v565_v12  ;;  %v189_v3 = vld [vmem:[%s737_s12 + $0x1e0] sm:$0xff]  ;;  %v447_v5 = vsel %vm383_vm11, %v188_v7, 0.0  ;;  %v577_v12 = vmul.f32 %v440_v11, %v440_v11 }
  0x8c   : > { %v448_v61 = vsel %vm384_vm12, %v189_v3, 0.0  ;;  %v449_v50 = vsel %vm385_vm13, %v190_v39, 0.0 }
  0x8d   : > { %v500_v9 = vadd.f32 %v499_v34, %v436_v26  ;;  %v629_v52 = vadd.f32 %v628_v51, %v566_v40  ;;  %v191_v26 = vld [vmem:[%s737_s12 + $0x1f0] sm:$0xff] }
  0x8e   : > { %v450_v51 = vsel %vm386_vm14, %v191_v26, 0.0 }
  0x8f   : > { %v501_v13 = vadd.f32 %v500_v9, %v437_v18  ;;  %v630_v53 = vadd.f32 %v629_v52, %v567_v16  ;;  %v578_v9 = vmul.f32 %v441_v31, %v441_v31  ;;  %v1049_v18 = vld [vmem:[#allocation2_spill] sm:$0xff]  ;;  %v581_v52 = vmul.f32 %v444_v37, %v444_v37 }
  0x90   : > { %vm387_vm15 = vcmp.lt.s32.totalorder %v1049_v18, 844 }
  0x91   : > { %v502_v14 = vadd.f32 %v501_v13, %v438_v41  ;;  %v631_v54 = vadd.f32 %v630_v53, %v568_v33  ;;  %v579_v13 = vmul.f32 %v442_v30, %v442_v30  ;;  %v583_v53 = vmul.f32 %v446_v10, %v446_v10 }
  0x93   : > { %v503_v24 = vadd.f32 %v502_v14, %v439_v25  ;;  %v632_v55 = vadd.f32 %v631_v54, %v569_v20  ;;  %v451_v14 = vsel %vm387_vm15, %v192_v62, 0.0 }
  0x95   : > { %v504_v43 = vadd.f32 %v503_v24, %v440_v11  ;;  %v633_v56 = vadd.f32 %v632_v55, %v570_v35 }
  0x97   : > { %v505_v28 = vadd.f32 %v504_v43, %v441_v31  ;;  %v634_v57 = vadd.f32 %v633_v56, %v571_v44  ;;  %v584_v43 = vmul.f32 %v447_v5, %v447_v5  ;;  %v585_v31 = vmul.f32 %v448_v61, %v448_v61 }
  0x98   : > { %v586_v44 = vmul.f32 %v449_v50, %v449_v50 }
  0x99   : > { %v506_v22 = vadd.f32 %v505_v28, %v442_v30  ;;  %v635_v58 = vadd.f32 %v634_v57, %v572_v29  ;;  %v452_v30 = vld [vmem:[%s1047_s1] sm:$0x1] }
  0x9b   : > { %v507_v1 = vadd.f32 %v506_v22, %v443_v45  ;;  %v636_v59 = vadd.f32 %v635_v58, %v573_v2  ;;  %v587_v22 = vmul.f32 %v450_v51, %v450_v51  ;;  %v588_v45 = vmul.f32 %v451_v14, %v451_v14  ;;  %v524_v58 = vld [vmem:[%s1047_s1 + $0x1] sm:$0x1] }
  0x9d   : > { %v508_v6 = vadd.f32 %v507_v1, %v444_v37  ;;  %v637_v60 = vadd.f32 %v636_v59, %v574_v15 }
  0x9f   : > { %v509_v47 = vadd.f32 %v508_v6, %v445_v27  ;;  %v638_v49 = vadd.f32 %v637_v60, %v575_v38 }
  0xa1   : > { %v510_v21 = vadd.f32 %v509_v47, %v446_v10  ;;  %v639_v40 = vadd.f32 %v638_v49, %v576_v48 }
  0xa3   : > { %v511_v34 = vadd.f32 %v510_v21, %v447_v5  ;;  %v640_v16 = vadd.f32 %v639_v40, %v577_v12 }
  0xa5   : > { %v512_v8 = vadd.f32 %v511_v34, %v448_v61  ;;  %v641_v17 = vadd.f32 %v640_v16, %v578_v9 }
  0xa7   : > { %v513_v32 = vadd.f32 %v512_v8, %v449_v50  ;;  %v642_v25 = vadd.f32 %v641_v17, %v579_v13 }
  0xa9   : > { %v514_v41 = vadd.f32 %v513_v32, %v450_v51  ;;  %v643_v24 = vadd.f32 %v642_v25, %v580_v63 }
  0xab   : > { %v515_v33 = vadd.f32 %v514_v41, %v451_v14  ;;  %v644_v11 = vadd.f32 %v643_v24, %v581_v52 }
  0xad   : > { %v516_v42 = vrot.slane %v515_v33, 4  ;;  %v645_v35 = vadd.f32 %v644_v11, %v582_v0 }
  0xaf   : > { %v517_v20 = vadd.f32 %v516_v42, %v515_v33  ;;  %v646_v19 = vadd.f32 %v645_v35, %v583_v53 }
  0xb1   : > { %v518_v23 = vrot.slane %v517_v20, 2  ;;  %v647_v55 = vadd.f32 %v646_v19, %v584_v43 }
  0xb3   : > { %v519_v54 = vadd.f32 %v518_v23, %v517_v20  ;;  %v648_v29 = vadd.f32 %v647_v55, %v585_v31 }
  0xb5   : > { %v520_v28 = vrot.slane %v519_v54, 1  ;;  %v649_v4 = vadd.f32 %v648_v29, %v586_v44 }
  0xb7   : > { %v521_v36 = vadd.f32 %v520_v28, %v519_v54  ;;  %v650_v1 = vadd.f32 %v649_v4, %v587_v22 }
  0xb9   : > { %v522_v56 = vadd.f32 %v521_v36, %v452_v30  ;;  %v651_v2 = vadd.f32 %v650_v1, %v588_v45 }
  0xbb   : > { %523 = vst [vmem:[%s1047_s1] sm:$0x1] %v522_v56  ;;  %v652_v57 = vrot.slane %v651_v2, 4 }
  0xbd   : > { %v653_v37 = vadd.f32 %v652_v57, %v651_v2 }
  0xbf   : > { %v654_v46 = vrot.slane %v653_v37, 2 }
  0xc1   : > { %v655_v6 = vadd.f32 %v654_v46, %v653_v37 }
  0xc3   : > { %v656_v15 = vrot.slane %v655_v6, 1 }
  0xc5   : > { %v657_v27 = vadd.f32 %v656_v15, %v655_v6 }
  0xc7   : > { %v658_v7 = vadd.f32 %v657_v27, %v524_v58 }
  0xc9   : > { %659 = vst [vmem:[%s1047_s1 + $0x1] sm:$0x1] %v658_v7 }
  0xca PF: > { %s11_s6 = sadd.s32 1, %s713_s6  }
  0xcb   : > { %p8_p5 = scmp.ge.s32.totalorder %s11_s6, 4  }
  0xcd   :  { %10 = sbr.rel (!%p8_p5) target bundleno = 1 (0x1), region = 54 }

// kernel: tile.8
= control target key start
LH: loop header
LB: loop body
LE: loop exit
PB: predicated region body
PF: predicated region fallthrough
CT: control target
= control target key end

     0   :  { %s22_s0 = inlined_call_operand.vmem [shape: f32[128], index: 0, kind: input, shape index: {}]   ;;  %s23_s1 = inlined_call_operand.vmem [shape: f32[4,128], index: 1, kind: output, shape index: {}]  }
   0x1   :  { %v4_v0 = vld [vmem:[%s22_s0] ss:$0 sm:$0xff] }
   0x2   :  { %5 = vst [vmem:[%s23_s1] sm:$0xf] %v4_v0 }

// kernel: resgen_block_forward.5
= control target key start
LH: loop header
LB: loop body
LE: loop exit
PB: predicated region body
PF: predicated region fallthrough
CT: control target
= control target key end

     0   :  { %s7346_s30 = smov 0   ;;  %s7348_s10 = smov 0   ;;  %s10400_s0 = inlined_call_operand.vmem [shape: f32[2,422,128], index: 0, kind: input, shape index: {}]   ;;  %s10401_s1 = inlined_call_operand.vmem [shape: f32[422,1], index: 1, kind: input, shape index: {}]   ;;  %s10402_s2 = inlined_call_operand.vmem [shape: f32[1,128], index: 2, kind: input, shape index: {}]   ;;  %s10403_s3 = inlined_call_operand.vmem [shape: f32[1,128], index: 3, kind: input, shape index: {}]   ;;  %s10404_s4 = inlined_call_operand.vmem [shape: f32[9,128,512], index: 4, kind: input, shape index: {}]   ;;  %s10405_s5 = inlined_call_operand.vmem [shape: f32[1,512], index: 5, kind: input, shape index: {}]   ;;  %s10406_s6 = inlined_call_operand.vmem [shape: f32[128,128], index: 6, kind: input, shape index: {}]   ;;  %s10407_s7 = inlined_call_operand.vmem [shape: f32[1,128], index: 7, kind: input, shape index: {}]   ;;  %s10408_s8 = inlined_call_operand.vmem [shape: f32[2,384,512], index: 8, kind: output, shape index: {0}]   ;;  %s10409_s9 = inlined_call_operand.vmem [shape: f32[2,384,128], index: 9, kind: output, shape index: {1}]  }
   0x1   :  { %s7350_s11 = smov 0   ;;  %s7352_s12 = smov 0  }
   0x2   :  { %s7354_s13 = smov 0  }
   0x3 LB: > { %s29_s14 = sadd.s32 1, %s7284_s11  ;;  %s32_s15 = sadd.s32 1, %s7288_s12  ;;  %s7292_s13 = sphi %s7354_s13, %s20_s13   ;;  %s7288_s12 = sphi %s7352_s12, %s10419_s12   ;;  %s7284_s11 = sphi %s7350_s11, %s10418_s11   ;;  %s7280_s10 = sphi %s7348_s10, %s10417_s10   ;;  %s7276_s30 = sphi %s7346_s30, %s10416_s30  }
   0x4   : > { %p30_p0 = scmp.ge.s32.totalorder %s29_s14, 3  ;;  %p5441_p1 = scmp.ge.s32.totalorder %s7292_s13, 1 }
   0x5   : > { %p306_p2 = scmp.lt.s32.totalorder %s7292_s13, 7 }
   0x6   : > { %s10421_s14 = smov (%p30_p0, %s29_s14), 0  ;;  %s10423_s15 = smov (!%p30_p0, %s32_s15), %s7288_s12 }
   0x7   : > { %p307_p3 = pnand %p5441_p1, %p306_p2  ;;  %p34_p4 = scmp.ge.s32.totalorder %s10423_s15, 2 }
   0x8   : > { %s5448_s16 = sshll.u32 (!%p307_p3), %s7276_s30, 7  ;;  %v5452_v0 = vld [vmem:[%s10404_s4 + $0x208] sm:$0xff] (!%p307_p3)  ;;  %v5454_v2 = vld [vmem:[%s10404_s4 + $0x218] sm:$0xff] (!%p307_p3)  ;;  %v7294_v3 = vmov (!%p307_p3), 0   ;;  %v5451_v6 = vld [vmem:[%s10404_s4 + $0x200] sm:$0xff] (!%p307_p3)  ;;  %v7295_v34 = vmov (!%p307_p3), 0.0  }
   0x9   : > { %s10425_s15 = smov (%p34_p4, %s10423_s15), 0  ;;  %310 = sbr.rel (%p307_p3) target bundleno = 953 (0x3b9), region = 52 }
   0xa   : > { %v5456_v1 = vld [vmem:[%s10404_s4 + $0x228] sm:$0xff] (!%p307_p3)  ;;  %7236 = vset.pattern.permute.xlu1 (!%p307_p3), %v7294_v3  ;;  %7235 = vset.pattern.permute.xlu0 (!%p307_p3), %v7294_v3  ;;  %s7395_s25 = scalar_lea.vmem (!%p307_p3), %s10401_s1, %s5448_s16  ;;  %v5458_v5 = vld [vmem:[%s10404_s4 + $0x238] sm:$0xff] (!%p307_p3)  ;;  %v5455_v7 = vld [vmem:[%s10404_s4 + $0x220] sm:$0xff] (!%p307_p3)  ;;  %p356_p5 = scmp.lt.s32.totalorder (!%p307_p3), %s7280_s10, 1  ;;  %vm776_vm0 = vcmask (!%p307_p3), 1046528   ;;  %vm1535_vm1 = vcmask (!%p307_p3), 1045504  }
   0xb   : > { %v6054_v4 = vpack.c.bf16 (!%p307_p3), %v5456_v1, %v5452_v0  ;;  %v408_v8 = vld [vmem:[%s7395_s25 + $0x10] sm:$0xff] (!%p307_p3)  ;;  %v406_v9 = vld [vmem:[%s7395_s25] sm:$0xff] (!%p307_p3)  ;;  %v6086_v10 = vpack.c.bf16 (!%p307_p3), %v5458_v5, %v5454_v2  ;;  %v6056_v11 = vpack.c.bf16 (!%p307_p3), %v5455_v7, %v5451_v6  ;;  %v409_v12 = vld [vmem:[%s7395_s25 + $0x18] sm:$0xff] (!%p307_p3)  ;;  %890 = vmatprep.mubr.f32.mxu0 (!%p307_p3), %v7295_v34  ;;  %1051 = vmatprep.mubr.f32.mxu1 (!%p307_p3), %v7295_v34  ;;  %vm2495_vm2 = vcmask (!%p307_p3), 1044480  }
   0xc   : > { %516 = vperm.xlu1 (!%p307_p3), %7236, %v408_v8   ;;  %506 = vperm.xlu0 (!%p307_p3), %7235, %v406_v9   ;;  %v407_v13 = vld [vmem:[%s7395_s25 + $0x8] sm:$0xff] (!%p307_p3)  ;;  %v410_v15 = vld [vmem:[%s7395_s25 + $0x20] sm:$0xff] (!%p307_p3)  ;;  %v5453_v16 = vld [vmem:[%s10404_s4 + $0x210] sm:$0xff] (!%p307_p3)  ;;  %vm2996_vm3 = vcmask (!%p307_p3), 1043456   ;;  %vm3956_vm4 = vcmask (!%p307_p3), 1042432   ;;  %vm4457_vm5 = vcmask (!%p307_p3), 1041408  }
   0xd   : > { %6055 = vmatprep.subr.bf16.mxu0 (!%p307_p3), %v6054_v4  ;;  %6087 = vmatprep.subr.bf16.mxu1 (!%p307_p3), %v6086_v10  ;;  %v411_v14 = vld [vmem:[%s7395_s25 + $0x28] sm:$0xff] (!%p307_p3)  ;;  %v5457_v17 = vld [vmem:[%s10404_s4 + $0x230] sm:$0xff] (!%p307_p3)  ;;  %v413_v19 = vld [vmem:[%s7395_s25 + $0x38] sm:$0xff] (!%p307_p3) }
   0xe   : > { %6057 = vmatpush1.bf16.msra.mxu0 (!%p307_p3), %v6056_v11  ;;  %v5460_v18 = vld [vmem:[%s10404_s4 + $0x248] sm:$0xff] (!%p307_p3)  ;;  %v412_v20 = vld [vmem:[%s7395_s25 + $0x30] sm:$0xff] (!%p307_p3)  ;;  %v6088_v21 = vpack.c.bf16 (!%p307_p3), %v5457_v17, %v5453_v16  ;;  %v5462_v23 = vld [vmem:[%s10404_s4 + $0x258] sm:$0xff] (!%p307_p3) }
   0xf   : > { %v5464_v22 = vld [vmem:[%s10404_s4 + $0x268] sm:$0xff] (!%p307_p3)  ;;  %v5466_v24 = vld [vmem:[%s10404_s4 + $0x278] sm:$0xff] (!%p307_p3)  ;;  %v5459_v27 = vld [vmem:[%s10404_s4 + $0x240] sm:$0xff] (!%p307_p3) }
  0x10   : > { %521 = vperm.xlu1 %7236, %v409_v12   ;;  %511 = vperm.xlu0 %7235, %v407_v13   ;;  %v6058_v25 = vpack.c.bf16 %v5464_v22, %v5460_v18  ;;  %v6090_v26 = vpack.c.bf16 %v5466_v24, %v5462_v23  ;;  %v5463_v28 = vld [vmem:[%s10404_s4 + $0x260] sm:$0xff]  ;;  %v5461_v29 = vld [vmem:[%s10404_s4 + $0x250] sm:$0xff]  ;;  %v5468_v32 = vld [vmem:[%s10404_s4 + $0x288] sm:$0xff]  ;;  %s10427_s10 = smov (!%p356_p5, %s7280_s10), 1 }
  0x11   : > { %6089 = vmatpush1.bf16.msra.mxu1 %v6088_v21  ;;  %v6060_v30 = vpack.c.bf16 %v5463_v28, %v5459_v27  ;;  %v5465_v31 = vld [vmem:[%s10404_s4 + $0x270] sm:$0xff]  ;;  %v5472_v33 = vld [vmem:[%s10404_s4 + $0x2a8] sm:$0xff]  ;;  %v5470_v37 = vld [vmem:[%s10404_s4 + $0x298] sm:$0xff]  ;;  %s7190_s19 = smul.u32 424, %s10427_s10 }
  0x12   : > { %6059 = vmatprep.subr.bf16.mxu0 %v6058_v25  ;;  %6091 = vmatprep.subr.bf16.mxu1 %v6090_v26  ;;  %v6092_v35 = vpack.c.bf16 %v5465_v31, %v5461_v29  ;;  %v6062_v36 = vpack.c.bf16 %v5472_v33, %v5468_v32  ;;  %v5474_v38 = vld [vmem:[%s10404_s4 + $0x2b8] sm:$0xff]  ;;  %v5467_v39 = vld [vmem:[%s10404_s4 + $0x280] sm:$0xff]  ;;  %v415_v40 = vld [vmem:[%s7395_s25 + $0x48] sm:$0xff]  ;;  %s7192_s21 = smul.u32 48, %s10427_s10 }
  0x13   : > { %v414_v41 = vld [vmem:[%s7395_s25 + $0x40] sm:$0xff]  ;;  %6061 = vmatpush1.bf16.msra.mxu0 %v6060_v30  ;;  %v6094_v42 = vpack.c.bf16 %v5474_v38, %v5470_v37  ;;  %v5469_v44 = vld [vmem:[%s10404_s4 + $0x290] sm:$0xff]  ;;  %v5476_v47 = vld [vmem:[%s10404_s4 + $0x2c8] sm:$0xff]  ;;  %s360_s27 = scalar_lea.vmem %s10400_s0, %s7190_s19 }
  0x14   : > { %531 = vperm.xlu1 %7236, %v411_v14   ;;  %526 = vperm.xlu0 %7235, %v410_v15   ;;  %v5471_v43 = vld [vmem:[%s10404_s4 + $0x2a0] sm:$0xff]  ;;  %v5473_v45 = vld [vmem:[%s10404_s4 + $0x2b0] sm:$0xff]  ;;  %v5480_v48 = vld [vmem:[%s10404_s4 + $0x2e8] sm:$0xff]  ;;  %s7627_s28 = scalar_lea.vmem %s360_s27, %s5448_s16  ;;  %s5443_s27 = sshll.u32 %s7276_s30, 4 }
  0x15   : > { %v6064_v46 = vpack.c.bf16 %v5471_v43, %v5467_v39  ;;  %v5478_v49 = vld [vmem:[%s10404_s4 + $0x2d8] sm:$0xff]  ;;  %6093 = vmatpush1.bf16.msra.mxu1 %v6092_v35  ;;  %6063 = vmatprep.subr.bf16.mxu0 %v6062_v36  ;;  %v6096_v50 = vpack.c.bf16 %v5473_v45, %v5469_v44  ;;  %v6066_v51 = vpack.c.bf16 %v5480_v48, %v5476_v47  ;;  %v5475_v53 = vld [vmem:[%s10404_s4 + $0x2c0] sm:$0xff]  ;;  %v5477_v56 = vld [vmem:[%s10404_s4 + $0x2d0] sm:$0xff]  ;;  %p364_p6 = scmp.lt.s32.totalorder %s5443_s27, 47 }
  0x16   : > { %v5482_v52 = vld [vmem:[%s10404_s4 + $0x2f8] sm:$0xff]  ;;  %v5479_v54 = vld [vmem:[%s10404_s4 + $0x2e0] sm:$0xff]  ;;  %6095 = vmatprep.subr.bf16.mxu1 %v6094_v42  ;;  %v5481_v57 = vld [vmem:[%s10404_s4 + $0x2f0] sm:$0xff] }
  0x17   : > { %v6098_v55 = vpack.c.bf16 %v5482_v52, %v5478_v49  ;;  %v5484_v58 = vld [vmem:[%s10404_s4 + $0x308] sm:$0xff]  ;;  %6065 = vmatpush1.bf16.msra.mxu0 %v6064_v46  ;;  %v6068_v59 = vpack.c.bf16 %v5479_v54, %v5475_v53  ;;  %v5486_v61 = vld [vmem:[%s10404_s4 + $0x318] sm:$0xff]  ;;  %v5483_v63 = vld [vmem:[%s10404_s4 + $0x300] sm:$0xff]  ;;  %v6100_v3 = vpack.c.bf16 %v5481_v57, %v5477_v56  ;;  %s10429_s27 = smov (!%p364_p6, %s5443_s27), 47 }
  0x18   : > { %541 = vperm.xlu1 %7236, %v413_v19   ;;  %536 = vperm.xlu0 %7235, %v412_v20   ;;  %v5488_v60 = vld [vmem:[%s10404_s4 + $0x328] sm:$0xff]  ;;  %v5490_v62 = vld [vmem:[%s10404_s4 + $0x338] sm:$0xff]  ;;  %v5487_v0 = vld [vmem:[%s10404_s4 + $0x320] sm:$0xff]  ;;  %s5444_s29 = sshll.u32 %s10429_s27, 2 }
  0x19   : > { %v417_v1 = vld [vmem:[%s7395_s25 + $0x58] sm:$0xff]  ;;  %v416_v2 = vld [vmem:[%s7395_s25 + $0x50] sm:$0xff]  ;;  %6097 = vmatpush1.bf16.msra.mxu1 %v6096_v50  ;;  %6067 = vmatprep.subr.bf16.mxu0 %v6066_v51  ;;  %v6070_v4 = vpack.c.bf16 %v5488_v60, %v5484_v58  ;;  %v6102_v6 = vpack.c.bf16 %v5490_v62, %v5486_v61  ;;  %v5492_v8 = vld [vmem:[%s10404_s4 + $0x348] sm:$0xff]  ;;  %v6072_v10 = vpack.c.bf16 %v5487_v0, %v5483_v63 }
  0x1a   : > { %v5485_v5 = vld [vmem:[%s10404_s4 + $0x310] sm:$0xff]  ;;  %6099 = vmatprep.subr.bf16.mxu1 %v6098_v55  ;;  %v5496_v9 = vld [vmem:[%s10404_s4 + $0x368] sm:$0xff]  ;;  %v5494_v11 = vld [vmem:[%s10404_s4 + $0x358] sm:$0xff] }
  0x1b   : > { %v5489_v7 = vld [vmem:[%s10404_s4 + $0x330] sm:$0xff]  ;;  %6069 = vmatpush1.bf16.msra.mxu0 %v6068_v59  ;;  %v5498_v12 = vld [vmem:[%s10404_s4 + $0x378] sm:$0xff]  ;;  %v5491_v13 = vld [vmem:[%s10404_s4 + $0x340] sm:$0xff]  ;;  %v6074_v18 = vpack.c.bf16 %v5496_v9, %v5492_v8 }
  0x1c   : > { %551 = vperm.xlu1 %7236, %v415_v40   ;;  %546 = vperm.xlu0 %7235, %v414_v41   ;;  %v5495_v14 = vld [vmem:[%s10404_s4 + $0x360] sm:$0xff]  ;;  %v419_v15 = vld [vmem:[%s7395_s25 + $0x68] sm:$0xff]  ;;  %v6104_v17 = vpack.c.bf16 %v5489_v7, %v5485_v5  ;;  %v5493_v19 = vld [vmem:[%s10404_s4 + $0x350] sm:$0xff]  ;;  %v6106_v20 = vpack.c.bf16 %v5498_v12, %v5494_v11 }
  0x1d   : > { %v418_v16 = vld [vmem:[%s7395_s25 + $0x60] sm:$0xff]  ;;  %6101 = vmatpush1.bf16.msra.mxu1 %v6100_v3  ;;  %6071 = vmatprep.subr.bf16.mxu0 %v6070_v4  ;;  %v5497_v21 = vld [vmem:[%s10404_s4 + $0x370] sm:$0xff]  ;;  %v5500_v22 = vld [vmem:[%s10404_s4 + $0x388] sm:$0xff]  ;;  %v6076_v24 = vpack.c.bf16 %v5495_v14, %v5491_v13 }
  0x1e   : > { %6103 = vmatprep.subr.bf16.mxu1 %v6102_v6  ;;  %v5504_v23 = vld [vmem:[%s10404_s4 + $0x3a8] sm:$0xff]  ;;  %v5502_v25 = vld [vmem:[%s10404_s4 + $0x398] sm:$0xff]  ;;  %v5499_v27 = vld [vmem:[%s10404_s4 + $0x380] sm:$0xff]  ;;  %v6108_v31 = vpack.c.bf16 %v5497_v21, %v5493_v19 }
  0x1f   : > { %6073 = vmatpush1.bf16.msra.mxu0 %v6072_v10  ;;  %v5506_v26 = vld [vmem:[%s10404_s4 + $0x3b8] sm:$0xff]  ;;  %v5503_v28 = vld [vmem:[%s10404_s4 + $0x3a0] sm:$0xff]  ;;  %v420_v30 = vld [vmem:[%s7395_s25 + $0x70] sm:$0xff]  ;;  %v6078_v32 = vpack.c.bf16 %v5504_v23, %v5500_v22 }
  0x20   : > { %561 = vperm.xlu1 %7236, %v417_v1   ;;  %556 = vperm.xlu0 %7235, %v416_v2   ;;  %v421_v29 = vld [vmem:[%s7395_s25 + $0x78] sm:$0xff]  ;;  %v5501_v33 = vld [vmem:[%s10404_s4 + $0x390] sm:$0xff]  ;;  %v6110_v35 = vpack.c.bf16 %v5506_v26, %v5502_v25  ;;  %v5508_v37 = vld [vmem:[%s10404_s4 + $0x3c8] sm:$0xff]  ;;  %v6080_v39 = vpack.c.bf16 %v5503_v28, %v5499_v27 }
  0x21   : > { %6105 = vmatpush1.bf16.msra.mxu1 %v6104_v17  ;;  %6075 = vmatprep.subr.bf16.mxu0 %v6074_v18  ;;  %v5505_v36 = vld [vmem:[%s10404_s4 + $0x3b0] sm:$0xff]  ;;  %v5512_v38 = vld [vmem:[%s10404_s4 + $0x3e8] sm:$0xff]  ;;  %v5510_v40 = vld [vmem:[%s10404_s4 + $0x3d8] sm:$0xff] }
  0x22   : > { %6107 = vmatprep.subr.bf16.mxu1 %v6106_v20  ;;  %v5514_v41 = vld [vmem:[%s10404_s4 + $0x3f8] sm:$0xff]  ;;  %v5507_v42 = vld [vmem:[%s10404_s4 + $0x3c0] sm:$0xff]  ;;  %v423_v44 = vld [vmem:[%s7395_s25 + $0x88] sm:$0xff]  ;;  %v6112_v46 = vpack.c.bf16 %v5505_v36, %v5501_v33  ;;  %v6082_v47 = vpack.c.bf16 %v5512_v38, %v5508_v37 }
  0x23   : > { %6077 = vmatpush1.bf16.msra.mxu0 %v6076_v24  ;;  %v5511_v43 = vld [vmem:[%s10404_s4 + $0x3e0] sm:$0xff]  ;;  %v5509_v48 = vld [vmem:[%s10404_s4 + $0x3d0] sm:$0xff]  ;;  %v6114_v49 = vpack.c.bf16 %v5514_v41, %v5510_v40  ;;  %v631_v51 = vld [vmem:[%s10404_s4 + $0x8] sm:$0xff] }
  0x24   : > { %571 = vperm.xlu1 %7236, %v419_v15   ;;  %566 = vperm.xlu0 %7235, %v418_v16   ;;  %v422_v45 = vld [vmem:[%s7395_s25 + $0x80] sm:$0xff]  ;;  %v5513_v50 = vld [vmem:[%s10404_s4 + $0x3f0] sm:$0xff]  ;;  %v635_v52 = vld [vmem:[%s10404_s4 + $0x28] sm:$0xff]  ;;  %v6084_v53 = vpack.c.bf16 %v5511_v43, %v5507_v42 }
  0x25   : > { %6109 = vmatpush1.bf16.msra.mxu1 %v6108_v31  ;;  %6079 = vmatprep.subr.bf16.mxu0 %v6078_v32  ;;  %v633_v54 = vld [vmem:[%s10404_s4 + $0x18] sm:$0xff]  ;;  %v424_v57 = vld [vmem:[%s7395_s25 + $0x90] sm:$0xff]  ;;  %v6116_v58 = vpack.c.bf16 %v5513_v50, %v5509_v48  ;;  %v6118_v59 = vpack.c.bf16 %v635_v52, %v631_v51  ;;  %v426_v61 = vld [vmem:[%s7395_s25 + $0xa0] sm:$0x3f] }
  0x26   : > { %6111 = vmatprep.subr.bf16.mxu1 %v6110_v35  ;;  %v637_v55 = vld [vmem:[%s10404_s4 + $0x38] sm:$0xff]  ;;  %v401_v62 = vld [vmem:[%s7627_s28 + $0x88] sm:$0xff]  ;;  %v7633_v63 = vld [vmem:[%s10402_s2] ss:$0 sm:$0xff] }
  0x27   : > { %6081 = vmatpush1.bf16.msra.mxu0 %v6080_v39  ;;  %v425_v56 = vld [vmem:[%s7395_s25 + $0x98] sm:$0xff]  ;;  %v6150_v60 = vpack.c.bf16 %v637_v55, %v633_v54  ;;  %v451_v0 = vmul.f32 %v7633_v63, %v401_v62  ;;  %v7639_v1 = vld [vmem:[%s10403_s3] ss:$0 sm:$0xff]  ;;  %v402_v5 = vld [vmem:[%s7627_s28 + $0x90] sm:$0xff] }
  0x28   : > { %581 = vperm.xlu1 %7236, %v421_v29   ;;  %576 = vperm.xlu0 %7235, %v420_v30   ;;  %v403_v2 = vld [vmem:[%s7627_s28 + $0x98] sm:$0xff]  ;;  %v404_v6 = vld [vmem:[%s7627_s28 + $0xa0] sm:$0x3f]  ;;  %v452_v7 = vmul.f32 %v7633_v63, %v402_v5  ;;  %v386_v13 = vld [vmem:[%s7627_s28 + $0x10] sm:$0xff] }
  0x29   : > { %6113 = vmatpush1.bf16.msra.mxu1 %v6112_v46  ;;  %6083 = vmatprep.subr.bf16.mxu0 %v6082_v47  ;;  %v7643_v3 = vadd.f32 %v7639_v1, %v451_v0  ;;  %v453_v4 = vmul.f32 %v7633_v63, %v403_v2  ;;  %v454_v8 = vmul.f32 %v7633_v63, %v404_v6  ;;  %v384_v12 = vld [vmem:[%s7627_s28] sm:$0xff]  ;;  %v385_v14 = vld [vmem:[%s7627_s28 + $0x8] sm:$0xff]  ;;  %v387_v18 = vld [vmem:[%s7627_s28 + $0x18] sm:$0xff] }
  0x2a   : > { %6115 = vmatprep.subr.bf16.mxu1 %v6114_v49  ;;  %v7654_v10 = vadd.f32 %v7639_v1, %v452_v7  ;;  %v434_v15 = vmul.f32 %v7633_v63, %v384_v12  ;;  %v436_v16 = vmul.f32 %v7633_v63, %v386_v13  ;;  %v435_v17 = vmul.f32 %v7633_v63, %v385_v14  ;;  %v388_v23 = vld [vmem:[%s7627_s28 + $0x20] sm:$0xff]  ;;  %v389_v31 = vld [vmem:[%s7627_s28 + $0x28] sm:$0xff]  ;;  %v632_v40 = vld [vmem:[%s10404_s4 + $0x10] sm:$0xff] }
  0x2b   : > { %6085 = vmatpush1.bf16.msra.mxu0 %v6084_v53  ;;  %v7651_v9 = vadd.f32 %v7639_v1, %v453_v4  ;;  %v7657_v11 = vadd.f32 %v7639_v1, %v454_v8  ;;  %v437_v21 = vmul.f32 %v7633_v63, %v387_v18  ;;  %v438_v27 = vmul.f32 %v7633_v63, %v388_v23  ;;  %v630_v33 = vld [vmem:[%s10404_s4] sm:$0xff]  ;;  %v636_v41 = vld [vmem:[%s10404_s4 + $0x30] sm:$0xff]  ;;  %v639_v46 = vld [vmem:[%s10404_s4 + $0x48] sm:$0xff] }
  0x2c   : > { %591 = vperm.xlu1 %7236, %v423_v44   ;;  %586 = vperm.xlu0 %7235, %v422_v45   ;;  %v462_v19 = vadd.f32 %v7639_v1, %v434_v15  ;;  %v464_v20 = vadd.f32 %v7639_v1, %v436_v16  ;;  %v463_v22 = vadd.f32 %v7639_v1, %v435_v17  ;;  %v634_v35 = vld [vmem:[%s10404_s4 + $0x20] sm:$0xff]  ;;  %v390_v42 = vld [vmem:[%s7627_s28 + $0x30] sm:$0xff]  ;;  %v643_v47 = vld [vmem:[%s10404_s4 + $0x68] sm:$0xff] }
  0x2d   : > { %6117 = vmatpush1.bf16.msra.mxu1 %v6116_v58  ;;  %6119 = vmatprep.subr.bf16.mxu0 %v6118_v59  ;;  %v465_v29 = vadd.f32 %v7639_v1, %v437_v21  ;;  %v439_v38 = vmul.f32 %v7633_v63, %v389_v31  ;;  %v466_v39 = vadd.f32 %v7639_v1, %v438_v27  ;;  %v641_v49 = vld [vmem:[%s10404_s4 + $0x58] sm:$0xff]  ;;  %v642_v62 = vld [vmem:[%s10404_s4 + $0x60] sm:$0xff]  ;;  %v640_v0 = vld [vmem:[%s10404_s4 + $0x50] sm:$0xff] }
  0x2e   : > { %6151 = vmatprep.subr.bf16.mxu1 %v6150_v60  ;;  %v483_v24 = vmax.f32 %v462_v19, 0.0  ;;  %v485_v28 = vmax.f32 %v464_v20, 0.0  ;;  %v484_v30 = vmax.f32 %v463_v22, 0.0  ;;  %v6120_v48 = vpack.c.bf16 %v634_v35, %v630_v33  ;;  %v645_v50 = vld [vmem:[%s10404_s4 + $0x78] sm:$0xff]  ;;  %v644_v7 = vld [vmem:[%s10404_s4 + $0x70] sm:$0xff]  ;;  %v647_v8 = vld [vmem:[%s10404_s4 + $0x88] sm:$0xff] }
  0x2f   : > { %v486_v44 = vmax.f32 %v465_v29, 0.0  ;;  %v6152_v53 = vpack.c.bf16 %v636_v41, %v632_v40  ;;  %v391_v54 = vld [vmem:[%s7627_s28 + $0x38] sm:$0xff]  ;;  %v440_v55 = vmul.f32 %v7633_v63, %v390_v42  ;;  %v487_v59 = vmax.f32 %v466_v39, 0.0  ;;  %v651_v12 = vld [vmem:[%s10404_s4 + $0xa8] sm:$0xff]  ;;  %v392_v17 = vld [vmem:[%s7627_s28 + $0x40] sm:$0xff] }
  0x30   : > { %601 = vperm.xlu1 %7236, %v425_v56   ;;  %596 = vperm.xlu0 %7235, %v424_v57   ;;  %v7714_v57 = vadd.f32 %v7639_v1, %v439_v38  ;;  %v6122_v60 = vpack.c.bf16 %v643_v47, %v639_v46  ;;  %v6154_v6 = vpack.c.bf16 %v645_v50, %v641_v49  ;;  %v649_v13 = vld [vmem:[%s10404_s4 + $0x98] sm:$0xff]  ;;  %v652_v31 = vld [vmem:[%s10404_s4 + $0xb0] sm:$0xff]  ;;  %v655_v33 = vld [vmem:[%s10404_s4 + $0xc8] sm:$0xff] }
  0x31   : > { %v653_v14 = vld [vmem:[%s10404_s4 + $0xb8] sm:$0xff]  ;;  %v441_v15 = vmul.f32 %v7633_v63, %v391_v54  ;;  %v7746_v16 = vadd.f32 %v7639_v1, %v440_v55  ;;  %v6156_v22 = vpack.c.bf16 %v644_v7, %v640_v0  ;;  %v6126_v23 = vpack.c.bf16 %v651_v12, %v647_v8  ;;  %v659_v35 = vld [vmem:[%s10404_s4 + $0xe8] sm:$0xff]  ;;  %v400_v41 = vld [vmem:[%s7627_s28 + $0x80] sm:$0xff] }
  0x32   : > { %v488_v18 = vmax.f32 %v7714_v57, 0.0  ;;  %v393_v39 = vld [vmem:[%s7627_s28 + $0x48] sm:$0xff]  ;;  %v442_v40 = vmul.f32 %v7633_v63, %v392_v17  ;;  %v6130_v49 = vpack.c.bf16 %v659_v35, %v655_v33  ;;  %v654_v50 = vld [vmem:[%s10404_s4 + $0xc0] sm:$0xff]  ;;  %v664_v17 = vld [vmem:[%s10404_s4 + $0x110] sm:$0xff] }
  0x33   : > { %v7785_v38 = vadd.f32 %v7639_v1, %v441_v15  ;;  %v489_v42 = vmax.f32 %v7746_v16, 0.0  ;;  %v662_v15 = vld [vmem:[%s10404_s4 + $0x100] sm:$0xff] }
  0x34   : > { %606 = vperm.xlu0 %7235, %v426_v61   ;;  %v638_v61 = vld [vmem:[%s10404_s4 + $0x40] sm:$0xff]  ;;  %v7828_v0 = vadd.f32 %v7639_v1, %v442_v40 }
  0x35   : > { %v6124_v21 = vpack.c.bf16 %v642_v62, %v638_v61  ;;  %v669_v61 = vld [vmem:[%s10404_s4 + $0x138] sm:$0xff]  ;;  %v443_v62 = vmul.f32 %v7633_v63, %v393_v39  ;;  %v666_v16 = vld [vmem:[%s10404_s4 + $0x120] sm:$0xff] }
  0x36   : > { %v491_v35 = vmax.f32 %v7828_v0, 0.0  ;;  %v7931_v0 = vld [vmem:[%s10404_s4 + $0x1a0] sm:$0xff] }
  0x8b   : > { %v517_v25 = vpop.permute.xlu1 %516  ;;  %v507_v26 = vpop.permute.xlu0 %506 }
  0x8c   : > { %v7674_v32 = vmul.f32 %v507_v26, %v483_v24  ;;  %v7691_v43 = vmul.f32 %v517_v25, %v485_v28  ;;  %v646_v24 = vld [vmem:[%s10404_s4 + $0x80] sm:$0xff]  ;;  %v648_v26 = vld [vmem:[%s10404_s4 + $0x90] sm:$0xff] }
  0x8d   : > { %v650_v25 = vld [vmem:[%s10404_s4 + $0xa0] sm:$0xff] }
  0x8e   : > { %v777_v51 = vrot.slane %v7674_v32, 1  ;;  %v780_v5 = vrot.slane %v7691_v43, 1  ;;  %v6128_v47 = vpack.c.bf16 %v650_v25, %v646_v24  ;;  %v668_v24 = vld [vmem:[%s10404_s4 + $0x130] sm:$0xff]  ;;  %v671_v25 = vld [vmem:[%s10404_s4 + $0x148] sm:$0xff] }
  0x8f   : > { %v522_v36 = vpop.permute.xlu1 %521  ;;  %v512_v37 = vpop.permute.xlu0 %511  ;;  %v6168_v39 = vpack.c.bf16 %v668_v24, %v664_v17 }
  0x90   : > { %v7693_v45 = vmul.f32 %v512_v37, %v484_v30  ;;  %v7725_v2 = vmul.f32 %v522_v36, %v486_v44  ;;  %v6158_v30 = vpack.c.bf16 %v653_v14, %v649_v13  ;;  %v657_v36 = vld [vmem:[%s10404_s4 + $0xd8] sm:$0xff] }
  0x91   : > { %v661_v37 = vld [vmem:[%s10404_s4 + $0xf8] sm:$0xff] }
  0x92   : > { %v778_v52 = vrot.slane %v7693_v45, 1  ;;  %v782_v29 = vrot.slane %v7725_v2, 1  ;;  %v6162_v57 = vpack.c.bf16 %v661_v37, %v657_v36 }
  0x93   : > { %v7711_v56 = vpop.permute.xlu1 %531  ;;  %v527_v58 = vpop.permute.xlu0 %526 }
  0x94   : > { %v779_v4 = vsel %vm776_vm0, %v777_v51, %v778_v52  ;;  %v7765_v27 = vmul.f32 %v527_v58, %v487_v59  ;;  %v781_v28 = vsel %vm776_vm0, %v778_v52, %v780_v5  ;;  %v658_v51 = vld [vmem:[%s10404_s4 + $0xe0] sm:$0xff]  ;;  %v656_v52 = vld [vmem:[%s10404_s4 + $0xd0] sm:$0xff]  ;;  %v783_v54 = vsel %vm776_vm0, %v780_v5, %v782_v29  ;;  %v663_v59 = vld [vmem:[%s10404_s4 + $0x108] sm:$0xff] }
  0x95   : > { %891 = vmatmul.mubr.f32.vlgmr.msra.gmra.mrb[0].mxu0 %v779_v4  ;;  %1052 = vmatmul.mubr.f32.vlgmr.msra.gmra.mrb[0].mxu1 %v779_v4  ;;  %v660_v58 = vld [vmem:[%s10404_s4 + $0xf0] sm:$0xff]  ;;  %v450_v5 = vmul.f32 %v7633_v63, %v400_v41  ;;  %v6132_v12 = vpack.c.bf16 %v658_v51, %v654_v50  ;;  %v670_v41 = vld [vmem:[%s10404_s4 + $0x140] sm:$0xff] }
  0x96   : > { %6121 = vmatpush1.bf16.msra.mxu0 %v6120_v48  ;;  %6153 = vmatpush1.bf16.msra.mxu1 %v6152_v53  ;;  %v6160_v48 = vpack.c.bf16 %v652_v31, %v648_v26  ;;  %v7807_v53 = vmul.f32 %v7711_v56, %v488_v18  ;;  %v784_v55 = vrot.slane %v7765_v27, 1  ;;  %v667_v56 = vld [vmem:[%s10404_s4 + $0x128] sm:$0xff]  ;;  %v394_v4 = vld [vmem:[%s7627_s28 + $0x50] sm:$0xff]  ;;  %v6164_v13 = vpack.c.bf16 %v660_v58, %v656_v52  ;;  %v673_v26 = vld [vmem:[%s10404_s4 + $0x158] sm:$0xff] }
  0x97   : > { %v7750_v19 = vpop.permute.xlu1 %541  ;;  %v7752_v20 = vpop.permute.xlu0 %536  ;;  %896 = vmatprep.mubr.f32.mxu0 %v7295_v34  ;;  %1057 = vmatprep.mubr.f32.mxu1 %v7295_v34  ;;  %v6134_v14 = vpack.c.bf16 %v667_v56, %v663_v59  ;;  %v444_v31 = vmul.f32 %v7633_v63, %v394_v4  ;;  %v7876_v33 = vadd.f32 %v7639_v1, %v450_v5  ;;  %v676_v52 = vld [vmem:[%s10404_s4 + $0x170] sm:$0xff]  ;;  %v685_v58 = vld [vmem:[%s10404_s4 + $0x1b8] sm:$0xff] }
  0x98   : > { %6123 = vmatprep.subr.bf16.mxu0 %v6122_v60  ;;  %6155 = vmatprep.subr.bf16.mxu1 %v6154_v6  ;;  %v665_v60 = vld [vmem:[%s10404_s4 + $0x118] sm:$0xff]  ;;  %v490_v6 = vmax.f32 %v7785_v38, 0.0  ;;  %v7849_v18 = vmul.f32 %v7752_v20, %v489_v42  ;;  %v675_v20 = vld [vmem:[%s10404_s4 + $0x168] sm:$0xff]  ;;  %v6136_v38 = vpack.c.bf16 %v666_v16, %v662_v15  ;;  %v674_v42 = vld [vmem:[%s10404_s4 + $0x160] sm:$0xff] }
  0x99   : > { %897 = vmatmul.mubr.f32.gmra.mrb[2].mxu0 %v781_v28  ;;  %1058 = vmatmul.mubr.f32.gmra.mrb[2].mxu1 %v781_v28  ;;  %v677_v28 = vld [vmem:[%s10404_s4 + $0x178] sm:$0xff]  ;;  %v6138_v40 = vpack.c.bf16 %v675_v20, %v671_v25  ;;  %v7917_v56 = vadd.f32 %v7639_v1, %v444_v31  ;;  %v684_v15 = vld [vmem:[%s10404_s4 + $0x1b0] sm:$0xff]  ;;  %v7947_v16 = vld [vmem:[%s10404_s4 + $0x1c8] sm:$0xff] }
  0x9a   : > { %902 = vmatprep.mubr.f32.mxu0 %v7295_v34  ;;  %1063 = vmatprep.mubr.f32.mxu1 %v7295_v34  ;;  %v788_v50 = vrot.slane %v7849_v18, 1  ;;  %v6170_v51 = vpack.c.bf16 %v677_v28, %v673_v26  ;;  %v691_v25 = vld [vmem:[%s10404_s4 + $0x1e8] sm:$0xff]  ;;  %v693_v20 = vld [vmem:[%s10404_s4 + $0x1f8] sm:$0xff] }
  0x9b   : > { %v7793_v44 = vpop.permute.xlu1 %551  ;;  %v7795_v46 = vpop.permute.xlu0 %546  ;;  %6125 = vmatpush1.bf16.msra.mxu0 %v6124_v21  ;;  %6157 = vmatpush1.bf16.msra.mxu1 %v6156_v22  ;;  %v785_v21 = vsel %vm776_vm0, %v782_v29, %v784_v55  ;;  %v786_v22 = vrot.slane %v7807_v53, 1  ;;  %v7869_v29 = vadd.f32 %v7639_v1, %v443_v62  ;;  %v7926_v62 = vld [vmem:[%s10404_s4 + $0x180] sm:$0xff]  ;;  %v397_v28 = vld [vmem:[%s7627_s28 + $0x68] sm:$0xff] }
  0x9c   : > { %6127 = vmatprep.subr.bf16.mxu0 %v6126_v23  ;;  %6159 = vmatprep.subr.bf16.mxu1 %v6158_v30  ;;  %v6166_v23 = vpack.c.bf16 %v669_v61, %v665_v60  ;;  %v395_v30 = vld [vmem:[%s7627_s28 + $0x58] sm:$0xff]  ;;  %v396_v60 = vld [vmem:[%s7627_s28 + $0x60] sm:$0xff]  ;;  %v500_v61 = vmax.f32 %v7643_v3, 0.0  ;;  %v7950_v17 = vmul.f32 %v7795_v46, %v491_v35 }
  0x9d   : > { %903 = vmatmul.mubr.f32.gmra.mrb[4].mxu0 %v783_v54  ;;  %1064 = vmatmul.mubr.f32.gmra.mrb[4].mxu1 %v783_v54  ;;  %v679_v54 = vld [vmem:[%s10404_s4 + $0x188] sm:$0xff]  ;;  %v492_v59 = vmax.f32 %v7869_v29, 0.0  ;;  %v689_v46 = vld [vmem:[%s10404_s4 + $0x1d8] sm:$0xff]  ;;  %v446_v29 = vmul.f32 %v7633_v63, %v396_v60  ;;  %v690_v35 = vld [vmem:[%s10404_s4 + $0x1e0] sm:$0xff] }
  0x9e   : > { %908 = vmatprep.mubr.f32.mxu0 %v7295_v34  ;;  %1069 = vmatprep.mubr.f32.mxu1 %v7295_v34 }
  0x9f   : > { %v7835_v7 = vpop.permute.xlu1 %561  ;;  %v7837_v8 = vpop.permute.xlu0 %556  ;;  %6129 = vmatpush1.bf16.msra.mxu0 %v6128_v47  ;;  %6161 = vmatpush1.bf16.msra.mxu1 %v6160_v48  ;;  %v672_v47 = vld [vmem:[%s10404_s4 + $0x150] sm:$0xff]  ;;  %v7893_v48 = vmul.f32 %v7750_v19, %v490_v6  ;;  %v683_v19 = vld [vmem:[%s10404_s4 + $0x1a8] sm:$0xff]  ;;  %v499_v6 = vmax.f32 %v7876_v33, 0.0  ;;  %v686_v33 = vld [vmem:[%s10404_s4 + $0x1c0] sm:$0xff] }
  0xa0   : > { %6131 = vmatprep.subr.bf16.mxu0 %v6130_v49  ;;  %6163 = vmatprep.subr.bf16.mxu1 %v6162_v57  ;;  %v787_v49 = vsel %vm776_vm0, %v784_v55, %v786_v22  ;;  %v445_v57 = vmul.f32 %v7633_v63, %v395_v30  ;;  %v681_v55 = vld [vmem:[%s10404_s4 + $0x198] sm:$0xff]  ;;  %v6172_v3 = vpack.c.bf16 %v676_v52, %v672_v47 }
  0xa1   : > { %909 = vmatmul.mubr.f32.gmra.mrb[6].mxu0 %v785_v21  ;;  %1070 = vmatmul.mubr.f32.gmra.mrb[6].mxu1 %v785_v21  ;;  %v789_v21 = vsel %vm776_vm0, %v786_v22, %v788_v50  ;;  %v6174_v24 = vpack.c.bf16 %v685_v58, %v681_v55  ;;  %v493_v22 = vmax.f32 %v7917_v56, 0.0  ;;  %v6144_v30 = vpack.c.bf16 %v7931_v0, %v7926_v62  ;;  %v5518_v55 = vld [vmem:[%s10404_s4 + $0x418] sm:$0xff]  ;;  %v398_v0 = vld [vmem:[%s7627_s28 + $0x70] sm:$0xff] }
  0xa2   : > { %914 = vmatprep.mubr.f32.mxu0 %v7295_v34  ;;  %1075 = vmatprep.mubr.f32.mxu1 %v7295_v34  ;;  %v7968_v26 = vadd.f32 %v7639_v1, %v445_v57  ;;  %v6178_v47 = vpack.c.bf16 %v693_v20, %v689_v46  ;;  %v5520_v57 = vld [vmem:[%s10404_s4 + $0x428] sm:$0xff]  ;;  %v5522_v58 = vld [vmem:[%s10404_s4 + $0x438] sm:$0xff]  ;;  %v474_v56 = vadd.f32 %v7639_v1, %v446_v29 }
  0xa3   : > { %v7879_v36 = vpop.permute.xlu1 %571  ;;  %v7881_v37 = vpop.permute.xlu0 %566  ;;  %6133 = vmatpush1.bf16.msra.mxu0 %v6132_v12  ;;  %6165 = vmatpush1.bf16.msra.mxu1 %v6164_v13  ;;  %v6140_v12 = vpack.c.bf16 %v674_v42, %v670_v41  ;;  %v6142_v13 = vpack.c.bf16 %v683_v19, %v679_v54  ;;  %v501_v41 = vmax.f32 %v7654_v10, 0.0  ;;  %v6146_v42 = vpack.c.bf16 %v691_v25, %v7947_v16 }
  0xa4   : > { %6135 = vmatprep.subr.bf16.mxu0 %v6134_v14  ;;  %6167 = vmatprep.subr.bf16.mxu1 %v6166_v23  ;;  %v680_v14 = vld [vmem:[%s10404_s4 + $0x190] sm:$0xff]  ;;  %v790_v23 = vrot.slane %v7893_v48, 1  ;;  %v792_v19 = vrot.slane %v7950_v17, 1  ;;  %v6148_v60 = vpack.c.bf16 %v690_v35, %v686_v33  ;;  %v503_v25 = vmax.f32 %v7657_v11, 0.0  ;;  %v399_v33 = vld [vmem:[%s7627_s28 + $0x78] sm:$0xff] }
  0xa5   : > { %915 = vmatmul.mubr.f32.gmra.mrb[8].mxu0 %v787_v49  ;;  %1076 = vmatmul.mubr.f32.gmra.mrb[8].mxu1 %v787_v49  ;;  %v6176_v31 = vpack.c.bf16 %v684_v15, %v680_v14  ;;  %v688_v49 = vld [vmem:[%s10404_s4 + $0x1d0] sm:$0xff]  ;;  %v8024_v15 = vmul.f32 %v7837_v8, %v493_v22 }
  0xa6   : > { %920 = vmatprep.mubr.f32.mxu0 %v7295_v34  ;;  %1081 = vmatprep.mubr.f32.mxu1 %v7295_v34  ;;  %v791_v54 = vsel %vm776_vm0, %v788_v50, %v790_v23  ;;  %v447_v50 = vmul.f32 %v7633_v63, %v397_v28 }
  0xa7   : > { %v7933_v4 = vpop.permute.xlu1 %581  ;;  %v7935_v5 = vpop.permute.xlu0 %576  ;;  %6137 = vmatpush1.bf16.msra.mxu0 %v6136_v38  ;;  %6169 = vmatpush1.bf16.msra.mxu1 %v6168_v39  ;;  %v7984_v38 = vmul.f32 %v7793_v44, %v492_v59  ;;  %v5516_v44 = vld [vmem:[%s10404_s4 + $0x408] sm:$0xff]  ;;  %v494_v59 = vmax.f32 %v7968_v26, 0.0  ;;  %v502_v26 = vmax.f32 %v7651_v9, 0.0 }
  0xa8   : > { %6139 = vmatprep.subr.bf16.mxu0 %v6138_v40  ;;  %6171 = vmatprep.subr.bf16.mxu1 %v6170_v51  ;;  %v692_v51 = vld [vmem:[%s10404_s4 + $0x1f0] sm:$0xff]  ;;  %v475_v20 = vadd.f32 %v7639_v1, %v447_v50 }
  0xa9   : > { %921 = vmatmul.mubr.f32.gmra.mrb[10].mxu0 %v789_v21  ;;  %1082 = vmatmul.mubr.f32.gmra.mrb[10].mxu1 %v789_v21  ;;  %v793_v21 = vsel %vm776_vm0, %v790_v23, %v792_v19  ;;  %v448_v23 = vmul.f32 %v7633_v63, %v398_v0 }
  0xaa   : > { %926 = vmatprep.mubr.f32.mxu0 %v7295_v34  ;;  %1087 = vmatprep.mubr.f32.mxu1 %v7295_v34 }
  0xab   : > { %v592_v39 = vpop.permute.xlu1 %591  ;;  %v587_v40 = vpop.permute.xlu0 %586  ;;  %6141 = vmatpush1.bf16.msra.mxu0 %v6140_v12  ;;  %6173 = vmatpush1.bf16.msra.mxu1 %v6172_v3  ;;  %v794_v12 = vrot.slane %v7984_v38, 1  ;;  %v6182_v3 = vpack.c.bf16 %v5520_v57, %v5516_v44 }
  0xac   : > { %v7997_v52 = vmul.f32 %v592_v39, %v500_v61  ;;  %v7999_v10 = vmul.f32 %v587_v40, %v499_v6  ;;  %6143 = vmatprep.subr.bf16.mxu0 %v6142_v13  ;;  %6175 = vmatprep.subr.bf16.mxu1 %v6174_v24  ;;  %v6180_v61 = vpack.c.bf16 %v692_v51, %v688_v49  ;;  %v796_v39 = vrot.slane %v8024_v15, 1 }
  0xad   : > { %927 = vmatmul.mubr.f32.gmra.mrb[12].mxu0 %v791_v54  ;;  %1088 = vmatmul.mubr.f32.gmra.mrb[12].mxu1 %v791_v54  ;;  %v6214_v13 = vpack.c.bf16 %v5522_v58, %v5518_v55  ;;  %v795_v9 = vsel %vm776_vm0, %v792_v19, %v794_v12  ;;  %v496_v51 = vmax.f32 %v475_v20, 0.0 }
  0xae   : > { %932 = vmatprep.mubr.f32.mxu0 %v7295_v34  ;;  %1093 = vmatprep.mubr.f32.mxu1 %v7295_v34  ;;  %v1567_v62 = vrot.slane %v7999_v10, 2  ;;  %v2038_v14 = vrot.slane %v7997_v52, 2  ;;  %v2523_v24 = vrot.slane %v7999_v10, 3  ;;  %v2525_v8 = vrot.slane %v7997_v52, 3 }
  0xaf   : > { %v597_v6 = vpop.permute.xlu0 %596  ;;  %6145 = vmatpush1.bf16.msra.mxu0 %v6144_v30  ;;  %6177 = vmatpush1.bf16.msra.mxu1 %v6176_v31  ;;  %v8050_v30 = vmul.f32 %v7835_v7, %v494_v59  ;;  %v495_v31 = vmax.f32 %v474_v56, 0.0  ;;  %v602_v35 = vpop.permute.xlu1 %601  ;;  %v449_v7 = vmul.f32 %v7633_v63, %v399_v33  ;;  %v797_v54 = vsel %vm776_vm0, %v794_v12, %v796_v39 }
  0xb0   : > { %v8026_v16 = vmul.f32 %v597_v6, %v501_v41  ;;  %6147 = vmatprep.subr.bf16.mxu0 %v6146_v42  ;;  %6179 = vmatprep.subr.bf16.mxu1 %v6178_v47  ;;  %v8034_v46 = vsel %vm1535_vm1, %v1567_v62, %v2038_v14  ;;  %v8046_v28 = vsel %vm2495_vm2, %v2523_v24, %v2525_v8  ;;  %v10412_v56 = vrot.slane %v7999_v10, 4 }
  0xb1   : > { %933 = vmatmul.mubr.f32.gmra.mrb[14].mxu0 %v793_v21  ;;  %1094 = vmatmul.mubr.f32.gmra.mrb[14].mxu1 %v793_v21  ;;  %v476_v47 = vadd.f32 %v7639_v1, %v448_v23  ;;  %v8067_v49 = vmul.f32 %v602_v35, %v502_v26  ;;  %v8070_v44 = vmul.f32 %v7881_v37, %v495_v31  ;;  %v798_v19 = vrot.slane %v8050_v30, 1 }
  0xb2   : > { %938 = vmatprep.mubr.f32.mxu0 %v7295_v34  ;;  %1099 = vmatprep.mubr.f32.mxu1 %v7295_v34  ;;  %v2040_v22 = vrot.slane %v8026_v16, 2  ;;  %v2527_v29 = vrot.slane %v8026_v16, 3  ;;  %v477_v63 = vadd.f32 %v7639_v1, %v449_v7  ;;  %v8080_v37 = vmul.f32 %v7879_v36, %v496_v51 }
  0xb3   : > { %v607_v11 = vpop.permute.xlu0 %606  ;;  %6149 = vmatpush1.bf16.msra.mxu0 %v6148_v60  ;;  %6181 = vmatpush1.bf16.msra.mxu1 %v6180_v61  ;;  %v497_v55 = vmax.f32 %v476_v47, 0.0  ;;  %v3499_v58 = vrot.slane %v8067_v49, 4  ;;  %v799_v59 = vsel %vm776_vm0, %v796_v39, %v798_v19  ;;  %v800_v50 = vrot.slane %v8070_v44, 1 }
  0xb4   : > { %6183 = vmatprep.subr.bf16.mxu0 %v6182_v3  ;;  %6215 = vmatprep.subr.bf16.mxu1 %v6214_v13  ;;  %v8055_v40 = vmul.f32 %v607_v11, %v503_v25  ;;  %v8058_v41 = vsel %vm1535_vm1, %v2038_v14, %v2040_v22  ;;  %v8061_v42 = vsel %vm2495_vm2, %v2525_v8, %v2527_v29  ;;  %v3026_v60 = vrot.slane %v7997_v52, 4 }
  0xb5   : > { %939 = vmatmul.mubr.f32.gmra.mrb[16].mxu0 %v795_v9  ;;  %1100 = vmatmul.mubr.f32.gmra.mrb[16].mxu1 %v795_v9  ;;  %v3028_v61 = vrot.slane %v8026_v16, 4  ;;  %v498_v12 = vmax.f32 %v477_v63, 0.0  ;;  %v8104_v3 = vmul.f32 %v7935_v5, %v497_v55  ;;  %v801_v13 = vsel %vm776_vm0, %v798_v19, %v800_v50  ;;  %v5517_v63 = vld [vmem:[%s10404_s4 + $0x410] sm:$0xff] }
  0xb6   : > { %944 = vmatprep.mubr.f32.mxu0 %v7295_v34  ;;  %1105 = vmatprep.mubr.f32.mxu1 %v7295_v34  ;;  %v3501_v57 = vrot.slane %v8055_v40, 4  ;;  %v8095_v36 = vsel %vm2996_vm3, %v10412_v56, %v3026_v60  ;;  %v802_v14 = vrot.slane %v8080_v37, 1  ;;  %v3988_v21 = vrot.slane %v8055_v40, 5  ;;  %v5521_v55 = vld [vmem:[%s10404_s4 + $0x430] sm:$0xff] }
  0xb7   : > { %v8098_v0 = vsel %vm2996_vm3, %v3026_v60, %v3028_v61  ;;  %v8101_v6 = vsel %vm2996_vm3, %v3028_v61, %v3499_v58  ;;  %v3986_v25 = vrot.slane %v8067_v49, 5  ;;  %v8113_v8 = vmul.f32 %v7933_v4, %v498_v12  ;;  %v5528_v60 = vld [vmem:[%s10404_s4 + $0x468] sm:$0xff]  ;;  %v5526_v61 = vld [vmem:[%s10404_s4 + $0x458] sm:$0xff] }
  0xb8   : > { %v8088_v1 = vsel %vm2996_vm3, %v3499_v58, %v3501_v57  ;;  %v803_v5 = vsel %vm776_vm0, %v800_v50, %v802_v14  ;;  %v804_v20 = vrot.slane %v8104_v3, 1  ;;  %v10411_v23 = vrot.slane %v7999_v10, 5  ;;  %v5519_v57 = vld [vmem:[%s10404_s4 + $0x420] sm:$0xff]  ;;  %v5530_v12 = vld [vmem:[%s10404_s4 + $0x478] sm:$0xff] }
  0xb9   : > { %945 = vmatmul.mubr.f32.gmra.mrb[18].mxu0 %v797_v54  ;;  %1106 = vmatmul.mubr.f32.gmra.mrb[18].mxu1 %v797_v54  ;;  %v3982_v26 = vrot.slane %v7997_v52, 5  ;;  %v8120_v11 = vsel %vm3956_vm4, %v3986_v25, %v3988_v21  ;;  %v3984_v4 = vrot.slane %v8026_v16, 5  ;;  %v806_v31 = vrot.slane %v8113_v8, 1  ;;  %v5523_v21 = vld [vmem:[%s10404_s4 + $0x440] sm:$0xff] }
  0xba   : > { %950 = vmatprep.mubr.f32.mxu0 %v7295_v34  ;;  %1111 = vmatprep.mubr.f32.mxu1 %v7295_v34  ;;  %v805_v29 = vsel %vm776_vm0, %v802_v14, %v804_v20  ;;  %v4489_v9 = vrot.slane %v8055_v40, 6  ;;  %v4487_v39 = vrot.slane %v8067_v49, 6  ;;  %v808_v47 = vrot.slane %v7999_v10, 1  ;;  %v5515_v40 = vld [vmem:[%s10404_s4 + $0x400] sm:$0xff] }
  0xbb   : > { %v8128_v22 = vsel %vm3956_vm4, %v10411_v23, %v3982_v26  ;;  %v8133_v33 = vsel %vm3956_vm4, %v3982_v26, %v3984_v4  ;;  %v8136_v35 = vsel %vm3956_vm4, %v3984_v4, %v3986_v25  ;;  %v807_v7 = vsel %vm776_vm0, %v804_v20, %v806_v31  ;;  %v5527_v25 = vld [vmem:[%s10404_s4 + $0x460] sm:$0xff]  ;;  %v5525_v26 = vld [vmem:[%s10404_s4 + $0x450] sm:$0xff] }
  0xbc   : > { %v10410_v51 = vrot.slane %v7999_v10, 6  ;;  %v4483_v54 = vrot.slane %v7997_v52, 6  ;;  %v4485_v49 = vrot.slane %v8026_v16, 6  ;;  %v8153_v19 = vsel %vm4457_vm5, %v4487_v39, %v4489_v9  ;;  %v5524_v52 = vld [vmem:[%s10404_s4 + $0x448] sm:$0xff]  ;;  %v5529_v4 = vld [vmem:[%s10404_s4 + $0x470] sm:$0xff]  ;;  %v5534_v9 = vld [vmem:[%s10404_s4 + $0x498] sm:$0xff] }
  0xbd   : > { %951 = vmatmul.mubr.f32.gmra.mrb[20].mxu0 %v799_v59  ;;  %1112 = vmatmul.mubr.f32.gmra.mrb[20].mxu1 %v799_v59  ;;  %v809_v58 = vsel %vm776_vm0, %v806_v31, %v808_v47  ;;  %v6216_v14 = vpack.c.bf16 %v5521_v55, %v5517_v63  ;;  %v6218_v20 = vpack.c.bf16 %v5530_v12, %v5526_v61  ;;  %v5536_v31 = vld [vmem:[%s10404_s4 + $0x4a8] sm:$0xff]  ;;  %v5533_v63 = vld [vmem:[%s10404_s4 + $0x490] sm:$0xff]  ;;  %v5546_v61 = vld [vmem:[%s10404_s4 + $0x4f8] sm:$0xff] }
  0xbe   : > { %956 = vmatprep.mubr.f32.mxu0 %v7295_v34  ;;  %1117 = vmatprep.mubr.f32.mxu1 %v7295_v34  ;;  %v8171_v16 = vsel %vm4457_vm5, %v10410_v51, %v4483_v54  ;;  %v8174_v59 = vsel %vm4457_vm5, %v4483_v54, %v4485_v49  ;;  %v8177_v50 = vsel %vm4457_vm5, %v4485_v49, %v4487_v39  ;;  %v5538_v39 = vld [vmem:[%s10404_s4 + $0x4b8] sm:$0xff]  ;;  %v5535_v54 = vld [vmem:[%s10404_s4 + $0x4a0] sm:$0xff]  ;;  %v5537_v55 = vld [vmem:[%s10404_s4 + $0x4b0] sm:$0xff] }
  0xbf   : > { %v6220_v47 = vpack.c.bf16 %v5529_v4, %v5525_v26  ;;  %v5545_v26 = vld [vmem:[%s10404_s4 + $0x4f0] sm:$0xff]  ;;  %v5548_v4 = vld [vmem:[%s10404_s4 + $0x508] sm:$0xff] }
  0xc0   : > { %v5653_v51 = vld [vmem:[%s10404_s4 + $0x850] sm:$0xff] }
  0xc1   : > { %957 = vmatmul.mubr.f32.gmra.mrb[22].mxu0 %v801_v13  ;;  %1118 = vmatmul.mubr.f32.gmra.mrb[22].mxu1 %v801_v13  ;;  %v6184_v13 = vpack.c.bf16 %v5519_v57, %v5515_v40  ;;  %v5531_v40 = vld [vmem:[%s10404_s4 + $0x480] sm:$0xff]  ;;  %v6222_v57 = vpack.c.bf16 %v5538_v39, %v5534_v9  ;;  %v5554_v9 = vld [vmem:[%s10404_s4 + $0x538] sm:$0xff]  ;;  %v5657_v23 = vld [vmem:[%s10404_s4 + $0x870] sm:$0xff] }
  0xc2   : > { %962 = vmatprep.mubr.f32.mxu0 %v7295_v34  ;;  %1123 = vmatprep.mubr.f32.mxu1 %v7295_v34  ;;  %v6192_v12 = vpack.c.bf16 %v5535_v54, %v5531_v40  ;;  %v5551_v40 = vld [vmem:[%s10404_s4 + $0x520] sm:$0xff] }
  0xc5   : > { %963 = vmatmul.mubr.f32.gmra.mrb[24].mxu0 %v803_v5  ;;  %1124 = vmatmul.mubr.f32.gmra.mrb[24].mxu1 %v803_v5  ;;  %v6186_v5 = vpack.c.bf16 %v5528_v60, %v5524_v52  ;;  %v5544_v52 = vld [vmem:[%s10404_s4 + $0x4e8] sm:$0xff]  ;;  %v5542_v60 = vld [vmem:[%s10404_s4 + $0x4d8] sm:$0xff] }
  0xc6   : > { %968 = vmatprep.mubr.f32.mxu0 %v7295_v34  ;;  %1129 = vmatprep.mubr.f32.mxu1 %v7295_v34 }
  0xc9   : > { %969 = vmatmul.mubr.f32.gmra.mrb[26].mxu0 %v805_v29  ;;  %1130 = vmatmul.mubr.f32.gmra.mrb[26].mxu1 %v805_v29  ;;  %v5532_v29 = vld [vmem:[%s10404_s4 + $0x488] sm:$0xff] }
  0xca   : > { %974 = vmatprep.mubr.f32.mxu0 %v7295_v34  ;;  %1135 = vmatprep.mubr.f32.mxu1 %v7295_v34  ;;  %v6190_v49 = vpack.c.bf16 %v5536_v31, %v5532_v29  ;;  %v5552_v29 = vld [vmem:[%s10404_s4 + $0x528] sm:$0xff]  ;;  %v5550_v31 = vld [vmem:[%s10404_s4 + $0x518] sm:$0xff] }
  0xcb   : > { %v6198_v54 = vpack.c.bf16 %v5552_v29, %v5548_v4  ;;  %v5568_v4 = vld [vmem:[%s10404_s4 + $0x5a8] sm:$0xff]  ;;  %v5566_v29 = vld [vmem:[%s10404_s4 + $0x598] sm:$0xff] }
  0xcd   : > { %975 = vmatmul.mubr.f32.gmra.mrb[28].mxu0 %v807_v7  ;;  %1136 = vmatmul.mubr.f32.gmra.mrb[28].mxu1 %v807_v7  ;;  %v6188_v7 = vpack.c.bf16 %v5527_v25, %v5523_v21  ;;  %v5543_v21 = vld [vmem:[%s10404_s4 + $0x4e0] sm:$0xff] }
  0xce   : > { %980 = vmatprep.mubr.f32.mxu0 %v7295_v34  ;;  %1141 = vmatprep.mubr.f32.mxu1 %v7295_v34 }
  0xd1   : > { %981 = vmatmul.mubr.f32.gmra.mrb[30].mxu0 %v809_v58  ;;  %1142 = vmatmul.mubr.f32.gmra.mrb[30].mxu1 %v809_v58  ;;  %v5540_v58 = vld [vmem:[%s10404_s4 + $0x4c8] sm:$0xff] }
  0xd2   : > { %1212 = vmatprep.mubr.f32.mxu0 %v7295_v34  ;;  %1373 = vmatprep.mubr.f32.mxu1 %v7295_v34  ;;  %v6194_v25 = vpack.c.bf16 %v5544_v52, %v5540_v58  ;;  %v5560_v58 = vld [vmem:[%s10404_s4 + $0x568] sm:$0xff]  ;;  %v5558_v52 = vld [vmem:[%s10404_s4 + $0x558] sm:$0xff] }
  0xd5   : > { %1213 = vmatmul.mubr.f32.vlgmr.msra.gmra.mrb[0].mxu0 %v7674_v32  ;;  %1374 = vmatmul.mubr.f32.vlgmr.msra.gmra.mrb[0].mxu1 %v7674_v32 }
  0xd6   : > { %6185 = vmatpush1.bf16.msra.mxu0 %v6184_v13  ;;  %6217 = vmatpush1.bf16.msra.mxu1 %v6216_v14  ;;  %v6224_v13 = vpack.c.bf16 %v5537_v55, %v5533_v63  ;;  %v5539_v14 = vld [vmem:[%s10404_s4 + $0x4c0] sm:$0xff]  ;;  %v5553_v63 = vld [vmem:[%s10404_s4 + $0x530] sm:$0xff]  ;;  %v5556_v55 = vld [vmem:[%s10404_s4 + $0x548] sm:$0xff] }
  0xd7   : > { %1218 = vmatprep.mubr.f32.mxu0 %v7295_v34  ;;  %1379 = vmatprep.mubr.f32.mxu1 %v7295_v34  ;;  %v6196_v39 = vpack.c.bf16 %v5543_v21, %v5539_v14  ;;  %v5559_v14 = vld [vmem:[%s10404_s4 + $0x560] sm:$0xff]  ;;  %v6202_v21 = vpack.c.bf16 %v5560_v58, %v5556_v55  ;;  %v5576_v55 = vld [vmem:[%s10404_s4 + $0x5e8] sm:$0xff]  ;;  %v5574_v58 = vld [vmem:[%s10404_s4 + $0x5d8] sm:$0xff] }
  0xd8   : > { %6187 = vmatprep.subr.bf16.mxu0 %v6186_v5  ;;  %6219 = vmatprep.subr.bf16.mxu1 %v6218_v20  ;;  %v6226_v5 = vpack.c.bf16 %v5546_v61, %v5542_v60  ;;  %v5541_v20 = vld [vmem:[%s10404_s4 + $0x4d0] sm:$0xff]  ;;  %v5562_v60 = vld [vmem:[%s10404_s4 + $0x578] sm:$0xff] }
  0xd9   : > { %1219 = vmatmul.mubr.f32.gmra.mrb[2].mxu0 %v7693_v45  ;;  %1380 = vmatmul.mubr.f32.gmra.mrb[2].mxu1 %v7693_v45 }
  0xda   : > { %1224 = vmatprep.mubr.f32.mxu0 %v7295_v34  ;;  %1385 = vmatprep.mubr.f32.mxu1 %v7295_v34 }
  0xdb   : > { %6189 = vmatpush1.bf16.msra.mxu0 %v6188_v7  ;;  %6221 = vmatpush1.bf16.msra.mxu1 %v6220_v47  ;;  %v6228_v7 = vpack.c.bf16 %v5545_v26, %v5541_v20  ;;  %v5547_v47 = vld [vmem:[%s10404_s4 + $0x500] sm:$0xff]  ;;  %v5561_v20 = vld [vmem:[%s10404_s4 + $0x570] sm:$0xff]  ;;  %v5564_v26 = vld [vmem:[%s10404_s4 + $0x588] sm:$0xff] }
  0xdc   : > { %6191 = vmatprep.subr.bf16.mxu0 %v6190_v49  ;;  %6223 = vmatprep.subr.bf16.mxu1 %v6222_v57  ;;  %v6230_v49 = vpack.c.bf16 %v5554_v9, %v5550_v31  ;;  %v5549_v57 = vld [vmem:[%s10404_s4 + $0x510] sm:$0xff]  ;;  %v6200_v61 = vpack.c.bf16 %v5551_v40, %v5547_v47  ;;  %v5570_v31 = vld [vmem:[%s10404_s4 + $0x5b8] sm:$0xff]  ;;  %v5567_v47 = vld [vmem:[%s10404_s4 + $0x5a0] sm:$0xff]  ;;  %v6206_v40 = vpack.c.bf16 %v5568_v4, %v5564_v26 }
  0xdd   : > { %1225 = vmatmul.mubr.f32.gmra.mrb[4].mxu0 %v7691_v43  ;;  %1386 = vmatmul.mubr.f32.gmra.mrb[4].mxu1 %v7691_v43  ;;  %v5584_v26 = vld [vmem:[%s10404_s4 + $0x628] sm:$0xff]  ;;  %v5582_v4 = vld [vmem:[%s10404_s4 + $0x618] sm:$0xff] }
  0xde   : > { %1230 = vmatprep.mubr.f32.mxu0 %v7295_v34  ;;  %1391 = vmatprep.mubr.f32.mxu1 %v7295_v34 }
  0xdf   : > { %6193 = vmatpush1.bf16.msra.mxu0 %v6192_v12  ;;  %6225 = vmatpush1.bf16.msra.mxu1 %v6224_v13  ;;  %v6232_v12 = vpack.c.bf16 %v5553_v63, %v5549_v57  ;;  %v5555_v13 = vld [vmem:[%s10404_s4 + $0x540] sm:$0xff]  ;;  %v5569_v57 = vld [vmem:[%s10404_s4 + $0x5b0] sm:$0xff]  ;;  %v5572_v63 = vld [vmem:[%s10404_s4 + $0x5c8] sm:$0xff] }
  0xe0   : > { %6195 = vmatprep.subr.bf16.mxu0 %v6194_v25  ;;  %6227 = vmatprep.subr.bf16.mxu1 %v6226_v5  ;;  %v6234_v25 = vpack.c.bf16 %v5562_v60, %v5558_v52  ;;  %v5557_v5 = vld [vmem:[%s10404_s4 + $0x550] sm:$0xff]  ;;  %v6204_v9 = vpack.c.bf16 %v5559_v14, %v5555_v13  ;;  %v5578_v52 = vld [vmem:[%s10404_s4 + $0x5f8] sm:$0xff]  ;;  %v5575_v13 = vld [vmem:[%s10404_s4 + $0x5e0] sm:$0xff]  ;;  %v6210_v14 = vpack.c.bf16 %v5576_v55, %v5572_v63 }
  0xe1   : > { %1231 = vmatmul.mubr.f32.gmra.mrb[6].mxu0 %v7725_v2  ;;  %1392 = vmatmul.mubr.f32.gmra.mrb[6].mxu1 %v7725_v2  ;;  %v5588_v63 = vld [vmem:[%s10404_s4 + $0x648] sm:$0xff] }
  0xe2   : > { %1236 = vmatprep.mubr.f32.mxu0 %v7295_v34  ;;  %1397 = vmatprep.mubr.f32.mxu1 %v7295_v34  ;;  %v5592_v55 = vld [vmem:[%s10404_s4 + $0x668] sm:$0xff] }
  0xe3   : > { %6197 = vmatpush1.bf16.msra.mxu0 %v6196_v39  ;;  %6229 = vmatpush1.bf16.msra.mxu1 %v6228_v7  ;;  %v6236_v39 = vpack.c.bf16 %v5561_v20, %v5557_v5  ;;  %v5563_v7 = vld [vmem:[%s10404_s4 + $0x580] sm:$0xff]  ;;  %v5577_v5 = vld [vmem:[%s10404_s4 + $0x5f0] sm:$0xff]  ;;  %v5580_v20 = vld [vmem:[%s10404_s4 + $0x608] sm:$0xff] }
  0xe4   : > { %6199 = vmatprep.subr.bf16.mxu0 %v6198_v54  ;;  %6231 = vmatprep.subr.bf16.mxu1 %v6230_v49  ;;  %v6238_v54 = vpack.c.bf16 %v5570_v31, %v5566_v29  ;;  %v5565_v49 = vld [vmem:[%s10404_s4 + $0x590] sm:$0xff]  ;;  %v6208_v60 = vpack.c.bf16 %v5567_v47, %v5563_v7  ;;  %v5586_v29 = vld [vmem:[%s10404_s4 + $0x638] sm:$0xff]  ;;  %v5579_v47 = vld [vmem:[%s10404_s4 + $0x600] sm:$0xff] }
  0xe5   : > { %1237 = vmatmul.mubr.f32.gmra.mrb[8].mxu0 %v7765_v27  ;;  %1398 = vmatmul.mubr.f32.gmra.mrb[8].mxu1 %v7765_v27  ;;  %v6278_v7 = vpack.c.bf16 %v5586_v29, %v5582_v4  ;;  %v5600_v4 = vld [vmem:[%s10404_s4 + $0x6a8] sm:$0xff]  ;;  %v5598_v29 = vld [vmem:[%s10404_s4 + $0x698] sm:$0xff] }
  0xe6   : > { %1242 = vmatprep.mubr.f32.mxu0 %v7295_v34  ;;  %1403 = vmatprep.mubr.f32.mxu1 %v7295_v34 }
  0xe7   : > { %6201 = vmatpush1.bf16.msra.mxu0 %v6200_v61  ;;  %6233 = vmatpush1.bf16.msra.mxu1 %v6232_v12  ;;  %v6240_v61 = vpack.c.bf16 %v5569_v57, %v5565_v49  ;;  %v5571_v12 = vld [vmem:[%s10404_s4 + $0x5c0] sm:$0xff]  ;;  %v5585_v49 = vld [vmem:[%s10404_s4 + $0x630] sm:$0xff]  ;;  %v1537_v57 = vrot.slane %v7693_v45, 2  ;;  %v5594_v45 = vld [vmem:[%s10404_s4 + $0x678] sm:$0xff] }
  0xe8   : > { %6203 = vmatprep.subr.bf16.mxu0 %v6202_v21  ;;  %6235 = vmatprep.subr.bf16.mxu1 %v6234_v25  ;;  %v6242_v21 = vpack.c.bf16 %v5578_v52, %v5574_v58  ;;  %v5573_v25 = vld [vmem:[%s10404_s4 + $0x5d0] sm:$0xff]  ;;  %v6212_v31 = vpack.c.bf16 %v5575_v13, %v5571_v12  ;;  %v5590_v58 = vld [vmem:[%s10404_s4 + $0x658] sm:$0xff]  ;;  %v1536_v52 = vrot.slane %v7674_v32, 2  ;;  %v5587_v12 = vld [vmem:[%s10404_s4 + $0x640] sm:$0xff] }
  0xe9   : > { %1243 = vmatmul.mubr.f32.gmra.mrb[10].mxu0 %v7807_v53  ;;  %1404 = vmatmul.mubr.f32.gmra.mrb[10].mxu1 %v7807_v53  ;;  %v5591_v13 = vld [vmem:[%s10404_s4 + $0x660] sm:$0xff]  ;;  %v6282_v32 = vpack.c.bf16 %v5594_v45, %v5590_v58  ;;  %v5601_v58 = vld [vmem:[%s10404_s4 + $0x6b0] sm:$0xff]  ;;  %v5604_v45 = vld [vmem:[%s10404_s4 + $0x6c8] sm:$0xff] }
  0xea   : > { %1248 = vmatprep.mubr.f32.mxu0 %v7295_v34  ;;  %1409 = vmatprep.mubr.f32.mxu1 %v7295_v34 }
  0xeb   : > { %6205 = vmatpush1.bf16.msra.mxu0 %v6204_v9  ;;  %6237 = vmatpush1.bf16.msra.mxu1 %v6236_v39  ;;  %v6244_v9 = vpack.c.bf16 %v5577_v5, %v5573_v25  ;;  %v6246_v39 = vpack.c.bf16 %v5584_v26, %v5580_v20  ;;  %v6250_v25 = vpack.c.bf16 %v5592_v55, %v5588_v63  ;;  %v5589_v5 = vld [vmem:[%s10404_s4 + $0x650] sm:$0xff]  ;;  %v5596_v26 = vld [vmem:[%s10404_s4 + $0x688] sm:$0xff] }
  0xec   : > { %6207 = vmatprep.subr.bf16.mxu0 %v6206_v40  ;;  %6239 = vmatprep.subr.bf16.mxu1 %v6238_v54  ;;  %v5583_v40 = vld [vmem:[%s10404_s4 + $0x620] sm:$0xff]  ;;  %v5581_v54 = vld [vmem:[%s10404_s4 + $0x610] sm:$0xff] }
  0xed   : > { %1249 = vmatmul.mubr.f32.gmra.mrb[12].mxu0 %v7849_v18  ;;  %1410 = vmatmul.mubr.f32.gmra.mrb[12].mxu1 %v7849_v18  ;;  %v5593_v20 = vld [vmem:[%s10404_s4 + $0x670] sm:$0xff] }
  0xee   : > { %1254 = vmatprep.mubr.f32.mxu0 %v7295_v34  ;;  %1415 = vmatprep.mubr.f32.mxu1 %v7295_v34  ;;  %v5597_v55 = vld [vmem:[%s10404_s4 + $0x690] sm:$0xff] }
  0xef   : > { %6209 = vmatpush1.bf16.msra.mxu0 %v6208_v60  ;;  %6241 = vmatpush1.bf16.msra.mxu1 %v6240_v61  ;;  %v6248_v60 = vpack.c.bf16 %v5583_v40, %v5579_v47  ;;  %v6280_v61 = vpack.c.bf16 %v5585_v49, %v5581_v54  ;;  %v5599_v47 = vld [vmem:[%s10404_s4 + $0x6a0] sm:$0xff]  ;;  %v1541_v54 = vrot.slane %v7725_v2, 2  ;;  %v6254_v49 = vpack.c.bf16 %v5600_v4, %v5596_v26  ;;  %v5605_v26 = vld [vmem:[%s10404_s4 + $0x6d0] sm:$0xff] }
  0xf0   : > { %6211 = vmatprep.subr.bf16.mxu0 %v6210_v14  ;;  %6243 = vmatprep.subr.bf16.mxu1 %v6242_v21  ;;  %v1538_v14 = vsel %vm1535_vm1, %v1536_v52, %v1537_v57  ;;  %v1539_v21 = vrot.slane %v7691_v43, 2  ;;  %v5606_v52 = vld [vmem:[%s10404_s4 + $0x6d8] sm:$0xff]  ;;  %v5609_v4 = vld [vmem:[%s10404_s4 + $0x6f0] sm:$0xff] }
  0xf1   : > { %1255 = vmatmul.mubr.f32.gmra.mrb[14].mxu0 %v7893_v48  ;;  %1416 = vmatmul.mubr.f32.gmra.mrb[14].mxu1 %v7893_v48 }
  0xf2   : > { %1260 = vmatprep.mubr.f32.mxu0 %v7295_v34  ;;  %1421 = vmatprep.mubr.f32.mxu1 %v7295_v34  ;;  %v1540_v40 = vsel %vm1535_vm1, %v1537_v57, %v1539_v21  ;;  %v5608_v57 = vld [vmem:[%s10404_s4 + $0x6e8] sm:$0xff] }
  0xf3   : > { %6213 = vmatpush1.bf16.msra.mxu0 %v6212_v31  ;;  %6245 = vmatpush1.bf16.msra.mxu1 %v6244_v9  ;;  %v5602_v31 = vld [vmem:[%s10404_s4 + $0x6b8] sm:$0xff]  ;;  %v6252_v9 = vpack.c.bf16 %v5591_v13, %v5587_v12  ;;  %v6288_v12 = vpack.c.bf16 %v5601_v58, %v5597_v55  ;;  %v5603_v13 = vld [vmem:[%s10404_s4 + $0x6c0] sm:$0xff] }
  0xf4   : > { %6247 = vmatprep.subr.bf16.mxu0 %v6246_v39  ;;  %6279 = vmatprep.subr.bf16.mxu1 %v6278_v7  ;;  %v6284_v39 = vpack.c.bf16 %v5593_v20, %v5589_v5  ;;  %v5595_v7 = vld [vmem:[%s10404_s4 + $0x680] sm:$0xff]  ;;  %v6286_v63 = vpack.c.bf16 %v5602_v31, %v5598_v29  ;;  %v6258_v5 = vpack.c.bf16 %v5608_v57, %v5604_v45  ;;  %v5612_v29 = vld [vmem:[%s10404_s4 + $0x708] sm:$0xff]  ;;  %v5614_v31 = vld [vmem:[%s10404_s4 + $0x718] sm:$0xff] }
  0xf5   : > { %1261 = vmatmul.mubr.f32.gmra.mrb[16].mxu0 %v7950_v17  ;;  %1422 = vmatmul.mubr.f32.gmra.mrb[16].mxu1 %v7950_v17  ;;  %v5613_v45 = vld [vmem:[%s10404_s4 + $0x710] sm:$0xff] }
  0xf6   : > { %1266 = vmatprep.mubr.f32.mxu0 %v7295_v34  ;;  %1427 = vmatprep.mubr.f32.mxu1 %v7295_v34  ;;  %v5617_v57 = vld [vmem:[%s10404_s4 + $0x730] sm:$0xff] }
  0xf9   : > { %1267 = vmatmul.mubr.f32.gmra.mrb[18].mxu0 %v7984_v38  ;;  %1428 = vmatmul.mubr.f32.gmra.mrb[18].mxu1 %v7984_v38 }
  0xfa   : > { %1272 = vmatprep.mubr.f32.mxu0 %v7295_v34  ;;  %1433 = vmatprep.mubr.f32.mxu1 %v7295_v34 }
  0xfd   : > { %1273 = vmatmul.mubr.f32.gmra.mrb[20].mxu0 %v8024_v15  ;;  %1434 = vmatmul.mubr.f32.gmra.mrb[20].mxu1 %v8024_v15 }
  0xfe   : > { %1278 = vmatprep.mubr.f32.mxu0 %v7295_v34  ;;  %1439 = vmatprep.mubr.f32.mxu1 %v7295_v34 }
 0x101   : > { %1279 = vmatmul.mubr.f32.gmra.mrb[22].mxu0 %v8050_v30  ;;  %1440 = vmatmul.mubr.f32.gmra.mrb[22].mxu1 %v8050_v30 }
 0x102   : > { %1284 = vmatprep.mubr.f32.mxu0 %v7295_v34  ;;  %1445 = vmatprep.mubr.f32.mxu1 %v7295_v34 }
 0x105   : > { %1285 = vmatmul.mubr.f32.gmra.mrb[24].mxu0 %v8070_v44  ;;  %1446 = vmatmul.mubr.f32.gmra.mrb[24].mxu1 %v8070_v44 }
 0x106   : > { %1290 = vmatprep.mubr.f32.mxu0 %v7295_v34  ;;  %1451 = vmatprep.mubr.f32.mxu1 %v7295_v34 }
 0x109   : > { %1291 = vmatmul.mubr.f32.gmra.mrb[26].mxu0 %v8080_v37  ;;  %1452 = vmatmul.mubr.f32.gmra.mrb[26].mxu1 %v8080_v37 }
 0x10a   : > { %1296 = vmatprep.mubr.f32.mxu0 %v7295_v34  ;;  %1457 = vmatprep.mubr.f32.mxu1 %v7295_v34 }
 0x10d   : > { %1297 = vmatmul.mubr.f32.gmra.mrb[28].mxu0 %v8104_v3  ;;  %1458 = vmatmul.mubr.f32.gmra.mrb[28].mxu1 %v8104_v3 }
 0x10e   : > { %1302 = vmatprep.mubr.f32.mxu0 %v7295_v34  ;;  %1463 = vmatprep.mubr.f32.mxu1 %v7295_v34 }
 0x111   : > { %1303 = vmatmul.mubr.f32.gmra.mrb[30].mxu0 %v8113_v8  ;;  %1464 = vmatmul.mubr.f32.gmra.mrb[30].mxu1 %v8113_v8 }
 0x112   : > { %1649 = vmatprep.mubr.f32.mxu0 %v7295_v34  ;;  %1810 = vmatprep.mubr.f32.mxu1 %v7295_v34 }
 0x115   : > { %1650 = vmatmul.mubr.f32.vlgmr.msra.gmra.mrb[0].mxu0 %v1538_v14  ;;  %1811 = vmatmul.mubr.f32.vlgmr.msra.gmra.mrb[0].mxu1 %v1538_v14  ;;  %v5607_v14 = vld [vmem:[%s10404_s4 + $0x6e0] sm:$0xff] }
 0x116   : > { %6249 = vmatpush1.bf16.msra.mxu0 %v6248_v60  ;;  %6281 = vmatpush1.bf16.msra.mxu1 %v6280_v61  ;;  %v5610_v60 = vld [vmem:[%s10404_s4 + $0x6f8] sm:$0xff]  ;;  %v6256_v61 = vpack.c.bf16 %v5599_v47, %v5595_v7  ;;  %v6292_v7 = vpack.c.bf16 %v5609_v4, %v5605_v26  ;;  %v5611_v47 = vld [vmem:[%s10404_s4 + $0x700] sm:$0xff]  ;;  %v1547_v26 = vrot.slane %v7849_v18, 2 }
 0x117   : > { %1655 = vmatprep.mubr.f32.mxu0 %v7295_v34  ;;  %1816 = vmatprep.mubr.f32.mxu1 %v7295_v34  ;;  %v6290_v20 = vpack.c.bf16 %v5610_v60, %v5606_v52  ;;  %v5620_v52 = vld [vmem:[%s10404_s4 + $0x748] sm:$0xff]  ;;  %v5622_v60 = vld [vmem:[%s10404_s4 + $0x758] sm:$0xff] }
 0x118   : > { %6251 = vmatprep.subr.bf16.mxu0 %v6250_v25  ;;  %6283 = vmatprep.subr.bf16.mxu1 %v6282_v32  ;;  %v8511_v25 = vsel %vm1535_vm1, %v1539_v21, %v1541_v54  ;;  %v1543_v32 = vrot.slane %v7765_v27, 2  ;;  %v5616_v21 = vld [vmem:[%s10404_s4 + $0x728] sm:$0xff] }
 0x119   : > { %1656 = vmatmul.mubr.f32.gmra.mrb[2].mxu0 %v1540_v40  ;;  %1817 = vmatmul.mubr.f32.gmra.mrb[2].mxu1 %v1540_v40  ;;  %v5615_v40 = vld [vmem:[%s10404_s4 + $0x720] sm:$0xff]  ;;  %v6262_v55 = vpack.c.bf16 %v5616_v21, %v5612_v29  ;;  %v5621_v21 = vld [vmem:[%s10404_s4 + $0x750] sm:$0xff] }
 0x11a   : > { %1661 = vmatprep.mubr.f32.mxu0 %v7295_v34  ;;  %1822 = vmatprep.mubr.f32.mxu1 %v7295_v34 }
 0x11b   : > { %6253 = vmatpush1.bf16.msra.mxu0 %v6252_v9  ;;  %6285 = vmatpush1.bf16.msra.mxu1 %v6284_v39  ;;  %v5618_v9 = vld [vmem:[%s10404_s4 + $0x738] sm:$0xff]  ;;  %v6260_v39 = vpack.c.bf16 %v5607_v14, %v5603_v13  ;;  %v6296_v13 = vpack.c.bf16 %v5617_v57, %v5613_v45  ;;  %v5619_v14 = vld [vmem:[%s10404_s4 + $0x740] sm:$0xff]  ;;  %v1549_v57 = vrot.slane %v7893_v48, 2 }
 0x11c   : > { %6255 = vmatprep.subr.bf16.mxu0 %v6254_v49  ;;  %6287 = vmatprep.subr.bf16.mxu1 %v6286_v63  ;;  %v8543_v49 = vsel %vm1535_vm1, %v1541_v54, %v1543_v32  ;;  %v1545_v63 = vrot.slane %v7807_v53, 2  ;;  %v6294_v58 = vpack.c.bf16 %v5618_v9, %v5614_v31  ;;  %v5624_v54 = vld [vmem:[%s10404_s4 + $0x768] sm:$0xff]  ;;  %v5625_v31 = vld [vmem:[%s10404_s4 + $0x770] sm:$0xff] }
 0x11d   : > { %1662 = vmatmul.mubr.f32.gmra.mrb[4].mxu0 %v8511_v25  ;;  %1823 = vmatmul.mubr.f32.gmra.mrb[4].mxu1 %v8511_v25  ;;  %v6266_v4 = vpack.c.bf16 %v5624_v54, %v5620_v52  ;;  %v5628_v9 = vld [vmem:[%s10404_s4 + $0x788] sm:$0xff] }
 0x11e   : > { %1667 = vmatprep.mubr.f32.mxu0 %v7295_v34  ;;  %1828 = vmatprep.mubr.f32.mxu1 %v7295_v34  ;;  %v8607_v45 = vsel %vm1535_vm1, %v1545_v63, %v1547_v26 }
 0x11f   : > { %6257 = vmatpush1.bf16.msra.mxu0 %v6256_v61  ;;  %6289 = vmatpush1.bf16.msra.mxu1 %v6288_v12  ;;  %v5626_v61 = vld [vmem:[%s10404_s4 + $0x778] sm:$0xff]  ;;  %v6264_v12 = vpack.c.bf16 %v5615_v40, %v5611_v47  ;;  %v6300_v40 = vpack.c.bf16 %v5625_v31, %v5621_v21  ;;  %v5639_v21 = vld [vmem:[%s10404_s4 + $0x7e0] sm:$0xff]  ;;  %v8639_v31 = vsel %vm1535_vm1, %v1547_v26, %v1549_v57  ;;  %v5648_v26 = vld [vmem:[%s10404_s4 + $0x828] sm:$0xff] }
 0x120   : > { %6259 = vmatprep.subr.bf16.mxu0 %v6258_v5  ;;  %6291 = vmatprep.subr.bf16.mxu1 %v6290_v20  ;;  %v5623_v5 = vld [vmem:[%s10404_s4 + $0x760] sm:$0xff]  ;;  %v8575_v20 = vsel %vm1535_vm1, %v1543_v32, %v1545_v63  ;;  %v6298_v29 = vpack.c.bf16 %v5626_v61, %v5622_v60  ;;  %v5632_v32 = vld [vmem:[%s10404_s4 + $0x7a8] sm:$0xff]  ;;  %v5629_v60 = vld [vmem:[%s10404_s4 + $0x790] sm:$0xff] }
 0x121   : > { %1668 = vmatmul.mubr.f32.gmra.mrb[6].mxu0 %v8543_v49  ;;  %1829 = vmatmul.mubr.f32.gmra.mrb[6].mxu1 %v8543_v49  ;;  %v6268_v47 = vpack.c.bf16 %v5623_v5, %v5619_v14  ;;  %v6270_v52 = vpack.c.bf16 %v5632_v32, %v5628_v9  ;;  %v5633_v61 = vld [vmem:[%s10404_s4 + $0x7b0] sm:$0xff]  ;;  %v5640_v63 = vld [vmem:[%s10404_s4 + $0x7e8] sm:$0xff]  ;;  %v5642_v14 = vld [vmem:[%s10404_s4 + $0x7f8] sm:$0xff]  ;;  %v1551_v9 = vrot.slane %v7950_v17, 2 }
 0x122   : > { %1673 = vmatprep.mubr.f32.mxu0 %v7295_v34  ;;  %1834 = vmatprep.mubr.f32.mxu1 %v7295_v34 }
 0x123   : > { %6261 = vmatpush1.bf16.msra.mxu0 %v6260_v39  ;;  %6293 = vmatpush1.bf16.msra.mxu1 %v6292_v7  ;;  %v5630_v39 = vld [vmem:[%s10404_s4 + $0x798] sm:$0xff] }
 0x124   : > { %6263 = vmatprep.subr.bf16.mxu0 %v6262_v55  ;;  %6295 = vmatprep.subr.bf16.mxu1 %v6294_v58  ;;  %v5634_v7 = vld [vmem:[%s10404_s4 + $0x7b8] sm:$0xff]  ;;  %v5627_v55 = vld [vmem:[%s10404_s4 + $0x780] sm:$0xff] }
 0x125   : > { %1674 = vmatmul.mubr.f32.gmra.mrb[8].mxu0 %v8575_v20  ;;  %1835 = vmatmul.mubr.f32.gmra.mrb[8].mxu1 %v8575_v20  ;;  %v5631_v58 = vld [vmem:[%s10404_s4 + $0x7a0] sm:$0xff]  ;;  %v6302_v54 = vpack.c.bf16 %v5634_v7, %v5630_v39  ;;  %v5637_v7 = vld [vmem:[%s10404_s4 + $0x7d0] sm:$0xff] }
 0x126   : > { %1679 = vmatprep.mubr.f32.mxu0 %v7295_v34  ;;  %1840 = vmatprep.mubr.f32.mxu1 %v7295_v34  ;;  %v6272_v5 = vpack.c.bf16 %v5631_v58, %v5627_v55  ;;  %v5646_v55 = vld [vmem:[%s10404_s4 + $0x818] sm:$0xff] }
 0x127   : > { %6265 = vmatpush1.bf16.msra.mxu0 %v6264_v12  ;;  %6297 = vmatpush1.bf16.msra.mxu1 %v6296_v13  ;;  %v5636_v12 = vld [vmem:[%s10404_s4 + $0x7c8] sm:$0xff]  ;;  %v5638_v13 = vld [vmem:[%s10404_s4 + $0x7d8] sm:$0xff] }
 0x128   : > { %6267 = vmatprep.subr.bf16.mxu0 %v6266_v4  ;;  %6299 = vmatprep.subr.bf16.mxu1 %v6298_v29  ;;  %v6304_v4 = vpack.c.bf16 %v5633_v61, %v5629_v60  ;;  %v5635_v29 = vld [vmem:[%s10404_s4 + $0x7c0] sm:$0xff]  ;;  %v6274_v32 = vpack.c.bf16 %v5640_v63, %v5636_v12  ;;  %v6306_v39 = vpack.c.bf16 %v5642_v14, %v5638_v13  ;;  %v5650_v58 = vld [vmem:[%s10404_s4 + $0x838] sm:$0xff]  ;;  %v1553_v61 = vrot.slane %v7984_v38, 2 }
 0x129   : > { %1680 = vmatmul.mubr.f32.gmra.mrb[10].mxu0 %v8607_v45  ;;  %1841 = vmatmul.mubr.f32.gmra.mrb[10].mxu1 %v8607_v45  ;;  %v8665_v60 = vsel %vm1535_vm1, %v1549_v57, %v1551_v9  ;;  %v6342_v63 = vpack.c.bf16 %v5650_v58, %v5646_v55  ;;  %v1555_v57 = vrot.slane %v8024_v15, 2  ;;  %v5647_v55 = vld [vmem:[%s10404_s4 + $0x820] sm:$0xff]  ;;  %v5645_v58 = vld [vmem:[%s10404_s4 + $0x810] sm:$0xff] }
 0x12a   : > { %1685 = vmatprep.mubr.f32.mxu0 %v7295_v34  ;;  %1846 = vmatprep.mubr.f32.mxu1 %v7295_v34  ;;  %v8673_v13 = vsel %vm1535_vm1, %v1551_v9, %v1553_v61  ;;  %v1561_v9 = vrot.slane %v8080_v37, 2 }
 0x12b   : > { %6269 = vmatpush1.bf16.msra.mxu0 %v6268_v47  ;;  %6301 = vmatpush1.bf16.msra.mxu1 %v6300_v40  ;;  %v5641_v47 = vld [vmem:[%s10404_s4 + $0x7f0] sm:$0xff]  ;;  %v5644_v40 = vld [vmem:[%s10404_s4 + $0x808] sm:$0xff]  ;;  %v8681_v14 = vsel %vm1535_vm1, %v1553_v61, %v1555_v57 }
 0x12c   : > { %6271 = vmatprep.subr.bf16.mxu0 %v6270_v52  ;;  %6303 = vmatprep.subr.bf16.mxu1 %v6302_v54  ;;  %v6276_v52 = vpack.c.bf16 %v5639_v21, %v5635_v29  ;;  %v6308_v54 = vpack.c.bf16 %v5641_v47, %v5637_v7  ;;  %v6310_v12 = vpack.c.bf16 %v5648_v26, %v5644_v40  ;;  %v1559_v29 = vrot.slane %v8070_v44, 2  ;;  %v5643_v26 = vld [vmem:[%s10404_s4 + $0x800] sm:$0xff]  ;;  %v5652_v61 = vld [vmem:[%s10404_s4 + $0x848] sm:$0xff] }
 0x12d   : > { %1686 = vmatmul.mubr.f32.gmra.mrb[12].mxu0 %v8639_v31  ;;  %1847 = vmatmul.mubr.f32.gmra.mrb[12].mxu1 %v8639_v31  ;;  %v1565_v47 = vrot.slane %v8113_v8, 2 }
 0x12e   : > { %1691 = vmatprep.mubr.f32.mxu0 %v7295_v34  ;;  %1852 = vmatprep.mubr.f32.mxu1 %v7295_v34 }
 0x12f   : > { %6273 = vmatpush1.bf16.msra.mxu0 %v6272_v5  ;;  %6305 = vmatpush1.bf16.msra.mxu1 %v6304_v4  ;;  %v1557_v5 = vrot.slane %v8050_v30, 2 }
 0x130   : > { %6275 = vmatprep.subr.bf16.mxu0 %v6274_v32  ;;  %6307 = vmatprep.subr.bf16.mxu1 %v6306_v39  ;;  %v8705_v32 = vsel %vm1535_vm1, %v1559_v29, %v1561_v9  ;;  %v1563_v39 = vrot.slane %v8104_v3, 2 }
 0x131   : > { %1692 = vmatmul.mubr.f32.gmra.mrb[14].mxu0 %v8665_v60  ;;  %1853 = vmatmul.mubr.f32.gmra.mrb[14].mxu1 %v8665_v60  ;;  %v8689_v4 = vsel %vm1535_vm1, %v1555_v57, %v1557_v5  ;;  %v8697_v21 = vsel %vm1535_vm1, %v1557_v5, %v1559_v29  ;;  %v6312_v57 = vpack.c.bf16 %v5647_v55, %v5643_v26  ;;  %v5651_v29 = vld [vmem:[%s10404_s4 + $0x840] sm:$0xff]  ;;  %v5660_v26 = vld [vmem:[%s10404_s4 + $0x888] sm:$0xff] }
 0x132   : > { %1697 = vmatprep.mubr.f32.mxu0 %v7295_v34  ;;  %1858 = vmatprep.mubr.f32.mxu1 %v7295_v34  ;;  %v8713_v7 = vsel %vm1535_vm1, %v1561_v9, %v1563_v39  ;;  %v8721_v40 = vsel %vm1535_vm1, %v1563_v39, %v1565_v47  ;;  %v5655_v9 = vld [vmem:[%s10404_s4 + $0x860] sm:$0xff]  ;;  %v5664_v55 = vld [vmem:[%s10404_s4 + $0x8a8] sm:$0xff] }
 0x133   : > { %6277 = vmatpush1.bf16.msra.mxu0 %v6276_v52  ;;  %6309 = vmatpush1.bf16.msra.mxu1 %v6308_v54  ;;  %v5649_v52 = vld [vmem:[%s10404_s4 + $0x830] sm:$0xff]  ;;  %v8742_v54 = vsel %vm1535_vm1, %v1565_v47, %v1567_v62  ;;  %v5658_v62 = vld [vmem:[%s10404_s4 + $0x878] sm:$0xff] }
 0x134   : > { %6311 = vmatprep.subr.bf16.mxu0 %v6310_v12  ;;  %6343 = vmatprep.subr.bf16.mxu1 %v6342_v63  ;;  %v5656_v12 = vld [vmem:[%s10404_s4 + $0x868] sm:$0xff]  ;;  %v5654_v63 = vld [vmem:[%s10404_s4 + $0x858] sm:$0xff]  ;;  %v6344_v5 = vpack.c.bf16 %v5649_v52, %v5645_v58 }
 0x135   : > { %1698 = vmatmul.mubr.f32.gmra.mrb[16].mxu0 %v8673_v13  ;;  %1859 = vmatmul.mubr.f32.gmra.mrb[16].mxu1 %v8673_v13  ;;  %v6314_v39 = vpack.c.bf16 %v5656_v12, %v5652_v61  ;;  %v6346_v47 = vpack.c.bf16 %v5658_v62, %v5654_v63  ;;  %v5662_v58 = vld [vmem:[%s10404_s4 + $0x898] sm:$0xff]  ;;  %v6316_v61 = vpack.c.bf16 %v5655_v9, %v5651_v29  ;;  %v5659_v12 = vld [vmem:[%s10404_s4 + $0x880] sm:$0xff] }
 0x136   : > { %1703 = vmatprep.mubr.f32.mxu0 %v7295_v34  ;;  %1864 = vmatprep.mubr.f32.mxu1 %v7295_v34  ;;  %v5666_v52 = vld [vmem:[%s10404_s4 + $0x8b8] sm:$0xff]  ;;  %v5663_v63 = vld [vmem:[%s10404_s4 + $0x8a0] sm:$0xff]  ;;  %v6318_v62 = vpack.c.bf16 %v5664_v55, %v5660_v26 }
 0x137   : > { %v6350_v56 = vpack.c.bf16 %v5666_v52, %v5662_v58  ;;  %v5670_v29 = vld [vmem:[%s10404_s4 + $0x8d8] sm:$0xff]  ;;  %v5671_v26 = vld [vmem:[%s10404_s4 + $0x8e0] sm:$0xff]  ;;  %v5669_v52 = vld [vmem:[%s10404_s4 + $0x8d0] sm:$0xff] }
 0x138   : > { %v5674_v9 = vld [vmem:[%s10404_s4 + $0x8f8] sm:$0xff] }
 0x139   : > { %1704 = vmatmul.mubr.f32.gmra.mrb[18].mxu0 %v8681_v14  ;;  %1865 = vmatmul.mubr.f32.gmra.mrb[18].mxu1 %v8681_v14  ;;  %v6354_v58 = vpack.c.bf16 %v5674_v9, %v5670_v29  ;;  %v5677_v29 = vld [vmem:[%s10404_s4 + $0x910] sm:$0xff] }
 0x13a   : > { %1709 = vmatprep.mubr.f32.mxu0 %v7295_v34  ;;  %1870 = vmatprep.mubr.f32.mxu1 %v7295_v34  ;;  %v5681_v9 = vld [vmem:[%s10404_s4 + $0x930] sm:$0xff] }
 0x13d   : > { %1710 = vmatmul.mubr.f32.gmra.mrb[20].mxu0 %v8689_v4  ;;  %1871 = vmatmul.mubr.f32.gmra.mrb[20].mxu1 %v8689_v4 }
 0x13e   : > { %1715 = vmatprep.mubr.f32.mxu0 %v7295_v34  ;;  %1876 = vmatprep.mubr.f32.mxu1 %v7295_v34 }
 0x141   : > { %1716 = vmatmul.mubr.f32.gmra.mrb[22].mxu0 %v8697_v21  ;;  %1877 = vmatmul.mubr.f32.gmra.mrb[22].mxu1 %v8697_v21 }
 0x142   : > { %1721 = vmatprep.mubr.f32.mxu0 %v7295_v34  ;;  %1882 = vmatprep.mubr.f32.mxu1 %v7295_v34 }
 0x145   : > { %1722 = vmatmul.mubr.f32.gmra.mrb[24].mxu0 %v8705_v32  ;;  %1883 = vmatmul.mubr.f32.gmra.mrb[24].mxu1 %v8705_v32 }
 0x146   : > { %1727 = vmatprep.mubr.f32.mxu0 %v7295_v34  ;;  %1888 = vmatprep.mubr.f32.mxu1 %v7295_v34 }
 0x149   : > { %1728 = vmatmul.mubr.f32.gmra.mrb[26].mxu0 %v8713_v7  ;;  %1889 = vmatmul.mubr.f32.gmra.mrb[26].mxu1 %v8713_v7 }
 0x14a   : > { %1733 = vmatprep.mubr.f32.mxu0 %v7295_v34  ;;  %1894 = vmatprep.mubr.f32.mxu1 %v7295_v34 }
 0x14d   : > { %1734 = vmatmul.mubr.f32.gmra.mrb[28].mxu0 %v8721_v40  ;;  %1895 = vmatmul.mubr.f32.gmra.mrb[28].mxu1 %v8721_v40 }
 0x14e   : > { %1739 = vmatprep.mubr.f32.mxu0 %v7295_v34  ;;  %1900 = vmatprep.mubr.f32.mxu1 %v7295_v34 }
 0x151   : > { %1740 = vmatmul.mubr.f32.gmra.mrb[30].mxu0 %v8742_v54  ;;  %1901 = vmatmul.mubr.f32.gmra.mrb[30].mxu1 %v8742_v54 }
 0x152   : > { %2108 = vmatprep.mubr.f32.mxu0 %v7295_v34  ;;  %2269 = vmatprep.mubr.f32.mxu1 %v7295_v34 }
 0x155   : > { %2109 = vmatmul.mubr.f32.vlgmr.msra.gmra.mrb[0].mxu0 %v8511_v25  ;;  %2270 = vmatmul.mubr.f32.vlgmr.msra.gmra.mrb[0].mxu1 %v8511_v25  ;;  %v6348_v25 = vpack.c.bf16 %v5657_v23, %v5653_v51  ;;  %v5665_v23 = vld [vmem:[%s10404_s4 + $0x8b0] sm:$0xff]  ;;  %v5668_v51 = vld [vmem:[%s10404_s4 + $0x8c8] sm:$0xff] }
 0x156   : > { %6313 = vmatpush1.bf16.msra.mxu0 %v6312_v57  ;;  %6345 = vmatpush1.bf16.msra.mxu1 %v6344_v5  ;;  %v5661_v57 = vld [vmem:[%s10404_s4 + $0x890] sm:$0xff]  ;;  %v5672_v5 = vld [vmem:[%s10404_s4 + $0x8e8] sm:$0xff] }
 0x157   : > { %2114 = vmatprep.mubr.f32.mxu0 %v7295_v34  ;;  %2275 = vmatprep.mubr.f32.mxu1 %v7295_v34  ;;  %v6322_v55 = vpack.c.bf16 %v5672_v5, %v5668_v51 }
 0x158   : > { %6315 = vmatprep.subr.bf16.mxu0 %v6314_v39  ;;  %6347 = vmatprep.subr.bf16.mxu1 %v6346_v47  ;;  %v6320_v39 = vpack.c.bf16 %v5663_v63, %v5659_v12  ;;  %v5667_v47 = vld [vmem:[%s10404_s4 + $0x8c0] sm:$0xff]  ;;  %v5678_v12 = vld [vmem:[%s10404_s4 + $0x918] sm:$0xff] }
 0x159   : > { %2115 = vmatmul.mubr.f32.gmra.mrb[2].mxu0 %v8543_v49  ;;  %2276 = vmatmul.mubr.f32.gmra.mrb[2].mxu1 %v8543_v49  ;;  %v6352_v49 = vpack.c.bf16 %v5665_v23, %v5661_v57  ;;  %v5682_v63 = vld [vmem:[%s10404_s4 + $0x938] sm:$0xff]  ;;  %v5675_v57 = vld [vmem:[%s10404_s4 + $0x900] sm:$0xff] }
 0x15a   : > { %2120 = vmatprep.mubr.f32.mxu0 %v7295_v34  ;;  %2281 = vmatprep.mubr.f32.mxu1 %v7295_v34  ;;  %v5679_v23 = vld [vmem:[%s10404_s4 + $0x920] sm:$0xff]  ;;  %v6358_v5 = vpack.c.bf16 %v5682_v63, %v5678_v12  ;;  %v5689_v12 = vld [vmem:[%s10404_s4 + $0x970] sm:$0xff]  ;;  %v5692_v63 = vld [vmem:[%s10404_s4 + $0x988] sm:$0xff] }
 0x15b   : > { %6317 = vmatpush1.bf16.msra.mxu0 %v6316_v61  ;;  %6349 = vmatpush1.bf16.msra.mxu1 %v6348_v25  ;;  %v5673_v61 = vld [vmem:[%s10404_s4 + $0x8f0] sm:$0xff]  ;;  %v5676_v25 = vld [vmem:[%s10404_s4 + $0x908] sm:$0xff] }
 0x15c   : > { %6319 = vmatprep.subr.bf16.mxu0 %v6318_v62  ;;  %6351 = vmatprep.subr.bf16.mxu1 %v6350_v56  ;;  %v5680_v56 = vld [vmem:[%s10404_s4 + $0x928] sm:$0xff]  ;;  %v6324_v62 = vpack.c.bf16 %v5671_v26, %v5667_v47  ;;  %v5686_v47 = vld [vmem:[%s10404_s4 + $0x958] sm:$0xff] }
 0x15d   : > { %2121 = vmatmul.mubr.f32.gmra.mrb[4].mxu0 %v8575_v20  ;;  %2282 = vmatmul.mubr.f32.gmra.mrb[4].mxu1 %v8575_v20  ;;  %v6356_v20 = vpack.c.bf16 %v5673_v61, %v5669_v52  ;;  %v6326_v51 = vpack.c.bf16 %v5680_v56, %v5676_v25  ;;  %v5690_v26 = vld [vmem:[%s10404_s4 + $0x978] sm:$0xff]  ;;  %v5687_v52 = vld [vmem:[%s10404_s4 + $0x960] sm:$0xff]  ;;  %v5685_v56 = vld [vmem:[%s10404_s4 + $0x950] sm:$0xff] }
 0x15e   : > { %2126 = vmatprep.mubr.f32.mxu0 %v7295_v34  ;;  %2287 = vmatprep.mubr.f32.mxu1 %v7295_v34  ;;  %v6362_v25 = vpack.c.bf16 %v5690_v26, %v5686_v47  ;;  %v5700_v47 = vld [vmem:[%s10404_s4 + $0x9c8] sm:$0xff] }
 0x15f   : > { %6321 = vmatpush1.bf16.msra.mxu0 %v6320_v39  ;;  %6353 = vmatpush1.bf16.msra.mxu1 %v6352_v49  ;;  %v5684_v39 = vld [vmem:[%s10404_s4 + $0x948] sm:$0xff] }
 0x160   : > { %6323 = vmatprep.subr.bf16.mxu0 %v6322_v55  ;;  %6355 = vmatprep.subr.bf16.mxu1 %v6354_v58  ;;  %v5688_v49 = vld [vmem:[%s10404_s4 + $0x968] sm:$0xff]  ;;  %v6328_v55 = vpack.c.bf16 %v5679_v23, %v5675_v57  ;;  %v5683_v58 = vld [vmem:[%s10404_s4 + $0x940] sm:$0xff]  ;;  %v5698_v57 = vld [vmem:[%s10404_s4 + $0x9b8] sm:$0xff] }
 0x161   : > { %2127 = vmatmul.mubr.f32.gmra.mrb[6].mxu0 %v8607_v45  ;;  %2288 = vmatmul.mubr.f32.gmra.mrb[6].mxu1 %v8607_v45  ;;  %v6360_v45 = vpack.c.bf16 %v5681_v9, %v5677_v29  ;;  %v6330_v61 = vpack.c.bf16 %v5688_v49, %v5684_v39  ;;  %v6332_v23 = vpack.c.bf16 %v5687_v52, %v5683_v58  ;;  %v5693_v39 = vld [vmem:[%s10404_s4 + $0x990] sm:$0xff]  ;;  %v5704_v26 = vld [vmem:[%s10404_s4 + $0x9e8] sm:$0xff]  ;;  %v5699_v52 = vld [vmem:[%s10404_s4 + $0x9c0] sm:$0xff] }
 0x162   : > { %2132 = vmatprep.mubr.f32.mxu0 %v7295_v34  ;;  %2293 = vmatprep.mubr.f32.mxu1 %v7295_v34  ;;  %v5697_v49 = vld [vmem:[%s10404_s4 + $0x9b0] sm:$0xff] }
 0x163   : > { %6325 = vmatpush1.bf16.msra.mxu0 %v6324_v62  ;;  %6357 = vmatpush1.bf16.msra.mxu1 %v6356_v20  ;;  %v5696_v62 = vld [vmem:[%s10404_s4 + $0x9a8] sm:$0xff]  ;;  %v5694_v20 = vld [vmem:[%s10404_s4 + $0x998] sm:$0xff] }
 0x164   : > { %6327 = vmatprep.subr.bf16.mxu0 %v6326_v51  ;;  %6359 = vmatprep.subr.bf16.mxu1 %v6358_v5  ;;  %v5691_v51 = vld [vmem:[%s10404_s4 + $0x980] sm:$0xff]  ;;  %v6334_v29 = vpack.c.bf16 %v5696_v62, %v5692_v63  ;;  %v6366_v9 = vpack.c.bf16 %v5698_v57, %v5694_v20  ;;  %v5705_v63 = vld [vmem:[%s10404_s4 + $0x9f0] sm:$0xff]  ;;  %v5708_v62 = vld [vmem:[%s10404_s4 + $0xa08] sm:$0xff] }
 0x165   : > { %2133 = vmatmul.mubr.f32.gmra.mrb[8].mxu0 %v8639_v31  ;;  %2294 = vmatmul.mubr.f32.gmra.mrb[8].mxu1 %v8639_v31  ;;  %v6364_v31 = vpack.c.bf16 %v5689_v12, %v5685_v56  ;;  %v5695_v5 = vld [vmem:[%s10404_s4 + $0x9a0] sm:$0xff]  ;;  %v5701_v12 = vld [vmem:[%s10404_s4 + $0x9d0] sm:$0xff]  ;;  %v5712_v20 = vld [vmem:[%s10404_s4 + $0xa28] sm:$0xff] }
 0x166   : > { %2138 = vmatprep.mubr.f32.mxu0 %v7295_v34  ;;  %2299 = vmatprep.mubr.f32.mxu1 %v7295_v34  ;;  %v6336_v58 = vpack.c.bf16 %v5695_v5, %v5691_v51  ;;  %v5710_v57 = vld [vmem:[%s10404_s4 + $0xa18] sm:$0xff]  ;;  %v6374_v51 = vpack.c.bf16 %v5712_v20, %v5708_v62  ;;  %v5723_v20 = vld [vmem:[%s10404_s4 + $0xa80] sm:$0xff] }
 0x167   : > { %6329 = vmatpush1.bf16.msra.mxu0 %v6328_v55  ;;  %6361 = vmatpush1.bf16.msra.mxu1 %v6360_v45  ;;  %v5702_v55 = vld [vmem:[%s10404_s4 + $0x9d8] sm:$0xff] }
 0x168   : > { %6331 = vmatprep.subr.bf16.mxu0 %v6330_v61  ;;  %6363 = vmatprep.subr.bf16.mxu1 %v6362_v25  ;;  %v5706_v45 = vld [vmem:[%s10404_s4 + $0x9f8] sm:$0xff]  ;;  %v5703_v61 = vld [vmem:[%s10404_s4 + $0x9e0] sm:$0xff]  ;;  %v6338_v25 = vpack.c.bf16 %v5704_v26, %v5700_v47 }
 0x169   : > { %2139 = vmatmul.mubr.f32.gmra.mrb[10].mxu0 %v8665_v60  ;;  %2300 = vmatmul.mubr.f32.gmra.mrb[10].mxu1 %v8665_v60  ;;  %v6368_v60 = vpack.c.bf16 %v5697_v49, %v5693_v39  ;;  %v6370_v56 = vpack.c.bf16 %v5706_v45, %v5702_v55  ;;  %v5719_v47 = vld [vmem:[%s10404_s4 + $0xa60] sm:$0xff]  ;;  %v2499_v55 = vrot.slane %v7765_v27, 3 }
 0x16a   : > { %2144 = vmatprep.mubr.f32.mxu0 %v7295_v34  ;;  %2305 = vmatprep.mubr.f32.mxu1 %v7295_v34 }
 0x16b   : > { %6333 = vmatpush1.bf16.msra.mxu0 %v6332_v23  ;;  %6365 = vmatpush1.bf16.msra.mxu1 %v6364_v31  ;;  %v5714_v23 = vld [vmem:[%s10404_s4 + $0xa38] sm:$0xff]  ;;  %v6340_v31 = vpack.c.bf16 %v5703_v61, %v5699_v52  ;;  %v5721_v52 = vld [vmem:[%s10404_s4 + $0xa70] sm:$0xff]  ;;  %v5724_v61 = vld [vmem:[%s10404_s4 + $0xa88] sm:$0xff] }
 0x16c   : > { %6335 = vmatprep.subr.bf16.mxu0 %v6334_v29  ;;  %6367 = vmatprep.subr.bf16.mxu1 %v6366_v9  ;;  %v6406_v5 = vpack.c.bf16 %v5714_v23, %v5710_v57  ;;  %v5718_v29 = vld [vmem:[%s10404_s4 + $0xa58] sm:$0xff]  ;;  %v5727_v57 = vld [vmem:[%s10404_s4 + $0xaa0] sm:$0xff] }
 0x16d   : > { %2145 = vmatmul.mubr.f32.gmra.mrb[12].mxu0 %v8673_v13  ;;  %2306 = vmatmul.mubr.f32.gmra.mrb[12].mxu1 %v8673_v13  ;;  %v6372_v13 = vpack.c.bf16 %v5705_v63, %v5701_v12  ;;  %v5722_v9 = vld [vmem:[%s10404_s4 + $0xa78] sm:$0xff] }
 0x16e   : > { %2150 = vmatprep.mubr.f32.mxu0 %v7295_v34  ;;  %2311 = vmatprep.mubr.f32.mxu1 %v7295_v34  ;;  %v5730_v12 = vld [vmem:[%s10404_s4 + $0xab8] sm:$0xff] }
 0x16f   : > { %6337 = vmatpush1.bf16.msra.mxu0 %v6336_v58  ;;  %6369 = vmatpush1.bf16.msra.mxu1 %v6368_v60  ;;  %v6410_v58 = vpack.c.bf16 %v5722_v9, %v5718_v29  ;;  %v5717_v60 = vld [vmem:[%s10404_s4 + $0xa50] sm:$0xff]  ;;  %v5735_v29 = vld [vmem:[%s10404_s4 + $0xae0] sm:$0xff] }
 0x170   : > { %6339 = vmatprep.subr.bf16.mxu0 %v6338_v25  ;;  %6371 = vmatprep.subr.bf16.mxu1 %v6370_v56  ;;  %v5728_v25 = vld [vmem:[%s10404_s4 + $0xaa8] sm:$0xff]  ;;  %v5726_v56 = vld [vmem:[%s10404_s4 + $0xa98] sm:$0xff]  ;;  %v6412_v62 = vpack.c.bf16 %v5721_v52, %v5717_v60 }
 0x171   : > { %2151 = vmatmul.mubr.f32.gmra.mrb[14].mxu0 %v8681_v14  ;;  %2312 = vmatmul.mubr.f32.gmra.mrb[14].mxu1 %v8681_v14  ;;  %v5707_v14 = vld [vmem:[%s10404_s4 + $0xa00] sm:$0xff]  ;;  %v5746_v60 = vld [vmem:[%s10404_s4 + $0xb38] sm:$0xff] }
 0x172   : > { %2156 = vmatprep.mubr.f32.mxu0 %v7295_v34  ;;  %2317 = vmatprep.mubr.f32.mxu1 %v7295_v34 }
 0x173   : > { %6341 = vmatpush1.bf16.msra.mxu0 %v6340_v31  ;;  %6373 = vmatpush1.bf16.msra.mxu1 %v6372_v13  ;;  %v2501_v31 = vrot.slane %v7807_v53, 3  ;;  %v6382_v13 = vpack.c.bf16 %v5728_v25, %v5724_v61  ;;  %v5739_v25 = vld [vmem:[%s10404_s4 + $0xb00] sm:$0xff] }
 0x174   : > { %6375 = vmatprep.subr.bf16.mxu0 %v6374_v51  ;;  %6407 = vmatprep.subr.bf16.mxu1 %v6406_v5  ;;  %v6414_v51 = vpack.c.bf16 %v5730_v12, %v5726_v56  ;;  %v5725_v5 = vld [vmem:[%s10404_s4 + $0xa90] sm:$0xff]  ;;  %v5743_v56 = vld [vmem:[%s10404_s4 + $0xb20] sm:$0xff] }
 0x175   : > { %2157 = vmatmul.mubr.f32.gmra.mrb[16].mxu0 %v8689_v4  ;;  %2318 = vmatmul.mubr.f32.gmra.mrb[16].mxu1 %v8689_v4  ;;  %v5711_v4 = vld [vmem:[%s10404_s4 + $0xa20] sm:$0xff]  ;;  %v2502_v9 = vsel %vm2495_vm2, %v2499_v55, %v2501_v31 }
 0x176   : > { %2162 = vmatprep.mubr.f32.mxu0 %v7295_v34  ;;  %2323 = vmatprep.mubr.f32.mxu1 %v7295_v34  ;;  %v6376_v39 = vpack.c.bf16 %v5711_v4, %v5707_v14  ;;  %v5729_v14 = vld [vmem:[%s10404_s4 + $0xab0] sm:$0xff]  ;;  %v5732_v4 = vld [vmem:[%s10404_s4 + $0xac8] sm:$0xff] }
 0x179   : > { %2163 = vmatmul.mubr.f32.gmra.mrb[18].mxu0 %v8697_v21  ;;  %2324 = vmatmul.mubr.f32.gmra.mrb[18].mxu1 %v8697_v21  ;;  %v5709_v21 = vld [vmem:[%s10404_s4 + $0xa10] sm:$0xff] }
 0x17a   : > { %2168 = vmatprep.mubr.f32.mxu0 %v7295_v34  ;;  %2329 = vmatprep.mubr.f32.mxu1 %v7295_v34 }
 0x17d   : > { %2169 = vmatmul.mubr.f32.gmra.mrb[20].mxu0 %v8705_v32  ;;  %2330 = vmatmul.mubr.f32.gmra.mrb[20].mxu1 %v8705_v32  ;;  %v2496_v32 = vrot.slane %v7691_v43, 3 }
 0x17e   : > { %2174 = vmatprep.mubr.f32.mxu0 %v7295_v34  ;;  %2335 = vmatprep.mubr.f32.mxu1 %v7295_v34 }
 0x181   : > { %2175 = vmatmul.mubr.f32.gmra.mrb[22].mxu0 %v8713_v7  ;;  %2336 = vmatmul.mubr.f32.gmra.mrb[22].mxu1 %v8713_v7  ;;  %v2497_v7 = vrot.slane %v7725_v2, 3 }
 0x182   : > { %2180 = vmatprep.mubr.f32.mxu0 %v7295_v34  ;;  %2341 = vmatprep.mubr.f32.mxu1 %v7295_v34 }
 0x183   : > { %v2498_v26 = vsel %vm2495_vm2, %v2496_v32, %v2497_v7  ;;  %v2500_v23 = vsel %vm2495_vm2, %v2497_v7, %v2499_v55  ;;  %v5738_v32 = vld [vmem:[%s10404_s4 + $0xaf8] sm:$0xff]  ;;  %v6384_v7 = vpack.c.bf16 %v5727_v57, %v5723_v20  ;;  %v5744_v55 = vld [vmem:[%s10404_s4 + $0xb28] sm:$0xff]  ;;  %v5741_v57 = vld [vmem:[%s10404_s4 + $0xb10] sm:$0xff] }
 0x185   : > { %2181 = vmatmul.mubr.f32.gmra.mrb[24].mxu0 %v8721_v40  ;;  %2342 = vmatmul.mubr.f32.gmra.mrb[24].mxu1 %v8721_v40  ;;  %v5716_v40 = vld [vmem:[%s10404_s4 + $0xa48] sm:$0xff] }
 0x186   : > { %2186 = vmatprep.mubr.f32.mxu0 %v7295_v34  ;;  %2347 = vmatprep.mubr.f32.mxu1 %v7295_v34 }
 0x189   : > { %2187 = vmatmul.mubr.f32.gmra.mrb[26].mxu0 %v8742_v54  ;;  %2348 = vmatmul.mubr.f32.gmra.mrb[26].mxu1 %v8742_v54  ;;  %v5720_v54 = vld [vmem:[%s10404_s4 + $0xa68] sm:$0xff] }
 0x18a   : > { %2192 = vmatprep.mubr.f32.mxu0 %v7295_v34  ;;  %2353 = vmatprep.mubr.f32.mxu1 %v7295_v34  ;;  %v6378_v45 = vpack.c.bf16 %v5720_v54, %v5716_v40  ;;  %v6416_v40 = vpack.c.bf16 %v5729_v14, %v5725_v5  ;;  %v5731_v54 = vld [vmem:[%s10404_s4 + $0xac0] sm:$0xff]  ;;  %v5754_v5 = vld [vmem:[%s10404_s4 + $0xb78] sm:$0xff]  ;;  %v6392_v14 = vpack.c.bf16 %v5743_v56, %v5739_v25  ;;  %v5757_v56 = vld [vmem:[%s10404_s4 + $0xb90] sm:$0xff] }
 0x18b   : > { %v6388_v52 = vpack.c.bf16 %v5735_v29, %v5731_v54  ;;  %v5749_v29 = vld [vmem:[%s10404_s4 + $0xb50] sm:$0xff] }
 0x18d   : > { %2193 = vmatmul.mubr.f32.gmra.mrb[28].mxu0 %v8034_v46  ;;  %2354 = vmatmul.mubr.f32.gmra.mrb[28].mxu1 %v8034_v46  ;;  %v5713_v46 = vld [vmem:[%s10404_s4 + $0xa30] sm:$0xff] }
 0x18e   : > { %2198 = vmatprep.mubr.f32.mxu0 %v7295_v34  ;;  %2359 = vmatprep.mubr.f32.mxu1 %v7295_v34  ;;  %v6408_v49 = vpack.c.bf16 %v5713_v46, %v5709_v21  ;;  %v5736_v21 = vld [vmem:[%s10404_s4 + $0xae8] sm:$0xff]  ;;  %v5734_v46 = vld [vmem:[%s10404_s4 + $0xad8] sm:$0xff] }
 0x191   : > { %2199 = vmatmul.mubr.f32.gmra.mrb[30].mxu0 %v8058_v41  ;;  %2360 = vmatmul.mubr.f32.gmra.mrb[30].mxu1 %v8058_v41  ;;  %v5715_v41 = vld [vmem:[%s10404_s4 + $0xa40] sm:$0xff] }
 0x192   : > { %2609 = vmatprep.mubr.f32.mxu0 %v7295_v34  ;;  %2770 = vmatprep.mubr.f32.mxu1 %v7295_v34  ;;  %v6380_v63 = vpack.c.bf16 %v5719_v47, %v5715_v41  ;;  %v6418_v41 = vpack.c.bf16 %v5738_v32, %v5734_v46  ;;  %v5733_v47 = vld [vmem:[%s10404_s4 + $0xad0] sm:$0xff]  ;;  %v5751_v46 = vld [vmem:[%s10404_s4 + $0xb60] sm:$0xff] }
 0x195   : > { %2610 = vmatmul.mubr.f32.vlgmr.msra.gmra.mrb[0].mxu0 %v2498_v26  ;;  %2771 = vmatmul.mubr.f32.vlgmr.msra.gmra.mrb[0].mxu1 %v2498_v26  ;;  %v5737_v26 = vld [vmem:[%s10404_s4 + $0xaf0] sm:$0xff] }
 0x196   : > { %6377 = vmatpush1.bf16.msra.mxu0 %v6376_v39  ;;  %6409 = vmatpush1.bf16.msra.mxu1 %v6408_v49  ;;  %v2503_v39 = vrot.slane %v7849_v18, 3  ;;  %v6386_v49 = vpack.c.bf16 %v5736_v21, %v5732_v4  ;;  %v6420_v61 = vpack.c.bf16 %v5737_v26, %v5733_v47  ;;  %v5747_v21 = vld [vmem:[%s10404_s4 + $0xb40] sm:$0xff]  ;;  %v5762_v47 = vld [vmem:[%s10404_s4 + $0xbb8] sm:$0xff] }
 0x197   : > { %2615 = vmatprep.mubr.f32.mxu0 %v7295_v34  ;;  %2776 = vmatprep.mubr.f32.mxu1 %v7295_v34  ;;  %v6396_v26 = vpack.c.bf16 %v5751_v46, %v5747_v21  ;;  %v5765_v46 = vld [vmem:[%s10404_s4 + $0xbd0] sm:$0xff] }
 0x198   : > { %6379 = vmatprep.subr.bf16.mxu0 %v6378_v45  ;;  %6411 = vmatprep.subr.bf16.mxu1 %v6410_v58  ;;  %v5740_v45 = vld [vmem:[%s10404_s4 + $0xb08] sm:$0xff]  ;;  %v5742_v58 = vld [vmem:[%s10404_s4 + $0xb18] sm:$0xff]  ;;  %v2504_v12 = vsel %vm2495_vm2, %v2501_v31, %v2503_v39 }
 0x199   : > { %2616 = vmatmul.mubr.f32.gmra.mrb[2].mxu0 %v2500_v23  ;;  %2777 = vmatmul.mubr.f32.gmra.mrb[2].mxu1 %v2500_v23  ;;  %v6422_v20 = vpack.c.bf16 %v5746_v60, %v5742_v58  ;;  %v5745_v23 = vld [vmem:[%s10404_s4 + $0xb30] sm:$0xff]  ;;  %v5752_v31 = vld [vmem:[%s10404_s4 + $0xb68] sm:$0xff]  ;;  %v5759_v58 = vld [vmem:[%s10404_s4 + $0xba0] sm:$0xff] }
 0x19a   : > { %2621 = vmatprep.mubr.f32.mxu0 %v7295_v34  ;;  %2782 = vmatprep.mubr.f32.mxu1 %v7295_v34  ;;  %v6424_v4 = vpack.c.bf16 %v5745_v23, %v5741_v57  ;;  %v5770_v57 = vld [vmem:[%s10404_s4 + $0xbf8] sm:$0xff] }
 0x19b   : > { %6381 = vmatpush1.bf16.msra.mxu0 %v6380_v63  ;;  %6413 = vmatpush1.bf16.msra.mxu1 %v6412_v62  ;;  %v2505_v63 = vrot.slane %v7893_v48, 3  ;;  %v6390_v62 = vpack.c.bf16 %v5744_v55, %v5740_v45  ;;  %v5755_v55 = vld [vmem:[%s10404_s4 + $0xb80] sm:$0xff] }
 0x19c   : > { %6383 = vmatprep.subr.bf16.mxu0 %v6382_v13  ;;  %6415 = vmatprep.subr.bf16.mxu1 %v6414_v51  ;;  %v5748_v13 = vld [vmem:[%s10404_s4 + $0xb48] sm:$0xff]  ;;  %v5750_v51 = vld [vmem:[%s10404_s4 + $0xb58] sm:$0xff]  ;;  %v6400_v23 = vpack.c.bf16 %v5759_v58, %v5755_v55  ;;  %v2515_v55 = vrot.slane %v8070_v44, 3 }
 0x19d   : > { %2622 = vmatmul.mubr.f32.gmra.mrb[4].mxu0 %v2502_v9  ;;  %2783 = vmatmul.mubr.f32.gmra.mrb[4].mxu1 %v2502_v9  ;;  %v2506_v32 = vsel %vm2495_vm2, %v2503_v39, %v2505_v63  ;;  %v6426_v54 = vpack.c.bf16 %v5754_v5, %v5750_v51  ;;  %v5753_v9 = vld [vmem:[%s10404_s4 + $0xb70] sm:$0xff]  ;;  %v5760_v39 = vld [vmem:[%s10404_s4 + $0xba8] sm:$0xff]  ;;  %v5767_v51 = vld [vmem:[%s10404_s4 + $0xbe0] sm:$0xff] }
 0x19e   : > { %2627 = vmatprep.mubr.f32.mxu0 %v7295_v34  ;;  %2788 = vmatprep.mubr.f32.mxu1 %v7295_v34  ;;  %v6428_v45 = vpack.c.bf16 %v5753_v9, %v5749_v29  ;;  %v5778_v29 = vld [vmem:[%s10404_s4 + $0xc38] sm:$0xff] }
 0x19f   : > { %6385 = vmatpush1.bf16.msra.mxu0 %v6384_v7  ;;  %6417 = vmatpush1.bf16.msra.mxu1 %v6416_v40  ;;  %v2507_v7 = vrot.slane %v7950_v17, 3  ;;  %v6394_v40 = vpack.c.bf16 %v5752_v31, %v5748_v13  ;;  %v5763_v31 = vld [vmem:[%s10404_s4 + $0xbc0] sm:$0xff] }
 0x1a0   : > { %6387 = vmatprep.subr.bf16.mxu0 %v6386_v49  ;;  %6419 = vmatprep.subr.bf16.mxu1 %v6418_v41  ;;  %v5756_v49 = vld [vmem:[%s10404_s4 + $0xb88] sm:$0xff]  ;;  %v5758_v41 = vld [vmem:[%s10404_s4 + $0xb98] sm:$0xff]  ;;  %v6404_v9 = vpack.c.bf16 %v5767_v51, %v5763_v31 }
 0x1a1   : > { %2628 = vmatmul.mubr.f32.gmra.mrb[6].mxu0 %v2504_v12  ;;  %2789 = vmatmul.mubr.f32.gmra.mrb[6].mxu1 %v2504_v12  ;;  %v2508_v60 = vsel %vm2495_vm2, %v2505_v63, %v2507_v7  ;;  %v6430_v25 = vpack.c.bf16 %v5762_v47, %v5758_v41  ;;  %v5761_v12 = vld [vmem:[%s10404_s4 + $0xbb0] sm:$0xff]  ;;  %v5768_v63 = vld [vmem:[%s10404_s4 + $0xbe8] sm:$0xff]  ;;  %v2513_v41 = vrot.slane %v8050_v30, 3  ;;  %v5782_v51 = vld [vmem:[%s10404_s4 + $0xc58] sm:$0xff] }
 0x1a2   : > { %2633 = vmatprep.mubr.f32.mxu0 %v7295_v34  ;;  %2794 = vmatprep.mubr.f32.mxu1 %v7295_v34  ;;  %v6432_v13 = vpack.c.bf16 %v5761_v12, %v5757_v56  ;;  %v2521_v56 = vrot.slane %v8113_v8, 3  ;;  %v5784_v31 = vld [vmem:[%s10404_s4 + $0xc68] sm:$0xff] }
 0x1a3   : > { %6389 = vmatpush1.bf16.msra.mxu0 %v6388_v52  ;;  %6421 = vmatpush1.bf16.msra.mxu1 %v6420_v61  ;;  %v2509_v52 = vrot.slane %v7984_v38, 3  ;;  %v6398_v61 = vpack.c.bf16 %v5760_v39, %v5756_v49  ;;  %v2516_v58 = vsel %vm2495_vm2, %v2513_v41, %v2515_v55 }
 0x1a4   : > { %6391 = vmatprep.subr.bf16.mxu0 %v6390_v62  ;;  %6423 = vmatprep.subr.bf16.mxu1 %v6422_v20  ;;  %v5764_v62 = vld [vmem:[%s10404_s4 + $0xbc8] sm:$0xff]  ;;  %v5766_v20 = vld [vmem:[%s10404_s4 + $0xbd8] sm:$0xff] }
 0x1a5   : > { %2634 = vmatmul.mubr.f32.gmra.mrb[8].mxu0 %v2506_v32  ;;  %2795 = vmatmul.mubr.f32.gmra.mrb[8].mxu1 %v2506_v32  ;;  %v2510_v5 = vsel %vm2495_vm2, %v2507_v7, %v2509_v52  ;;  %v6434_v21 = vpack.c.bf16 %v5770_v57, %v5766_v20  ;;  %v5769_v32 = vld [vmem:[%s10404_s4 + $0xbf0] sm:$0xff]  ;;  %v5776_v7 = vld [vmem:[%s10404_s4 + $0xc28] sm:$0xff]  ;;  %v2997_v57 = vrot.slane %v7691_v43, 4  ;;  %v5786_v43 = vld [vmem:[%s10404_s4 + $0xc78] sm:$0xff] }
 0x1a6   : > { %2639 = vmatprep.mubr.f32.mxu0 %v7295_v34  ;;  %2800 = vmatprep.mubr.f32.mxu1 %v7295_v34  ;;  %v6436_v49 = vpack.c.bf16 %v5769_v32, %v5765_v46  ;;  %v5773_v20 = vld [vmem:[%s10404_s4 + $0xc10] sm:$0xff]  ;;  %v6474_v32 = vpack.c.bf16 %v5786_v43, %v5782_v51 }
 0x1a7   : > { %6393 = vmatpush1.bf16.msra.mxu0 %v6392_v14  ;;  %6425 = vmatpush1.bf16.msra.mxu1 %v6424_v4  ;;  %v2511_v14 = vrot.slane %v8024_v15, 3  ;;  %v6402_v4 = vpack.c.bf16 %v5768_v63, %v5764_v62  ;;  %v2524_v62 = vsel %vm2495_vm2, %v2521_v56, %v2523_v24  ;;  %v5771_v63 = vld [vmem:[%s10404_s4 + $0xc00] sm:$0xff]  ;;  %v5797_v51 = vld [vmem:[%s10404_s4 + $0xcd0] sm:$0xff] }
 0x1a8   : > { %6395 = vmatprep.subr.bf16.mxu0 %v6394_v40  ;;  %6427 = vmatprep.subr.bf16.mxu1 %v6426_v54  ;;  %v5772_v40 = vld [vmem:[%s10404_s4 + $0xc08] sm:$0xff]  ;;  %v5774_v54 = vld [vmem:[%s10404_s4 + $0xc18] sm:$0xff]  ;;  %v5775_v24 = vld [vmem:[%s10404_s4 + $0xc20] sm:$0xff] }
 0x1a9   : > { %2640 = vmatmul.mubr.f32.gmra.mrb[10].mxu0 %v2508_v60  ;;  %2801 = vmatmul.mubr.f32.gmra.mrb[10].mxu1 %v2508_v60  ;;  %v2512_v39 = vsel %vm2495_vm2, %v2509_v52, %v2511_v14  ;;  %v6438_v47 = vpack.c.bf16 %v5776_v7, %v5772_v40  ;;  %v2517_v60 = vrot.slane %v8080_v37, 3  ;;  %v5781_v40 = vld [vmem:[%s10404_s4 + $0xc50] sm:$0xff] }
 0x1aa   : > { %2645 = vmatprep.mubr.f32.mxu0 %v7295_v34  ;;  %2806 = vmatprep.mubr.f32.mxu1 %v7295_v34  ;;  %v5785_v7 = vld [vmem:[%s10404_s4 + $0xc70] sm:$0xff] }
 0x1ab   : > { %6397 = vmatpush1.bf16.msra.mxu0 %v6396_v26  ;;  %6429 = vmatpush1.bf16.msra.mxu1 %v6428_v45  ;;  %v6470_v26 = vpack.c.bf16 %v5778_v29, %v5774_v54  ;;  %v2514_v45 = vsel %vm2495_vm2, %v2511_v14, %v2513_v41  ;;  %v2518_v52 = vsel %vm2495_vm2, %v2515_v55, %v2517_v60  ;;  %v5783_v14 = vld [vmem:[%s10404_s4 + $0xc60] sm:$0xff]  ;;  %v5788_v54 = vld [vmem:[%s10404_s4 + $0xc88] sm:$0xff]  ;;  %v3002_v55 = vrot.slane %v7807_v53, 4  ;;  %v5801_v43 = vld [vmem:[%s10404_s4 + $0xcf0] sm:$0xff] }
 0x1ac   : > { %6399 = vmatprep.subr.bf16.mxu0 %v6398_v61  ;;  %6431 = vmatprep.subr.bf16.mxu1 %v6430_v25  ;;  %v2519_v61 = vrot.slane %v8104_v3, 3  ;;  %v5792_v29 = vld [vmem:[%s10404_s4 + $0xca8] sm:$0xff]  ;;  %v6476_v41 = vpack.c.bf16 %v5785_v7, %v5781_v40  ;;  %v3006_v7 = vrot.slane %v7893_v48, 4 }
 0x1ad   : > { %2646 = vmatmul.mubr.f32.gmra.mrb[12].mxu0 %v2510_v5  ;;  %2807 = vmatmul.mubr.f32.gmra.mrb[12].mxu1 %v2510_v5 }
 0x1ae   : > { %2651 = vmatprep.mubr.f32.mxu0 %v7295_v34  ;;  %2812 = vmatprep.mubr.f32.mxu1 %v7295_v34  ;;  %v2520_v25 = vsel %vm2495_vm2, %v2517_v60, %v2519_v61  ;;  %v2522_v12 = vsel %vm2495_vm2, %v2519_v61, %v2521_v56  ;;  %v5793_v61 = vld [vmem:[%s10404_s4 + $0xcb0] sm:$0xff]  ;;  %v5800_v56 = vld [vmem:[%s10404_s4 + $0xce8] sm:$0xff] }
 0x1af   : > { %6401 = vmatpush1.bf16.msra.mxu0 %v6400_v23  ;;  %6433 = vmatpush1.bf16.msra.mxu1 %v6432_v13  ;;  %v2998_v23 = vrot.slane %v7725_v2, 4  ;;  %v5780_v13 = vld [vmem:[%s10404_s4 + $0xc48] sm:$0xff]  ;;  %v6440_v2 = vpack.c.bf16 %v5775_v24, %v5771_v63 }
 0x1b0   : > { %6403 = vmatprep.subr.bf16.mxu0 %v6402_v4  ;;  %6435 = vmatprep.subr.bf16.mxu1 %v6434_v21  ;;  %v3000_v21 = vrot.slane %v7765_v27, 4  ;;  %v6442_v46 = vpack.c.bf16 %v5784_v31, %v5780_v13 }
 0x1b1   : > { %2652 = vmatmul.mubr.f32.gmra.mrb[14].mxu0 %v2512_v39  ;;  %2813 = vmatmul.mubr.f32.gmra.mrb[14].mxu1 %v2512_v39  ;;  %v2999_v4 = vsel %vm2996_vm3, %v2997_v57, %v2998_v23 }
 0x1b2   : > { %2657 = vmatprep.mubr.f32.mxu0 %v7295_v34  ;;  %2818 = vmatprep.mubr.f32.mxu1 %v7295_v34  ;;  %v9339_v57 = vsel %vm2996_vm3, %v3000_v21, %v3002_v55 }
 0x1b3   : > { %6405 = vmatpush1.bf16.msra.mxu0 %v6404_v9  ;;  %6437 = vmatpush1.bf16.msra.mxu1 %v6436_v49  ;;  %v5790_v9 = vld [vmem:[%s10404_s4 + $0xc98] sm:$0xff] }
 0x1b4   : > { %6439 = vmatprep.subr.bf16.mxu0 %v6438_v47  ;;  %6471 = vmatprep.subr.bf16.mxu1 %v6470_v26  ;;  %v5794_v49 = vld [vmem:[%s10404_s4 + $0xcb8] sm:$0xff]  ;;  %v5787_v47 = vld [vmem:[%s10404_s4 + $0xc80] sm:$0xff] }
 0x1b5   : > { %2658 = vmatmul.mubr.f32.gmra.mrb[16].mxu0 %v2514_v45  ;;  %2819 = vmatmul.mubr.f32.gmra.mrb[16].mxu1 %v2514_v45  ;;  %v5791_v26 = vld [vmem:[%s10404_s4 + $0xca0] sm:$0xff]  ;;  %v3001_v45 = vsel %vm2996_vm3, %v2998_v23, %v3000_v21  ;;  %v6478_v60 = vpack.c.bf16 %v5794_v49, %v5790_v9  ;;  %v3004_v23 = vrot.slane %v7849_v18, 4  ;;  %v6484_v21 = vpack.c.bf16 %v5801_v43, %v5797_v51  ;;  %v5805_v9 = vld [vmem:[%s10404_s4 + $0xd10] sm:$0xff] }
 0x1b6   : > { %2663 = vmatprep.mubr.f32.mxu0 %v7295_v34  ;;  %2824 = vmatprep.mubr.f32.mxu1 %v7295_v34  ;;  %v6448_v63 = vpack.c.bf16 %v5791_v26, %v5787_v47  ;;  %v5809_v49 = vld [vmem:[%s10404_s4 + $0xd30] sm:$0xff]  ;;  %v5814_v47 = vld [vmem:[%s10404_s4 + $0xd58] sm:$0xff]  ;;  %v5823_v51 = vld [vmem:[%s10404_s4 + $0xda0] sm:$0xff] }
 0x1b7   : > { %v9371_v40 = vsel %vm2996_vm3, %v3002_v55, %v3004_v23  ;;  %v5818_v26 = vld [vmem:[%s10404_s4 + $0xd78] sm:$0xff]  ;;  %v6488_v55 = vpack.c.bf16 %v5809_v49, %v5805_v9  ;;  %v5827_v9 = vld [vmem:[%s10404_s4 + $0xdc0] sm:$0xff] }
 0x1b8   : > { %v5831_v49 = vld [vmem:[%s10404_s4 + $0xde0] sm:$0xff] }
 0x1b9   : > { %2664 = vmatmul.mubr.f32.gmra.mrb[18].mxu0 %v2516_v58  ;;  %2825 = vmatmul.mubr.f32.gmra.mrb[18].mxu1 %v2516_v58  ;;  %v6446_v58 = vpack.c.bf16 %v5792_v29, %v5788_v54 }
 0x1ba   : > { %2669 = vmatprep.mubr.f32.mxu0 %v7295_v34  ;;  %2830 = vmatprep.mubr.f32.mxu1 %v7295_v34 }
 0x1bd   : > { %2670 = vmatmul.mubr.f32.gmra.mrb[20].mxu0 %v2518_v52  ;;  %2831 = vmatmul.mubr.f32.gmra.mrb[20].mxu1 %v2518_v52  ;;  %v5789_v52 = vld [vmem:[%s10404_s4 + $0xc90] sm:$0xff] }
 0x1be   : > { %2675 = vmatprep.mubr.f32.mxu0 %v7295_v34  ;;  %2836 = vmatprep.mubr.f32.mxu1 %v7295_v34  ;;  %v6480_v24 = vpack.c.bf16 %v5793_v61, %v5789_v52  ;;  %v9403_v52 = vsel %vm2996_vm3, %v3004_v23, %v3006_v7  ;;  %v3008_v61 = vrot.slane %v7950_v17, 4 }
 0x1c0   : > { %v9435_v43 = vsel %vm2996_vm3, %v3006_v7, %v3008_v61  ;;  %v5834_v7 = vld [vmem:[%s10404_s4 + $0xdf8] sm:$0xff] }
 0x1c1   : > { %2676 = vmatmul.mubr.f32.gmra.mrb[22].mxu0 %v2520_v25  ;;  %2837 = vmatmul.mubr.f32.gmra.mrb[22].mxu1 %v2520_v25  ;;  %v5796_v25 = vld [vmem:[%s10404_s4 + $0xcc8] sm:$0xff] }
 0x1c2   : > { %2681 = vmatprep.mubr.f32.mxu0 %v7295_v34  ;;  %2842 = vmatprep.mubr.f32.mxu1 %v7295_v34  ;;  %v6450_v13 = vpack.c.bf16 %v5800_v56, %v5796_v25  ;;  %v6490_v56 = vpack.c.bf16 %v5818_v26, %v5814_v47 }
 0x1c5   : > { %2682 = vmatmul.mubr.f32.gmra.mrb[24].mxu0 %v2522_v12  ;;  %2843 = vmatmul.mubr.f32.gmra.mrb[24].mxu1 %v2522_v12  ;;  %v5798_v12 = vld [vmem:[%s10404_s4 + $0xcd8] sm:$0xff] }
 0x1c6   : > { %2687 = vmatprep.mubr.f32.mxu0 %v7295_v34  ;;  %2848 = vmatprep.mubr.f32.mxu1 %v7295_v34 }
 0x1c9   : > { %2688 = vmatmul.mubr.f32.gmra.mrb[26].mxu0 %v2524_v62  ;;  %2849 = vmatmul.mubr.f32.gmra.mrb[26].mxu1 %v2524_v62  ;;  %v5802_v62 = vld [vmem:[%s10404_s4 + $0xcf8] sm:$0xff] }
 0x1ca   : > { %2693 = vmatprep.mubr.f32.mxu0 %v7295_v34  ;;  %2854 = vmatprep.mubr.f32.mxu1 %v7295_v34  ;;  %v6482_v31 = vpack.c.bf16 %v5802_v62, %v5798_v12  ;;  %v5813_v12 = vld [vmem:[%s10404_s4 + $0xd50] sm:$0xff] }
 0x1cb   : > { %v5817_v62 = vld [vmem:[%s10404_s4 + $0xd70] sm:$0xff] }
 0x1cd   : > { %2694 = vmatmul.mubr.f32.gmra.mrb[28].mxu0 %v8046_v28  ;;  %2855 = vmatmul.mubr.f32.gmra.mrb[28].mxu1 %v8046_v28  ;;  %v5777_v28 = vld [vmem:[%s10404_s4 + $0xc30] sm:$0xff] }
 0x1ce   : > { %2699 = vmatprep.mubr.f32.mxu0 %v7295_v34  ;;  %2860 = vmatprep.mubr.f32.mxu1 %v7295_v34  ;;  %v6472_v5 = vpack.c.bf16 %v5777_v28, %v5773_v20  ;;  %v5795_v20 = vld [vmem:[%s10404_s4 + $0xcc0] sm:$0xff] }
 0x1cf   : > { %v5799_v28 = vld [vmem:[%s10404_s4 + $0xce0] sm:$0xff] }
 0x1d1   : > { %2700 = vmatmul.mubr.f32.gmra.mrb[30].mxu0 %v8061_v42  ;;  %2861 = vmatmul.mubr.f32.gmra.mrb[30].mxu1 %v8061_v42  ;;  %v5779_v42 = vld [vmem:[%s10404_s4 + $0xc40] sm:$0xff] }
 0x1d2   : > { %3110 = vmatprep.mubr.f32.mxu0 %v7295_v34  ;;  %3271 = vmatprep.mubr.f32.mxu1 %v7295_v34  ;;  %v6444_v39 = vpack.c.bf16 %v5783_v14, %v5779_v42  ;;  %v5806_v42 = vld [vmem:[%s10404_s4 + $0xd18] sm:$0xff] }
 0x1d3   : > { %v5810_v14 = vld [vmem:[%s10404_s4 + $0xd38] sm:$0xff] }
 0x1d4   : > { %v6486_v29 = vpack.c.bf16 %v5810_v14, %v5806_v42  ;;  %v5821_v14 = vld [vmem:[%s10404_s4 + $0xd90] sm:$0xff] }
 0x1d5   : > { %3111 = vmatmul.mubr.f32.vlgmr.msra.gmra.mrb[0].mxu0 %v2999_v4  ;;  %3272 = vmatmul.mubr.f32.vlgmr.msra.gmra.mrb[0].mxu1 %v2999_v4  ;;  %v6452_v4 = vpack.c.bf16 %v5799_v28, %v5795_v20  ;;  %v5822_v20 = vld [vmem:[%s10404_s4 + $0xd98] sm:$0xff] }
 0x1d6   : > { %6441 = vmatpush1.bf16.msra.mxu0 %v6440_v2  ;;  %6473 = vmatpush1.bf16.msra.mxu1 %v6472_v5  ;;  %v5804_v2 = vld [vmem:[%s10404_s4 + $0xd08] sm:$0xff]  ;;  %v5826_v28 = vld [vmem:[%s10404_s4 + $0xdb8] sm:$0xff] }
 0x1d7   : > { %3116 = vmatprep.mubr.f32.mxu0 %v7295_v34  ;;  %3277 = vmatprep.mubr.f32.mxu1 %v7295_v34  ;;  %v5808_v5 = vld [vmem:[%s10404_s4 + $0xd28] sm:$0xff]  ;;  %v6494_v42 = vpack.c.bf16 %v5826_v28, %v5822_v20 }
 0x1d8   : > { %6443 = vmatprep.subr.bf16.mxu0 %v6442_v46  ;;  %6475 = vmatprep.subr.bf16.mxu1 %v6474_v32  ;;  %v5803_v46 = vld [vmem:[%s10404_s4 + $0xd00] sm:$0xff]  ;;  %v6454_v54 = vpack.c.bf16 %v5808_v5, %v5804_v2  ;;  %v3010_v2 = vrot.slane %v7984_v38, 4 }
 0x1d9   : > { %3117 = vmatmul.mubr.f32.gmra.mrb[2].mxu0 %v3001_v45  ;;  %3278 = vmatmul.mubr.f32.gmra.mrb[2].mxu1 %v3001_v45  ;;  %v5807_v32 = vld [vmem:[%s10404_s4 + $0xd20] sm:$0xff] }
 0x1da   : > { %3122 = vmatprep.mubr.f32.mxu0 %v7295_v34  ;;  %3283 = vmatprep.mubr.f32.mxu1 %v7295_v34  ;;  %v6456_v45 = vpack.c.bf16 %v5807_v32, %v5803_v46  ;;  %v5832_v46 = vld [vmem:[%s10404_s4 + $0xde8] sm:$0xff]  ;;  %v5830_v32 = vld [vmem:[%s10404_s4 + $0xdd8] sm:$0xff] }
 0x1db   : > { %6445 = vmatpush1.bf16.msra.mxu0 %v6444_v39  ;;  %6477 = vmatpush1.bf16.msra.mxu1 %v6476_v41  ;;  %v5812_v39 = vld [vmem:[%s10404_s4 + $0xd48] sm:$0xff]  ;;  %v6498_v26 = vpack.c.bf16 %v5834_v7, %v5830_v32  ;;  %v5839_v32 = vld [vmem:[%s10404_s4 + $0xe20] sm:$0xff]  ;;  %v5837_v7 = vld [vmem:[%s10404_s4 + $0xe10] sm:$0xff] }
 0x1dc   : > { %6447 = vmatprep.subr.bf16.mxu0 %v6446_v58  ;;  %6479 = vmatprep.subr.bf16.mxu1 %v6478_v60  ;;  %v5816_v41 = vld [vmem:[%s10404_s4 + $0xd68] sm:$0xff]  ;;  %v5811_v58 = vld [vmem:[%s10404_s4 + $0xd40] sm:$0xff] }
 0x1dd   : > { %3123 = vmatmul.mubr.f32.gmra.mrb[4].mxu0 %v9339_v57  ;;  %3284 = vmatmul.mubr.f32.gmra.mrb[4].mxu1 %v9339_v57  ;;  %v5815_v60 = vld [vmem:[%s10404_s4 + $0xd60] sm:$0xff]  ;;  %v6458_v25 = vpack.c.bf16 %v5816_v41, %v5812_v39  ;;  %v9467_v39 = vsel %vm2996_vm3, %v3008_v61, %v3010_v2  ;;  %v3012_v41 = vrot.slane %v8024_v15, 4  ;;  %v5838_v61 = vld [vmem:[%s10404_s4 + $0xe18] sm:$0xff] }
 0x1de   : > { %3128 = vmatprep.mubr.f32.mxu0 %v7295_v34  ;;  %3289 = vmatprep.mubr.f32.mxu1 %v7295_v34  ;;  %v6460_v23 = vpack.c.bf16 %v5815_v60, %v5811_v58  ;;  %v5836_v58 = vld [vmem:[%s10404_s4 + $0xe08] sm:$0xff] }
 0x1df   : > { %6449 = vmatpush1.bf16.msra.mxu0 %v6448_v63  ;;  %6481 = vmatpush1.bf16.msra.mxu1 %v6480_v24  ;;  %v5820_v63 = vld [vmem:[%s10404_s4 + $0xd88] sm:$0xff] }
 0x1e0   : > { %6451 = vmatprep.subr.bf16.mxu0 %v6450_v13  ;;  %6483 = vmatprep.subr.bf16.mxu1 %v6482_v31  ;;  %v5824_v24 = vld [vmem:[%s10404_s4 + $0xda8] sm:$0xff]  ;;  %v6492_v13 = vpack.c.bf16 %v5817_v62, %v5813_v12  ;;  %v5819_v31 = vld [vmem:[%s10404_s4 + $0xd80] sm:$0xff]  ;;  %v9493_v62 = vsel %vm2996_vm3, %v3010_v2, %v3012_v41  ;;  %v3020_v2 = vrot.slane %v8104_v3, 4 }
 0x1e1   : > { %3129 = vmatmul.mubr.f32.gmra.mrb[6].mxu0 %v9371_v40  ;;  %3290 = vmatmul.mubr.f32.gmra.mrb[6].mxu1 %v9371_v40  ;;  %v6462_v5 = vpack.c.bf16 %v5824_v24, %v5820_v63  ;;  %v5840_v60 = vld [vmem:[%s10404_s4 + $0xe28] sm:$0xff]  ;;  %v3014_v63 = vrot.slane %v8050_v30, 4 }
 0x1e2   : > { %3134 = vmatprep.mubr.f32.mxu0 %v7295_v34  ;;  %3295 = vmatprep.mubr.f32.mxu1 %v7295_v34  ;;  %v6502_v24 = vpack.c.bf16 %v5840_v60, %v5836_v58 }
 0x1e3   : > { %6453 = vmatpush1.bf16.msra.mxu0 %v6452_v4  ;;  %6485 = vmatpush1.bf16.msra.mxu1 %v6484_v21  ;;  %v5825_v4 = vld [vmem:[%s10404_s4 + $0xdb0] sm:$0xff]  ;;  %v5828_v21 = vld [vmem:[%s10404_s4 + $0xdc8] sm:$0xff]  ;;  %v9501_v28 = vsel %vm2996_vm3, %v3012_v41, %v3014_v63  ;;  %v5850_v41 = vld [vmem:[%s10404_s4 + $0xe78] sm:$0xff] }
 0x1e4   : > { %6455 = vmatprep.subr.bf16.mxu0 %v6454_v54  ;;  %6487 = vmatprep.subr.bf16.mxu1 %v6486_v29  ;;  %v6464_v54 = vpack.c.bf16 %v5823_v51, %v5819_v31  ;;  %v6496_v29 = vpack.c.bf16 %v5825_v4, %v5821_v14  ;;  %v6466_v47 = vpack.c.bf16 %v5832_v46, %v5828_v21  ;;  %v3018_v31 = vrot.slane %v8080_v37, 4  ;;  %v5835_v46 = vld [vmem:[%s10404_s4 + $0xe00] sm:$0xff] }
 0x1e5   : > { %3135 = vmatmul.mubr.f32.gmra.mrb[8].mxu0 %v9403_v52  ;;  %3296 = vmatmul.mubr.f32.gmra.mrb[8].mxu1 %v9403_v52  ;;  %v10413_v4 = vrot.slane %v7999_v10, 4 }
 0x1e6   : > { %3140 = vmatprep.mubr.f32.mxu0 %v7295_v34  ;;  %3301 = vmatprep.mubr.f32.mxu1 %v7295_v34 }
 0x1e7   : > { %6457 = vmatpush1.bf16.msra.mxu0 %v6456_v45  ;;  %6489 = vmatpush1.bf16.msra.mxu1 %v6488_v55  ;;  %v5829_v45 = vld [vmem:[%s10404_s4 + $0xdd0] sm:$0xff] }
 0x1e8   : > { %6459 = vmatprep.subr.bf16.mxu0 %v6458_v25  ;;  %6491 = vmatprep.subr.bf16.mxu1 %v6490_v56  ;;  %v5833_v55 = vld [vmem:[%s10404_s4 + $0xdf0] sm:$0xff]  ;;  %v5842_v25 = vld [vmem:[%s10404_s4 + $0xe38] sm:$0xff]  ;;  %v6468_v56 = vpack.c.bf16 %v5831_v49, %v5827_v9  ;;  %v5848_v9 = vld [vmem:[%s10404_s4 + $0xe68] sm:$0xff] }
 0x1e9   : > { %3141 = vmatmul.mubr.f32.gmra.mrb[10].mxu0 %v9435_v43  ;;  %3302 = vmatmul.mubr.f32.gmra.mrb[10].mxu1 %v9435_v43  ;;  %v6500_v12 = vpack.c.bf16 %v5833_v55, %v5829_v45  ;;  %v6534_v20 = vpack.c.bf16 %v5842_v25, %v5838_v61  ;;  %v5846_v49 = vld [vmem:[%s10404_s4 + $0xe58] sm:$0xff]  ;;  %v5843_v45 = vld [vmem:[%s10404_s4 + $0xe40] sm:$0xff]  ;;  %v5845_v61 = vld [vmem:[%s10404_s4 + $0xe50] sm:$0xff] }
 0x1ea   : > { %3146 = vmatprep.mubr.f32.mxu0 %v7295_v34  ;;  %3307 = vmatprep.mubr.f32.mxu1 %v7295_v34  ;;  %v5847_v55 = vld [vmem:[%s10404_s4 + $0xe60] sm:$0xff]  ;;  %v6538_v60 = vpack.c.bf16 %v5850_v41, %v5846_v49  ;;  %v5849_v25 = vld [vmem:[%s10404_s4 + $0xe70] sm:$0xff] }
 0x1eb   : > { %6461 = vmatpush1.bf16.msra.mxu0 %v6460_v23  ;;  %6493 = vmatpush1.bf16.msra.mxu1 %v6492_v13  ;;  %v3016_v23 = vrot.slane %v8070_v44, 4  ;;  %v5859_v49 = vld [vmem:[%s10404_s4 + $0xec0] sm:$0xff] }
 0x1ec   : > { %6463 = vmatprep.subr.bf16.mxu0 %v6462_v5  ;;  %6495 = vmatprep.subr.bf16.mxu1 %v6494_v42  ;;  %v9525_v5 = vsel %vm2996_vm3, %v3018_v31, %v3020_v2  ;;  %v3022_v42 = vrot.slane %v8113_v8, 4  ;;  %v5863_v41 = vld [vmem:[%s10404_s4 + $0xee0] sm:$0xff] }
 0x1ed   : > { %3147 = vmatmul.mubr.f32.gmra.mrb[12].mxu0 %v9467_v39  ;;  %3308 = vmatmul.mubr.f32.gmra.mrb[12].mxu1 %v9467_v39  ;;  %v9509_v13 = vsel %vm2996_vm3, %v3014_v63, %v3016_v23  ;;  %v9517_v51 = vsel %vm2996_vm3, %v3016_v23, %v3018_v31  ;;  %v5854_v63 = vld [vmem:[%s10404_s4 + $0xe98] sm:$0xff]  ;;  %v5851_v23 = vld [vmem:[%s10404_s4 + $0xe80] sm:$0xff] }
 0x1ee   : > { %3152 = vmatprep.mubr.f32.mxu0 %v7295_v34  ;;  %3313 = vmatprep.mubr.f32.mxu1 %v7295_v34  ;;  %v9533_v14 = vsel %vm2996_vm3, %v3020_v2, %v3022_v42  ;;  %v9542_v21 = vsel %vm2996_vm3, %v3022_v42, %v10413_v4  ;;  %v5855_v31 = vld [vmem:[%s10404_s4 + $0xea0] sm:$0xff]  ;;  %v5853_v4 = vld [vmem:[%s10404_s4 + $0xe90] sm:$0xff] }
 0x1ef   : > { %6465 = vmatpush1.bf16.msra.mxu0 %v6464_v54  ;;  %6497 = vmatpush1.bf16.msra.mxu1 %v6496_v29  ;;  %v5841_v54 = vld [vmem:[%s10404_s4 + $0xe30] sm:$0xff]  ;;  %v5844_v29 = vld [vmem:[%s10404_s4 + $0xe48] sm:$0xff] }
 0x1f0   : > { %6467 = vmatprep.subr.bf16.mxu0 %v6466_v47  ;;  %6499 = vmatprep.subr.bf16.mxu1 %v6498_v26  ;;  %v6504_v47 = vpack.c.bf16 %v5839_v32, %v5835_v46  ;;  %v6536_v26 = vpack.c.bf16 %v5841_v54, %v5837_v7  ;;  %v6506_v58 = vpack.c.bf16 %v5848_v9, %v5844_v29  ;;  %v5857_v46 = vld [vmem:[%s10404_s4 + $0xeb0] sm:$0xff]  ;;  %v5860_v32 = vld [vmem:[%s10404_s4 + $0xec8] sm:$0xff]  ;;  %v5862_v54 = vld [vmem:[%s10404_s4 + $0xed8] sm:$0xff] }
 0x1f1   : > { %3153 = vmatmul.mubr.f32.gmra.mrb[14].mxu0 %v9493_v62  ;;  %3314 = vmatmul.mubr.f32.gmra.mrb[14].mxu1 %v9493_v62  ;;  %v5864_v7 = vld [vmem:[%s10404_s4 + $0xee8] sm:$0xff]  ;;  %v5866_v29 = vld [vmem:[%s10404_s4 + $0xef8] sm:$0xff]  ;;  %v6512_v9 = vpack.c.bf16 %v5855_v31, %v5851_v23  ;;  %v5873_v23 = vld [vmem:[%s10404_s4 + $0xf30] sm:$0xff] }
 0x1f2   : > { %3158 = vmatprep.mubr.f32.mxu0 %v7295_v34  ;;  %3319 = vmatprep.mubr.f32.mxu1 %v7295_v34  ;;  %v5876_v31 = vld [vmem:[%s10404_s4 + $0xf48] sm:$0xff] }
 0x1f3   : > { %6469 = vmatpush1.bf16.msra.mxu0 %v6468_v56  ;;  %6501 = vmatpush1.bf16.msra.mxu1 %v6500_v12  ;;  %v5852_v56 = vld [vmem:[%s10404_s4 + $0xe88] sm:$0xff] }
 0x1f4   : > { %6503 = vmatprep.subr.bf16.mxu0 %v6502_v24  ;;  %6535 = vmatprep.subr.bf16.mxu1 %v6534_v20  ;;  %v5856_v12 = vld [vmem:[%s10404_s4 + $0xea8] sm:$0xff]  ;;  %v5858_v24 = vld [vmem:[%s10404_s4 + $0xeb8] sm:$0xff]  ;;  %v6508_v20 = vpack.c.bf16 %v5847_v55, %v5843_v45  ;;  %v5861_v45 = vld [vmem:[%s10404_s4 + $0xed0] sm:$0xff] }
 0x1f5   : > { %3159 = vmatmul.mubr.f32.gmra.mrb[16].mxu0 %v9501_v28  ;;  %3320 = vmatmul.mubr.f32.gmra.mrb[16].mxu1 %v9501_v28  ;;  %v6510_v2 = vpack.c.bf16 %v5856_v12, %v5852_v56  ;;  %v6542_v42 = vpack.c.bf16 %v5858_v24, %v5854_v63  ;;  %v5865_v55 = vld [vmem:[%s10404_s4 + $0xef0] sm:$0xff]  ;;  %v6516_v56 = vpack.c.bf16 %v5863_v41, %v5859_v49  ;;  %v5867_v12 = vld [vmem:[%s10404_s4 + $0xf00] sm:$0xff]  ;;  %v5884_v49 = vld [vmem:[%s10404_s4 + $0xf88] sm:$0xff] }
 0x1f6   : > { %3164 = vmatprep.mubr.f32.mxu0 %v7295_v34  ;;  %3325 = vmatprep.mubr.f32.mxu1 %v7295_v34  ;;  %v5871_v63 = vld [vmem:[%s10404_s4 + $0xf20] sm:$0xff]  ;;  %v5888_v41 = vld [vmem:[%s10404_s4 + $0xfa8] sm:$0xff] }
 0x1f9   : > { %3165 = vmatmul.mubr.f32.gmra.mrb[18].mxu0 %v9509_v13  ;;  %3326 = vmatmul.mubr.f32.gmra.mrb[18].mxu1 %v9509_v13 }
 0x1fa   : > { %3170 = vmatprep.mubr.f32.mxu0 %v7295_v34  ;;  %3331 = vmatprep.mubr.f32.mxu1 %v7295_v34 }
 0x1fd   : > { %3171 = vmatmul.mubr.f32.gmra.mrb[20].mxu0 %v9517_v51  ;;  %3332 = vmatmul.mubr.f32.gmra.mrb[20].mxu1 %v9517_v51 }
 0x1fe   : > { %3176 = vmatprep.mubr.f32.mxu0 %v7295_v34  ;;  %3337 = vmatprep.mubr.f32.mxu1 %v7295_v34 }
 0x201   : > { %3177 = vmatmul.mubr.f32.gmra.mrb[22].mxu0 %v9525_v5  ;;  %3338 = vmatmul.mubr.f32.gmra.mrb[22].mxu1 %v9525_v5 }
 0x202   : > { %3182 = vmatprep.mubr.f32.mxu0 %v7295_v34  ;;  %3343 = vmatprep.mubr.f32.mxu1 %v7295_v34 }
 0x205   : > { %3183 = vmatmul.mubr.f32.gmra.mrb[24].mxu0 %v9533_v14  ;;  %3344 = vmatmul.mubr.f32.gmra.mrb[24].mxu1 %v9533_v14 }
 0x206   : > { %3188 = vmatprep.mubr.f32.mxu0 %v7295_v34  ;;  %3349 = vmatprep.mubr.f32.mxu1 %v7295_v34 }
 0x209   : > { %3189 = vmatmul.mubr.f32.gmra.mrb[26].mxu0 %v9542_v21  ;;  %3350 = vmatmul.mubr.f32.gmra.mrb[26].mxu1 %v9542_v21 }
 0x20a   : > { %3194 = vmatprep.mubr.f32.mxu0 %v7295_v34  ;;  %3355 = vmatprep.mubr.f32.mxu1 %v7295_v34 }
 0x20d   : > { %3195 = vmatmul.mubr.f32.gmra.mrb[28].mxu0 %v8095_v36  ;;  %3356 = vmatmul.mubr.f32.gmra.mrb[28].mxu1 %v8095_v36 }
 0x20e   : > { %3200 = vmatprep.mubr.f32.mxu0 %v7295_v34  ;;  %3361 = vmatprep.mubr.f32.mxu1 %v7295_v34 }
 0x211   : > { %3201 = vmatmul.mubr.f32.gmra.mrb[30].mxu0 %v8098_v0  ;;  %3362 = vmatmul.mubr.f32.gmra.mrb[30].mxu1 %v8098_v0 }
 0x212   : > { %3569 = vmatprep.mubr.f32.mxu0 %v7295_v34  ;;  %3730 = vmatprep.mubr.f32.mxu1 %v7295_v34 }
 0x215   : > { %3570 = vmatmul.mubr.f32.vlgmr.msra.gmra.mrb[0].mxu0 %v9339_v57  ;;  %3731 = vmatmul.mubr.f32.vlgmr.msra.gmra.mrb[0].mxu1 %v9339_v57  ;;  %v6540_v57 = vpack.c.bf16 %v5849_v25, %v5845_v61  ;;  %v5870_v61 = vld [vmem:[%s10404_s4 + $0xf18] sm:$0xff] }
 0x216   : > { %6505 = vmatpush1.bf16.msra.mxu0 %v6504_v47  ;;  %6537 = vmatpush1.bf16.msra.mxu1 %v6536_v26  ;;  %v6514_v47 = vpack.c.bf16 %v5864_v7, %v5860_v32  ;;  %v6546_v26 = vpack.c.bf16 %v5866_v29, %v5862_v54  ;;  %v5874_v25 = vld [vmem:[%s10404_s4 + $0xf38] sm:$0xff]  ;;  %v5875_v32 = vld [vmem:[%s10404_s4 + $0xf40] sm:$0xff] }
 0x217   : > { %3575 = vmatprep.mubr.f32.mxu0 %v7295_v34  ;;  %3736 = vmatprep.mubr.f32.mxu1 %v7295_v34  ;;  %v5879_v7 = vld [vmem:[%s10404_s4 + $0xf60] sm:$0xff] }
 0x218   : > { %6507 = vmatprep.subr.bf16.mxu0 %v6506_v58  ;;  %6539 = vmatprep.subr.bf16.mxu1 %v6538_v60  ;;  %v5868_v58 = vld [vmem:[%s10404_s4 + $0xf08] sm:$0xff] }
 0x219   : > { %3576 = vmatmul.mubr.f32.gmra.mrb[2].mxu0 %v9371_v40  ;;  %3737 = vmatmul.mubr.f32.gmra.mrb[2].mxu1 %v9371_v40  ;;  %v6544_v40 = vpack.c.bf16 %v5857_v46, %v5853_v4  ;;  %v5872_v60 = vld [vmem:[%s10404_s4 + $0xf28] sm:$0xff]  ;;  %v5882_v4 = vld [vmem:[%s10404_s4 + $0xf78] sm:$0xff]  ;;  %v6520_v46 = vpack.c.bf16 %v5871_v63, %v5867_v12 }
 0x21a   : > { %3581 = vmatprep.mubr.f32.mxu0 %v7295_v34  ;;  %3742 = vmatprep.mubr.f32.mxu1 %v7295_v34  ;;  %v6518_v24 = vpack.c.bf16 %v5872_v60, %v5868_v58  ;;  %v5887_v58 = vld [vmem:[%s10404_s4 + $0xfa0] sm:$0xff]  ;;  %v6526_v60 = vpack.c.bf16 %v5888_v41, %v5884_v49  ;;  %v5896_v12 = vld [vmem:[%s10404_s4 + $0xfe8] sm:$0xff]  ;;  %v5894_v63 = vld [vmem:[%s10404_s4 + $0xfd8] sm:$0xff] }
 0x21b   : > { %6509 = vmatpush1.bf16.msra.mxu0 %v6508_v20  ;;  %6541 = vmatpush1.bf16.msra.mxu1 %v6540_v57  ;;  %v6550_v20 = vpack.c.bf16 %v5874_v25, %v5870_v61  ;;  %v5869_v57 = vld [vmem:[%s10404_s4 + $0xf10] sm:$0xff]  ;;  %v5914_v49 = vld [vmem:[%s10404_s4 + $0x1078] sm:$0xff] }
 0x21c   : > { %6511 = vmatprep.subr.bf16.mxu0 %v6510_v2  ;;  %6543 = vmatprep.subr.bf16.mxu1 %v6542_v42  ;;  %v5880_v2 = vld [vmem:[%s10404_s4 + $0xf68] sm:$0xff]  ;;  %v5878_v42 = vld [vmem:[%s10404_s4 + $0xf58] sm:$0xff]  ;;  %v5885_v25 = vld [vmem:[%s10404_s4 + $0xf90] sm:$0xff] }
 0x21d   : > { %3582 = vmatmul.mubr.f32.gmra.mrb[4].mxu0 %v9403_v52  ;;  %3743 = vmatmul.mubr.f32.gmra.mrb[4].mxu1 %v9403_v52  ;;  %v6548_v52 = vpack.c.bf16 %v5865_v55, %v5861_v45  ;;  %v6522_v54 = vpack.c.bf16 %v5880_v2, %v5876_v31  ;;  %v6554_v29 = vpack.c.bf16 %v5882_v4, %v5878_v42  ;;  %v5883_v55 = vld [vmem:[%s10404_s4 + $0xf80] sm:$0xff]  ;;  %v5893_v42 = vld [vmem:[%s10404_s4 + $0xfd0] sm:$0xff] }
 0x21e   : > { %3587 = vmatprep.mubr.f32.mxu0 %v7295_v34  ;;  %3748 = vmatprep.mubr.f32.mxu1 %v7295_v34  ;;  %v6524_v45 = vpack.c.bf16 %v5879_v7, %v5875_v32  ;;  %v5897_v4 = vld [vmem:[%s10404_s4 + $0xff0] sm:$0xff]  ;;  %v5902_v32 = vld [vmem:[%s10404_s4 + $0x1018] sm:$0xff] }
 0x21f   : > { %6513 = vmatpush1.bf16.msra.mxu0 %v6512_v9  ;;  %6545 = vmatpush1.bf16.msra.mxu1 %v6544_v40  ;;  %v5877_v9 = vld [vmem:[%s10404_s4 + $0xf50] sm:$0xff]  ;;  %v5906_v7 = vld [vmem:[%s10404_s4 + $0x1038] sm:$0xff] }
 0x220   : > { %6515 = vmatprep.subr.bf16.mxu0 %v6514_v47  ;;  %6547 = vmatprep.subr.bf16.mxu1 %v6546_v26  ;;  %v5881_v40 = vld [vmem:[%s10404_s4 + $0xf70] sm:$0xff]  ;;  %v5886_v47 = vld [vmem:[%s10404_s4 + $0xf98] sm:$0xff] }
 0x221   : > { %3588 = vmatmul.mubr.f32.gmra.mrb[6].mxu0 %v9435_v43  ;;  %3749 = vmatmul.mubr.f32.gmra.mrb[6].mxu1 %v9435_v43  ;;  %v6552_v43 = vpack.c.bf16 %v5873_v23, %v5869_v57  ;;  %v5890_v26 = vld [vmem:[%s10404_s4 + $0xfb8] sm:$0xff]  ;;  %v5891_v57 = vld [vmem:[%s10404_s4 + $0xfc0] sm:$0xff] }
 0x222   : > { %3593 = vmatprep.mubr.f32.mxu0 %v7295_v34  ;;  %3754 = vmatprep.mubr.f32.mxu1 %v7295_v34  ;;  %v6558_v61 = vpack.c.bf16 %v5890_v26, %v5886_v47  ;;  %v5895_v23 = vld [vmem:[%s10404_s4 + $0xfe0] sm:$0xff] }
 0x223   : > { %6517 = vmatpush1.bf16.msra.mxu0 %v6516_v56  ;;  %6549 = vmatpush1.bf16.msra.mxu1 %v6548_v52  ;;  %v5889_v56 = vld [vmem:[%s10404_s4 + $0xfb0] sm:$0xff]  ;;  %v5892_v52 = vld [vmem:[%s10404_s4 + $0xfc8] sm:$0xff]  ;;  %v5911_v26 = vld [vmem:[%s10404_s4 + $0x1060] sm:$0xff] }
 0x224   : > { %6519 = vmatprep.subr.bf16.mxu0 %v6518_v24  ;;  %6551 = vmatprep.subr.bf16.mxu1 %v6550_v20  ;;  %v5898_v24 = vld [vmem:[%s10404_s4 + $0xff8] sm:$0xff]  ;;  %v6528_v20 = vpack.c.bf16 %v5887_v58, %v5883_v55  ;;  %v6530_v31 = vpack.c.bf16 %v5896_v12, %v5892_v52 }
 0x225   : > { %3594 = vmatmul.mubr.f32.gmra.mrb[8].mxu0 %v9467_v39  ;;  %3755 = vmatmul.mubr.f32.gmra.mrb[8].mxu1 %v9467_v39  ;;  %v6556_v39 = vpack.c.bf16 %v5881_v40, %v5877_v9  ;;  %v6562_v2 = vpack.c.bf16 %v5898_v24, %v5894_v63  ;;  %v6598_v9 = vpack.c.bf16 %v5906_v7, %v5902_v32  ;;  %v5910_v40 = vld [vmem:[%s10404_s4 + $0x1058] sm:$0xff] }
 0x226   : > { %3599 = vmatprep.mubr.f32.mxu0 %v7295_v34  ;;  %3760 = vmatprep.mubr.f32.mxu1 %v7295_v34  ;;  %v6602_v58 = vpack.c.bf16 %v5914_v49, %v5910_v40  ;;  %v5918_v52 = vld [vmem:[%s10404_s4 + $0x1098] sm:$0xff] }
 0x227   : > { %6521 = vmatpush1.bf16.msra.mxu0 %v6520_v46  ;;  %6553 = vmatpush1.bf16.msra.mxu1 %v6552_v43  ;;  %v5900_v46 = vld [vmem:[%s10404_s4 + $0x1008] sm:$0xff]  ;;  %v5922_v12 = vld [vmem:[%s10404_s4 + $0x10b8] sm:$0xff] }
 0x228   : > { %6523 = vmatprep.subr.bf16.mxu0 %v6522_v54  ;;  %6555 = vmatprep.subr.bf16.mxu1 %v6554_v29  ;;  %v5904_v43 = vld [vmem:[%s10404_s4 + $0x1028] sm:$0xff]  ;;  %v6532_v54 = vpack.c.bf16 %v5895_v23, %v5891_v57  ;;  %v3962_v23 = vrot.slane %v7893_v48, 5  ;;  %v5926_v32 = vld [vmem:[%s10404_s4 + $0x10d8] sm:$0xff] }
 0x229   : > { %3600 = vmatmul.mubr.f32.gmra.mrb[10].mxu0 %v9493_v62  ;;  %3761 = vmatmul.mubr.f32.gmra.mrb[10].mxu1 %v9493_v62  ;;  %v6560_v62 = vpack.c.bf16 %v5889_v56, %v5885_v25  ;;  %v6566_v29 = vpack.c.bf16 %v5904_v43, %v5900_v46  ;;  %v5916_v25 = vld [vmem:[%s10404_s4 + $0x1088] sm:$0xff]  ;;  %v5930_v7 = vld [vmem:[%s10404_s4 + $0x10f8] sm:$0xff] }
 0x22a   : > { %3605 = vmatprep.mubr.f32.mxu0 %v7295_v34  ;;  %3766 = vmatprep.mubr.f32.mxu1 %v7295_v34  ;;  %v5920_v56 = vld [vmem:[%s10404_s4 + $0x10a8] sm:$0xff]  ;;  %v5934_v40 = vld [vmem:[%s10404_s4 + $0x1118] sm:$0xff] }
 0x22b   : > { %6525 = vmatpush1.bf16.msra.mxu0 %v6524_v45  ;;  %6557 = vmatpush1.bf16.msra.mxu1 %v6556_v39  ;;  %v3960_v39 = vrot.slane %v7849_v18, 5  ;;  %v5924_v46 = vld [vmem:[%s10404_s4 + $0x10c8] sm:$0xff]  ;;  %v5938_v49 = vld [vmem:[%s10404_s4 + $0x1138] sm:$0xff] }
 0x22c   : > { %6527 = vmatprep.subr.bf16.mxu0 %v6526_v60  ;;  %6559 = vmatprep.subr.bf16.mxu1 %v6558_v61  ;;  %v5909_v60 = vld [vmem:[%s10404_s4 + $0x1050] sm:$0xff]  ;;  %v5928_v43 = vld [vmem:[%s10404_s4 + $0x10e8] sm:$0xff] }
 0x22d   : > { %3606 = vmatmul.mubr.f32.gmra.mrb[12].mxu0 %v9501_v28  ;;  %3767 = vmatmul.mubr.f32.gmra.mrb[12].mxu1 %v9501_v28  ;;  %v6564_v28 = vpack.c.bf16 %v5897_v4, %v5893_v42  ;;  %v5913_v61 = vld [vmem:[%s10404_s4 + $0x1070] sm:$0xff] }
 0x22e   : > { %3611 = vmatprep.mubr.f32.mxu0 %v7295_v34  ;;  %3772 = vmatprep.mubr.f32.mxu1 %v7295_v34  ;;  %v6604_v24 = vpack.c.bf16 %v5913_v61, %v5909_v60  ;;  %v5917_v42 = vld [vmem:[%s10404_s4 + $0x1090] sm:$0xff] }
 0x22f   : > { %6529 = vmatpush1.bf16.msra.mxu0 %v6528_v20  ;;  %6561 = vmatpush1.bf16.msra.mxu1 %v6560_v62  ;;  %v5915_v20 = vld [vmem:[%s10404_s4 + $0x1080] sm:$0xff]  ;;  %v5921_v4 = vld [vmem:[%s10404_s4 + $0x10b0] sm:$0xff] }
 0x230   : > { %6531 = vmatprep.subr.bf16.mxu0 %v6530_v31  ;;  %6563 = vmatprep.subr.bf16.mxu1 %v6562_v2  ;;  %v5919_v62 = vld [vmem:[%s10404_s4 + $0x10a0] sm:$0xff]  ;;  %v6574_v31 = vpack.c.bf16 %v5920_v56, %v5916_v25  ;;  %v6606_v2 = vpack.c.bf16 %v5922_v12, %v5918_v52  ;;  %v5933_v60 = vld [vmem:[%s10404_s4 + $0x1110] sm:$0xff]  ;;  %v5940_v25 = vld [vmem:[%s10404_s4 + $0x1148] sm:$0xff] }
 0x231   : > { %3612 = vmatmul.mubr.f32.gmra.mrb[14].mxu0 %v9509_v13  ;;  %3773 = vmatmul.mubr.f32.gmra.mrb[14].mxu1 %v9509_v13  ;;  %v5901_v13 = vld [vmem:[%s10404_s4 + $0x1010] sm:$0xff]  ;;  %v5944_v56 = vld [vmem:[%s10404_s4 + $0x1168] sm:$0xff]  ;;  %v5942_v52 = vld [vmem:[%s10404_s4 + $0x1158] sm:$0xff] }
 0x232   : > { %3617 = vmatprep.mubr.f32.mxu0 %v7295_v34  ;;  %3778 = vmatprep.mubr.f32.mxu1 %v7295_v34  ;;  %v5937_v61 = vld [vmem:[%s10404_s4 + $0x1130] sm:$0xff]  ;;  %v5946_v12 = vld [vmem:[%s10404_s4 + $0x1178] sm:$0xff] }
 0x233   : > { %6533 = vmatpush1.bf16.msra.mxu0 %v6532_v54  ;;  %6565 = vmatpush1.bf16.msra.mxu1 %v6564_v28  ;;  %v6576_v54 = vpack.c.bf16 %v5919_v62, %v5915_v20  ;;  %v6608_v28 = vpack.c.bf16 %v5921_v4, %v5917_v42  ;;  %v5939_v20 = vld [vmem:[%s10404_s4 + $0x1140] sm:$0xff]  ;;  %v5941_v42 = vld [vmem:[%s10404_s4 + $0x1150] sm:$0xff] }
 0x234   : > { %6567 = vmatprep.subr.bf16.mxu0 %v6566_v29  ;;  %6599 = vmatprep.subr.bf16.mxu1 %v6598_v9  ;;  %v5923_v29 = vld [vmem:[%s10404_s4 + $0x10c0] sm:$0xff]  ;;  %v5945_v4 = vld [vmem:[%s10404_s4 + $0x1170] sm:$0xff] }
 0x235   : > { %3618 = vmatmul.mubr.f32.gmra.mrb[16].mxu0 %v9517_v51  ;;  %3779 = vmatmul.mubr.f32.gmra.mrb[16].mxu1 %v9517_v51  ;;  %v3957_v51 = vrot.slane %v7765_v27, 5  ;;  %v5927_v9 = vld [vmem:[%s10404_s4 + $0x10e0] sm:$0xff] }
 0x236   : > { %3623 = vmatprep.mubr.f32.mxu0 %v7295_v34  ;;  %3784 = vmatprep.mubr.f32.mxu1 %v7295_v34  ;;  %v5943_v62 = vld [vmem:[%s10404_s4 + $0x1160] sm:$0xff] }
 0x239   : > { %3624 = vmatmul.mubr.f32.gmra.mrb[18].mxu0 %v9525_v5  ;;  %3785 = vmatmul.mubr.f32.gmra.mrb[18].mxu1 %v9525_v5  ;;  %v3958_v5 = vrot.slane %v7807_v53, 5 }
 0x23a   : > { %3629 = vmatprep.mubr.f32.mxu0 %v7295_v34  ;;  %3790 = vmatprep.mubr.f32.mxu1 %v7295_v34 }
 0x23b   : > { %v3959_v45 = vsel %vm3956_vm4, %v3957_v51, %v3958_v5  ;;  %v3961_v57 = vsel %vm3956_vm4, %v3958_v5, %v3960_v39  ;;  %v5925_v51 = vld [vmem:[%s10404_s4 + $0x10d0] sm:$0xff] }
 0x23c   : > { %v5929_v5 = vld [vmem:[%s10404_s4 + $0x10f0] sm:$0xff] }
 0x23d   : > { %3630 = vmatmul.mubr.f32.gmra.mrb[20].mxu0 %v9533_v14  ;;  %3791 = vmatmul.mubr.f32.gmra.mrb[20].mxu1 %v9533_v14  ;;  %v5908_v14 = vld [vmem:[%s10404_s4 + $0x1048] sm:$0xff] }
 0x23e   : > { %3635 = vmatprep.mubr.f32.mxu0 %v7295_v34  ;;  %3796 = vmatprep.mubr.f32.mxu1 %v7295_v34 }
 0x241   : > { %3636 = vmatmul.mubr.f32.gmra.mrb[22].mxu0 %v9542_v21  ;;  %3797 = vmatmul.mubr.f32.gmra.mrb[22].mxu1 %v9542_v21  ;;  %v5912_v21 = vld [vmem:[%s10404_s4 + $0x1068] sm:$0xff] }
 0x242   : > { %3641 = vmatprep.mubr.f32.mxu0 %v7295_v34  ;;  %3802 = vmatprep.mubr.f32.mxu1 %v7295_v34  ;;  %v6570_v55 = vpack.c.bf16 %v5912_v21, %v5908_v14  ;;  %v5932_v14 = vld [vmem:[%s10404_s4 + $0x1108] sm:$0xff] }
 0x243   : > { %v5936_v21 = vld [vmem:[%s10404_s4 + $0x1128] sm:$0xff] }
 0x245   : > { %3642 = vmatmul.mubr.f32.gmra.mrb[24].mxu0 %v8095_v36  ;;  %3803 = vmatmul.mubr.f32.gmra.mrb[24].mxu1 %v8095_v36  ;;  %v5899_v36 = vld [vmem:[%s10404_s4 + $0x1000] sm:$0xff] }
 0x246   : > { %3647 = vmatprep.mubr.f32.mxu0 %v7295_v34  ;;  %3808 = vmatprep.mubr.f32.mxu1 %v7295_v34 }
 0x249   : > { %3648 = vmatmul.mubr.f32.gmra.mrb[26].mxu0 %v8098_v0  ;;  %3809 = vmatmul.mubr.f32.gmra.mrb[26].mxu1 %v8098_v0  ;;  %v5903_v0 = vld [vmem:[%s10404_s4 + $0x1020] sm:$0xff] }
 0x24a   : > { %3653 = vmatprep.mubr.f32.mxu0 %v7295_v34  ;;  %3814 = vmatprep.mubr.f32.mxu1 %v7295_v34  ;;  %v6568_v41 = vpack.c.bf16 %v5903_v0, %v5899_v36  ;;  %v3963_v36 = vsel %vm3956_vm4, %v3960_v39, %v3962_v23  ;;  %v3964_v0 = vrot.slane %v7950_v17, 5  ;;  %v3966_v39 = vrot.slane %v7984_v38, 5 }
 0x24d   : > { %3654 = vmatmul.mubr.f32.gmra.mrb[28].mxu0 %v8101_v6  ;;  %3815 = vmatmul.mubr.f32.gmra.mrb[28].mxu1 %v8101_v6  ;;  %v5905_v6 = vld [vmem:[%s10404_s4 + $0x1030] sm:$0xff] }
 0x24e   : > { %3659 = vmatprep.mubr.f32.mxu0 %v7295_v34  ;;  %3820 = vmatprep.mubr.f32.mxu1 %v7295_v34  ;;  %v6600_v47 = vpack.c.bf16 %v5905_v6, %v5901_v13  ;;  %v6578_v13 = vpack.c.bf16 %v5928_v43, %v5924_v46  ;;  %v6610_v6 = vpack.c.bf16 %v5930_v7, %v5926_v32  ;;  %v5948_v46 = vld [vmem:[%s10404_s4 + $0x1188] sm:$0xff]  ;;  %v5950_v32 = vld [vmem:[%s10404_s4 + $0x1198] sm:$0xff] }
 0x24f   : > { %v5952_v43 = vld [vmem:[%s10404_s4 + $0x11a8] sm:$0xff]  ;;  %v5954_v7 = vld [vmem:[%s10404_s4 + $0x11b8] sm:$0xff] }
 0x251   : > { %3660 = vmatmul.mubr.f32.gmra.mrb[30].mxu0 %v8088_v1  ;;  %3821 = vmatmul.mubr.f32.gmra.mrb[30].mxu1 %v8088_v1  ;;  %v5907_v1 = vld [vmem:[%s10404_s4 + $0x1040] sm:$0xff] }
 0x252   : > { %4070 = vmatprep.mubr.f32.mxu0 %v7295_v34  ;;  %4231 = vmatprep.mubr.f32.mxu1 %v7295_v34  ;;  %v6572_v63 = vpack.c.bf16 %v5911_v26, %v5907_v1  ;;  %v5931_v1 = vld [vmem:[%s10404_s4 + $0x1100] sm:$0xff] }
 0x253   : > { %v5935_v26 = vld [vmem:[%s10404_s4 + $0x1120] sm:$0xff] }
 0x255   : > { %4071 = vmatmul.mubr.f32.vlgmr.msra.gmra.mrb[0].mxu0 %v3959_v45  ;;  %4232 = vmatmul.mubr.f32.vlgmr.msra.gmra.mrb[0].mxu1 %v3959_v45  ;;  %v3965_v45 = vsel %vm3956_vm4, %v3962_v23, %v3964_v0  ;;  %v3968_v23 = vrot.slane %v8024_v15, 5 }
 0x256   : > { %6569 = vmatpush1.bf16.msra.mxu0 %v6568_v41  ;;  %6601 = vmatpush1.bf16.msra.mxu1 %v6600_v47  ;;  %v6580_v41 = vpack.c.bf16 %v5927_v9, %v5923_v29  ;;  %v6612_v47 = vpack.c.bf16 %v5929_v5, %v5925_v51  ;;  %v5947_v29 = vld [vmem:[%s10404_s4 + $0x1180] sm:$0xff]  ;;  %v5949_v51 = vld [vmem:[%s10404_s4 + $0x1190] sm:$0xff] }
 0x257   : > { %4076 = vmatprep.mubr.f32.mxu0 %v7295_v34  ;;  %4237 = vmatprep.mubr.f32.mxu1 %v7295_v34  ;;  %v5951_v9 = vld [vmem:[%s10404_s4 + $0x11a0] sm:$0xff]  ;;  %v5953_v5 = vld [vmem:[%s10404_s4 + $0x11b0] sm:$0xff] }
 0x258   : > { %6571 = vmatprep.subr.bf16.mxu0 %v6570_v55  ;;  %6603 = vmatprep.subr.bf16.mxu1 %v6602_v58  ;;  %v6582_v55 = vpack.c.bf16 %v5936_v21, %v5932_v14  ;;  %v6614_v58 = vpack.c.bf16 %v5938_v49, %v5934_v40  ;;  %v5956_v14 = vld [vmem:[%s10404_s4 + $0x11c8] sm:$0xff]  ;;  %v5958_v40 = vld [vmem:[%s10404_s4 + $0x11d8] sm:$0xff] }
 0x259   : > { %4077 = vmatmul.mubr.f32.gmra.mrb[2].mxu0 %v3961_v57  ;;  %4238 = vmatmul.mubr.f32.gmra.mrb[2].mxu1 %v3961_v57  ;;  %v3967_v57 = vsel %vm3956_vm4, %v3964_v0, %v3966_v39  ;;  %v3970_v0 = vrot.slane %v8050_v30, 5  ;;  %v5960_v21 = vld [vmem:[%s10404_s4 + $0x11e8] sm:$0xff]  ;;  %v5962_v49 = vld [vmem:[%s10404_s4 + $0x11f8] sm:$0xff] }
 0x25a   : > { %4082 = vmatprep.mubr.f32.mxu0 %v7295_v34  ;;  %4243 = vmatprep.mubr.f32.mxu1 %v7295_v34 }
 0x25b   : > { %6573 = vmatpush1.bf16.msra.mxu0 %v6572_v63  ;;  %6605 = vmatpush1.bf16.msra.mxu1 %v6604_v24  ;;  %v6584_v63 = vpack.c.bf16 %v5935_v26, %v5931_v1  ;;  %v6616_v24 = vpack.c.bf16 %v5937_v61, %v5933_v60  ;;  %v5955_v1 = vld [vmem:[%s10404_s4 + $0x11c0] sm:$0xff]  ;;  %v3971_v26 = vsel %vm3956_vm4, %v3968_v23, %v3970_v0  ;;  %v5957_v60 = vld [vmem:[%s10404_s4 + $0x11d0] sm:$0xff] }
 0x25c   : > { %6575 = vmatprep.subr.bf16.mxu0 %v6574_v31  ;;  %6607 = vmatprep.subr.bf16.mxu1 %v6606_v2  ;;  %v6586_v31 = vpack.c.bf16 %v5944_v56, %v5940_v25  ;;  %v6618_v2 = vpack.c.bf16 %v5946_v12, %v5942_v52  ;;  %v5961_v61 = vld [vmem:[%s10404_s4 + $0x11f0] sm:$0xff]  ;;  %v5043_v25 = vld [vmem:[%s10406_s6] sm:$0xff]  ;;  %v5044_v56 = vld [vmem:[%s10406_s6 + $0x8] sm:$0xff] }
 0x25d   : > { %4083 = vmatmul.mubr.f32.gmra.mrb[4].mxu0 %v3963_v36  ;;  %4244 = vmatmul.mubr.f32.gmra.mrb[4].mxu1 %v3963_v36  ;;  %v3969_v36 = vsel %vm3956_vm4, %v3966_v39, %v3968_v23  ;;  %v6594_v39 = vpack.c.bf16 %v5960_v21, %v5956_v14  ;;  %v6628_v12 = vpack.c.bf16 %v5961_v61, %v5957_v60  ;;  %v5054_v14 = vld [vmem:[%s10406_s6 + $0x58] sm:$0xff]  ;;  %v4469_v21 = vrot.slane %v8024_v15, 6 }
 0x25e   : > { %4088 = vmatprep.mubr.f32.mxu0 %v7295_v34  ;;  %4249 = vmatprep.mubr.f32.mxu1 %v7295_v34  ;;  %v4475_v60 = vrot.slane %v8080_v37, 6  ;;  %v4477_v61 = vrot.slane %v8104_v3, 6 }
 0x25f   : > { %6577 = vmatpush1.bf16.msra.mxu0 %v6576_v54  ;;  %6609 = vmatpush1.bf16.msra.mxu1 %v6608_v28  ;;  %v6588_v54 = vpack.c.bf16 %v5943_v62, %v5939_v20  ;;  %v6620_v28 = vpack.c.bf16 %v5945_v4, %v5941_v42  ;;  %v6630_v20 = vpack.c.bf16 %v5044_v56, %v5043_v25  ;;  %v10414_v42 = vrot.slane %v7999_v10, 5 }
 0x260   : > { %6579 = vmatprep.subr.bf16.mxu0 %v6578_v13  ;;  %6611 = vmatprep.subr.bf16.mxu1 %v6610_v6  ;;  %v6590_v13 = vpack.c.bf16 %v5952_v43, %v5948_v46  ;;  %v6622_v6 = vpack.c.bf16 %v5954_v7, %v5950_v32  ;;  %v4459_v46 = vrot.slane %v7807_v53, 6  ;;  %v4461_v53 = vrot.slane %v7849_v18, 6  ;;  %v5048_v32 = vld [vmem:[%s10406_s6 + $0x28] sm:$0xff] }
 0x261   : > { %4089 = vmatmul.mubr.f32.gmra.mrb[6].mxu0 %v3965_v45  ;;  %4250 = vmatmul.mubr.f32.gmra.mrb[6].mxu1 %v3965_v45  ;;  %v3972_v45 = vrot.slane %v8070_v44, 5  ;;  %v4463_v18 = vrot.slane %v7893_v48, 6  ;;  %v4465_v48 = vrot.slane %v7950_v17, 6  ;;  %v4479_v25 = vrot.slane %v8113_v8, 6 }
 0x262   : > { %4094 = vmatprep.mubr.f32.mxu0 %v7295_v34  ;;  %4255 = vmatprep.mubr.f32.mxu1 %v7295_v34  ;;  %v4462_v7 = vsel %vm4457_vm5, %v4459_v46, %v4461_v53 }
 0x263   : > { %6581 = vmatpush1.bf16.msra.mxu0 %v6580_v41  ;;  %6613 = vmatpush1.bf16.msra.mxu1 %v6612_v47  ;;  %v6592_v41 = vpack.c.bf16 %v5951_v9, %v5947_v29  ;;  %v6624_v47 = vpack.c.bf16 %v5953_v5, %v5949_v51  ;;  %v5050_v29 = vld [vmem:[%s10406_s6 + $0x38] sm:$0xff]  ;;  %v4464_v9 = vsel %vm4457_vm5, %v4461_v53, %v4463_v18  ;;  %v5053_v5 = vld [vmem:[%s10406_s6 + $0x50] sm:$0xff] }
 0x264   : > { %6583 = vmatprep.subr.bf16.mxu0 %v6582_v55  ;;  %6615 = vmatprep.subr.bf16.mxu1 %v6614_v58  ;;  %v6626_v55 = vpack.c.bf16 %v5962_v49, %v5958_v40  ;;  %v5959_v58 = vld [vmem:[%s10404_s4 + $0x11e0] sm:$0xff]  ;;  %v4466_v17 = vsel %vm4457_vm5, %v4463_v18, %v4465_v48  ;;  %v6650_v40 = vpack.c.bf16 %v5054_v14, %v5053_v5  ;;  %v7246_v53 = vld [vmem:[%s7627_s28 + $0x70] sm:$0xff]  ;;  %v7252_v5 = vld [vmem:[%s7627_s28 + $0x88] sm:$0xff] }
 0x265   : > { %4095 = vmatmul.mubr.f32.gmra.mrb[8].mxu0 %v3967_v57  ;;  %4256 = vmatmul.mubr.f32.gmra.mrb[8].mxu1 %v3967_v57  ;;  %v6596_v52 = vpack.c.bf16 %v5959_v58, %v5955_v1  ;;  %v3976_v57 = vrot.slane %v8104_v3, 5  ;;  %v5055_v49 = vld [vmem:[%s10406_s6 + $0x60] sm:$0xff]  ;;  %v4480_v56 = vsel %vm4457_vm5, %v4477_v61, %v4479_v25  ;;  %v10415_v3 = vrot.slane %v7999_v10, 6  ;;  %v7237_v10 = vld [vmem:[%s7627_s28 + $0x10] sm:$0xff] }
 0x266   : > { %4100 = vmatprep.mubr.f32.mxu0 %v7295_v34  ;;  %4261 = vmatprep.mubr.f32.mxu1 %v7295_v34  ;;  %v5112_v14 = vrot.slane %v7252_v5, 3 }
 0x267   : > { %6585 = vmatpush1.bf16.msra.mxu0 %v6584_v63  ;;  %6617 = vmatpush1.bf16.msra.mxu1 %v6616_v24  ;;  %v3973_v63 = vsel %vm3956_vm4, %v3970_v0, %v3972_v45  ;;  %v3974_v24 = vrot.slane %v8080_v37, 5  ;;  %v5051_v0 = vld [vmem:[%s10406_s6 + $0x40] sm:$0xff]  ;;  %v4478_v37 = vsel %vm4457_vm5, %v4475_v60, %v4477_v61 }
 0x268   : > { %6587 = vmatprep.subr.bf16.mxu0 %v6586_v31  ;;  %6619 = vmatprep.subr.bf16.mxu1 %v6618_v2  ;;  %v3978_v31 = vrot.slane %v8113_v8, 5  ;;  %v4482_v8 = vsel %vm4457_vm5, %v4479_v25, %v10415_v3 }
 0x269   : > { %4101 = vmatmul.mubr.f32.gmra.mrb[10].mxu0 %v3969_v36  ;;  %4262 = vmatmul.mubr.f32.gmra.mrb[10].mxu1 %v3969_v36  ;;  %v3975_v62 = vsel %vm3956_vm4, %v3972_v45, %v3974_v24  ;;  %v3977_v23 = vsel %vm3956_vm4, %v3974_v24, %v3976_v57  ;;  %v5058_v45 = vld [vmem:[%s10406_s6 + $0x78] sm:$0xff] }
 0x26a   : > { %4106 = vmatprep.mubr.f32.mxu0 %v7295_v34  ;;  %4267 = vmatprep.mubr.f32.mxu1 %v7295_v34  ;;  %v3979_v2 = vsel %vm3956_vm4, %v3976_v57, %v3978_v31  ;;  %v3981_v4 = vsel %vm3956_vm4, %v3978_v31, %v10414_v42 }
 0x26b   : > { %6589 = vmatpush1.bf16.msra.mxu0 %v6588_v54  ;;  %6621 = vmatpush1.bf16.msra.mxu1 %v6620_v28  ;;  %v5049_v28 = vld [vmem:[%s10406_s6 + $0x30] sm:$0xff] }
 0x26c   : > { %6591 = vmatprep.subr.bf16.mxu0 %v6590_v13  ;;  %6623 = vmatprep.subr.bf16.mxu1 %v6622_v6  ;;  %v6642_v36 = vpack.c.bf16 %v5050_v29, %v5049_v28  ;;  %v5052_v13 = vld [vmem:[%s10406_s6 + $0x48] sm:$0xff]  ;;  %v4467_v6 = vrot.slane %v7984_v38, 6 }
 0x26d   : > { %4107 = vmatmul.mubr.f32.gmra.mrb[12].mxu0 %v3971_v26  ;;  %4268 = vmatmul.mubr.f32.gmra.mrb[12].mxu1 %v3971_v26  ;;  %v6646_v51 = vpack.c.bf16 %v5052_v13, %v5051_v0  ;;  %v5057_v26 = vld [vmem:[%s10406_s6 + $0x70] sm:$0xff] }
 0x26e   : > { %4112 = vmatprep.mubr.f32.mxu0 %v7295_v34  ;;  %4273 = vmatprep.mubr.f32.mxu1 %v7295_v34  ;;  %v4468_v38 = vsel %vm4457_vm5, %v4465_v48, %v4467_v6  ;;  %v4470_v15 = vsel %vm4457_vm5, %v4467_v6, %v4469_v21  ;;  %v7251_v6 = vld [vmem:[%s7627_s28 + $0x48] sm:$0xff] }
 0x26f   : > { %6593 = vmatpush1.bf16.msra.mxu0 %v6592_v41  ;;  %6625 = vmatpush1.bf16.msra.mxu1 %v6624_v47  ;;  %v5056_v41 = vld [vmem:[%s10406_s6 + $0x68] sm:$0xff]  ;;  %v4471_v47 = vrot.slane %v8050_v30, 6 }
 0x270   : > { %6595 = vmatprep.subr.bf16.mxu0 %v6594_v39  ;;  %6627 = vmatprep.subr.bf16.mxu1 %v6626_v55  ;;  %v6654_v1 = vpack.c.bf16 %v5056_v41, %v5055_v49  ;;  %v4473_v39 = vrot.slane %v8070_v44, 6  ;;  %v6658_v55 = vpack.c.bf16 %v5058_v45, %v5057_v26  ;;  %v4895_v26 = vlaneseq }
 0x271   : > { %4113 = vmatmul.mubr.f32.gmra.mrb[14].mxu0 %v3973_v63  ;;  %4274 = vmatmul.mubr.f32.gmra.mrb[14].mxu1 %v3973_v63  ;;  %v4472_v30 = vsel %vm4457_vm5, %v4469_v21, %v4471_v47 }
 0x272   : > { %4118 = vmatprep.mubr.f32.mxu0 %v7295_v34  ;;  %4279 = vmatprep.mubr.f32.mxu1 %v7295_v34  ;;  %v4474_v58 = vsel %vm4457_vm5, %v4471_v47, %v4473_v39  ;;  %v4476_v44 = vsel %vm4457_vm5, %v4473_v39, %v4475_v60  ;;  %v4896_v45 = vshrl.u32 %v4895_v26, 7 }
 0x273   : > { %6597 = vmatpush1.bf16.msra.mxu0 %v6596_v52  ;;  %6629 = vmatpush1.bf16.msra.mxu1 %v6628_v12  ;;  %v5083_v52 = vrot.slane %v7237_v10, 3  ;;  %v7238_v12 = vld [vmem:[%s7627_s28 + $0x18] sm:$0xff] }
 0x274   : > { %6631 = vmatprep.subr.bf16.mxu0 %v6630_v20  ;;  %6662 = vmatprep.subr.bf16.mxu1 %v6630_v20  ;;  %v5084_v63 = vrot.slane %v7238_v12, 3  ;;  %v4905_v39 = vsub.s32 2, %v4896_v45  ;;  %v4909_v60 = vsub.s32 3, %v4896_v45 }
 0x275   : > { %4119 = vmatmul.mubr.f32.gmra.mrb[16].mxu0 %v3975_v62  ;;  %4280 = vmatmul.mubr.f32.gmra.mrb[16].mxu1 %v3975_v62 }
 0x276   : > { %4124 = vmatprep.mubr.f32.mxu0 %v7295_v34  ;;  %4285 = vmatprep.mubr.f32.mxu1 %v7295_v34 }
 0x279   : > { %4125 = vmatmul.mubr.f32.gmra.mrb[18].mxu0 %v3977_v23  ;;  %4286 = vmatmul.mubr.f32.gmra.mrb[18].mxu1 %v3977_v23  ;;  %v7242_v23 = vld [vmem:[%s7627_s28 + $0x60] sm:$0xff] }
 0x27a   : > { %4130 = vmatprep.mubr.f32.mxu0 %v7295_v34  ;;  %4291 = vmatprep.mubr.f32.mxu1 %v7295_v34  ;;  %v5102_v31 = vrot.slane %v7242_v23, 3 }
 0x27d   : > { %4131 = vmatmul.mubr.f32.gmra.mrb[20].mxu0 %v3979_v2  ;;  %4292 = vmatmul.mubr.f32.gmra.mrb[20].mxu1 %v3979_v2  ;;  %v5085_v2 = vsel %vm2495_vm2, %v5083_v52, %v5084_v63 }
 0x27e   : > { %4136 = vmatprep.mubr.f32.mxu0 %v7295_v34  ;;  %4297 = vmatprep.mubr.f32.mxu1 %v7295_v34 }
 0x281   : > { %4137 = vmatmul.mubr.f32.gmra.mrb[22].mxu0 %v3981_v4  ;;  %4298 = vmatmul.mubr.f32.gmra.mrb[22].mxu1 %v3981_v4  ;;  %v7243_v4 = vld [vmem:[%s7627_s28 + $0x28] sm:$0xff] }
 0x282   : > { %4142 = vmatprep.mubr.f32.mxu0 %v7295_v34  ;;  %4303 = vmatprep.mubr.f32.mxu1 %v7295_v34 }
 0x285   : > { %4143 = vmatmul.mubr.f32.gmra.mrb[24].mxu0 %v8128_v22  ;;  %4304 = vmatmul.mubr.f32.gmra.mrb[24].mxu1 %v8128_v22  ;;  %v4458_v22 = vrot.slane %v7765_v27, 6 }
 0x286   : > { %4148 = vmatprep.mubr.f32.mxu0 %v7295_v34  ;;  %4309 = vmatprep.mubr.f32.mxu1 %v7295_v34 }
 0x287   : > { %v4460_v27 = vsel %vm4457_vm5, %v4458_v22, %v4459_v46  ;;  %v5088_v22 = vrot.slane %v7243_v4, 3 }
 0x289   : > { %4149 = vmatmul.mubr.f32.gmra.mrb[26].mxu0 %v8133_v33  ;;  %4310 = vmatmul.mubr.f32.gmra.mrb[26].mxu1 %v8133_v33  ;;  %v5045_v33 = vld [vmem:[%s10406_s6 + $0x10] sm:$0xff] }
 0x28a   : > { %4154 = vmatprep.mubr.f32.mxu0 %v7295_v34  ;;  %4315 = vmatprep.mubr.f32.mxu1 %v7295_v34 }
 0x28d   : > { %4155 = vmatmul.mubr.f32.gmra.mrb[28].mxu0 %v8136_v35  ;;  %4316 = vmatmul.mubr.f32.gmra.mrb[28].mxu1 %v8136_v35  ;;  %v5046_v35 = vld [vmem:[%s10406_s6 + $0x18] sm:$0xff] }
 0x28e   : > { %4160 = vmatprep.mubr.f32.mxu0 %v7295_v34  ;;  %4321 = vmatprep.mubr.f32.mxu1 %v7295_v34  ;;  %v6634_v43 = vpack.c.bf16 %v5046_v35, %v5045_v33  ;;  %v7245_v35 = vld [vmem:[%s7627_s28 + $0x30] sm:$0xff] }
 0x291   : > { %4161 = vmatmul.mubr.f32.gmra.mrb[30].mxu0 %v8120_v11  ;;  %4322 = vmatmul.mubr.f32.gmra.mrb[30].mxu1 %v8120_v11  ;;  %v5047_v11 = vld [vmem:[%s10406_s6 + $0x20] sm:$0xff] }
 0x292   : > { %4571 = vmatprep.mubr.f32.mxu0 %v7295_v34  ;;  %4732 = vmatprep.mubr.f32.mxu1 %v7295_v34  ;;  %v6638_v54 = vpack.c.bf16 %v5048_v32, %v5047_v11 }
 0x295   : > { %4572 = vmatmul.mubr.f32.vlgmr.msra.gmra.mrb[0].mxu0 %v4460_v27  ;;  %4733 = vmatmul.mubr.f32.vlgmr.msra.gmra.mrb[0].mxu1 %v4460_v27  ;;  %v5090_v27 = vrot.slane %v7245_v35, 3 }
 0x296   : > { %6633 = vmatpush3.bf16.msra.mxu0 %v6630_v20  ;;  %6670 = vmatpush3.bf16.msra.mxu1 %v6630_v20  ;;  %v7240_v20 = vld [vmem:[%s7627_s28 + $0x58] sm:$0xff] }
 0x297   : > { %4577 = vmatprep.mubr.f32.mxu0 %v7295_v34  ;;  %4738 = vmatprep.mubr.f32.mxu1 %v7295_v34  ;;  %v5100_v62 = vrot.slane %v7240_v20, 3  ;;  %v5091_v28 = vsel %vm2495_vm2, %v5088_v22, %v5090_v27 }
 0x298   : > { %6635 = vmatprep.subr.bf16.mxu0 %v6634_v43  ;;  %6663 = vmatprep.subr.bf16.mxu1 %v6634_v43 }
 0x299   : > { %4578 = vmatmul.mubr.f32.gmra.mrb[2].mxu0 %v4462_v7  ;;  %4739 = vmatmul.mubr.f32.gmra.mrb[2].mxu1 %v4462_v7  ;;  %v5103_v33 = vsel %vm2495_vm2, %v5100_v62, %v5102_v31  ;;  %v7247_v7 = vld [vmem:[%s7627_s28 + $0x38] sm:$0xff] }
 0x29a   : > { %4583 = vmatprep.mubr.f32.mxu0 %v7295_v34  ;;  %4744 = vmatprep.mubr.f32.mxu1 %v7295_v34  ;;  %v5092_v18 = vrot.slane %v7247_v7, 3 }
 0x29b   : > { %6637 = vmatpush3.bf16.msra.mxu0 %v6634_v43  ;;  %6671 = vmatpush3.bf16.msra.mxu1 %v6634_v43  ;;  %v5106_v43 = vrot.slane %v7246_v53, 3 }
 0x29c   : > { %6639 = vmatprep.subr.bf16.mxu0 %v6638_v54  ;;  %6664 = vmatprep.subr.bf16.mxu1 %v6638_v54  ;;  %v5093_v13 = vsel %vm2495_vm2, %v5090_v27, %v5092_v18 }
 0x29d   : > { %4584 = vmatmul.mubr.f32.gmra.mrb[4].mxu0 %v4464_v9  ;;  %4745 = vmatmul.mubr.f32.gmra.mrb[4].mxu1 %v4464_v9  ;;  %v7249_v9 = vld [vmem:[%s7627_s28 + $0x40] sm:$0xff] }
 0x29e   : > { %4589 = vmatprep.mubr.f32.mxu0 %v7295_v34  ;;  %4750 = vmatprep.mubr.f32.mxu1 %v7295_v34  ;;  %v5094_v48 = vrot.slane %v7249_v9, 3 }
 0x29f   : > { %6641 = vmatpush3.bf16.msra.mxu0 %v6638_v54  ;;  %6672 = vmatpush3.bf16.msra.mxu1 %v6638_v54 }
 0x2a0   : > { %6643 = vmatprep.subr.bf16.mxu0 %v6642_v36  ;;  %6665 = vmatprep.subr.bf16.mxu1 %v6642_v36 }
 0x2a1   : > { %4590 = vmatmul.mubr.f32.gmra.mrb[6].mxu0 %v4466_v17  ;;  %4751 = vmatmul.mubr.f32.gmra.mrb[6].mxu1 %v4466_v17 }
 0x2a2   : > { %4595 = vmatprep.mubr.f32.mxu0 %v7295_v34  ;;  %4756 = vmatprep.mubr.f32.mxu1 %v7295_v34 }
 0x2a3   : > { %6645 = vmatpush3.bf16.msra.mxu0 %v6642_v36  ;;  %6673 = vmatpush3.bf16.msra.mxu1 %v6642_v36  ;;  %v7250_v36 = vld [vmem:[%s7627_s28 + $0x80] sm:$0xff] }
 0x2a4   : > { %6647 = vmatprep.subr.bf16.mxu0 %v6646_v51  ;;  %6666 = vmatprep.subr.bf16.mxu1 %v6646_v51  ;;  %v5110_v0 = vrot.slane %v7250_v36, 3 }
 0x2a5   : > { %4596 = vmatmul.mubr.f32.gmra.mrb[8].mxu0 %v4468_v38  ;;  %4757 = vmatmul.mubr.f32.gmra.mrb[8].mxu1 %v4468_v38  ;;  %v5095_v38 = vsel %vm2495_vm2, %v5092_v18, %v5094_v48 }
 0x2a6   : > { %4601 = vmatprep.mubr.f32.mxu0 %v7295_v34  ;;  %4762 = vmatprep.mubr.f32.mxu1 %v7295_v34 }
 0x2a7   : > { %6649 = vmatpush3.bf16.msra.mxu0 %v6646_v51  ;;  %6674 = vmatpush3.bf16.msra.mxu1 %v6646_v51  ;;  %v5096_v51 = vrot.slane %v7251_v6, 3 }
 0x2a8   : > { %6651 = vmatprep.subr.bf16.mxu0 %v6650_v40  ;;  %6667 = vmatprep.subr.bf16.mxu1 %v6650_v40 }
 0x2a9   : > { %4602 = vmatmul.mubr.f32.gmra.mrb[10].mxu0 %v4470_v15  ;;  %4763 = vmatmul.mubr.f32.gmra.mrb[10].mxu1 %v4470_v15  ;;  %v5097_v41 = vsel %vm2495_vm2, %v5094_v48, %v5096_v51  ;;  %v5113_v15 = vsel %vm2495_vm2, %v5110_v0, %v5112_v14 }
 0x2aa   : > { %4607 = vmatprep.mubr.f32.mxu0 %v7295_v34  ;;  %4768 = vmatprep.mubr.f32.mxu1 %v7295_v34 }
 0x2ab   : > { %6653 = vmatpush3.bf16.msra.mxu0 %v6650_v40  ;;  %6675 = vmatpush3.bf16.msra.mxu1 %v6650_v40  ;;  %v7253_v40 = vld [vmem:[%s7627_s28 + $0x90] sm:$0xff] }
 0x2ac   : > { %6655 = vmatprep.subr.bf16.mxu0 %v6654_v1  ;;  %6668 = vmatprep.subr.bf16.mxu1 %v6654_v1  ;;  %v5114_v49 = vrot.slane %v7253_v40, 3 }
 0x2ad   : > { %4608 = vmatmul.mubr.f32.gmra.mrb[12].mxu0 %v4472_v30  ;;  %4769 = vmatmul.mubr.f32.gmra.mrb[12].mxu1 %v4472_v30  ;;  %v4897_v30 = vsub.s32 0, %v4896_v45 }
 0x2ae   : > { %4613 = vmatprep.mubr.f32.mxu0 %v7295_v34  ;;  %4774 = vmatprep.mubr.f32.mxu1 %v7295_v34 }
 0x2af   : > { %6657 = vmatpush3.bf16.msra.mxu0 %v6654_v1  ;;  %6676 = vmatpush3.bf16.msra.mxu1 %v6654_v1  ;;  %v5115_v1 = vsel %vm2495_vm2, %v5112_v14, %v5114_v49 }
 0x2b0   : > { %6659 = vmatprep.subr.bf16.mxu0 %v6658_v55  ;;  %6669 = vmatprep.subr.bf16.mxu1 %v6658_v55 }
 0x2b1   : > { %4614 = vmatmul.mubr.f32.gmra.mrb[14].mxu0 %v4474_v58  ;;  %4775 = vmatmul.mubr.f32.gmra.mrb[14].mxu1 %v4474_v58  ;;  %v4901_v58 = vsub.s32 1, %v4896_v45 }
 0x2b2   : > { %4619 = vmatprep.mubr.f32.mxu0 %v7295_v34  ;;  %4780 = vmatprep.mubr.f32.mxu1 %v7295_v34 }
 0x2b3   : > { %6661 = vmatpush3.bf16.msra.mxu0 %v6658_v55  ;;  %6677 = vmatpush3.bf16.msra.mxu1 %v6658_v55  ;;  %v4893_v55 = vld [vmem:[%s10405_s5] sm:$0xf] }
 0x2b4   : > { %v10220_v61 = vrot.slane %v4893_v55, %v4905_v39  ;;  %v10224_v25 = vrot.slane %v4893_v55, %v4909_v60 }
 0x2b5   : > { %4620 = vmatmul.mubr.f32.gmra.mrb[16].mxu0 %v4476_v44  ;;  %4781 = vmatmul.mubr.f32.gmra.mrb[16].mxu1 %v4476_v44  ;;  %v10218_v44 = vrot.slane %v4893_v55, %v4897_v30 }
 0x2b6   : > { %4625 = vmatprep.mubr.f32.mxu0 %v7295_v34  ;;  %4786 = vmatprep.mubr.f32.mxu1 %v7295_v34 }
 0x2b9   : > { %4626 = vmatmul.mubr.f32.gmra.mrb[18].mxu0 %v4478_v37  ;;  %4787 = vmatmul.mubr.f32.gmra.mrb[18].mxu1 %v4478_v37  ;;  %v10222_v37 = vrot.slane %v4893_v55, %v4901_v58 }
 0x2ba   : > { %4631 = vmatprep.mubr.f32.mxu0 %v7295_v34  ;;  %4792 = vmatprep.mubr.f32.mxu1 %v7295_v34 }
 0x2bd   : > { %4632 = vmatmul.mubr.f32.gmra.mrb[20].mxu0 %v4480_v56  ;;  %4793 = vmatmul.mubr.f32.gmra.mrb[20].mxu1 %v4480_v56 }
 0x2be   : > { %4637 = vmatprep.mubr.f32.mxu0 %v7295_v34  ;;  %4798 = vmatprep.mubr.f32.mxu1 %v7295_v34 }
 0x2c1   : > { %4638 = vmatmul.mubr.f32.gmra.mrb[22].mxu0 %v4482_v8  ;;  %4799 = vmatmul.mubr.f32.gmra.mrb[22].mxu1 %v4482_v8 }
 0x2c2   : > { %4643 = vmatprep.mubr.f32.mxu0 %v7295_v34  ;;  %4804 = vmatprep.mubr.f32.mxu1 %v7295_v34 }
 0x2c5   : > { %4644 = vmatmul.mubr.f32.gmra.mrb[24].mxu0 %v8171_v16  ;;  %4805 = vmatmul.mubr.f32.gmra.mrb[24].mxu1 %v8171_v16  ;;  %v10167_v16 = vld [vmem:[%s7627_s28 + $0x50] sm:$0xff] }
 0x2c6   : > { %4649 = vmatprep.mubr.f32.mxu0 %v7295_v34  ;;  %4810 = vmatprep.mubr.f32.mxu1 %v7295_v34  ;;  %v5098_v24 = vrot.slane %v10167_v16, 3 }
 0x2c8   : > { %v5101_v42 = vsel %vm2495_vm2, %v5098_v24, %v5100_v62  ;;  %v5099_v47 = vsel %vm2495_vm2, %v5096_v51, %v5098_v24 }
 0x2c9   : > { %4650 = vmatmul.mubr.f32.gmra.mrb[26].mxu0 %v8174_v59  ;;  %4811 = vmatmul.mubr.f32.gmra.mrb[26].mxu1 %v8174_v59  ;;  %v7241_v59 = vld [vmem:[%s7627_s28 + $0x20] sm:$0xff] }
 0x2ca   : > { %4655 = vmatprep.mubr.f32.mxu0 %v7295_v34  ;;  %4816 = vmatprep.mubr.f32.mxu1 %v7295_v34  ;;  %v5086_v57 = vrot.slane %v7241_v59, 3 }
 0x2cc   : > { %v5089_v11 = vsel %vm2495_vm2, %v5086_v57, %v5088_v22 }
 0x2cd   : > { %4656 = vmatmul.mubr.f32.gmra.mrb[28].mxu0 %v8177_v50  ;;  %4817 = vmatmul.mubr.f32.gmra.mrb[28].mxu1 %v8177_v50  ;;  %v7244_v50 = vld [vmem:[%s7627_s28 + $0x68] sm:$0xff] }
 0x2ce   : > { %4661 = vmatprep.mubr.f32.mxu0 %v7295_v34  ;;  %4822 = vmatprep.mubr.f32.mxu1 %v7295_v34  ;;  %v5104_v46 = vrot.slane %v7244_v50, 3  ;;  %v5087_v34 = vsel %vm2495_vm2, %v5084_v63, %v5086_v57 }
 0x2d0   : > { %v5105_v32 = vsel %vm2495_vm2, %v5102_v31, %v5104_v46  ;;  %v5107_v29 = vsel %vm2495_vm2, %v5104_v46, %v5106_v43 }
 0x2d1   : > { %4662 = vmatmul.mubr.f32.gmra.mrb[30].mxu0 %v8153_v19  ;;  %4823 = vmatmul.mubr.f32.gmra.mrb[30].mxu1 %v8153_v19  ;;  %v7248_v19 = vld [vmem:[%s7627_s28 + $0x78] sm:$0xff]  ;;  %s7191_s28 = smul.u32 192, %s10427_s10  ;;  %s378_s10 = sadd.s32 %s7192_s21, %s10429_s27 }
 0x2d2   : > { %6030 = vmatprep.mubr.f32.mxu0 %v5085_v2  ;;  %6042 = vmatprep.mubr.f32.mxu1 %v5101_v42  ;;  %v5108_v54 = vrot.slane %v7248_v19, 3  ;;  %s5447_s22 = sshll.u32 %s378_s10, 3 }
 0x2d3   : > { %s368_s17 = sadd.s32 %s7191_s28, %s5444_s29  ;;  %s10367_s28 = scalar_lea.vmem %s10409_s9, %s5447_s22 }
 0x2d4   : > { %v5109_v17 = vsel %vm2495_vm2, %v5106_v43, %v5108_v54  ;;  %v5111_v21 = vsel %vm2495_vm2, %v5108_v54, %v5110_v0  ;;  %s5445_s18 = sshll.u32 %s368_s17, 3 }
 0x2d5   : > { %6031 = vmatmul.mubr.f32.vlgmr.msra.gmra.mrb[32].mxu0 %v5087_v34  ;;  %6043 = vmatmul.mubr.f32.vlgmr.msra.gmra.mrb[32].mxu1 %v5103_v33  ;;  %s10229_s20 = scalar_lea.vmem %s10408_s8, %s5445_s18 }
 0x2d6   : > { %6033 = vmatprep.mubr.f32.mxu0 %v5089_v11  ;;  %6045 = vmatprep.mubr.f32.mxu1 %v5105_v32 }
 0x2d9   : > { %6034 = vmatmul.mubr.f32.gmra.mrb[34].mxu0 %v5091_v28  ;;  %6046 = vmatmul.mubr.f32.gmra.mrb[34].mxu1 %v5107_v29 }
 0x2da   : > { %6036 = vmatprep.mubr.f32.mxu0 %v5093_v13  ;;  %6048 = vmatprep.mubr.f32.mxu1 %v5109_v17 }
 0x2dd   : > { %6037 = vmatmul.mubr.f32.gmra.mrb[36].mxu0 %v5095_v38  ;;  %6049 = vmatmul.mubr.f32.gmra.mrb[36].mxu1 %v5111_v21 }
 0x2de   : > { %6039 = vmatprep.mubr.f32.mxu0 %v5097_v41  ;;  %6051 = vmatprep.mubr.f32.mxu1 %v5113_v15 }
 0x2e1   : > { %6040 = vmatmul.mubr.f32.gmra.mrb[38].mxu0 %v5099_v47  ;;  %6052 = vmatmul.mubr.f32.gmra.mrb[38].mxu1 %v5115_v1 }
 0x368   : > { %v4573_v56 = vpop.f32.mrb[0].mxu0  ;;  %v4734_v3 = vpop.f32.mrb[0].mxu1 }
 0x369   : > { %v4915_v8 = vadd.f32 %v10218_v44, %v4573_v56  ;;  %v4917_v10 = vadd.f32 %v10220_v61, %v4734_v3  ;;  %v4575_v52 = vpop.f32.mrb[1].mxu0  ;;  %v4736_v12 = vpop.f32.mrb[1].mxu1 }
 0x36a   : > { %v4916_v63 = vadd.f32 %v10222_v37, %v4575_v52  ;;  %v4918_v16 = vadd.f32 %v10224_v25, %v4736_v12 }
 0x36b   : > { %4979 = vst [vmem:[%s10229_s20] sm:$0xff] %v4915_v8  ;;  %4981 = vst [vmem:[%s10229_s20 + $0x10] sm:$0xff] %v4917_v10 }
 0x36c   : > { %4980 = vst [vmem:[%s10229_s20 + $0x8] sm:$0xff] %v4916_v63  ;;  %4982 = vst [vmem:[%s10229_s20 + $0x18] sm:$0xff] %v4918_v16  ;;  %v4579_v24 = vpop.f32.mrb[2].mxu0  ;;  %v4740_v20 = vpop.f32.mrb[2].mxu1 }
 0x36d   : > { %v4919_v62 = vadd.f32 %v10218_v44, %v4579_v24  ;;  %v4921_v59 = vadd.f32 %v10220_v61, %v4740_v20  ;;  %v4581_v57 = vpop.f32.mrb[3].mxu0  ;;  %v4742_v23 = vpop.f32.mrb[3].mxu1 }
 0x36e   : > { %v4920_v31 = vadd.f32 %v10222_v37, %v4581_v57  ;;  %v4922_v2 = vadd.f32 %v10224_v25, %v4742_v23 }
 0x36f   : > { %4983 = vst [vmem:[%s10229_s20 + $0x20] sm:$0xff] %v4919_v62  ;;  %4985 = vst [vmem:[%s10229_s20 + $0x30] sm:$0xff] %v4921_v59 }
 0x370   : > { %4984 = vst [vmem:[%s10229_s20 + $0x28] sm:$0xff] %v4920_v31  ;;  %4986 = vst [vmem:[%s10229_s20 + $0x38] sm:$0xff] %v4922_v2  ;;  %v4585_v42 = vpop.f32.mrb[4].mxu0  ;;  %v4746_v4 = vpop.f32.mrb[4].mxu1 }
 0x371   : > { %v4923_v22 = vadd.f32 %v10218_v44, %v4585_v42  ;;  %v4925_v50 = vadd.f32 %v10220_v61, %v4746_v4  ;;  %v4587_v46 = vpop.f32.mrb[5].mxu0  ;;  %v4748_v34 = vpop.f32.mrb[5].mxu1 }
 0x372   : > { %v4924_v33 = vadd.f32 %v10222_v37, %v4587_v46  ;;  %v4926_v35 = vadd.f32 %v10224_v25, %v4748_v34 }
 0x373   : > { %4987 = vst [vmem:[%s10229_s20 + $0x40] sm:$0xff] %v4923_v22  ;;  %4989 = vst [vmem:[%s10229_s20 + $0x50] sm:$0xff] %v4925_v50 }
 0x374   : > { %4988 = vst [vmem:[%s10229_s20 + $0x48] sm:$0xff] %v4924_v33  ;;  %4990 = vst [vmem:[%s10229_s20 + $0x58] sm:$0xff] %v4926_v35  ;;  %v4591_v27 = vpop.f32.mrb[6].mxu0  ;;  %v4752_v53 = vpop.f32.mrb[6].mxu1 }
 0x375   : > { %v4927_v43 = vadd.f32 %v10218_v44, %v4591_v27  ;;  %v4929_v11 = vadd.f32 %v10220_v61, %v4752_v53  ;;  %v4593_v32 = vpop.f32.mrb[7].mxu0  ;;  %v4754_v7 = vpop.f32.mrb[7].mxu1 }
 0x376   : > { %v4928_v18 = vadd.f32 %v10222_v37, %v4593_v32  ;;  %v4930_v19 = vadd.f32 %v10224_v25, %v4754_v7 }
 0x377   : > { %4991 = vst [vmem:[%s10229_s20 + $0x60] sm:$0xff] %v4927_v43  ;;  %4993 = vst [vmem:[%s10229_s20 + $0x70] sm:$0xff] %v4929_v11 }
 0x378   : > { %4992 = vst [vmem:[%s10229_s20 + $0x68] sm:$0xff] %v4928_v18  ;;  %4994 = vst [vmem:[%s10229_s20 + $0x78] sm:$0xff] %v4930_v19  ;;  %v4597_v54 = vpop.f32.mrb[8].mxu0  ;;  %v4758_v28 = vpop.f32.mrb[8].mxu1 }
 0x379   : > { %v4931_v29 = vadd.f32 %v10218_v44, %v4597_v54  ;;  %v4933_v9 = vadd.f32 %v10220_v61, %v4758_v28  ;;  %v4599_v48 = vpop.f32.mrb[9].mxu0  ;;  %v4760_v36 = vpop.f32.mrb[9].mxu1 }
 0x37a   : > { %v4932_v0 = vadd.f32 %v10222_v37, %v4599_v48  ;;  %v4934_v13 = vadd.f32 %v10224_v25, %v4760_v36 }
 0x37b   : > { %4995 = vst [vmem:[%s10229_s20 + $0x80] sm:$0xff] %v4931_v29  ;;  %4997 = vst [vmem:[%s10229_s20 + $0x90] sm:$0xff] %v4933_v9 }
 0x37c   : > { %4996 = vst [vmem:[%s10229_s20 + $0x88] sm:$0xff] %v4932_v0  ;;  %4998 = vst [vmem:[%s10229_s20 + $0x98] sm:$0xff] %v4934_v13  ;;  %v4603_v17 = vpop.f32.mrb[10].mxu0  ;;  %v4764_v6 = vpop.f32.mrb[10].mxu1 }
 0x37d   : > { %v4935_v51 = vadd.f32 %v10218_v44, %v4603_v17  ;;  %v4937_v5 = vadd.f32 %v10220_v61, %v4764_v6  ;;  %v4605_v14 = vpop.f32.mrb[11].mxu0  ;;  %v4766_v38 = vpop.f32.mrb[11].mxu1 }
 0x37e   : > { %v4936_v21 = vadd.f32 %v10222_v37, %v4605_v14  ;;  %v4938_v40 = vadd.f32 %v10224_v25, %v4766_v38 }
 0x37f   : > { %4999 = vst [vmem:[%s10229_s20 + $0xa0] sm:$0xff] %v4935_v51  ;;  %5001 = vst [vmem:[%s10229_s20 + $0xb0] sm:$0xff] %v4937_v5 }
 0x380   : > { %5000 = vst [vmem:[%s10229_s20 + $0xa8] sm:$0xff] %v4936_v21  ;;  %5002 = vst [vmem:[%s10229_s20 + $0xb8] sm:$0xff] %v4938_v40  ;;  %v4609_v49 = vpop.f32.mrb[12].mxu0  ;;  %v4770_v41 = vpop.f32.mrb[12].mxu1 }
 0x381   : > { %v4939_v15 = vadd.f32 %v10218_v44, %v4609_v49  ;;  %v4941_v47 = vadd.f32 %v10220_v61, %v4770_v41  ;;  %v4611_v1 = vpop.f32.mrb[13].mxu0  ;;  %v4772_v26 = vpop.f32.mrb[13].mxu1 }
 0x382   : > { %v4940_v45 = vadd.f32 %v10222_v37, %v4611_v1  ;;  %v4942_v30 = vadd.f32 %v10224_v25, %v4772_v26 }
 0x383   : > { %5003 = vst [vmem:[%s10229_s20 + $0xc0] sm:$0xff] %v4939_v15  ;;  %5005 = vst [vmem:[%s10229_s20 + $0xd0] sm:$0xff] %v4941_v47 }
 0x384   : > { %5004 = vst [vmem:[%s10229_s20 + $0xc8] sm:$0xff] %v4940_v45  ;;  %5006 = vst [vmem:[%s10229_s20 + $0xd8] sm:$0xff] %v4942_v30  ;;  %v4615_v39 = vpop.f32.mrb[14].mxu0  ;;  %v4776_v55 = vpop.f32.mrb[14].mxu1 }
 0x385   : > { %v4943_v58 = vadd.f32 %v10218_v44, %v4615_v39  ;;  %v4945_v60 = vadd.f32 %v10220_v61, %v4776_v55  ;;  %v4617_v56 = vpop.f32.mrb[15].mxu0  ;;  %v4778_v3 = vpop.f32.mrb[15].mxu1 }
 0x386   : > { %v4944_v8 = vadd.f32 %v10222_v37, %v4617_v56  ;;  %v4946_v10 = vadd.f32 %v10224_v25, %v4778_v3 }
 0x387   : > { %5007 = vst [vmem:[%s10229_s20 + $0xe0] sm:$0xff] %v4943_v58  ;;  %5009 = vst [vmem:[%s10229_s20 + $0xf0] sm:$0xff] %v4945_v60 }
 0x388   : > { %5008 = vst [vmem:[%s10229_s20 + $0xe8] sm:$0xff] %v4944_v8  ;;  %5010 = vst [vmem:[%s10229_s20 + $0xf8] sm:$0xff] %v4946_v10  ;;  %v4621_v52 = vpop.f32.mrb[16].mxu0  ;;  %v4782_v12 = vpop.f32.mrb[16].mxu1 }
 0x389   : > { %v4947_v63 = vadd.f32 %v10218_v44, %v4621_v52  ;;  %v4949_v16 = vadd.f32 %v10220_v61, %v4782_v12  ;;  %v4623_v24 = vpop.f32.mrb[17].mxu0  ;;  %v4784_v20 = vpop.f32.mrb[17].mxu1 }
 0x38a   : > { %v4948_v62 = vadd.f32 %v10222_v37, %v4623_v24  ;;  %v4950_v59 = vadd.f32 %v10224_v25, %v4784_v20  ;;  %v5963_v24 = vld [vmem:[%s10407_s7] ss:$0 sm:$0xff] }
 0x38b   : > { %5011 = vst [vmem:[%s10229_s20 + $0x100] sm:$0xff] %v4947_v63  ;;  %5013 = vst [vmem:[%s10229_s20 + $0x110] sm:$0xff] %v4949_v16 }
 0x38c   : > { %5012 = vst [vmem:[%s10229_s20 + $0x108] sm:$0xff] %v4948_v62  ;;  %5014 = vst [vmem:[%s10229_s20 + $0x118] sm:$0xff] %v4950_v59  ;;  %v4627_v57 = vpop.f32.mrb[18].mxu0  ;;  %v4788_v23 = vpop.f32.mrb[18].mxu1 }
 0x38d   : > { %v4951_v31 = vadd.f32 %v10218_v44, %v4627_v57  ;;  %v4953_v2 = vadd.f32 %v10220_v61, %v4788_v23  ;;  %v4629_v42 = vpop.f32.mrb[19].mxu0  ;;  %v4790_v4 = vpop.f32.mrb[19].mxu1 }
 0x38e   : > { %v4952_v22 = vadd.f32 %v10222_v37, %v4629_v42  ;;  %v4954_v50 = vadd.f32 %v10224_v25, %v4790_v4 }
 0x38f   : > { %5015 = vst [vmem:[%s10229_s20 + $0x120] sm:$0xff] %v4951_v31  ;;  %5017 = vst [vmem:[%s10229_s20 + $0x130] sm:$0xff] %v4953_v2 }
 0x390   : > { %5016 = vst [vmem:[%s10229_s20 + $0x128] sm:$0xff] %v4952_v22  ;;  %5018 = vst [vmem:[%s10229_s20 + $0x138] sm:$0xff] %v4954_v50  ;;  %v4633_v46 = vpop.f32.mrb[20].mxu0  ;;  %v4794_v34 = vpop.f32.mrb[20].mxu1 }
 0x391   : > { %v4955_v33 = vadd.f32 %v10218_v44, %v4633_v46  ;;  %v4957_v35 = vadd.f32 %v10220_v61, %v4794_v34  ;;  %v4635_v27 = vpop.f32.mrb[21].mxu0  ;;  %v4796_v53 = vpop.f32.mrb[21].mxu1 }
 0x392   : > { %v4956_v43 = vadd.f32 %v10222_v37, %v4635_v27  ;;  %v4958_v11 = vadd.f32 %v10224_v25, %v4796_v53 }
 0x393   : > { %5019 = vst [vmem:[%s10229_s20 + $0x140] sm:$0xff] %v4955_v33  ;;  %5021 = vst [vmem:[%s10229_s20 + $0x150] sm:$0xff] %v4957_v35 }
 0x394   : > { %5020 = vst [vmem:[%s10229_s20 + $0x148] sm:$0xff] %v4956_v43  ;;  %5022 = vst [vmem:[%s10229_s20 + $0x158] sm:$0xff] %v4958_v11  ;;  %v4639_v32 = vpop.f32.mrb[22].mxu0  ;;  %v4800_v7 = vpop.f32.mrb[22].mxu1 }
 0x395   : > { %v4959_v18 = vadd.f32 %v10218_v44, %v4639_v32  ;;  %v4961_v19 = vadd.f32 %v10220_v61, %v4800_v7  ;;  %v4641_v54 = vpop.f32.mrb[23].mxu0  ;;  %v4802_v28 = vpop.f32.mrb[23].mxu1 }
 0x396   : > { %v4960_v29 = vadd.f32 %v10222_v37, %v4641_v54  ;;  %v4962_v9 = vadd.f32 %v10224_v25, %v4802_v28 }
 0x397   : > { %5023 = vst [vmem:[%s10229_s20 + $0x160] sm:$0xff] %v4959_v18  ;;  %5025 = vst [vmem:[%s10229_s20 + $0x170] sm:$0xff] %v4961_v19 }
 0x398   : > { %5024 = vst [vmem:[%s10229_s20 + $0x168] sm:$0xff] %v4960_v29  ;;  %5026 = vst [vmem:[%s10229_s20 + $0x178] sm:$0xff] %v4962_v9  ;;  %v4645_v48 = vpop.f32.mrb[24].mxu0  ;;  %v4806_v36 = vpop.f32.mrb[24].mxu1 }
 0x399   : > { %v4963_v0 = vadd.f32 %v10218_v44, %v4645_v48  ;;  %v4965_v13 = vadd.f32 %v10220_v61, %v4806_v36  ;;  %v4647_v17 = vpop.f32.mrb[25].mxu0  ;;  %v4808_v6 = vpop.f32.mrb[25].mxu1 }
 0x39a   : > { %v4964_v51 = vadd.f32 %v10222_v37, %v4647_v17  ;;  %v4966_v5 = vadd.f32 %v10224_v25, %v4808_v6 }
 0x39b   : > { %5027 = vst [vmem:[%s10229_s20 + $0x180] sm:$0xff] %v4963_v0  ;;  %5029 = vst [vmem:[%s10229_s20 + $0x190] sm:$0xff] %v4965_v13 }
 0x39c   : > { %5028 = vst [vmem:[%s10229_s20 + $0x188] sm:$0xff] %v4964_v51  ;;  %5030 = vst [vmem:[%s10229_s20 + $0x198] sm:$0xff] %v4966_v5  ;;  %v4651_v14 = vpop.f32.mrb[26].mxu0  ;;  %v4812_v38 = vpop.f32.mrb[26].mxu1 }
 0x39d   : > { %v4967_v21 = vadd.f32 %v10218_v44, %v4651_v14  ;;  %v4969_v40 = vadd.f32 %v10220_v61, %v4812_v38  ;;  %v4653_v49 = vpop.f32.mrb[27].mxu0  ;;  %v4814_v41 = vpop.f32.mrb[27].mxu1 }
 0x39e   : > { %v4968_v15 = vadd.f32 %v10222_v37, %v4653_v49  ;;  %v4970_v47 = vadd.f32 %v10224_v25, %v4814_v41 }
 0x39f   : > { %5031 = vst [vmem:[%s10229_s20 + $0x1a0] sm:$0xff] %v4967_v21  ;;  %5033 = vst [vmem:[%s10229_s20 + $0x1b0] sm:$0xff] %v4969_v40 }
 0x3a0   : > { %5032 = vst [vmem:[%s10229_s20 + $0x1a8] sm:$0xff] %v4968_v15  ;;  %5034 = vst [vmem:[%s10229_s20 + $0x1b8] sm:$0xff] %v4970_v47  ;;  %v4657_v1 = vpop.f32.mrb[28].mxu0  ;;  %v4818_v26 = vpop.f32.mrb[28].mxu1 }
 0x3a1   : > { %v4971_v45 = vadd.f32 %v10218_v44, %v4657_v1  ;;  %v4973_v30 = vadd.f32 %v10220_v61, %v4818_v26  ;;  %v4659_v39 = vpop.f32.mrb[29].mxu0  ;;  %v4820_v55 = vpop.f32.mrb[29].mxu1 }
 0x3a2   : > { %v4972_v58 = vadd.f32 %v10222_v37, %v4659_v39  ;;  %v4974_v60 = vadd.f32 %v10224_v25, %v4820_v55 }
 0x3a3   : > { %5035 = vst [vmem:[%s10229_s20 + $0x1c0] sm:$0xff] %v4971_v45  ;;  %5037 = vst [vmem:[%s10229_s20 + $0x1d0] sm:$0xff] %v4973_v30 }
 0x3a4   : > { %5036 = vst [vmem:[%s10229_s20 + $0x1c8] sm:$0xff] %v4972_v58  ;;  %5038 = vst [vmem:[%s10229_s20 + $0x1d8] sm:$0xff] %v4974_v60  ;;  %v4663_v56 = vpop.f32.mrb[30].mxu0  ;;  %v4824_v3 = vpop.f32.mrb[30].mxu1 }
 0x3a5   : > { %v4975_v8 = vadd.f32 %v10218_v44, %v4663_v56  ;;  %v4977_v10 = vadd.f32 %v10220_v61, %v4824_v3  ;;  %v4665_v52 = vpop.f32.mrb[31].mxu0  ;;  %v4826_v12 = vpop.f32.mrb[31].mxu1 }
 0x3a6   : > { %v4976_v63 = vadd.f32 %v10222_v37, %v4665_v52  ;;  %v4978_v16 = vadd.f32 %v10224_v25, %v4826_v12 }
 0x3a7   : > { %5039 = vst [vmem:[%s10229_s20 + $0x1e0] sm:$0xff] %v4975_v8  ;;  %5041 = vst [vmem:[%s10229_s20 + $0x1f0] sm:$0xff] %v4977_v10 }
 0x3a8   : > { %5040 = vst [vmem:[%s10229_s20 + $0x1e8] sm:$0xff] %v4976_v63  ;;  %5042 = vst [vmem:[%s10229_s20 + $0x1f8] sm:$0xff] %v4978_v16  ;;  %v6032_v44 = vpop.f32.mrb[32].mxu0  ;;  %v6044_v61 = vpop.f32.mrb[32].mxu1 }
 0x3a9   : > { %v5204_v37 = vadd.f32 %v6032_v44, %v5963_v24  ;;  %v5244_v25 = vadd.f32 %v6044_v61, %v5963_v24  ;;  %v5198_v20 = vpop.f32.mrb[33].mxu0  ;;  %v5238_v62 = vpop.f32.mrb[33].mxu1 }
 0x3aa   : > { %v5199_v59 = vadd.f32 %v5963_v24, %v5198_v20  ;;  %v5239_v57 = vadd.f32 %v5963_v24, %v5238_v62 }
 0x3ab   : > { %5278 = vst [vmem:[%s10367_s28 + $0x8] sm:$0xff] %v5204_v37  ;;  %5286 = vst [vmem:[%s10367_s28 + $0x48] sm:$0xff] %v5244_v25 }
 0x3ac   : > { %5277 = vst [vmem:[%s10367_s28] sm:$0xff] %v5199_v59  ;;  %5285 = vst [vmem:[%s10367_s28 + $0x40] sm:$0xff] %v5239_v57  ;;  %v6035_v23 = vpop.f32.mrb[34].mxu0  ;;  %v6047_v31 = vpop.f32.mrb[34].mxu1 }
 0x3ad   : > { %v5214_v2 = vadd.f32 %v6035_v23, %v5963_v24  ;;  %v5254_v42 = vadd.f32 %v6047_v31, %v5963_v24  ;;  %v5208_v4 = vpop.f32.mrb[35].mxu0  ;;  %v5248_v22 = vpop.f32.mrb[35].mxu1 }
 0x3ae   : > { %v5209_v50 = vadd.f32 %v5963_v24, %v5208_v4  ;;  %v5249_v46 = vadd.f32 %v5963_v24, %v5248_v22 }
 0x3af   : > { %5280 = vst [vmem:[%s10367_s28 + $0x18] sm:$0xff] %v5214_v2  ;;  %5288 = vst [vmem:[%s10367_s28 + $0x58] sm:$0xff] %v5254_v42 }
 0x3b0   : > { %5279 = vst [vmem:[%s10367_s28 + $0x10] sm:$0xff] %v5209_v50  ;;  %5287 = vst [vmem:[%s10367_s28 + $0x50] sm:$0xff] %v5249_v46  ;;  %v6038_v34 = vpop.f32.mrb[36].mxu0  ;;  %v6050_v33 = vpop.f32.mrb[36].mxu1 }
 0x3b1   : > { %v5224_v35 = vadd.f32 %v6038_v34, %v5963_v24  ;;  %v5264_v27 = vadd.f32 %v6050_v33, %v5963_v24  ;;  %v5218_v53 = vpop.f32.mrb[37].mxu0  ;;  %v5258_v43 = vpop.f32.mrb[37].mxu1 }
 0x3b2   : > { %v5219_v11 = vadd.f32 %v5963_v24, %v5218_v53  ;;  %v5259_v32 = vadd.f32 %v5963_v24, %v5258_v43 }
 0x3b3   : > { %5282 = vst [vmem:[%s10367_s28 + $0x28] sm:$0xff] %v5224_v35  ;;  %5290 = vst [vmem:[%s10367_s28 + $0x68] sm:$0xff] %v5264_v27 }
 0x3b4   : > { %5281 = vst [vmem:[%s10367_s28 + $0x20] sm:$0xff] %v5219_v11  ;;  %5289 = vst [vmem:[%s10367_s28 + $0x60] sm:$0xff] %v5259_v32  ;;  %v6041_v7 = vpop.f32.mrb[38].mxu0  ;;  %v6053_v18 = vpop.f32.mrb[38].mxu1 }
 0x3b5   : > { %v5234_v19 = vadd.f32 %v6041_v7, %v5963_v24  ;;  %v5274_v54 = vadd.f32 %v6053_v18, %v5963_v24  ;;  %v5228_v28 = vpop.f32.mrb[39].mxu0  ;;  %v5268_v29 = vpop.f32.mrb[39].mxu1 }
 0x3b6   : > { %v5229_v9 = vadd.f32 %v5963_v24, %v5228_v28  ;;  %v5269_v48 = vadd.f32 %v5963_v24, %v5268_v29 }
 0x3b7   : > { %5284 = vst [vmem:[%s10367_s28 + $0x38] sm:$0xff] %v5234_v19  ;;  %5292 = vst [vmem:[%s10367_s28 + $0x78] sm:$0xff] %v5274_v54 }
 0x3b8   : > { %5283 = vst [vmem:[%s10367_s28 + $0x30] sm:$0xff] %v5229_v9  ;;  %5291 = vst [vmem:[%s10367_s28 + $0x70] sm:$0xff] %v5269_v48 }
 0x3b9 PF: > { %s20_s13 = sadd.s32 1, %s7292_s13   ;;  %s10416_s30 = smov %s7284_s11 }
 0x3ba   : > { %p17_p7 = scmp.ge.s32.totalorder %s20_s13, 8   ;;  %s10417_s10 = smov %s7288_s12 }
 0x3bb   : > { %s10418_s11 = smov %s10421_s14  ;;  %s10419_s12 = smov %s10425_s15 }
 0x3bc   :  { %19 = sbr.rel (!%p17_p7) target bundleno = 3 (0x3), region = 104 }

// kernel: resgen_block_forward.6
= control target key start
LH: loop header
LB: loop body
LE: loop exit
PB: predicated region body
PF: predicated region fallthrough
CT: control target
= control target key end

     0   :  { %s726_s6 = smov 0   ;;  %s1046_s0 = inlined_call_operand.vmem [shape: f32[2700,128], index: 0, kind: input, shape index: {}]   ;;  %s1047_s1 = inlined_call_operand.vmem [shape: f32[2,128], index: 1, kind: output, shape index: {}]  }
   0x1 LB: > { %s688_s7 = sadd.s32 4294967295, %s713_s6   ;;  %p691_p0 = scmp.ge.s32.totalorder %s713_s6, 1  ;;  %s713_s6 = sphi %s726_s6, %s11_s6  }
   0x2   : > { %p91_p1 = scmp.lt.s32.totalorder %s713_s6, 7 }
   0x4   : > { %p92_p2 = pnand %p691_p0, %p91_p1 }
   0x6   : > { %95 = sbr.rel (%p92_p2) target bundleno = 202 (0xca), region = 24 }
   0xd   : > { %s692_s8 = sshll.u32 %s688_s7, 6  ;;  %p694_p4 = scmp.ne.s32.totalorder %s688_s7, 0 }
   0xe   : > { %p115_p3 = scmp.lt.s32.totalorder %s692_s8, 337  ;;  %v715_v0 = vmov (!%p694_p4), 0.0  }
   0xf   : > { %127 = sbr.rel (%p694_p4) target bundleno = 22 (0x16), region = 28  ;;  %128 = vst [vmem:[%s1047_s1] sm:$0x3] (!%p694_p4), %v715_v0 }
  0x10   : > { %s1051_s8 = smov (!%p115_p3, %s692_s8), 337 }
  0x11   : > { %s693_s9 = sshll.u32 %s1051_s8, 3 }
  0x12   : > { %s737_s12 = scalar_lea.vmem %s1046_s0, %s693_s9 }
  0x16 PF: > { %v193_v1 = vlaneseq  ;;  %s695_s15 = sshll.u32 %s688_s7, 9 }
  0x17   : > { %v746_v5 = vstv %s695_s15 }
  0x18   : > { %v742_v2 = vshrl.u32 %v193_v1, 7 }
  0x1a   : > { %v227_v3 = vadd.s32 264, %v742_v2  ;;  %v228_v4 = vadd.s32 272, %v742_v2  ;;  %v229_v6 = vadd.s32 280, %v742_v2  ;;  %v230_v7 = vadd.s32 288, %v742_v2 }
  0x1b   : > { %v231_v8 = vadd.s32 296, %v742_v2  ;;  %v232_v9 = vadd.s32 304, %v742_v2  ;;  %v233_v10 = vadd.s32 312, %v742_v2  ;;  %v234_v11 = vadd.s32 320, %v742_v2 }
  0x1c   : > { %v235_v12 = vadd.s32 328, %v742_v2  ;;  %v236_v13 = vadd.s32 336, %v742_v2  ;;  %v237_v14 = vadd.s32 344, %v742_v2  ;;  %v238_v15 = vadd.s32 352, %v742_v2 }
  0x1d   : > { %v239_v16 = vadd.s32 360, %v742_v2  ;;  %v240_v17 = vadd.s32 368, %v742_v2  ;;  %v241_v18 = vadd.s32 376, %v742_v2  ;;  %v242_v19 = vadd.s32 384, %v742_v2 }
  0x1e   : > { %v243_v20 = vadd.s32 392, %v742_v2  ;;  %v244_v21 = vadd.s32 400, %v742_v2  ;;  %v245_v22 = vadd.s32 408, %v742_v2  ;;  %v246_v23 = vadd.s32 416, %v742_v2 }
  0x1f   : > { %v247_v24 = vadd.s32 424, %v742_v2  ;;  %v248_v25 = vadd.s32 432, %v742_v2  ;;  %v249_v26 = vadd.s32 440, %v742_v2  ;;  %v250_v27 = vadd.s32 448, %v742_v2 }
  0x20   : > { %v251_v28 = vadd.s32 456, %v742_v2  ;;  %v252_v29 = vadd.s32 464, %v742_v2  ;;  %v253_v30 = vadd.s32 472, %v742_v2  ;;  %v254_v31 = vadd.s32 480, %v742_v2 }
  0x21   : > { %v255_v32 = vadd.s32 488, %v742_v2  ;;  %v256_v33 = vadd.s32 496, %v742_v2  ;;  %v257_v34 = vadd.s32 504, %v742_v2  ;;  %v778_v35 = vadd.s32 %v746_v5, %v227_v3 }
  0x22   : > { %v781_v36 = vadd.s32 %v746_v5, %v228_v4  ;;  %v784_v37 = vadd.s32 %v746_v5, %v229_v6  ;;  %v787_v38 = vadd.s32 %v746_v5, %v230_v7  ;;  %v790_v39 = vadd.s32 %v746_v5, %v231_v8 }
  0x23   : > { %v793_v40 = vadd.s32 %v746_v5, %v232_v9  ;;  %v796_v41 = vadd.s32 %v746_v5, %v233_v10  ;;  %v799_v42 = vadd.s32 %v746_v5, %v234_v11  ;;  %v802_v43 = vadd.s32 %v746_v5, %v235_v12  ;;  %v129_v11 = vld [vmem:[%s737_s12] sm:$0xff]  ;;  %v130_v12 = vld [vmem:[%s737_s12 + $0x8] sm:$0xff] }
  0x24   : > { %v805_v44 = vadd.s32 %v746_v5, %v236_v13  ;;  %v808_v45 = vadd.s32 %v746_v5, %v237_v14  ;;  %v811_v46 = vadd.s32 %v746_v5, %v238_v15  ;;  %v814_v47 = vadd.s32 %v746_v5, %v239_v16  ;;  %v131_v15 = vld [vmem:[%s737_s12 + $0x10] sm:$0xff] }
  0x25   : > { %v817_v48 = vadd.s32 %v746_v5, %v240_v17  ;;  %v820_v49 = vadd.s32 %v746_v5, %v241_v18  ;;  %v823_v50 = vadd.s32 %v746_v5, %v242_v19  ;;  %v826_v51 = vadd.s32 %v746_v5, %v243_v20  ;;  %v132_v20 = vld [vmem:[%s737_s12 + $0x18] sm:$0xff] }
  0x26   : > { %v829_v52 = vadd.s32 %v746_v5, %v244_v21  ;;  %v832_v53 = vadd.s32 %v746_v5, %v245_v22  ;;  %v835_v54 = vadd.s32 %v746_v5, %v246_v23  ;;  %v838_v55 = vadd.s32 %v746_v5, %v247_v24 }
  0x27   : > { %v841_v56 = vadd.s32 %v746_v5, %v248_v25  ;;  %v844_v57 = vadd.s32 %v746_v5, %v249_v26  ;;  %v847_v58 = vadd.s32 %v746_v5, %v250_v27  ;;  %v850_v59 = vadd.s32 %v746_v5, %v251_v28  ;;  %v133_v25 = vld [vmem:[%s737_s12 + $0x20] sm:$0xff] }
  0x28   : > { %v853_v60 = vadd.s32 %v746_v5, %v252_v29  ;;  %v856_v61 = vadd.s32 %v746_v5, %v253_v30  ;;  %v859_v62 = vadd.s32 %v746_v5, %v254_v31  ;;  %v862_v63 = vadd.s32 %v746_v5, %v255_v32  ;;  %v134_v30 = vld [vmem:[%s737_s12 + $0x28] sm:$0xff] }
  0x29   : > { %v865_v0 = vadd.s32 %v746_v5, %v256_v33  ;;  %v868_v1 = vadd.s32 %v746_v5, %v257_v34  ;;  %v195_v3 = vadd.s32 8, %v742_v2  ;;  %v196_v4 = vadd.s32 16, %v742_v2 }
  0x2a   : > { %v197_v6 = vadd.s32 24, %v742_v2  ;;  %v260_v7 = vadd.s32 %v746_v5, %v742_v2  ;;  %v198_v9 = vadd.s32 32, %v742_v2  ;;  %v199_v13 = vadd.s32 40, %v742_v2 }
  0x2b   : > { %1048 = vst [vmem:[#allocation2_spill] sm:$0xff] %v868_v1  ;;  %v261_v8 = vadd.s32 %v746_v5, %v195_v3  ;;  %v262_v10 = vadd.s32 %v746_v5, %v196_v4  ;;  %v200_v16 = vadd.s32 48, %v742_v2  ;;  %v201_v21 = vadd.s32 56, %v742_v2  ;;  %v135_v3 = vld [vmem:[%s737_s12 + $0x30] sm:$0xff] }
  0x2c   : > { %v263_v14 = vadd.s32 %v746_v5, %v197_v6  ;;  %vm324_vm0 = vcmp.lt.s32.totalorder %v260_v7, 2700  ;;  %v264_v17 = vadd.s32 %v746_v5, %v198_v9  ;;  %v265_v22 = vadd.s32 %v746_v5, %v199_v13  ;;  %v136_v9 = vld [vmem:[%s737_s12 + $0x38] sm:$0xff] }
  0x2d   : > { %vm325_vm1 = vcmp.lt.s32.totalorder %v261_v8, 2700  ;;  %vm326_vm2 = vcmp.lt.s32.totalorder %v262_v10, 2700  ;;  %v388_v18 = vsel %vm324_vm0, %v129_v11, 0.0  ;;  %v202_v26 = vadd.s32 64, %v742_v2 }
  0x2e   : > { %v389_v19 = vsel %vm325_vm1, %v130_v12, 0.0  ;;  %vm327_vm3 = vcmp.lt.s32.totalorder %v263_v14, 2700  ;;  %v390_v24 = vsel %vm326_vm2, %v131_v15, 0.0  ;;  %v266_v27 = vadd.s32 %v746_v5, %v200_v16  ;;  %v137_v15 = vld [vmem:[%s737_s12 + $0x40] sm:$0xff] }
  0x2f   : > { %v453_v23 = vadd.f32 %v389_v19, %v388_v18  ;;  %vm328_vm4 = vcmp.lt.s32.totalorder %v264_v17, 2700  ;;  %v391_v29 = vsel %vm327_vm3, %v132_v20, 0.0  ;;  %v203_v31 = vadd.s32 72, %v742_v2 }
  0x30   : > { %v267_v32 = vadd.s32 %v746_v5, %v201_v21  ;;  %vm329_vm5 = vcmp.lt.s32.totalorder %v265_v22, 2700  ;;  %v392_v34 = vsel %vm328_vm4, %v133_v25, 0.0  ;;  %v204_v4 = vadd.s32 80, %v742_v2  ;;  %v138_v21 = vld [vmem:[%s737_s12 + $0x48] sm:$0xff] }
  0x31   : > { %v454_v28 = vadd.f32 %v453_v23, %v390_v24  ;;  %v268_v6 = vadd.s32 %v746_v5, %v202_v26  ;;  %vm330_vm6 = vcmp.lt.s32.totalorder %v266_v27, 2700  ;;  %v393_v8 = vsel %vm329_vm5, %v134_v30, 0.0  ;;  %v139_v30 = vld [vmem:[%s737_s12 + $0x50] sm:$0xff] }
  0x32   : > { %v205_v10 = vadd.s32 88, %v742_v2  ;;  %v269_v11 = vadd.s32 %v746_v5, %v203_v31  ;;  %vm331_vm7 = vcmp.lt.s32.totalorder %v267_v32, 2700  ;;  %v206_v13 = vadd.s32 96, %v742_v2 }
  0x33   : > { %v455_v33 = vadd.f32 %v454_v28, %v391_v29  ;;  %v394_v14 = vsel %vm330_vm6, %v135_v3, 0.0  ;;  %v270_v16 = vadd.s32 %v746_v5, %v204_v4  ;;  %vm332_vm8 = vcmp.lt.s32.totalorder %v268_v6, 2700  ;;  %v140_v6 = vld [vmem:[%s737_s12 + $0x58] sm:$0xff] }
  0x34   : > { %v395_v20 = vsel %vm331_vm7, %v136_v9, 0.0  ;;  %v207_v22 = vadd.s32 104, %v742_v2  ;;  %v271_v23 = vadd.s32 %v746_v5, %v205_v10  ;;  %vm333_vm9 = vcmp.lt.s32.totalorder %v269_v11, 2700 }
  0x35   : > { %v456_v7 = vadd.f32 %v455_v33, %v392_v34  ;;  %v208_v26 = vadd.s32 112, %v742_v2  ;;  %v272_v27 = vadd.s32 %v746_v5, %v206_v13  ;;  %v396_v28 = vsel %vm332_vm8, %v137_v15, 0.0  ;;  %v141_v15 = vld [vmem:[%s737_s12 + $0x60] sm:$0xff] }
  0x36   : > { %vm334_vm10 = vcmp.lt.s32.totalorder %v270_v16, 2700  ;;  %v525_v32 = vmul.f32 %v388_v18, %v388_v18  ;;  %v526_v33 = vmul.f32 %v389_v19, %v389_v19  ;;  %v209_v3 = vadd.s32 120, %v742_v2 }
  0x37   : > { %v457_v12 = vadd.f32 %v456_v7, %v393_v8  ;;  %v397_v4 = vsel %vm333_vm9, %v138_v21, 0.0  ;;  %v273_v7 = vadd.s32 %v746_v5, %v207_v22  ;;  %vm335_vm11 = vcmp.lt.s32.totalorder %v271_v23, 2700  ;;  %v142_v22 = vld [vmem:[%s737_s12 + $0x68] sm:$0xff] }
  0x38   : > { %v527_v10 = vmul.f32 %v390_v24, %v390_v24  ;;  %v210_v11 = vadd.s32 128, %v742_v2  ;;  %v398_v13 = vsel %vm334_vm10, %v139_v30, 0.0  ;;  %vm336_vm12 = vcmp.lt.s32.totalorder %v272_v27, 2700  ;;  %v143_v27 = vld [vmem:[%s737_s12 + $0x70] sm:$0xff] }
  0x39   : > { %v458_v17 = vadd.f32 %v457_v12, %v394_v14  ;;  %v274_v12 = vadd.s32 %v746_v5, %v208_v26  ;;  %v528_v19 = vmul.f32 %v391_v29, %v391_v29  ;;  %v589_v16 = vadd.f32 %v526_v33, %v525_v32 }
  0x3a   : > { %v275_v21 = vadd.s32 %v746_v5, %v209_v3  ;;  %vm337_vm13 = vcmp.lt.s32.totalorder %v273_v7, 2700  ;;  %v529_v23 = vmul.f32 %v392_v34, %v392_v34  ;;  %v212_v26 = vadd.s32 144, %v742_v2  ;;  %v144_v7 = vld [vmem:[%s737_s12 + $0x78] sm:$0xff] }
  0x3b   : > { %v459_v25 = vadd.f32 %v458_v17, %v395_v20  ;;  %v211_v17 = vadd.s32 136, %v742_v2  ;;  %v276_v30 = vadd.s32 %v746_v5, %v210_v11  ;;  %v400_v1 = vsel %vm336_vm12, %v141_v15, 0.0 }
  0x3c   : > { %vm338_vm14 = vcmp.lt.s32.totalorder %v274_v12, 2700  ;;  %v530_v32 = vmul.f32 %v393_v8, %v393_v8  ;;  %v213_v3 = vadd.s32 152, %v742_v2  ;;  %vm339_vm15 = vcmp.lt.s32.totalorder %v275_v21, 2700  ;;  %v145_v12 = vld [vmem:[%s737_s12 + $0x80] sm:$0xff]  ;;  %v146_v21 = vld [vmem:[%s737_s12 + $0x88] sm:$0xff] }
  0x3d   : > { %v460_v31 = vadd.f32 %v459_v25, %v396_v28  ;;  %v399_v25 = vsel %vm335_vm11, %v140_v6, 0.0  ;;  %v277_v6 = vadd.s32 %v746_v5, %v211_v17  ;;  %v214_v11 = vadd.s32 160, %v742_v2 }
  0x3e   : > { %v278_v15 = vadd.s32 %v746_v5, %v212_v26  ;;  %vm340_vm0 = vcmp.lt.s32.totalorder %v276_v30, 2700  ;;  %v215_v17 = vadd.s32 168, %v742_v2  ;;  %v216_v26 = vadd.s32 176, %v742_v2  ;;  %v147_v30 = vld [vmem:[%s737_s12 + $0x90] sm:$0xff] }
  0x3f   : > { %v461_v9 = vadd.f32 %v460_v31, %v397_v4  ;;  %v590_v31 = vadd.f32 %v589_v16, %v527_v10  ;;  %v531_v10 = vmul.f32 %v394_v14, %v394_v14  ;;  %v402_v16 = vsel %vm338_vm14, %v143_v27, 0.0 }
  0x40   : > { %vm341_vm1 = vcmp.lt.s32.totalorder %v277_v6, 2700  ;;  %v280_v27 = vadd.s32 %v746_v5, %v214_v11  ;;  %vm342_vm2 = vcmp.lt.s32.totalorder %v278_v15, 2700  ;;  %v148_v6 = vld [vmem:[%s737_s12 + $0x98] sm:$0xff]  ;;  %v218_v11 = vadd.s32 192, %v742_v2  ;;  %v149_v15 = vld [vmem:[%s737_s12 + $0xa0] sm:$0xff] }
  0x41   : > { %v462_v18 = vadd.f32 %v461_v9, %v398_v13  ;;  %v591_v33 = vadd.f32 %v590_v31, %v528_v19  ;;  %v401_v9 = vsel %vm337_vm13, %v142_v22, 0.0  ;;  %v532_v19 = vmul.f32 %v395_v20, %v395_v20 }
  0x42   : > { %v279_v22 = vadd.s32 %v746_v5, %v213_v3  ;;  %v403_v31 = vsel %vm339_vm15, %v144_v7, 0.0  ;;  %v217_v3 = vadd.s32 184, %v742_v2  ;;  %v281_v7 = vadd.s32 %v746_v5, %v215_v17 }
  0x43   : > { %v463_v24 = vadd.f32 %v462_v18, %v399_v25  ;;  %v592_v18 = vadd.f32 %v591_v33, %v529_v23  ;;  %v533_v23 = vmul.f32 %v396_v28, %v396_v28  ;;  %v404_v33 = vsel %vm340_vm0, %v145_v12, 0.0 }
  0x44   : > { %vm343_vm3 = vcmp.lt.s32.totalorder %v279_v22, 2700  ;;  %v282_v12 = vadd.s32 %v746_v5, %v216_v26  ;;  %vm344_vm4 = vcmp.lt.s32.totalorder %v280_v27, 2700  ;;  %v219_v17 = vadd.s32 200, %v742_v2  ;;  %v150_v22 = vld [vmem:[%s737_s12 + $0xa8] sm:$0xff]  ;;  %v151_v27 = vld [vmem:[%s737_s12 + $0xb0] sm:$0xff] }
  0x45   : > { %v464_v29 = vadd.f32 %v463_v24, %v400_v1  ;;  %v593_v24 = vadd.f32 %v592_v18, %v530_v32  ;;  %v534_v32 = vmul.f32 %v397_v4, %v397_v4  ;;  %v405_v18 = vsel %vm341_vm1, %v146_v21, 0.0 }
  0x46   : > { %v283_v21 = vadd.s32 %v746_v5, %v217_v3  ;;  %vm345_vm5 = vcmp.lt.s32.totalorder %v281_v7, 2700  ;;  %v220_v26 = vadd.s32 208, %v742_v2  ;;  %vm346_vm6 = vcmp.lt.s32.totalorder %v282_v12, 2700  ;;  %v152_v7 = vld [vmem:[%s737_s12 + $0xb8] sm:$0xff]  ;;  %v153_v12 = vld [vmem:[%s737_s12 + $0xc0] sm:$0xff] }
  0x47   : > { %v465_v34 = vadd.f32 %v464_v29, %v401_v9  ;;  %v594_v29 = vadd.f32 %v593_v24, %v531_v10  ;;  %v535_v10 = vmul.f32 %v398_v13, %v398_v13  ;;  %v406_v24 = vsel %vm342_vm2, %v147_v30, 0.0 }
  0x48   : > { %v284_v30 = vadd.s32 %v746_v5, %v218_v11  ;;  %v221_v3 = vadd.s32 216, %v742_v2  ;;  %vm347_vm7 = vcmp.lt.s32.totalorder %v283_v21, 2700  ;;  %v222_v11 = vadd.s32 224, %v742_v2  ;;  %v154_v21 = vld [vmem:[%s737_s12 + $0xc8] sm:$0xff] }
  0x49   : > { %v466_v8 = vadd.f32 %v465_v34, %v402_v16  ;;  %v595_v34 = vadd.f32 %v594_v29, %v532_v19  ;;  %v536_v19 = vmul.f32 %v399_v25, %v399_v25  ;;  %v407_v29 = vsel %vm343_vm3, %v148_v6, 0.0 }
  0x4a   : > { %v285_v6 = vadd.s32 %v746_v5, %v219_v17  ;;  %vm348_vm8 = vcmp.lt.s32.totalorder %v284_v30, 2700  ;;  %v223_v17 = vadd.s32 232, %v742_v2  ;;  %v155_v30 = vld [vmem:[%s737_s12 + $0xd0] sm:$0xff]  ;;  %vm357_vm1 = vcmp.lt.s32.totalorder %v778_v35, 2700 }
  0x4b   : > { %v467_v14 = vadd.f32 %v466_v8, %v403_v31  ;;  %v596_v8 = vadd.f32 %v595_v34, %v533_v23  ;;  %v537_v23 = vmul.f32 %v400_v1, %v400_v1  ;;  %v408_v34 = vsel %vm344_vm4, %v149_v15, 0.0 }
  0x4c   : > { %v286_v15 = vadd.s32 %v746_v5, %v220_v26  ;;  %vm349_vm9 = vcmp.lt.s32.totalorder %v285_v6, 2700  ;;  %v224_v26 = vadd.s32 240, %v742_v2  ;;  %v156_v6 = vld [vmem:[%s737_s12 + $0xd8] sm:$0xff]  ;;  %vm358_vm2 = vcmp.lt.s32.totalorder %v781_v36, 2700 }
  0x4d   : > { %v468_v20 = vadd.f32 %v467_v14, %v404_v33  ;;  %v597_v14 = vadd.f32 %v596_v8, %v534_v32  ;;  %v538_v32 = vmul.f32 %v401_v9, %v401_v9  ;;  %v409_v8 = vsel %vm345_vm5, %v150_v22, 0.0 }
  0x4e   : > { %v287_v22 = vadd.s32 %v746_v5, %v221_v3  ;;  %vm350_vm10 = vcmp.lt.s32.totalorder %v286_v15, 2700  ;;  %v225_v3 = vadd.s32 248, %v742_v2  ;;  %vm359_vm3 = vcmp.lt.s32.totalorder %v784_v37, 2700 }
  0x4f   : > { %v469_v28 = vadd.f32 %v468_v20, %v405_v18  ;;  %v598_v20 = vadd.f32 %v597_v14, %v535_v10  ;;  %v539_v10 = vmul.f32 %v402_v16, %v402_v16  ;;  %v410_v14 = vsel %vm346_vm6, %v151_v27, 0.0 }
  0x50   : > { %v288_v27 = vadd.s32 %v746_v5, %v222_v11  ;;  %vm351_vm11 = vcmp.lt.s32.totalorder %v287_v22, 2700  ;;  %v226_v11 = vadd.s32 256, %v742_v2  ;;  %v414_v15 = vsel %vm350_vm10, %v155_v30, 0.0 }
  0x51   : > { %v470_v4 = vadd.f32 %v469_v28, %v406_v24  ;;  %v599_v28 = vadd.f32 %v598_v20, %v536_v19  ;;  %v540_v19 = vmul.f32 %v403_v31, %v403_v31  ;;  %v411_v20 = vsel %vm347_vm7, %v152_v7, 0.0 }
  0x52   : > { %v289_v7 = vadd.s32 %v746_v5, %v223_v17  ;;  %vm352_vm12 = vcmp.lt.s32.totalorder %v288_v27, 2700  ;;  %v291_v17 = vadd.s32 %v746_v5, %v225_v3  ;;  %v292_v2 = vadd.s32 %v746_v5, %v226_v11 }
  0x53   : > { %v471_v13 = vadd.f32 %v470_v4, %v407_v29  ;;  %v600_v4 = vadd.f32 %v599_v28, %v537_v23  ;;  %v541_v23 = vmul.f32 %v404_v33, %v404_v33  ;;  %v412_v28 = vsel %vm348_vm8, %v153_v12, 0.0 }
  0x54   : > { %v290_v12 = vadd.s32 %v746_v5, %v224_v26  ;;  %vm353_vm13 = vcmp.lt.s32.totalorder %v289_v7, 2700  ;;  %v546_v27 = vmul.f32 %v409_v8, %v409_v8  ;;  %vm355_vm15 = vcmp.lt.s32.totalorder %v291_v17, 2700 }
  0x55   : > { %v472_v25 = vadd.f32 %v471_v13, %v408_v34  ;;  %v601_v13 = vadd.f32 %v600_v4, %v538_v32  ;;  %v542_v32 = vmul.f32 %v405_v18, %v405_v18  ;;  %v413_v4 = vsel %vm349_vm9, %v154_v21, 0.0 }
  0x56   : > { %v415_v21 = vsel %vm351_vm11, %v156_v6, 0.0  ;;  %vm354_vm14 = vcmp.lt.s32.totalorder %v290_v12, 2700  ;;  %v547_v6 = vmul.f32 %v410_v14, %v410_v14  ;;  %vm356_vm0 = vcmp.lt.s32.totalorder %v292_v2, 2700  ;;  %v162_v12 = vld [vmem:[%s737_s12 + $0x108] sm:$0xff] }
  0x57   : > { %v473_v1 = vadd.f32 %v472_v25, %v409_v8  ;;  %v602_v25 = vadd.f32 %v601_v13, %v539_v10  ;;  %v543_v10 = vmul.f32 %v406_v24, %v406_v24  ;;  %v157_v13 = vld [vmem:[%s737_s12 + $0xe0] sm:$0xff]  ;;  %v545_v24 = vmul.f32 %v408_v34, %v408_v34 }
  0x58   : > { %v416_v26 = vsel %vm352_vm12, %v157_v13, 0.0  ;;  %v161_v34 = vld [vmem:[%s737_s12 + $0x100] sm:$0xff]  ;;  %v548_v5 = vmul.f32 %v411_v20, %v411_v20  ;;  %v549_v13 = vmul.f32 %v412_v28, %v412_v28  ;;  %v550_v17 = vmul.f32 %v413_v4, %v413_v4 }
  0x59   : > { %v474_v9 = vadd.f32 %v473_v1, %v410_v14  ;;  %v603_v1 = vadd.f32 %v602_v25, %v540_v19  ;;  %v544_v19 = vmul.f32 %v407_v29, %v407_v29  ;;  %v158_v25 = vld [vmem:[%s737_s12 + $0xe8] sm:$0xff]  ;;  %vm360_vm4 = vcmp.lt.s32.totalorder %v787_v38, 2700 }
  0x5a   : > { %vm361_vm5 = vcmp.lt.s32.totalorder %v790_v39, 2700  ;;  %vm362_vm6 = vcmp.lt.s32.totalorder %v793_v40, 2700  ;;  %vm363_vm7 = vcmp.lt.s32.totalorder %v796_v41, 2700  ;;  %vm364_vm8 = vcmp.lt.s32.totalorder %v799_v42, 2700 }
  0x5b   : > { %v475_v16 = vadd.f32 %v474_v9, %v411_v20  ;;  %v604_v9 = vadd.f32 %v603_v1, %v541_v23  ;;  %v160_v1 = vld [vmem:[%s737_s12 + $0xf8] sm:$0xff]  ;;  %vm365_vm9 = vcmp.lt.s32.totalorder %v802_v43, 2700  ;;  %vm366_vm10 = vcmp.lt.s32.totalorder %v805_v44, 2700 }
  0x5c   : > { %v419_v11 = vsel %vm355_vm15, %v160_v1, 0.0  ;;  %v553_v1 = vmul.f32 %v416_v26, %v416_v26  ;;  %vm367_vm11 = vcmp.lt.s32.totalorder %v808_v45, 2700  ;;  %vm368_vm12 = vcmp.lt.s32.totalorder %v811_v46, 2700 }
  0x5d   : > { %v476_v31 = vadd.f32 %v475_v16, %v412_v28  ;;  %v605_v16 = vadd.f32 %v604_v9, %v542_v32  ;;  %v417_v32 = vsel %vm353_vm13, %v158_v25, 0.0  ;;  %vm369_vm13 = vcmp.lt.s32.totalorder %v814_v47, 2700 }
  0x5e   : > { %vm371_vm15 = vcmp.lt.s32.totalorder %v820_v49, 2700 }
  0x5f   : > { %v477_v33 = vadd.f32 %v476_v31, %v413_v4  ;;  %v606_v23 = vadd.f32 %v605_v16, %v543_v10  ;;  %v159_v31 = vld [vmem:[%s737_s12 + $0xf0] sm:$0xff] }
  0x60   : > { %v163_v16 = vld [vmem:[%s737_s12 + $0x110] sm:$0xff] }
  0x61   : > { %v478_v18 = vadd.f32 %v477_v33, %v414_v15  ;;  %v607_v29 = vadd.f32 %v606_v23, %v544_v19  ;;  %v418_v33 = vsel %vm354_vm14, %v159_v31, 0.0  ;;  %v420_v19 = vsel %vm356_vm0, %v161_v34, 0.0  ;;  %v165_v31 = vld [vmem:[%s737_s12 + $0x120] sm:$0xff] }
  0x62   : > { %v551_v23 = vmul.f32 %v414_v15, %v414_v15  ;;  %v422_v2 = vsel %vm358_vm2, %v163_v16, 0.0  ;;  %v557_v16 = vmul.f32 %v420_v19, %v420_v19  ;;  %vm370_vm14 = vcmp.lt.s32.totalorder %v817_v48, 2700 }
  0x63   : > { %v479_v22 = vadd.f32 %v478_v18, %v415_v21  ;;  %v608_v7 = vadd.f32 %v607_v29, %v545_v24  ;;  %v164_v24 = vld [vmem:[%s737_s12 + $0x118] sm:$0xff]  ;;  %v166_v29 = vld [vmem:[%s737_s12 + $0x128] sm:$0xff]  ;;  %vm372_vm0 = vcmp.lt.s32.totalorder %v823_v50, 2700  ;;  %vm374_vm2 = vcmp.lt.s32.totalorder %v829_v52, 2700 }
  0x64   : > { %v425_v34 = vsel %vm361_vm5, %v166_v29, 0.0  ;;  %vm377_vm5 = vcmp.lt.s32.totalorder %v838_v55, 2700 }
  0x65   : > { %v480_v30 = vadd.f32 %v479_v22, %v416_v26  ;;  %v609_v9 = vadd.f32 %v608_v7, %v546_v27  ;;  %v421_v22 = vsel %vm357_vm1, %v162_v12, 0.0  ;;  %v423_v27 = vsel %vm359_vm3, %v164_v24, 0.0  ;;  %v169_v12 = vld [vmem:[%s737_s12 + $0x140] sm:$0xff] }
  0x66   : > { %v554_v7 = vmul.f32 %v417_v32, %v417_v32  ;;  %vm373_vm1 = vcmp.lt.s32.totalorder %v826_v51, 2700  ;;  %vm375_vm3 = vcmp.lt.s32.totalorder %v832_v53, 2700 }
  0x67   : > { %v481_v3 = vadd.f32 %v480_v30, %v417_v32  ;;  %v610_v18 = vadd.f32 %v609_v9, %v547_v6  ;;  %v552_v30 = vmul.f32 %v415_v21, %v415_v21  ;;  %v167_v6 = vld [vmem:[%s737_s12 + $0x130] sm:$0xff] }
  0x68   : > { %v426_v9 = vsel %vm362_vm6, %v167_v6, 0.0  ;;  %vm378_vm6 = vcmp.lt.s32.totalorder %v841_v56, 2700 }
  0x69   : > { %v482_v10 = vadd.f32 %v481_v3, %v418_v33  ;;  %v611_v25 = vadd.f32 %v610_v18, %v548_v5  ;;  %v424_v3 = vsel %vm360_vm4, %v165_v31, 0.0  ;;  %v555_v5 = vmul.f32 %v418_v33, %v418_v33  ;;  %v170_v18 = vld [vmem:[%s737_s12 + $0x148] sm:$0xff]  ;;  %v173_v31 = vld [vmem:[%s737_s12 + $0x160] sm:$0xff] }
  0x6a   : > { %v429_v24 = vsel %vm365_vm9, %v170_v18, 0.0  ;;  %v561_v29 = vmul.f32 %v424_v3, %v424_v3  ;;  %vm376_vm4 = vcmp.lt.s32.totalorder %v835_v54, 2700  ;;  %vm381_vm9 = vcmp.lt.s32.totalorder %v850_v59, 2700 }
  0x6b   : > { %v483_v8 = vadd.f32 %v482_v10, %v419_v11  ;;  %v612_v35 = vadd.f32 %v611_v25, %v549_v13  ;;  %v168_v10 = vld [vmem:[%s737_s12 + $0x138] sm:$0xff]  ;;  %v558_v25 = vmul.f32 %v421_v22, %v421_v22 }
  0x6c   : > { %v427_v13 = vsel %vm363_vm7, %v168_v10, 0.0  ;;  %v177_v10 = vld [vmem:[%s737_s12 + $0x180] sm:$0xff]  ;;  %vm379_vm7 = vcmp.lt.s32.totalorder %v844_v57, 2700 }
  0x6d   : > { %v484_v14 = vadd.f32 %v483_v8, %v420_v19  ;;  %v613_v36 = vadd.f32 %v612_v35, %v550_v17  ;;  %v556_v8 = vmul.f32 %v419_v11, %v419_v11  ;;  %v171_v17 = vld [vmem:[%s737_s12 + $0x150] sm:$0xff] }
  0x6e   : > { %v430_v35 = vsel %vm366_vm10, %v171_v17, 0.0  ;;  %v181_v17 = vld [vmem:[%s737_s12 + $0x1a0] sm:$0xff]  ;;  %vm382_vm10 = vcmp.lt.s32.totalorder %v853_v60, 2700 }
  0x6f   : > { %v485_v20 = vadd.f32 %v484_v14, %v421_v22  ;;  %v614_v37 = vadd.f32 %v613_v36, %v551_v23  ;;  %v428_v14 = vsel %vm364_vm8, %v169_v12, 0.0  ;;  %v559_v23 = vmul.f32 %v422_v2, %v422_v2  ;;  %v174_v36 = vld [vmem:[%s737_s12 + $0x168] sm:$0xff] }
  0x70   : > { %v433_v6 = vsel %vm369_vm13, %v174_v36, 0.0  ;;  %v565_v12 = vmul.f32 %v428_v14, %v428_v14  ;;  %v185_v36 = vld [vmem:[%s737_s12 + $0x1c0] sm:$0xff]  ;;  %vm380_vm8 = vcmp.lt.s32.totalorder %v847_v58, 2700  ;;  %vm385_vm13 = vcmp.lt.s32.totalorder %v862_v63, 2700 }
  0x71   : > { %v486_v28 = vadd.f32 %v485_v20, %v422_v2  ;;  %v615_v38 = vadd.f32 %v614_v37, %v552_v30  ;;  %v172_v20 = vld [vmem:[%s737_s12 + $0x158] sm:$0xff]  ;;  %v562_v37 = vmul.f32 %v425_v34, %v425_v34 }
  0x72   : > { %v431_v30 = vsel %vm367_vm11, %v172_v20, 0.0  ;;  %vm383_vm11 = vcmp.lt.s32.totalorder %v856_v61, 2700 }
  0x73   : > { %v487_v4 = vadd.f32 %v486_v28, %v423_v27  ;;  %v616_v39 = vadd.f32 %v615_v38, %v553_v1  ;;  %v560_v28 = vmul.f32 %v423_v27, %v423_v27  ;;  %v175_v1 = vld [vmem:[%s737_s12 + $0x170] sm:$0xff] }
  0x74   : > { %v434_v38 = vsel %vm370_vm14, %v175_v1, 0.0  ;;  %vm386_vm14 = vcmp.lt.s32.totalorder %v865_v0, 2700 }
  0x75   : > { %v488_v15 = vadd.f32 %v487_v4, %v424_v3  ;;  %v617_v40 = vadd.f32 %v616_v39, %v554_v7  ;;  %v432_v4 = vsel %vm368_vm12, %v173_v31, 0.0  ;;  %v563_v7 = vmul.f32 %v426_v9, %v426_v9  ;;  %v178_v39 = vld [vmem:[%s737_s12 + $0x188] sm:$0xff] }
  0x76   : > { %v437_v18 = vsel %vm373_vm1, %v178_v39, 0.0  ;;  %v569_v20 = vmul.f32 %v432_v4, %v432_v4  ;;  %vm384_vm12 = vcmp.lt.s32.totalorder %v859_v62, 2700  ;;  %v190_v39 = vld [vmem:[%s737_s12 + $0x1e8] sm:$0xff]  ;;  %v192_v62 = vld [vmem:[%s737_s12 + $0x1f8] sm:$0xff] }
  0x77   : > { %v489_v21 = vadd.f32 %v488_v15, %v425_v34  ;;  %v618_v41 = vadd.f32 %v617_v40, %v555_v5  ;;  %v176_v15 = vld [vmem:[%s737_s12 + $0x178] sm:$0xff]  ;;  %v566_v40 = vmul.f32 %v429_v24, %v429_v24 }
  0x78   : > { %v435_v5 = vsel %vm371_vm15, %v176_v15, 0.0  ;;  %v574_v15 = vmul.f32 %v437_v18, %v437_v18 }
  0x79   : > { %v490_v26 = vadd.f32 %v489_v21, %v426_v9  ;;  %v619_v42 = vadd.f32 %v618_v41, %v556_v8  ;;  %v564_v21 = vmul.f32 %v427_v13, %v427_v13  ;;  %v179_v8 = vld [vmem:[%s737_s12 + $0x190] sm:$0xff] }
  0x7a   : > { %v438_v41 = vsel %vm374_vm2, %v179_v8, 0.0 }
  0x7b   : > { %v491_v32 = vadd.f32 %v490_v26, %v427_v13  ;;  %v620_v43 = vadd.f32 %v619_v42, %v557_v16  ;;  %v436_v26 = vsel %vm372_vm0, %v177_v10, 0.0  ;;  %v567_v16 = vmul.f32 %v430_v35, %v430_v35  ;;  %v182_v42 = vld [vmem:[%s737_s12 + $0x1a8] sm:$0xff] }
  0x7c   : > { %v441_v31 = vsel %vm377_vm5, %v182_v42, 0.0 }
  0x7d   : > { %v492_v33 = vadd.f32 %v491_v32, %v428_v14  ;;  %v621_v44 = vadd.f32 %v620_v43, %v558_v25  ;;  %v180_v32 = vld [vmem:[%s737_s12 + $0x198] sm:$0xff] }
  0x7e   : > { %v439_v25 = vsel %vm375_vm3, %v180_v32, 0.0 }
  0x7f   : > { %v493_v11 = vadd.f32 %v492_v33, %v429_v24  ;;  %v622_v45 = vadd.f32 %v621_v44, %v559_v23  ;;  %v568_v33 = vmul.f32 %v431_v30, %v431_v30  ;;  %v183_v23 = vld [vmem:[%s737_s12 + $0x1b0] sm:$0xff]  ;;  %v571_v44 = vmul.f32 %v434_v38, %v434_v38 }
  0x81   : > { %v494_v19 = vadd.f32 %v493_v11, %v430_v35  ;;  %v623_v46 = vadd.f32 %v622_v45, %v560_v28  ;;  %v440_v11 = vsel %vm376_vm4, %v181_v17, 0.0  ;;  %v570_v35 = vmul.f32 %v433_v6, %v433_v6 }
  0x83   : > { %v495_v22 = vadd.f32 %v494_v19, %v431_v30  ;;  %v624_v47 = vadd.f32 %v623_v46, %v561_v29  ;;  %v184_v19 = vld [vmem:[%s737_s12 + $0x1b8] sm:$0xff]  ;;  %v442_v30 = vsel %vm378_vm6, %v183_v23, 0.0  ;;  %v572_v29 = vmul.f32 %v435_v5, %v435_v5  ;;  %v187_v46 = vld [vmem:[%s737_s12 + $0x1d0] sm:$0xff] }
  0x84   : > { %v443_v45 = vsel %vm379_vm7, %v184_v19, 0.0  ;;  %v446_v10 = vsel %vm382_vm10, %v187_v46, 0.0 }
  0x85   : > { %v496_v2 = vadd.f32 %v495_v22, %v432_v4  ;;  %v625_v48 = vadd.f32 %v624_v47, %v562_v37  ;;  %v186_v4 = vld [vmem:[%s737_s12 + $0x1c8] sm:$0xff]  ;;  %v444_v37 = vsel %vm380_vm8, %v185_v36, 0.0  ;;  %v580_v63 = vmul.f32 %v443_v45, %v443_v45 }
  0x87   : > { %v497_v27 = vadd.f32 %v496_v2, %v433_v6  ;;  %v626_v49 = vadd.f32 %v625_v48, %v563_v7  ;;  %v573_v2 = vmul.f32 %v436_v26, %v436_v26  ;;  %v188_v7 = vld [vmem:[%s737_s12 + $0x1d8] sm:$0xff]  ;;  %v576_v48 = vmul.f32 %v439_v25, %v439_v25 }
  0x89   : > { %v498_v3 = vadd.f32 %v497_v27, %v434_v38  ;;  %v627_v50 = vadd.f32 %v626_v49, %v564_v21  ;;  %v445_v27 = vsel %vm381_vm9, %v186_v4, 0.0  ;;  %v575_v38 = vmul.f32 %v438_v41, %v438_v41 }
  0x8a   : > { %v582_v0 = vmul.f32 %v445_v27, %v445_v27 }
  0x8b   : > { %v499_v34 = vadd.f32 %v498_v3, %v435_v5  ;;  %v628_v51 = vadd.f32 %v627_v50, %v565_v12  ;;  %v189_v3 = vld [vmem:[%s737_s12 + $0x1e0] sm:$0xff]  ;;  %v447_v5 = vsel %vm383_vm11, %v188_v7, 0.0  ;;  %v577_v12 = vmul.f32 %v440_v11, %v440_v11 }
  0x8c   : > { %v448_v61 = vsel %vm384_vm12, %v189_v3, 0.0  ;;  %v449_v50 = vsel %vm385_vm13, %v190_v39, 0.0 }
  0x8d   : > { %v500_v9 = vadd.f32 %v499_v34, %v436_v26  ;;  %v629_v52 = vadd.f32 %v628_v51, %v566_v40  ;;  %v191_v26 = vld [vmem:[%s737_s12 + $0x1f0] sm:$0xff] }
  0x8e   : > { %v450_v51 = vsel %vm386_vm14, %v191_v26, 0.0 }
  0x8f   : > { %v501_v13 = vadd.f32 %v500_v9, %v437_v18  ;;  %v630_v53 = vadd.f32 %v629_v52, %v567_v16  ;;  %v578_v9 = vmul.f32 %v441_v31, %v441_v31  ;;  %v1049_v18 = vld [vmem:[#allocation2_spill] sm:$0xff]  ;;  %v581_v52 = vmul.f32 %v444_v37, %v444_v37 }
  0x90   : > { %vm387_vm15 = vcmp.lt.s32.totalorder %v1049_v18, 2700 }
  0x91   : > { %v502_v14 = vadd.f32 %v501_v13, %v438_v41  ;;  %v631_v54 = vadd.f32 %v630_v53, %v568_v33  ;;  %v579_v13 = vmul.f32 %v442_v30, %v442_v30  ;;  %v583_v53 = vmul.f32 %v446_v10, %v446_v10 }
  0x93   : > { %v503_v24 = vadd.f32 %v502_v14, %v439_v25  ;;  %v632_v55 = vadd.f32 %v631_v54, %v569_v20  ;;  %v451_v14 = vsel %vm387_vm15, %v192_v62, 0.0 }
  0x95   : > { %v504_v43 = vadd.f32 %v503_v24, %v440_v11  ;;  %v633_v56 = vadd.f32 %v632_v55, %v570_v35 }
  0x97   : > { %v505_v28 = vadd.f32 %v504_v43, %v441_v31  ;;  %v634_v57 = vadd.f32 %v633_v56, %v571_v44  ;;  %v584_v43 = vmul.f32 %v447_v5, %v447_v5  ;;  %v585_v31 = vmul.f32 %v448_v61, %v448_v61 }
  0x98   : > { %v586_v44 = vmul.f32 %v449_v50, %v449_v50 }
  0x99   : > { %v506_v22 = vadd.f32 %v505_v28, %v442_v30  ;;  %v635_v58 = vadd.f32 %v634_v57, %v572_v29  ;;  %v452_v30 = vld [vmem:[%s1047_s1] sm:$0x1] }
  0x9b   : > { %v507_v1 = vadd.f32 %v506_v22, %v443_v45  ;;  %v636_v59 = vadd.f32 %v635_v58, %v573_v2  ;;  %v587_v22 = vmul.f32 %v450_v51, %v450_v51  ;;  %v588_v45 = vmul.f32 %v451_v14, %v451_v14  ;;  %v524_v58 = vld [vmem:[%s1047_s1 + $0x1] sm:$0x1] }
  0x9d   : > { %v508_v6 = vadd.f32 %v507_v1, %v444_v37  ;;  %v637_v60 = vadd.f32 %v636_v59, %v574_v15 }
  0x9f   : > { %v509_v47 = vadd.f32 %v508_v6, %v445_v27  ;;  %v638_v49 = vadd.f32 %v637_v60, %v575_v38 }
  0xa1   : > { %v510_v21 = vadd.f32 %v509_v47, %v446_v10  ;;  %v639_v40 = vadd.f32 %v638_v49, %v576_v48 }
  0xa3   : > { %v511_v34 = vadd.f32 %v510_v21, %v447_v5  ;;  %v640_v16 = vadd.f32 %v639_v40, %v577_v12 }
  0xa5   : > { %v512_v8 = vadd.f32 %v511_v34, %v448_v61  ;;  %v641_v17 = vadd.f32 %v640_v16, %v578_v9 }
  0xa7   : > { %v513_v32 = vadd.f32 %v512_v8, %v449_v50  ;;  %v642_v25 = vadd.f32 %v641_v17, %v579_v13 }
  0xa9   : > { %v514_v41 = vadd.f32 %v513_v32, %v450_v51  ;;  %v643_v24 = vadd.f32 %v642_v25, %v580_v63 }
  0xab   : > { %v515_v33 = vadd.f32 %v514_v41, %v451_v14  ;;  %v644_v11 = vadd.f32 %v643_v24, %v581_v52 }
  0xad   : > { %v516_v42 = vrot.slane %v515_v33, 4  ;;  %v645_v35 = vadd.f32 %v644_v11, %v582_v0 }
  0xaf   : > { %v517_v20 = vadd.f32 %v516_v42, %v515_v33  ;;  %v646_v19 = vadd.f32 %v645_v35, %v583_v53 }
  0xb1   : > { %v518_v23 = vrot.slane %v517_v20, 2  ;;  %v647_v55 = vadd.f32 %v646_v19, %v584_v43 }
  0xb3   : > { %v519_v54 = vadd.f32 %v518_v23, %v517_v20  ;;  %v648_v29 = vadd.f32 %v647_v55, %v585_v31 }
  0xb5   : > { %v520_v28 = vrot.slane %v519_v54, 1  ;;  %v649_v4 = vadd.f32 %v648_v29, %v586_v44 }
  0xb7   : > { %v521_v36 = vadd.f32 %v520_v28, %v519_v54  ;;  %v650_v1 = vadd.f32 %v649_v4, %v587_v22 }
  0xb9   : > { %v522_v56 = vadd.f32 %v521_v36, %v452_v30  ;;  %v651_v2 = vadd.f32 %v650_v1, %v588_v45 }
  0xbb   : > { %523 = vst [vmem:[%s1047_s1] sm:$0x1] %v522_v56  ;;  %v652_v57 = vrot.slane %v651_v2, 4 }
  0xbd   : > { %v653_v37 = vadd.f32 %v652_v57, %v651_v2 }
  0xbf   : > { %v654_v46 = vrot.slane %v653_v37, 2 }
  0xc1   : > { %v655_v6 = vadd.f32 %v654_v46, %v653_v37 }
  0xc3   : > { %v656_v15 = vrot.slane %v655_v6, 1 }
  0xc5   : > { %v657_v27 = vadd.f32 %v656_v15, %v655_v6 }
  0xc7   : > { %v658_v7 = vadd.f32 %v657_v27, %v524_v58 }
  0xc9   : > { %659 = vst [vmem:[%s1047_s1 + $0x1] sm:$0x1] %v658_v7 }
  0xca PF: > { %s11_s6 = sadd.s32 1, %s713_s6  }
  0xcb   : > { %p8_p5 = scmp.ge.s32.totalorder %s11_s6, 8  }
  0xcd   :  { %10 = sbr.rel (!%p8_p5) target bundleno = 1 (0x1), region = 54 }

// kernel: resgen_block_forward.7
= control target key start
LH: loop header
LB: loop body
LE: loop exit
PB: predicated region body
PF: predicated region fallthrough
CT: control target
= control target key end

     0   :  { %s4219_s24 = smov 0   ;;  %s4221_s25 = smov 0   ;;  %s5752_s0 = inlined_call_operand.vmem [shape: f32[2,1350,128], index: 0, kind: input, shape index: {}]   ;;  %s5753_s1 = inlined_call_operand.vmem [shape: f32[1350,1], index: 1, kind: input, shape index: {}]   ;;  %s5754_s2 = inlined_call_operand.vmem [shape: f32[1,128], index: 2, kind: input, shape index: {}]   ;;  %s5755_s3 = inlined_call_operand.vmem [shape: f32[1,128], index: 3, kind: input, shape index: {}]   ;;  %s5756_s4 = inlined_call_operand.vmem [shape: f32[9,128,128], index: 4, kind: input, shape index: {}]   ;;  %s5757_s5 = inlined_call_operand.vmem [shape: f32[1,128], index: 5, kind: input, shape index: {}]   ;;  %s5758_s6 = inlined_call_operand.vmem [shape: f32[2,1280,128], index: 6, kind: input, shape index: {}]   ;;  %s5759_s7 = inlined_call_operand.vmem [shape: f32[2,1280,128], index: 7, kind: output, shape index: {}]  }
   0x1   :  { %s4223_s26 = smov 0   ;;  %s4225_s27 = smov 0  }
   0x2   :  { %s4227_s28 = smov 0  }
   0x3 LB: > { %s26_s29 = sadd.s32 1, %s4168_s26  ;;  %s29_s30 = sadd.s32 1, %s4172_s27  ;;  %s4176_s28 = sphi %s4227_s28, %s17_s28   ;;  %s4172_s27 = sphi %s4225_s27, %s5892_s27   ;;  %s4168_s26 = sphi %s4223_s26, %s5891_s26   ;;  %s4164_s25 = sphi %s4221_s25, %s5890_s25   ;;  %s4160_s24 = sphi %s4219_s24, %s5889_s24  }
   0x4   : > { %p27_p0 = scmp.ge.s32.totalorder %s26_s29, 10  ;;  %p2729_p1 = scmp.ge.s32.totalorder %s4176_s28, 1 }
   0x5   : > { %p268_p2 = scmp.lt.s32.totalorder %s4176_s28, 21 }
   0x6   : > { %s5894_s29 = smov (%p27_p0, %s26_s29), 0  ;;  %s5896_s30 = smov (!%p27_p0, %s29_s30), %s4172_s27 }
   0x7   : > { %p269_p3 = pnand %p2729_p1, %p268_p2  ;;  %p31_p4 = scmp.ge.s32.totalorder %s5896_s30, 2 }
   0x9   : > { %s5898_s30 = smov (%p31_p4, %s5896_s30), 0  ;;  %272 = sbr.rel (%p269_p3) target bundleno = 533 (0x215), region = 48 }
  0x10   : > { %s2735_s8 = sshll.u32 %s4160_s24, 7  ;;  %v2738_v0 = vld [vmem:[%s5756_s4 + $0x80] sm:$0xff]  ;;  %v2739_v1 = vld [vmem:[%s5756_s4 + $0x88] sm:$0xff]  ;;  %v4178_v3 = vmov 0   ;;  %v2740_v6 = vld [vmem:[%s5756_s4 + $0x90] sm:$0xff]  ;;  %p313_p5 = scmp.lt.s32.totalorder %s4164_s25, 1 }
  0x11   : > { %v2786_v2 = vld [vmem:[%s5756_s4 + $0x200] sm:$0xff]  ;;  %4137 = vset.pattern.permute.xlu1 %v4178_v3  ;;  %4136 = vset.pattern.permute.xlu0 %v4178_v3  ;;  %s4268_s17 = scalar_lea.vmem %s5753_s1, %s2735_s8  ;;  %v3661_v4 = vpack.c.bf16 %v2739_v1, %v2738_v0  ;;  %v2787_v5 = vld [vmem:[%s5756_s4 + $0x208] sm:$0xff]  ;;  %v2741_v7 = vld [vmem:[%s5756_s4 + $0x98] sm:$0xff]  ;;  %vm680_vm0 = vcmask 1046528   ;;  %vm1459_vm1 = vcmask 1044480   ;;  %vm1037_vm2 = vcmask 1045504  }
  0x12   : > { %v370_v8 = vld [vmem:[%s4268_s17 + $0x20] sm:$0xff]  ;;  %v3789_v10 = vpack.c.bf16 %v2787_v5, %v2786_v2  ;;  %v3665_v11 = vpack.c.bf16 %v2741_v7, %v2740_v6  ;;  %v371_v12 = vld [vmem:[%s4268_s17 + $0x28] sm:$0xff]  ;;  %v372_v14 = vld [vmem:[%s4268_s17 + $0x30] sm:$0xff]  ;;  %s5900_s25 = smov (!%p313_p5, %s4164_s25), 1  ;;  %vm1687_vm3 = vcmask 1043456   ;;  %vm2109_vm4 = vcmask 1042432  }
  0x13   : > { %v366_v9 = vld [vmem:[%s4268_s17] sm:$0xff]  ;;  %502 = vperm.xlu1 %4137, %v370_v8   ;;  %v367_v13 = vld [vmem:[%s4268_s17 + $0x8] sm:$0xff]  ;;  %3662 = vmatprep.subr.bf16.mxu1 %v3661_v4  ;;  %v368_v15 = vld [vmem:[%s4268_s17 + $0x10] sm:$0xff]  ;;  %s4093_s15 = smul.u32 1352, %s5900_s25  ;;  %vm2337_vm5 = vcmask 1041408   ;;  %s2731_s14 = sshll.u32 %s4160_s24, 4 }
  0x14   : > { %482 = vperm.xlu0 %4136, %v366_v9   ;;  %3790 = vmatprep.subr.bf16.mxu0 %v3789_v10  ;;  %v373_v16 = vld [vmem:[%s4268_s17 + $0x38] sm:$0xff]  ;;  %v2788_v18 = vld [vmem:[%s5756_s4 + $0x210] sm:$0xff]  ;;  %v2742_v21 = vld [vmem:[%s5756_s4 + $0xa0] sm:$0xff]  ;;  %p321_p6 = scmp.lt.s32.totalorder %s2731_s14, 159  ;;  %s4094_s16 = smul.u32 160, %s5900_s25 }
  0x15   : > { %3664 = vmatpush3.bf16.msra.mxu1 %v3661_v4  ;;  %3792 = vmatpush3.bf16.msra.mxu0 %v3789_v10  ;;  %v369_v17 = vld [vmem:[%s4268_s17 + $0x18] sm:$0xff]  ;;  %v2743_v22 = vld [vmem:[%s5756_s4 + $0xa8] sm:$0xff]  ;;  %v2790_v23 = vld [vmem:[%s5756_s4 + $0x220] sm:$0xff]  ;;  %s317_s12 = scalar_lea.vmem %s5752_s0, %s4093_s15 }
  0x16   : > { %3666 = vmatprep.subr.bf16.mxu1 %v3665_v11  ;;  %v2789_v19 = vld [vmem:[%s5756_s4 + $0x218] sm:$0xff]  ;;  %v3669_v24 = vpack.c.bf16 %v2743_v22, %v2742_v21  ;;  %v2791_v25 = vld [vmem:[%s5756_s4 + $0x228] sm:$0xff]  ;;  %v2744_v26 = vld [vmem:[%s5756_s4 + $0xb0] sm:$0xff]  ;;  %s4401_s19 = scalar_lea.vmem %s317_s12, %s2735_s8  ;;  %s5902_s14 = smov (!%p321_p6, %s2731_s14), 159 }
  0x17   : > { %507 = vperm.xlu1 %4137, %v371_v12   ;;  %v3793_v20 = vpack.c.bf16 %v2789_v19, %v2788_v18  ;;  %v2745_v27 = vld [vmem:[%s5756_s4 + $0xb8] sm:$0xff]  ;;  %v3797_v28 = vpack.c.bf16 %v2791_v25, %v2790_v23  ;;  %v2792_v30 = vld [vmem:[%s5756_s4 + $0x230] sm:$0xff]  ;;  %v2746_v32 = vld [vmem:[%s5756_s4 + $0xc0] sm:$0xff]  ;;  %s324_s18 = sadd.s32 %s4094_s16, %s5902_s14 }
  0x18   : > { %487 = vperm.xlu0 %4136, %v367_v13   ;;  %v3673_v29 = vpack.c.bf16 %v2745_v27, %v2744_v26  ;;  %v2793_v31 = vld [vmem:[%s5756_s4 + $0x238] sm:$0xff]  ;;  %v2747_v33 = vld [vmem:[%s5756_s4 + $0xc8] sm:$0xff]  ;;  %v374_v35 = vld [vmem:[%s4268_s17 + $0x40] sm:$0xff]  ;;  %s2732_s24 = sshll.u32 %s324_s18, 3 }
  0x19   : > { %3668 = vmatpush3.bf16.msra.mxu1 %v3665_v11  ;;  %3794 = vmatprep.subr.bf16.mxu0 %v3793_v20  ;;  %v375_v34 = vld [vmem:[%s4268_s17 + $0x48] sm:$0xff]  ;;  %v3801_v36 = vpack.c.bf16 %v2793_v31, %v2792_v30  ;;  %v3677_v37 = vpack.c.bf16 %v2747_v33, %v2746_v32  ;;  %v2794_v38 = vld [vmem:[%s5756_s4 + $0x240] sm:$0xff]  ;;  %v2748_v40 = vld [vmem:[%s5756_s4 + $0xd0] sm:$0xff]  ;;  %s5667_s20 = scalar_lea.vmem %s5758_s6, %s2732_s24  ;;  %s5682_s22 = scalar_lea.vmem %s5759_s7, %s2732_s24 }
  0x1a   : > { %3796 = vmatpush3.bf16.msra.mxu0 %v3793_v20  ;;  %3670 = vmatprep.subr.bf16.mxu1 %v3669_v24  ;;  %v2795_v39 = vld [vmem:[%s5756_s4 + $0x248] sm:$0xff]  ;;  %v2749_v41 = vld [vmem:[%s5756_s4 + $0xd8] sm:$0xff]  ;;  %v376_v43 = vld [vmem:[%s4268_s17 + $0x50] sm:$0xff] }
  0x1b   : > { %512 = vperm.xlu1 %4137, %v372_v14   ;;  %3798 = vmatprep.subr.bf16.mxu0 %v3797_v28  ;;  %v377_v42 = vld [vmem:[%s4268_s17 + $0x58] sm:$0xff]  ;;  %v3805_v44 = vpack.c.bf16 %v2795_v39, %v2794_v38  ;;  %v3681_v45 = vpack.c.bf16 %v2749_v41, %v2748_v40  ;;  %v2796_v46 = vld [vmem:[%s5756_s4 + $0x250] sm:$0xff]  ;;  %v2750_v48 = vld [vmem:[%s5756_s4 + $0xe0] sm:$0xff] }
  0x1c   : > { %492 = vperm.xlu0 %4136, %v368_v15   ;;  %v2797_v47 = vld [vmem:[%s5756_s4 + $0x258] sm:$0xff]  ;;  %v2751_v49 = vld [vmem:[%s5756_s4 + $0xe8] sm:$0xff]  ;;  %v378_v51 = vld [vmem:[%s4268_s17 + $0x60] sm:$0xff] }
  0x1d   : > { %3672 = vmatpush3.bf16.msra.mxu1 %v3669_v24  ;;  %v379_v50 = vld [vmem:[%s4268_s17 + $0x68] sm:$0xff]  ;;  %v3809_v52 = vpack.c.bf16 %v2797_v47, %v2796_v46  ;;  %v3685_v53 = vpack.c.bf16 %v2751_v49, %v2750_v48  ;;  %v2798_v54 = vld [vmem:[%s5756_s4 + $0x260] sm:$0xff]  ;;  %v2752_v56 = vld [vmem:[%s5756_s4 + $0xf0] sm:$0xff] }
  0x1e   : > { %3674 = vmatprep.subr.bf16.mxu1 %v3673_v29  ;;  %3800 = vmatpush3.bf16.msra.mxu0 %v3797_v28  ;;  %v2799_v55 = vld [vmem:[%s5756_s4 + $0x268] sm:$0xff]  ;;  %v2753_v57 = vld [vmem:[%s5756_s4 + $0xf8] sm:$0xff]  ;;  %v380_v59 = vld [vmem:[%s4268_s17 + $0x70] sm:$0xff] }
  0x1f   : > { %517 = vperm.xlu1 %4137, %v373_v16   ;;  %3802 = vmatprep.subr.bf16.mxu0 %v3801_v36  ;;  %v381_v58 = vld [vmem:[%s4268_s17 + $0x78] sm:$0xff]  ;;  %v3813_v60 = vpack.c.bf16 %v2799_v55, %v2798_v54  ;;  %v3689_v61 = vpack.c.bf16 %v2753_v57, %v2752_v56  ;;  %v2800_v62 = vld [vmem:[%s5756_s4 + $0x270] sm:$0xff]  ;;  %v630_v0 = vld [vmem:[%s5756_s4] sm:$0xff] }
  0x20   : > { %497 = vperm.xlu0 %4136, %v369_v17   ;;  %v2801_v63 = vld [vmem:[%s5756_s4 + $0x278] sm:$0xff]  ;;  %v631_v1 = vld [vmem:[%s5756_s4 + $0x8] sm:$0xff]  ;;  %v382_v3 = vld [vmem:[%s4268_s17 + $0x80] sm:$0xff] }
  0x21   : > { %3676 = vmatpush3.bf16.msra.mxu1 %v3673_v29  ;;  %v383_v2 = vld [vmem:[%s4268_s17 + $0x88] sm:$0xff]  ;;  %v3817_v4 = vpack.c.bf16 %v2801_v63, %v2800_v62  ;;  %v4391_v5 = vpack.c.bf16 %v631_v1, %v630_v0  ;;  %v2802_v6 = vld [vmem:[%s5756_s4 + $0x280] sm:$0xff]  ;;  %v385_v8 = vld [vmem:[%s4268_s17 + $0x98] sm:$0xff] }
  0x22   : > { %3678 = vmatprep.subr.bf16.mxu1 %v3677_v37  ;;  %3804 = vmatpush3.bf16.msra.mxu0 %v3801_v36  ;;  %v2803_v7 = vld [vmem:[%s5756_s4 + $0x288] sm:$0xff]  ;;  %v384_v9 = vld [vmem:[%s4268_s17 + $0x90] sm:$0xff]  ;;  %v4410_v11 = vld [vmem:[%s5754_s2] ss:$0 sm:$0xff] }
  0x23   : > { %527 = vperm.xlu1 %4137, %v375_v34   ;;  %3806 = vmatprep.subr.bf16.mxu0 %v3805_v44  ;;  %v4405_v10 = vpack.c.bf16 %v2803_v7, %v2802_v6  ;;  %v361_v12 = vld [vmem:[%s4401_s19 + $0xa8] sm:$0xff]  ;;  %v4418_v14 = vld [vmem:[%s5755_s3] ss:$0 sm:$0xff]  ;;  %v363_v18 = vld [vmem:[%s4401_s19 + $0xb8] sm:$0xff] }
  0x24   : > { %522 = vperm.xlu0 %4136, %v374_v35   ;;  %v419_v13 = vmul.f32 %v4410_v11, %v361_v12  ;;  %v387_v15 = vld [vmem:[%s4268_s17 + $0xa8] sm:$0xff]  ;;  %v386_v16 = vld [vmem:[%s4268_s17 + $0xa0] sm:$0xff]  ;;  %v362_v19 = vld [vmem:[%s4401_s19 + $0xb0] sm:$0xff]  ;;  %v421_v20 = vmul.f32 %v4410_v11, %v363_v18 }
  0x25   : > { %3680 = vmatpush3.bf16.msra.mxu1 %v3677_v37  ;;  %v420_v21 = vmul.f32 %v4410_v11, %v362_v19  ;;  %v389_v22 = vld [vmem:[%s4268_s17 + $0xb8] sm:$0xff]  ;;  %v388_v23 = vld [vmem:[%s4268_s17 + $0xb0] sm:$0xff]  ;;  %v364_v26 = vld [vmem:[%s4401_s19 + $0xc0] sm:$0x3f] }
  0x26   : > { %3682 = vmatprep.subr.bf16.mxu1 %v3681_v45  ;;  %3808 = vmatpush3.bf16.msra.mxu0 %v3805_v44  ;;  %v4424_v17 = vadd.f32 %v4418_v14, %v419_v13  ;;  %v4433_v24 = vadd.f32 %v4418_v14, %v421_v20  ;;  %v422_v27 = vmul.f32 %v4410_v11, %v364_v26  ;;  %v390_v28 = vld [vmem:[%s4268_s17 + $0xc0] sm:$0x3f]  ;;  %v345_v32 = vld [vmem:[%s4401_s19 + $0x28] sm:$0xff]  ;;  %v346_v34 = vld [vmem:[%s4401_s19 + $0x30] sm:$0xff] }
  0x27   : > { %537 = vperm.xlu1 %4137, %v377_v42   ;;  %3810 = vmatprep.subr.bf16.mxu0 %v3809_v52  ;;  %v4436_v25 = vadd.f32 %v4418_v14, %v420_v21  ;;  %v344_v30 = vld [vmem:[%s4401_s19 + $0x20] sm:$0xff]  ;;  %v341_v33 = vld [vmem:[%s4401_s19 + $0x8] sm:$0xff]  ;;  %v342_v35 = vld [vmem:[%s4401_s19 + $0x10] sm:$0xff]  ;;  %v403_v39 = vmul.f32 %v4410_v11, %v345_v32  ;;  %v404_v41 = vmul.f32 %v4410_v11, %v346_v34 }
  0x28   : > { %532 = vperm.xlu0 %4136, %v376_v43   ;;  %v4442_v29 = vadd.f32 %v4418_v14, %v422_v27  ;;  %v340_v31 = vld [vmem:[%s4401_s19] sm:$0xff]  ;;  %v347_v36 = vld [vmem:[%s4401_s19 + $0x38] sm:$0xff]  ;;  %v402_v37 = vmul.f32 %v4410_v11, %v344_v30  ;;  %v399_v40 = vmul.f32 %v4410_v11, %v341_v33  ;;  %v400_v42 = vmul.f32 %v4410_v11, %v342_v35  ;;  %v349_v49 = vld [vmem:[%s4401_s19 + $0x48] sm:$0xff] }
  0x29   : > { %3684 = vmatpush3.bf16.msra.mxu1 %v3681_v45  ;;  %v398_v38 = vmul.f32 %v4410_v11, %v340_v31  ;;  %v343_v43 = vld [vmem:[%s4401_s19 + $0x18] sm:$0xff]  ;;  %v405_v44 = vmul.f32 %v4410_v11, %v347_v36  ;;  %v4466_v47 = vadd.f32 %v4418_v14, %v403_v39  ;;  %v632_v55 = vld [vmem:[%s5756_s4 + $0x10] sm:$0xff]  ;;  %v407_v57 = vmul.f32 %v4410_v11, %v349_v49  ;;  %v356_v21 = vld [vmem:[%s4401_s19 + $0x80] sm:$0xff] }
  0x2a   : > { %3686 = vmatprep.subr.bf16.mxu1 %v3685_v53  ;;  %3812 = vmatpush3.bf16.msra.mxu0 %v3809_v52  ;;  %v4460_v45 = vadd.f32 %v4418_v14, %v402_v37  ;;  %v401_v48 = vmul.f32 %v4410_v11, %v343_v43  ;;  %v4475_v52 = vadd.f32 %v4418_v14, %v404_v41  ;;  %v351_v56 = vld [vmem:[%s4401_s19 + $0x58] sm:$0xff]  ;;  %v354_v13 = vld [vmem:[%s4401_s19 + $0x70] sm:$0xff]  ;;  %v635_v30 = vld [vmem:[%s5756_s4 + $0x28] sm:$0xff] }
  0x2b   : > { %547 = vperm.xlu1 %4137, %v379_v50   ;;  %3814 = vmatprep.subr.bf16.mxu0 %v3813_v60  ;;  %v4463_v46 = vadd.f32 %v4418_v14, %v398_v38  ;;  %v348_v50 = vld [vmem:[%s4401_s19 + $0x40] sm:$0xff]  ;;  %v4481_v54 = vadd.f32 %v4418_v14, %v405_v44  ;;  %v460_v0 = vmax.f32 %v4466_v47, 0.0  ;;  %v2805_v12 = vld [vmem:[%s5756_s4 + $0x298] sm:$0xff]  ;;  %v4523_v26 = vadd.f32 %v4418_v14, %v407_v57  ;;  %v636_v41 = vld [vmem:[%s5756_s4 + $0x30] sm:$0xff] }
  0x2c   : > { %542 = vperm.xlu0 %4136, %v378_v51   ;;  %v4472_v51 = vadd.f32 %v4418_v14, %v399_v40  ;;  %v459_v62 = vmax.f32 %v4460_v45, 0.0  ;;  %v4498_v1 = vadd.f32 %v4418_v14, %v401_v48  ;;  %v461_v7 = vmax.f32 %v4475_v52, 0.0  ;;  %v360_v33 = vld [vmem:[%s4401_s19 + $0xa0] sm:$0xff]  ;;  %v2807_v40 = vld [vmem:[%s5756_s4 + $0x2a8] sm:$0xff]  ;;  %v645_v45 = vld [vmem:[%s5756_s4 + $0x78] sm:$0xff] }
  0x2d   : > { %3688 = vmatpush3.bf16.msra.mxu1 %v3685_v53  ;;  %v4478_v53 = vadd.f32 %v4418_v14, %v400_v42  ;;  %v455_v63 = vmax.f32 %v4463_v46, 0.0  ;;  %v2806_v36 = vld [vmem:[%s5756_s4 + $0x2a0] sm:$0xff]  ;;  %v412_v37 = vmul.f32 %v4410_v11, %v354_v13  ;;  %v637_v42 = vld [vmem:[%s5756_s4 + $0x38] sm:$0xff]  ;;  %v414_v43 = vmul.f32 %v4410_v11, %v356_v21  ;;  %v2819_v46 = vld [vmem:[%s5756_s4 + $0x308] sm:$0xff] }
  0x2e   : > { %3690 = vmatprep.subr.bf16.mxu1 %v3689_v61  ;;  %3816 = vmatpush3.bf16.msra.mxu0 %v3813_v60  ;;  %v350_v60 = vld [vmem:[%s4401_s19 + $0x50] sm:$0xff]  ;;  %v456_v6 = vmax.f32 %v4472_v51, 0.0  ;;  %v418_v57 = vmul.f32 %v4410_v11, %v360_v33  ;;  %v2825_v52 = vld [vmem:[%s5756_s4 + $0x338] sm:$0xff] }
  0x2f   : > { %557 = vperm.xlu1 %4137, %v381_v58   ;;  %3818 = vmatprep.subr.bf16.mxu0 %v3817_v4  ;;  %v406_v58 = vmul.f32 %v4410_v11, %v348_v50  ;;  %v408_v19 = vmul.f32 %v4410_v11, %v350_v60 }
  0x30   : > { %552 = vperm.xlu0 %4136, %v380_v59   ;;  %v633_v59 = vld [vmem:[%s5756_s4 + $0x18] sm:$0xff] }
  0x31   : > { %3692 = vmatpush3.bf16.msra.mxu1 %v3689_v61  ;;  %v353_v61 = vld [vmem:[%s4401_s19 + $0x68] sm:$0xff]  ;;  %v4515_v18 = vpack.c.bf16 %v633_v59, %v632_v55  ;;  %v4526_v27 = vadd.f32 %v4418_v14, %v406_v58  ;;  %v4561_v49 = vadd.f32 %v4418_v14, %v408_v19 }
  0x32   : > { %3694 = vmatprep.subr.bf16.mxu1 %v4391_v5  ;;  %3820 = vmatpush3.bf16.msra.mxu0 %v3817_v4  ;;  %v355_v4 = vld [vmem:[%s4401_s19 + $0x78] sm:$0xff]  ;;  %v411_v20 = vmul.f32 %v4410_v11, %v353_v61  ;;  %v2811_v19 = vld [vmem:[%s5756_s4 + $0x2c8] sm:$0xff] }
  0x33   : > { %567 = vperm.xlu1 %4137, %v383_v2   ;;  %3822 = vmatprep.subr.bf16.mxu0 %v4405_v10  ;;  %v2804_v2 = vld [vmem:[%s5756_s4 + $0x290] sm:$0xff]  ;;  %v413_v32 = vmul.f32 %v4410_v11, %v355_v4  ;;  %v4589_v4 = vpack.c.bf16 %v2807_v40, %v2806_v36 }
  0x34   : > { %562 = vperm.xlu0 %4136, %v382_v3   ;;  %v352_v3 = vld [vmem:[%s4401_s19 + $0x60] sm:$0xff]  ;;  %v4538_v35 = vpack.c.bf16 %v2805_v12, %v2804_v2  ;;  %v4566_v55 = vadd.f32 %v4418_v14, %v411_v20  ;;  %v2809_v2 = vld [vmem:[%s5756_s4 + $0x2b8] sm:$0xff]  ;;  %v4594_v12 = vadd.f32 %v4418_v14, %v412_v37  ;;  %v640_v20 = vld [vmem:[%s5756_s4 + $0x50] sm:$0xff] }
  0x35   : > { %v410_v31 = vmul.f32 %v4410_v11, %v352_v3  ;;  %v4578_v61 = vadd.f32 %v4418_v14, %v413_v32  ;;  %v638_v3 = vld [vmem:[%s5756_s4 + $0x40] sm:$0xff]  ;;  %v2813_v32 = vld [vmem:[%s5756_s4 + $0x2d8] sm:$0xff]  ;;  %v2815_v37 = vld [vmem:[%s5756_s4 + $0x2e8] sm:$0xff] }
  0x37   : > { %577 = vperm.xlu1 %4137, %v385_v8   ;;  %v4575_v60 = vadd.f32 %v4418_v14, %v410_v31  ;;  %v2812_v31 = vld [vmem:[%s5756_s4 + $0x2d0] sm:$0xff] }
  0x38   : > { %572 = vperm.xlu0 %4136, %v384_v9   ;;  %v409_v9 = vmul.f32 %v4410_v11, %v351_v56  ;;  %v2808_v56 = vld [vmem:[%s5756_s4 + $0x2b0] sm:$0xff]  ;;  %v4691_v21 = vpack.c.bf16 %v2813_v32, %v2812_v31  ;;  %v2757_v32 = vld [vmem:[%s5756_s4 + $0x118] sm:$0xff] }
  0x39   : > { %v4629_v40 = vpack.c.bf16 %v2809_v2, %v2808_v56  ;;  %v2817_v2 = vld [vmem:[%s5756_s4 + $0x2f8] sm:$0xff]  ;;  %v2754_v56 = vld [vmem:[%s5756_s4 + $0x100] sm:$0xff]  ;;  %v2756_v31 = vld [vmem:[%s5756_s4 + $0x110] sm:$0xff] }
  0x3a   : > { %v4546_v39 = vadd.f32 %v4418_v14, %v409_v9  ;;  %v4591_v9 = vpack.c.bf16 %v637_v42, %v636_v41  ;;  %v642_v41 = vld [vmem:[%s5756_s4 + $0x60] sm:$0xff]  ;;  %v643_v42 = vld [vmem:[%s5756_s4 + $0x68] sm:$0xff] }
  0x3b   : > { %587 = vperm.xlu1 %4137, %v387_v15   ;;  %v357_v15 = vld [vmem:[%s4401_s19 + $0x88] sm:$0xff] }
  0x3c   : > { %582 = vperm.xlu0 %4136, %v386_v16   ;;  %v415_v38 = vmul.f32 %v4410_v11, %v357_v15  ;;  %v2810_v15 = vld [vmem:[%s5756_s4 + $0x2c0] sm:$0xff] }
  0x3e   : > { %v4597_v13 = vadd.f32 %v4418_v14, %v415_v38 }
  0x3f   : > { %597 = vperm.xlu1 %4137, %v389_v22   ;;  %v359_v22 = vld [vmem:[%s4401_s19 + $0x98] sm:$0xff] }
  0x40   : > { %592 = vperm.xlu0 %4136, %v388_v23   ;;  %v358_v23 = vld [vmem:[%s4401_s19 + $0x90] sm:$0xff]  ;;  %v417_v44 = vmul.f32 %v4410_v11, %v359_v22  ;;  %v4610_v22 = vadd.f32 %v4418_v14, %v414_v43  ;;  %v4638_v43 = vadd.f32 %v4418_v14, %v418_v57  ;;  %v2818_v57 = vld [vmem:[%s5756_s4 + $0x300] sm:$0xff] }
  0x41   : > { %v416_v48 = vmul.f32 %v4410_v11, %v358_v23  ;;  %v639_v11 = vld [vmem:[%s5756_s4 + $0x48] sm:$0xff]  ;;  %v641_v23 = vld [vmem:[%s5756_s4 + $0x58] sm:$0xff]  ;;  %v4720_v51 = vpack.c.bf16 %v2819_v46, %v2818_v57  ;;  %v4739_v46 = vpack.c.bf16 %v2757_v32, %v2756_v31  ;;  %v5778_v32 = vmax.f32 %v4478_v53, 0.0 }
  0x42   : > { %v4649_v38 = vpack.c.bf16 %v639_v11, %v638_v3  ;;  %v4664_v3 = vpack.c.bf16 %v641_v23, %v640_v20  ;;  %v2816_v11 = vld [vmem:[%s5756_s4 + $0x2f0] sm:$0xff]  ;;  %v2755_v23 = vld [vmem:[%s5756_s4 + $0x108] sm:$0xff] }
  0x43   : > { %v4716_v47 = vpack.c.bf16 %v2817_v2, %v2816_v11  ;;  %5776 = vst [vmem:[#allocation4_spill] sm:$0xff] %v4720_v51  ;;  %5777 = vst [vmem:[#allocation5_spill] sm:$0xff] %v4739_v46  ;;  %v2824_v20 = vld [vmem:[%s5756_s4 + $0x330] sm:$0xff] }
  0x44   : > { %602 = vperm.xlu0 %4136, %v390_v28   ;;  %v634_v28 = vld [vmem:[%s5756_s4 + $0x20] sm:$0xff] }
  0x45   : > { %v4563_v50 = vpack.c.bf16 %v635_v30, %v634_v28  ;;  %v4616_v28 = vadd.f32 %v4418_v14, %v417_v44  ;;  %v4619_v30 = vadd.f32 %v4418_v14, %v416_v48  ;;  %v2814_v44 = vld [vmem:[%s5756_s4 + $0x2e0] sm:$0xff]  ;;  %v644_v14 = vld [vmem:[%s5756_s4 + $0x70] sm:$0xff] }
  0x46   : > { %v4706_v16 = vpack.c.bf16 %v2815_v37, %v2814_v44  ;;  %v2821_v37 = vld [vmem:[%s5756_s4 + $0x318] sm:$0xff] }
  0x92   : > { %v503_v33 = vpop.permute.xlu1 %502 }
  0x93   : > { %v483_v36 = vpop.permute.xlu0 %482  ;;  %v4645_v48 = vmul.f32 %v503_v33, %v459_v62  ;;  %v4662_v33 = vpack.c.bf16 %v2811_v19, %v2810_v15  ;;  %v4693_v15 = vpack.c.bf16 %v643_v42, %v642_v41  ;;  %v4714_v41 = vpack.c.bf16 %v645_v45, %v644_v14  ;;  %v2759_v45 = vld [vmem:[%s5756_s4 + $0x128] sm:$0xff]  ;;  %v2760_v19 = vld [vmem:[%s5756_s4 + $0x130] sm:$0xff] }
  0x94   : > { %v4677_v62 = vmul.f32 %v483_v36, %v455_v63 }
  0x95   : > { %v1460_v34 = vrot.slane %v4645_v48, 3 }
  0x96   : > { %v508_v63 = vpop.permute.xlu1 %507  ;;  %v681_v44 = vrot.slane %v4677_v62, 1  ;;  %v1038_v57 = vrot.slane %v4677_v62, 2 }
  0x97   : > { %v488_v36 = vpop.permute.xlu0 %487  ;;  %v4699_v59 = vmul.f32 %v508_v63, %v460_v0  ;;  %v4718_v0 = vpack.c.bf16 %v2755_v23, %v2754_v56  ;;  %v2758_v56 = vld [vmem:[%s5756_s4 + $0x120] sm:$0xff] }
  0x98   : > { %v4703_v58 = vmul.f32 %v488_v36, %v456_v6  ;;  %v2820_v6 = vld [vmem:[%s5756_s4 + $0x310] sm:$0xff]  ;;  %v2822_v63 = vld [vmem:[%s5756_s4 + $0x320] sm:$0xff]  ;;  %v2823_v36 = vld [vmem:[%s5756_s4 + $0x328] sm:$0xff] }
  0x99   : > { %5775 = vst [vmem:[#allocation3_spill] sm:$0xff] %v4718_v0  ;;  %v1461_v2 = vrot.slane %v4699_v59, 3  ;;  %v1047_v8 = vrot.slane %v4699_v59, 2  ;;  %v2761_v0 = vld [vmem:[%s5756_s4 + $0x138] sm:$0xff] }
  0x9a   : > { %5774 = vst [vmem:[#allocation2_spill] sm:$0xff] %v4703_v58  ;;  %v1039_v42 = vrot.slane %v4703_v58, 2  ;;  %v682_v14 = vrot.slane %v4703_v58, 1  ;;  %v513_v11 = vpop.permute.xlu1 %512  ;;  %v4796_v53 = vpack.c.bf16 %v2761_v0, %v2760_v19  ;;  %v5787_v19 = vmax.f32 %v4498_v1, 0.0 }
  0x9b   : > { %v493_v23 = vpop.permute.xlu0 %492  ;;  %v4754_v31 = vmul.f32 %v513_v11, %v461_v7  ;;  %v1462_v51 = vsel %vm1459_vm1, %v1460_v34, %v1461_v2  ;;  %v4772_v7 = vpack.c.bf16 %v2821_v37, %v2820_v6  ;;  %v2762_v34 = vld [vmem:[%s5756_s4 + $0x140] sm:$0xff]  ;;  %v2763_v6 = vld [vmem:[%s5756_s4 + $0x148] sm:$0xff]  ;;  %v5792_v1 = vmax.f32 %v4526_v27, 0.0 }
  0x9c   : > { %v4758_v46 = vmul.f32 %v493_v23, %v5778_v32  ;;  %v683_v58 = vsel %vm680_vm0, %v681_v44, %v682_v14  ;;  %3413 = vmatprep.mubr.f32.mxu0 %v1462_v51  ;;  %v4774_v44 = vpack.c.bf16 %v2759_v45, %v2758_v56  ;;  %v4780_v11 = vsel %vm1037_vm2, %v1038_v57, %v1039_v42  ;;  %v2826_v37 = vld [vmem:[%s5756_s4 + $0x340] sm:$0xff]  ;;  %v2827_v56 = vld [vmem:[%s5756_s4 + $0x348] sm:$0xff] }
  0x9d   : > { %3189 = vmatprep.mubr.f32.mxu1 %v683_v58  ;;  %5779 = vst [vmem:[#allocation6_spill] sm:$0xff] %v4772_v7  ;;  %5781 = vst [vmem:[#allocation8_spill] sm:$0xff] %v4780_v11  ;;  %v1463_v58 = vrot.slane %v4754_v31, 3  ;;  %v4785_v51 = vpack.c.bf16 %v2823_v36, %v2822_v63  ;;  %v4798_v32 = vpack.c.bf16 %v2825_v52, %v2824_v20  ;;  %v2764_v63 = vld [vmem:[%s5756_s4 + $0x150] sm:$0xff]  ;;  %v5784_v36 = vrot.slane %v4645_v48, 2 }
  0x9e   : > { %5780 = vst [vmem:[#allocation7_spill] sm:$0xff] %v4774_v44  ;;  %v684_v23 = vrot.slane %v4758_v46, 1  ;;  %v518_v45 = vpop.permute.xlu1 %517  ;;  %v5786_v44 = vmax.f32 %v4481_v54, 0.0  ;;  %v2829_v54 = vld [vmem:[%s5756_s4 + $0x358] sm:$0xff] }
  0x9f   : > { %5782 = vst [vmem:[#allocation9_spill] sm:$0xff] %v4785_v51  ;;  %v498_v57 = vpop.permute.xlu0 %497  ;;  %5783 = vst [vmem:[#allocation10_spill] sm:$0xff] %v4798_v32  ;;  %v4806_v11 = vsel %vm1037_vm2, %v5784_v36, %v1047_v8  ;;  %v5769_v51 = vrot.slane %v4754_v31, 2  ;;  %v1464_v52 = vsel %vm1459_vm1, %v1461_v2, %v1463_v58  ;;  %v2765_v32 = vld [vmem:[%s5756_s4 + $0x158] sm:$0xff]  ;;  %v2828_v36 = vld [vmem:[%s5756_s4 + $0x350] sm:$0xff]  ;;  %v5788_v2 = vrot.slane %v4758_v46, 2 }
  0xa0   : > { %5785 = vst [vmem:[#allocation11_spill] sm:$0xff] %v4806_v11  ;;  %v4811_v7 = vmul.f32 %v518_v45, %v5786_v44  ;;  %v4815_v0 = vmul.f32 %v498_v57, %v5787_v19  ;;  %v685_v20 = vsel %vm680_vm0, %v682_v14, %v684_v23  ;;  %3414 = vmatmul.mubr.f32.vlgmr.msra.gmra.mrb[0].mxu0 %v1464_v52 }
  0xa1   : > { %3190 = vmatmul.mubr.f32.vlgmr.msra.gmra.mrb[0].mxu1 %v685_v20  ;;  %v4829_v44 = vpack.c.bf16 %v2763_v6, %v2762_v34  ;;  %v4831_v14 = vpack.c.bf16 %v2827_v56, %v2826_v37  ;;  %v4836_v45 = vsel %vm1037_vm2, %v1039_v42, %v5788_v2  ;;  %3824 = vmatpush3.bf16.msra.mxu0 %v4405_v10  ;;  %v688_v20 = vrot.slane %v4645_v48, 1 }
  0xa2   : > { %5789 = vst [vmem:[#allocation12_spill] sm:$0xff] %v4836_v45  ;;  %v686_v57 = vrot.slane %v4815_v0, 1  ;;  %3696 = vmatpush3.bf16.msra.mxu1 %v4391_v5  ;;  %v1465_v19 = vrot.slane %v4811_v7, 3  ;;  %v690_v34 = vrot.slane %v4699_v59, 1  ;;  %v1043_v6 = vrot.slane %v4815_v0, 2  ;;  %v528_v37 = vpop.permute.xlu1 %527  ;;  %3826 = vmatprep.subr.bf16.mxu0 %v4538_v35 }
  0xa3   : > { %v523_v56 = vpop.permute.xlu0 %522  ;;  %3698 = vmatprep.subr.bf16.mxu1 %v4515_v18  ;;  %v4847_v42 = vpack.c.bf16 %v2765_v32, %v2764_v63  ;;  %v4849_v52 = vpack.c.bf16 %v2829_v54, %v2828_v36  ;;  %v4854_v5 = vsel %vm1037_vm2, %v1047_v8, %v5769_v51  ;;  %v5791_v10 = vmax.f32 %v4523_v26, 0.0 }
  0xa4   : > { %5790 = vst [vmem:[#allocation13_spill] sm:$0xff] %v4854_v5  ;;  %v4862_v11 = vmul.f32 %v523_v56, %v5792_v1  ;;  %v687_v45 = vsel %vm680_vm0, %v684_v23, %v686_v57  ;;  %v1466_v32 = vsel %vm1459_vm1, %v1463_v58, %v1465_v19  ;;  %v689_v63 = vsel %vm680_vm0, %v686_v57, %v688_v20 }
  0xa5   : > { %v4858_v2 = vmul.f32 %v528_v37, %v5791_v10  ;;  %3192 = vmatprep.mubr.f32.mxu1 %v687_v45  ;;  %3416 = vmatprep.mubr.f32.mxu0 %v1466_v32  ;;  %v692_v36 = vrot.slane %v4754_v31, 1  ;;  %v1688_v8 = vrot.slane %v4645_v48, 4  ;;  %v1689_v26 = vrot.slane %v4699_v59, 4 }
  0xa6   : > { %3193 = vmatmul.mubr.f32.gmra.mrb[2].mxu1 %v689_v63  ;;  %v691_v54 = vsel %vm680_vm0, %v688_v20, %v690_v34  ;;  %v1467_v27 = vrot.slane %v4862_v11, 3  ;;  %3828 = vmatpush3.bf16.msra.mxu0 %v4538_v35  ;;  %v694_v58 = vrot.slane %v4811_v7, 1  ;;  %v538_v1 = vpop.permute.xlu1 %537  ;;  %v1691_v57 = vrot.slane %v4754_v31, 4 }
  0xa7   : > { %v1469_v23 = vrot.slane %v4858_v2, 3  ;;  %v533_v45 = vpop.permute.xlu0 %532  ;;  %3195 = vmatprep.mubr.f32.mxu1 %v691_v54  ;;  %3700 = vmatpush3.bf16.msra.mxu1 %v4515_v18  ;;  %v5793_v37 = vrot.slane %v4758_v46, 2  ;;  %v5794_v20 = vrot.slane %v4645_v48, 2  ;;  %v5771_v10 = vrot.slane %v4811_v7, 2 }
  0xa8   : > { %v5796_v32 = vmax.f32 %v4546_v39, 0.0  ;;  %v5797_v18 = vmax.f32 %v4561_v49, 0.0  ;;  %v1468_v51 = vsel %vm1459_vm1, %v1465_v19, %v1467_v27  ;;  %3702 = vmatprep.subr.bf16.mxu1 %v4563_v50  ;;  %3830 = vmatprep.subr.bf16.mxu0 %v4589_v4  ;;  %v4903_v39 = vsel %vm1687_vm3, %v1688_v8, %v1689_v26 }
  0xa9   : > { %v4880_v56 = vsel %vm1037_vm2, %v5793_v37, %v1043_v6  ;;  %v4885_v35 = vsel %vm1037_vm2, %v1043_v6, %v5794_v20  ;;  %v1470_v37 = vsel %vm1459_vm1, %v1467_v27, %v1469_v23  ;;  %3417 = vmatmul.mubr.f32.gmra.mrb[2].mxu0 %v1468_v51  ;;  %v693_v6 = vsel %vm680_vm0, %v690_v34, %v692_v36 }
  0xaa   : > { %5795 = vst [vmem:[#allocation14_spill] sm:$0xff] %v4885_v35  ;;  %v4890_v63 = vmul.f32 %v538_v1, %v5796_v32  ;;  %v4894_v54 = vmul.f32 %v533_v45, %v5797_v18  ;;  %v696_v20 = vrot.slane %v4862_v11, 1  ;;  %v1693_v49 = vrot.slane %v4811_v7, 4  ;;  %3196 = vmatmul.mubr.f32.gmra.mrb[4].mxu1 %v693_v6  ;;  %3419 = vmatprep.mubr.f32.mxu0 %v1470_v37  ;;  %v548_v34 = vpop.permute.xlu1 %547 }
  0xab   : > { %v695_v19 = vsel %vm680_vm0, %v692_v36, %v694_v58  ;;  %v698_v51 = vrot.slane %v4858_v2, 1  ;;  %v543_v45 = vpop.permute.xlu0 %542  ;;  %3704 = vmatpush3.bf16.msra.mxu1 %v4563_v50  ;;  %v4912_v8 = vsel %vm1687_vm3, %v1689_v26, %v1691_v57  ;;  %v1695_v32 = vrot.slane %v4862_v11, 4  ;;  %3832 = vmatpush3.bf16.msra.mxu0 %v4589_v4 }
  0xac   : > { %v1471_v1 = vrot.slane %v4894_v54, 3  ;;  %v1473_v27 = vrot.slane %v4890_v63, 3  ;;  %3198 = vmatprep.mubr.f32.mxu1 %v695_v19  ;;  %v1697_v18 = vrot.slane %v4858_v2, 4  ;;  %v5798_v36 = vrot.slane %v4754_v31, 2  ;;  %3706 = vmatprep.subr.bf16.mxu1 %v4591_v9 }
  0xad   : > { %v5799_v6 = vmax.f32 %v4566_v55, 0.0  ;;  %v5800_v50 = vmax.f32 %v4575_v60, 0.0  ;;  %3834 = vmatprep.subr.bf16.mxu0 %v4629_v40  ;;  %v700_v55 = vrot.slane %v4894_v54, 1  ;;  %v4940_v60 = vsel %vm1687_vm3, %v1691_v57, %v1693_v49 }
  0xae   : > { %v4921_v37 = vsel %vm1037_vm2, %v5798_v36, %v5771_v10  ;;  %v1472_v26 = vsel %vm1459_vm1, %v1469_v23, %v1471_v1  ;;  %v697_v36 = vsel %vm680_vm0, %v694_v58, %v696_v20  ;;  %v1474_v10 = vsel %vm1459_vm1, %v1471_v1, %v1473_v27  ;;  %v558_v58 = vpop.permute.xlu1 %557 }
  0xaf   : > { %v4925_v5 = vmul.f32 %v548_v34, %v5799_v6  ;;  %v4929_v19 = vmul.f32 %v543_v45, %v5800_v50  ;;  %3420 = vmatmul.mubr.f32.gmra.mrb[4].mxu0 %v1472_v26  ;;  %3199 = vmatmul.mubr.f32.gmra.mrb[6].mxu1 %v697_v36  ;;  %v699_v4 = vsel %vm680_vm0, %v696_v20, %v698_v51  ;;  %v702_v45 = vrot.slane %v4890_v63, 1  ;;  %v553_v6 = vpop.permute.xlu0 %552 }
  0xb0   : > { %3422 = vmatprep.mubr.f32.mxu0 %v1474_v10  ;;  %3201 = vmatprep.mubr.f32.mxu1 %v699_v4  ;;  %v4948_v1 = vsel %vm1687_vm3, %v1693_v49, %v1695_v32  ;;  %v4951_v57 = vsel %vm1687_vm3, %v1695_v32, %v1697_v18  ;;  %v1699_v10 = vrot.slane %v4894_v54, 4  ;;  %v1701_v20 = vrot.slane %v4890_v63, 4 }
  0xb1   : > { %v1475_v23 = vrot.slane %v4929_v19, 3  ;;  %v1477_v34 = vrot.slane %v4925_v5, 3  ;;  %3708 = vmatpush3.bf16.msra.mxu1 %v4591_v9  ;;  %v5801_v50 = vmax.f32 %v4578_v61, 0.0  ;;  %v5802_v36 = vmax.f32 %v4594_v12, 0.0  ;;  %3836 = vmatpush3.bf16.msra.mxu0 %v4629_v40 }
  0xb2   : > { %3710 = vmatprep.subr.bf16.mxu1 %v4649_v38  ;;  %v701_v32 = vsel %vm680_vm0, %v698_v51, %v700_v55  ;;  %3838 = vmatprep.subr.bf16.mxu0 %v4662_v33  ;;  %v704_v61 = vrot.slane %v4929_v19, 1  ;;  %v5804_v12 = vmax.f32 %v4610_v22, 0.0 }
  0xb3   : > { %v4957_v26 = vmul.f32 %v558_v58, %v5801_v50  ;;  %v4961_v35 = vmul.f32 %v553_v6, %v5802_v36  ;;  %v1476_v9 = vsel %vm1459_vm1, %v1473_v27, %v1475_v23  ;;  %v1478_v4 = vsel %vm1459_vm1, %v1475_v23, %v1477_v34  ;;  %3202 = vmatmul.mubr.f32.gmra.mrb[8].mxu1 %v701_v32  ;;  %v568_v50 = vpop.permute.xlu1 %567  ;;  %v563_v51 = vpop.permute.xlu0 %562 }
  0xb4   : > { %3423 = vmatmul.mubr.f32.gmra.mrb[6].mxu0 %v1476_v9  ;;  %v703_v27 = vsel %vm680_vm0, %v700_v55, %v702_v45  ;;  %v706_v6 = vrot.slane %v4925_v5, 1  ;;  %v4978_v23 = vsel %vm1687_vm3, %v1697_v18, %v1699_v10  ;;  %v4981_v36 = vsel %vm1687_vm3, %v1699_v10, %v1701_v20 }
  0xb5   : > { %3425 = vmatprep.mubr.f32.mxu0 %v1478_v4  ;;  %v1479_v40 = vrot.slane %v4961_v35, 3  ;;  %v1481_v58 = vrot.slane %v4957_v26, 3  ;;  %3204 = vmatprep.mubr.f32.mxu1 %v703_v27  ;;  %v1703_v9 = vrot.slane %v4929_v19, 4  ;;  %v5772_v55 = vrot.slane %v4925_v5, 4 }
  0xb6   : > { %3712 = vmatpush3.bf16.msra.mxu1 %v4649_v38  ;;  %v5803_v32 = vmax.f32 %v4597_v13, 0.0  ;;  %v4991_v49 = vmul.f32 %v563_v51, %v5804_v12  ;;  %3840 = vmatpush3.bf16.msra.mxu0 %v4662_v33  ;;  %v1057_v18 = vrot.slane %v4894_v54, 2  ;;  %v705_v10 = vsel %vm680_vm0, %v702_v45, %v704_v61 }
  0xb7   : > { %v1480_v38 = vsel %vm1459_vm1, %v1477_v34, %v1479_v40  ;;  %3714 = vmatprep.subr.bf16.mxu1 %v4664_v3  ;;  %v1482_v27 = vsel %vm1459_vm1, %v1479_v40, %v1481_v58  ;;  %3842 = vmatprep.subr.bf16.mxu0 %v4691_v21  ;;  %v708_v13 = vrot.slane %v4961_v35, 1  ;;  %v707_v34 = vsel %vm680_vm0, %v704_v61, %v706_v6  ;;  %v578_v51 = vpop.permute.xlu1 %577  ;;  %v573_v45 = vpop.permute.xlu0 %572 }
  0xb8   : > { %v4987_v4 = vmul.f32 %v568_v50, %v5803_v32  ;;  %3426 = vmatmul.mubr.f32.gmra.mrb[8].mxu0 %v1480_v38  ;;  %3205 = vmatmul.mubr.f32.gmra.mrb[10].mxu1 %v705_v10  ;;  %v1483_v33 = vrot.slane %v4991_v49, 3  ;;  %v710_v50 = vrot.slane %v4957_v26, 1  ;;  %v5008_v40 = vsel %vm1687_vm3, %v1701_v20, %v1703_v9 }
  0xb9   : > { %3428 = vmatprep.mubr.f32.mxu0 %v1482_v27  ;;  %3207 = vmatprep.mubr.f32.mxu1 %v707_v34  ;;  %v5013_v32 = vsel %vm1687_vm3, %v1703_v9, %v5772_v55  ;;  %v5805_v61 = vrot.slane %v4862_v11, 2  ;;  %v5806_v38 = vrot.slane %v4811_v7, 2  ;;  %v1061_v27 = vrot.slane %v4929_v19, 2 }
  0xba   : > { %v1485_v12 = vrot.slane %v4987_v4, 3  ;;  %3716 = vmatpush3.bf16.msra.mxu1 %v4664_v3  ;;  %v5808_v34 = vmax.f32 %v4616_v28, 0.0  ;;  %v5809_v20 = vmax.f32 %v4619_v30, 0.0  ;;  %v1484_v9 = vsel %vm1459_vm1, %v1481_v58, %v1483_v33  ;;  %3844 = vmatpush3.bf16.msra.mxu0 %v4691_v21 }
  0xbb   : > { %v5020_v10 = vsel %vm1037_vm2, %v5806_v38, %v5805_v61  ;;  %3718 = vmatprep.subr.bf16.mxu1 %v4693_v15  ;;  %v709_v61 = vsel %vm680_vm0, %v706_v6, %v708_v13  ;;  %3846 = vmatprep.subr.bf16.mxu0 %v4706_v16  ;;  %v712_v30 = vrot.slane %v4991_v49, 1  ;;  %v711_v21 = vsel %vm680_vm0, %v708_v13, %v710_v50  ;;  %v583_v6 = vpop.permute.xlu0 %582 }
  0xbc   : > { %5807 = vst [vmem:[#allocation15_spill] sm:$0xff] %v5020_v10  ;;  %v5025_v3 = vmul.f32 %v578_v51, %v5808_v34  ;;  %v5029_v22 = vmul.f32 %v573_v45, %v5809_v20  ;;  %3429 = vmatmul.mubr.f32.gmra.mrb[10].mxu0 %v1484_v9  ;;  %v1486_v28 = vsel %vm1459_vm1, %v1483_v33, %v1485_v12  ;;  %v1063_v38 = vrot.slane %v4925_v5, 2  ;;  %v588_v34 = vpop.permute.xlu1 %587 }
  0xbd   : > { %3208 = vmatmul.mubr.f32.gmra.mrb[12].mxu1 %v709_v61  ;;  %3431 = vmatprep.mubr.f32.mxu0 %v1486_v28  ;;  %v5810_v33 = vrot.slane %v4858_v2, 2  ;;  %v5811_v20 = vrot.slane %v4862_v11, 2  ;;  %v5813_v28 = vrot.slane %v4890_v63, 2  ;;  %v5815_v10 = vmax.f32 %v4638_v43, 0.0 }
  0xbe   : > { %v1487_v58 = vrot.slane %v5029_v22, 3  ;;  %v1489_v45 = vrot.slane %v5025_v3, 3  ;;  %3210 = vmatprep.mubr.f32.mxu1 %v711_v21  ;;  %3720 = vmatpush3.bf16.msra.mxu1 %v4693_v15  ;;  %v1065_v21 = vrot.slane %v4961_v35, 2  ;;  %v5814_v15 = vmax.f32 %v4424_v17, 0.0 }
  0xbf   : > { %v5050_v9 = vsel %vm1037_vm2, %v5811_v20, %v5810_v33  ;;  %v5812_v13 = vmov %v5810_v33  ;;  %v5060_v51 = vsel %vm1037_vm2, %v1057_v18, %v5813_v28  ;;  %v5069_v33 = vmul.f32 %v583_v6, %v5815_v10  ;;  %3848 = vmatpush3.bf16.msra.mxu0 %v4706_v16  ;;  %3722 = vmatprep.subr.bf16.mxu1 %v4714_v41 }
  0xc0   : > { %v5055_v61 = vsel %vm1037_vm2, %v5812_v13, %v1057_v18  ;;  %v5065_v55 = vmul.f32 %v588_v34, %v5814_v15  ;;  %v1488_v20 = vsel %vm1459_vm1, %v1485_v12, %v1487_v58  ;;  %v1067_v13 = vrot.slane %v4957_v26, 2  ;;  %3850 = vmatprep.subr.bf16.mxu0 %v4716_v47  ;;  %v598_v6 = vpop.permute.xlu1 %597 }
  0xc1   : > { %3432 = vmatmul.mubr.f32.gmra.mrb[12].mxu0 %v1488_v20  ;;  %v713_v18 = vsel %vm680_vm0, %v710_v50, %v712_v30  ;;  %v1490_v28 = vsel %vm1459_vm1, %v1487_v58, %v1489_v45  ;;  %v2110_v43 = vrot.slane %v4862_v11, 5  ;;  %v1491_v16 = vrot.slane %v5069_v33, 3  ;;  %v593_v50 = vpop.permute.xlu0 %592 }
  0xc2   : > { %v1919_v10 = vrot.slane %v5065_v55, 4  ;;  %3211 = vmatmul.mubr.f32.gmra.mrb[14].mxu1 %v713_v18  ;;  %3434 = vmatprep.mubr.f32.mxu0 %v1490_v28  ;;  %v2111_v34 = vrot.slane %v4858_v2, 5  ;;  %v5816_v58 = vrot.slane %v4890_v63, 2  ;;  %v5093_v20 = vsel %vm1037_vm2, %v1061_v27, %v1063_v38 }
  0xc3   : > { %3724 = vmatpush3.bf16.msra.mxu1 %v4714_v41  ;;  %3245 = vmatprep.mubr.f32.mxu1 %v4677_v62  ;;  %v5096_v18 = vsel %vm1037_vm2, %v1063_v38, %v1065_v21  ;;  %v5817_v28 = vmax.f32 %v4433_v24, 0.0  ;;  %v5818_v41 = vmax.f32 %v4436_v25, 0.0  ;;  %v1492_v17 = vsel %vm1459_vm1, %v1489_v45, %v1491_v16  ;;  %v5820_v38 = vld [vmem:[#allocation4_spill] sm:$0xff] }
  0xc4   : > { %v5090_v15 = vsel %vm1037_vm2, %v5816_v58, %v1061_v27  ;;  %3852 = vmatpush3.bf16.msra.mxu0 %v4716_v47  ;;  %v5819_v58 = vld [vmem:[#allocation3_spill] sm:$0xff]  ;;  %v2113_v27 = vrot.slane %v4894_v54, 5  ;;  %v5821_v24 = vrot.slane %v5069_v33, 4  ;;  %v5118_v25 = vsel %vm1037_vm2, %v1065_v21, %v1067_v13 }
  0xc5   : > { %v5100_v12 = vmul.f32 %v598_v6, %v5817_v28  ;;  %v5104_v62 = vmul.f32 %v593_v50, %v5818_v41  ;;  %3726 = vmatprep.subr.bf16.mxu1 %v5819_v58  ;;  %3435 = vmatmul.mubr.f32.gmra.mrb[14].mxu0 %v1492_v17  ;;  %v2115_v45 = vrot.slane %v4890_v63, 5  ;;  %v5822_v28 = vld [vmem:[#allocation2_spill] sm:$0xff]  ;;  %v603_v21 = vpop.permute.xlu0 %602  ;;  %v5823_v30 = vrot.slane %v4991_v49, 2  ;;  %v5825_v41 = vld [vmem:[#allocation5_spill] sm:$0xff] }
  0xc6   : > { %3854 = vmatprep.subr.bf16.mxu0 %v5820_v38  ;;  %v5115_v6 = vsel %vm1687_vm3, %v5821_v24, %v1919_v10  ;;  %3246 = vmatmul.mubr.f32.vlgmr.msra.gmra.mrb[0].mxu1 %v5822_v28  ;;  %v5137_v50 = vsel %vm2109_vm4, %v2110_v43, %v2111_v34  ;;  %v5824_v28 = vmax.f32 %v4442_v29, 0.0  ;;  %v2117_v29 = vrot.slane %v4929_v19, 5 }
  0xc7   : > { %v1923_v47 = vrot.slane %v5100_v12, 4  ;;  %v1921_v17 = vrot.slane %v5104_v62, 4  ;;  %3469 = vmatprep.mubr.f32.mxu0 %v4903_v39  ;;  %3248 = vmatprep.mubr.f32.mxu1 %v4758_v46  ;;  %v5134_v16 = vsel %vm1037_vm2, %v1067_v13, %v5823_v30  ;;  %v5155_v13 = vsel %vm2109_vm4, %v2113_v27, %v2115_v45 }
  0xc8   : > { %3728 = vmatpush3.bf16.msra.mxu1 %v5819_v58  ;;  %v5141_v39 = vmul.f32 %v603_v21, %v5824_v28  ;;  %v5151_v58 = vsel %vm2109_vm4, %v2111_v34, %v2113_v27  ;;  %v2119_v43 = vrot.slane %v4925_v5, 5  ;;  %v2121_v30 = vrot.slane %v4961_v35, 5 }
  0xc9   : > { %3730 = vmatprep.subr.bf16.mxu1 %v5825_v41  ;;  %v5145_v24 = vsel %vm1687_vm3, %v1919_v10, %v1921_v17  ;;  %v5148_v46 = vsel %vm1687_vm3, %v1921_v17, %v1923_v47  ;;  %3470 = vmatmul.mubr.f32.vlgmr.msra.gmra.mrb[0].mxu0 %v4912_v8  ;;  %v2123_v8 = vrot.slane %v4957_v26, 5  ;;  %v5169_v34 = vsel %vm2109_vm4, %v2115_v45, %v2117_v29 }
  0xca   : > { %v1925_v10 = vrot.slane %v5141_v39, 4  ;;  %v2141_v17 = vrot.slane %v5141_v39, 5  ;;  %3856 = vmatpush3.bf16.msra.mxu0 %v5820_v38  ;;  %3249 = vmatmul.mubr.f32.gmra.mrb[2].mxu1 %v4815_v0  ;;  %v5172_v27 = vsel %vm2109_vm4, %v2117_v29, %v2119_v43  ;;  %v5175_v28 = vsel %vm2109_vm4, %v2119_v43, %v2121_v30  ;;  %v5827_v0 = vld [vmem:[#allocation6_spill] sm:$0xff]  ;;  %v5828_v29 = vld [vmem:[#allocation7_spill] sm:$0xff] }
  0xcb   : > { %3472 = vmatprep.mubr.f32.mxu0 %v4940_v60  ;;  %3251 = vmatprep.mubr.f32.mxu1 %v4645_v48  ;;  %5826 = vst [vmem:[#allocation3_spill] sm:$0xff] %v5175_v28  ;;  %v2125_v21 = vrot.slane %v4991_v49, 5  ;;  %v5184_v48 = vsel %vm2109_vm4, %v2121_v30, %v2123_v8  ;;  %v2127_v60 = vrot.slane %v4987_v4, 5  ;;  %v2129_v45 = vrot.slane %v5029_v22, 5 }
  0xcc   : > { %3732 = vmatpush3.bf16.msra.mxu1 %v5825_v41  ;;  %3858 = vmatprep.subr.bf16.mxu0 %v5827_v0  ;;  %v5181_v38 = vsel %vm1687_vm3, %v1923_v47, %v1925_v10  ;;  %v2131_v41 = vrot.slane %v5025_v3, 5  ;;  %v1269_v28 = vrot.slane %v4987_v4, 2  ;;  %v2133_v47 = vrot.slane %v5069_v33, 5 }
  0xcd   : > { %3473 = vmatmul.mubr.f32.gmra.mrb[2].mxu0 %v4948_v1  ;;  %3734 = vmatprep.subr.bf16.mxu1 %v5828_v29  ;;  %v5191_v43 = vsel %vm2109_vm4, %v2123_v8, %v2125_v21  ;;  %v5199_v30 = vsel %vm2109_vm4, %v2125_v21, %v2127_v60  ;;  %v5202_v1 = vsel %vm2109_vm4, %v2127_v60, %v2129_v45  ;;  %v1271_v10 = vrot.slane %v5029_v22, 2 }
  0xce   : > { %5829 = vst [vmem:[#allocation4_spill] sm:$0xff] %v5191_v43  ;;  %3860 = vmatpush3.bf16.msra.mxu0 %v5827_v0  ;;  %3252 = vmatmul.mubr.f32.gmra.mrb[4].mxu1 %v4699_v59  ;;  %5830 = vst [vmem:[#allocation2_spill] sm:$0xff] %v5199_v30  ;;  %v1273_v8 = vrot.slane %v5025_v3, 2  ;;  %v5209_v43 = vsel %vm2109_vm4, %v2129_v45, %v2131_v41  ;;  %v5832_v0 = vrot.slane %v4991_v49, 2  ;;  %v1275_v60 = vrot.slane %v5069_v33, 2 }
  0xcf   : > { %5831 = vst [vmem:[#allocation5_spill] sm:$0xff] %v5202_v1  ;;  %3475 = vmatprep.mubr.f32.mxu0 %v4951_v57  ;;  %3254 = vmatprep.mubr.f32.mxu1 %v4754_v31  ;;  %v5217_v21 = vsel %vm2109_vm4, %v2131_v41, %v2133_v47  ;;  %v5834_v1 = vld [vmem:[#allocation9_spill] sm:$0xff]  ;;  %v5223_v30 = vsel %vm1037_vm2, %v1269_v28, %v1271_v10  ;;  %v5836_v31 = vrot.slane %v5065_v55, 5  ;;  %v2353_v41 = vrot.slane %v4991_v49, 6 }
  0xd0   : > { %v5214_v59 = vsel %vm1037_vm2, %v5832_v0, %v1269_v28  ;;  %5833 = vst [vmem:[#allocation6_spill] sm:$0xff] %v5217_v21  ;;  %3736 = vmatpush3.bf16.msra.mxu1 %v5828_v29  ;;  %3862 = vmatprep.subr.bf16.mxu0 %v5834_v1  ;;  %5835 = vst [vmem:[#allocation7_spill] sm:$0xff] %v5223_v30  ;;  %v5231_v0 = vsel %vm1037_vm2, %v1271_v10, %v1273_v8  ;;  %v5839_v29 = vrot.slane %v5104_v62, 5 }
  0xd1   : > { %v5228_v45 = vsel %vm2109_vm4, %v2133_v47, %v5836_v31  ;;  %5838 = vst [vmem:[#allocation16_spill] sm:$0xff] %v5231_v0  ;;  %3476 = vmatmul.mubr.f32.gmra.mrb[4].mxu0 %v4978_v23  ;;  %3738 = vmatprep.subr.bf16.mxu1 %v4796_v53  ;;  %v5840_v21 = vmov %v5836_v31  ;;  %v5244_v30 = vsel %vm1037_vm2, %v1273_v8, %v1275_v60  ;;  %v5842_v47 = vrot.slane %v5100_v12, 5 }
  0xd2   : > { %5837 = vst [vmem:[#allocation9_spill] sm:$0xff] %v5228_v45  ;;  %v5241_v28 = vsel %vm2109_vm4, %v5840_v21, %v5839_v29  ;;  %5841 = vst [vmem:[#allocation17_spill] sm:$0xff] %v5244_v30  ;;  %v5843_v10 = vmov %v5839_v29  ;;  %v2355_v0 = vrot.slane %v4987_v4, 6  ;;  %3864 = vmatpush3.bf16.msra.mxu0 %v5834_v1  ;;  %3255 = vmatmul.mubr.f32.gmra.mrb[6].mxu1 %v4811_v7  ;;  %v2338_v8 = vrot.slane %v4862_v11, 6 }
  0xd3   : > { %v5251_v31 = vsel %vm2109_vm4, %v5843_v10, %v5842_v47  ;;  %v5844_v45 = vmov %v5842_v47  ;;  %v2339_v60 = vrot.slane %v4858_v2, 6  ;;  %v2357_v29 = vrot.slane %v5029_v22, 6  ;;  %3478 = vmatprep.mubr.f32.mxu0 %v4981_v36  ;;  %3257 = vmatprep.mubr.f32.mxu1 %v4862_v11 }
  0xd4   : > { %v5259_v21 = vsel %vm2109_vm4, %v5844_v45, %v2141_v17  ;;  %v5267_v47 = vsel %vm2337_vm5, %v2353_v41, %v2355_v0  ;;  %v2359_v7 = vrot.slane %v5025_v3, 6  ;;  %v2341_v1 = vrot.slane %v4894_v54, 6  ;;  %3740 = vmatpush3.bf16.msra.mxu1 %v4796_v53  ;;  %v5847_v45 = vld [vmem:[#allocation10_spill] sm:$0xff] }
  0xd5   : > { %5845 = vst [vmem:[#allocation18_spill] sm:$0xff] %v5259_v21  ;;  %5846 = vst [vmem:[#allocation19_spill] sm:$0xff] %v5267_v47  ;;  %v2343_v17 = vrot.slane %v4890_v63, 6  ;;  %3866 = vmatprep.subr.bf16.mxu0 %v5847_v45  ;;  %v5275_v10 = vsel %vm2337_vm5, %v2338_v8, %v2339_v60  ;;  %v5278_v21 = vsel %vm2337_vm5, %v2355_v0, %v2357_v29  ;;  %v2361_v11 = vrot.slane %v5069_v33, 6 }
  0xd6   : > { %5848 = vst [vmem:[#allocation10_spill] sm:$0xff] %v5278_v21  ;;  %v2345_v47 = vrot.slane %v4929_v19, 6  ;;  %3479 = vmatmul.mubr.f32.gmra.mrb[6].mxu0 %v5008_v40  ;;  %3742 = vmatprep.subr.bf16.mxu1 %v4829_v44  ;;  %v5285_v30 = vsel %vm2337_vm5, %v2357_v29, %v2359_v7  ;;  %v5288_v53 = vsel %vm2337_vm5, %v2339_v60, %v2341_v1  ;;  %v2347_v0 = vrot.slane %v4925_v5, 6  ;;  %v2766_v21 = vld [vmem:[%s5756_s4 + $0x160] sm:$0xff]  ;;  %v2767_v29 = vld [vmem:[%s5756_s4 + $0x168] sm:$0xff] }
  0xd7   : > { %5849 = vst [vmem:[#allocation20_spill] sm:$0xff] %v5285_v30  ;;  %5850 = vst [vmem:[#allocation21_spill] sm:$0xff] %v5288_v53  ;;  %v5291_v8 = vsel %vm2337_vm5, %v2341_v1, %v2343_v17  ;;  %3868 = vmatpush3.bf16.msra.mxu0 %v5847_v45  ;;  %3258 = vmatmul.mubr.f32.gmra.mrb[8].mxu1 %v4858_v2  ;;  %v5303_v60 = vsel %vm2337_vm5, %v2359_v7, %v2361_v11  ;;  %v5853_v1 = vrot.slane %v5065_v55, 6 }
  0xd8   : > { %5851 = vst [vmem:[#allocation22_spill] sm:$0xff] %v5291_v8  ;;  %5852 = vst [vmem:[#allocation23_spill] sm:$0xff] %v5303_v60  ;;  %v5311_v45 = vsel %vm2337_vm5, %v2343_v17, %v2345_v47  ;;  %v2349_v2 = vrot.slane %v4961_v35, 6  ;;  %3481 = vmatprep.mubr.f32.mxu0 %v5013_v32  ;;  %3260 = vmatprep.mubr.f32.mxu1 %v4894_v54  ;;  %v5317_v53 = vsel %vm2337_vm5, %v2345_v47, %v2347_v0 }
  0xd9   : > { %v5308_v8 = vsel %vm2337_vm5, %v2361_v11, %v5853_v1  ;;  %5854 = vst [vmem:[#allocation24_spill] sm:$0xff] %v5311_v45  ;;  %v5855_v7 = vrot.slane %v5104_v62, 6  ;;  %v5856_v60 = vmov %v5853_v1  ;;  %v5857_v11 = vrot.slane %v5100_v12, 6  ;;  %3744 = vmatpush3.bf16.msra.mxu1 %v4829_v44  ;;  %3870 = vmatprep.subr.bf16.mxu0 %v4831_v14 }
  0xda   : > { %v2351_v45 = vrot.slane %v4957_v26, 6  ;;  %v5859_v54 = vrot.slane %v4961_v35, 4  ;;  %v5860_v55 = vrot.slane %v4925_v5, 4  ;;  %v5345_v62 = vsel %vm2337_vm5, %v2347_v0, %v2349_v2  ;;  %3746 = vmatprep.subr.bf16.mxu1 %v4847_v42 }
  0xdb   : > { %v5324_v30 = vsel %vm2337_vm5, %v5856_v60, %v5855_v7  ;;  %v5858_v17 = vmov %v5855_v7  ;;  %v1711_v60 = vrot.slane %v4991_v49, 4  ;;  %v5861_v7 = vrot.slane %v5141_v39, 6  ;;  %v2831_v49 = vld [vmem:[%s5756_s4 + $0x368] sm:$0xff]  ;;  %3872 = vmatpush3.bf16.msra.mxu0 %v4831_v14  ;;  %3261 = vmatmul.mubr.f32.gmra.mrb[10].mxu1 %v4890_v63 }
  0xdc   : > { %v5331_v1 = vsel %vm2337_vm5, %v5858_v17, %v5857_v11  ;;  %v5341_v47 = vsel %vm1687_vm3, %v5860_v55, %v5859_v54  ;;  %v3749_v17 = vpack.c.bf16 %v2767_v29, %v2766_v21  ;;  %v2830_v54 = vld [vmem:[%s5756_s4 + $0x360] sm:$0xff]  ;;  %v5363_v39 = vsel %vm2337_vm5, %v2349_v2, %v2351_v45  ;;  %v2768_v2 = vld [vmem:[%s5756_s4 + $0x170] sm:$0xff]  ;;  %3263 = vmatprep.mubr.f32.mxu1 %v4929_v19 }
  0xdd   : > { %v5352_v44 = vsel %vm2337_vm5, %v5857_v11, %v5861_v7  ;;  %3482 = vmatmul.mubr.f32.gmra.mrb[8].mxu0 %v5341_v47  ;;  %v5366_v12 = vsel %vm2337_vm5, %v2351_v45, %v2353_v41  ;;  %v5862_v21 = vrot.slane %v4957_v26, 4  ;;  %v5863_v0 = vrot.slane %v4961_v35, 4  ;;  %v2769_v41 = vld [vmem:[%s5756_s4 + $0x178] sm:$0xff]  ;;  %3748 = vmatpush3.bf16.msra.mxu1 %v4847_v42  ;;  %v2832_v19 = vld [vmem:[%s5756_s4 + $0x370] sm:$0xff] }
  0xde   : > { %v1713_v55 = vrot.slane %v4987_v4, 4  ;;  %3874 = vmatprep.subr.bf16.mxu0 %v4849_v52  ;;  %v3877_v4 = vpack.c.bf16 %v2831_v49, %v2830_v54  ;;  %v1715_v45 = vrot.slane %v5029_v22, 4  ;;  %3750 = vmatprep.subr.bf16.mxu1 %v3749_v17  ;;  %v3753_v7 = vpack.c.bf16 %v2769_v41, %v2768_v2  ;;  %v2833_v42 = vld [vmem:[%s5756_s4 + $0x378] sm:$0xff]  ;;  %v2770_v54 = vld [vmem:[%s5756_s4 + $0x180] sm:$0xff]  ;;  %v2771_v49 = vld [vmem:[%s5756_s4 + $0x188] sm:$0xff] }
  0xdf   : > { %v5375_v29 = vsel %vm1687_vm3, %v5863_v0, %v5862_v21  ;;  %v5864_v14 = vmov %v5862_v21  ;;  %3876 = vmatpush3.bf16.msra.mxu0 %v4849_v52  ;;  %3264 = vmatmul.mubr.f32.gmra.mrb[12].mxu1 %v4925_v5  ;;  %v1717_v22 = vrot.slane %v5025_v3, 4  ;;  %v3881_v5 = vpack.c.bf16 %v2833_v42, %v2832_v19  ;;  %v2834_v3 = vld [vmem:[%s5756_s4 + $0x380] sm:$0xff]  ;;  %v2773_v0 = vld [vmem:[%s5756_s4 + $0x198] sm:$0xff]  ;;  %v5867_v19 = vld [vmem:[#allocation12_spill] sm:$0xff] }
  0xe0   : > { %3484 = vmatprep.mubr.f32.mxu0 %v5375_v29  ;;  %v5391_v63 = vsel %vm1687_vm3, %v5864_v14, %v1711_v60  ;;  %v5404_v11 = vsel %vm1687_vm3, %v1711_v60, %v1713_v55  ;;  %3266 = vmatprep.mubr.f32.mxu1 %v4961_v35  ;;  %v5416_v52 = vsel %vm1687_vm3, %v1713_v55, %v1715_v45  ;;  %v2835_v60 = vld [vmem:[%s5756_s4 + $0x388] sm:$0xff]  ;;  %v5865_v55 = vld [vmem:[#allocation8_spill] sm:$0xff] }
  0xe1   : > { %3485 = vmatmul.mubr.f32.gmra.mrb[10].mxu0 %v5391_v63  ;;  %3752 = vmatpush3.bf16.msra.mxu1 %v3749_v17  ;;  %v3757_v21 = vpack.c.bf16 %v2771_v49, %v2770_v54  ;;  %v5427_v35 = vsel %vm1687_vm3, %v1715_v45, %v1717_v22  ;;  %v2772_v17 = vld [vmem:[%s5756_s4 + $0x190] sm:$0xff]  ;;  %v3885_v2 = vpack.c.bf16 %v2835_v60, %v2834_v3  ;;  %v2777_v49 = vld [vmem:[%s5756_s4 + $0x1b8] sm:$0xff]  ;;  %v5869_v60 = vld [vmem:[#allocation11_spill] sm:$0xff] }
  0xe2   : > { %3487 = vmatprep.mubr.f32.mxu0 %v5404_v11  ;;  %3878 = vmatprep.subr.bf16.mxu0 %v3877_v4  ;;  %v2836_v14 = vld [vmem:[%s5756_s4 + $0x390] sm:$0xff]  ;;  %v3761_v45 = vpack.c.bf16 %v2773_v0, %v2772_v17  ;;  %v2778_v17 = vld [vmem:[%s5756_s4 + $0x1c0] sm:$0xff]  ;;  %v2779_v0 = vld [vmem:[%s5756_s4 + $0x1c8] sm:$0xff] }
  0xe3   : > { %3754 = vmatprep.subr.bf16.mxu1 %v3753_v7  ;;  %3880 = vmatpush3.bf16.msra.mxu0 %v3877_v4  ;;  %v2837_v4 = vld [vmem:[%s5756_s4 + $0x398] sm:$0xff] }
  0xe4   : > { %3267 = vmatmul.mubr.f32.gmra.mrb[14].mxu1 %v4957_v26  ;;  %3882 = vmatprep.subr.bf16.mxu0 %v3881_v5  ;;  %v5866_v26 = vrot.slane %v5069_v33, 4  ;;  %v2774_v33 = vld [vmem:[%s5756_s4 + $0x1a0] sm:$0xff]  ;;  %v3889_v42 = vpack.c.bf16 %v2837_v4, %v2836_v14  ;;  %v2780_v14 = vld [vmem:[%s5756_s4 + $0x1d0] sm:$0xff]  ;;  %v2781_v4 = vld [vmem:[%s5756_s4 + $0x1d8] sm:$0xff] }
  0xe5   : > { %3488 = vmatmul.mubr.f32.gmra.mrb[12].mxu0 %v5416_v52  ;;  %3301 = vmatprep.mubr.f32.mxu1 %v5865_v55  ;;  %v5870_v55 = vld [vmem:[#allocation13_spill] sm:$0xff] }
  0xe6   : > { %3490 = vmatprep.mubr.f32.mxu0 %v5427_v35  ;;  %3756 = vmatpush3.bf16.msra.mxu1 %v3753_v7  ;;  %v5440_v41 = vsel %vm1687_vm3, %v1717_v22, %v5866_v26  ;;  %v2775_v7 = vld [vmem:[%s5756_s4 + $0x1a8] sm:$0xff]  ;;  %v2838_v22 = vld [vmem:[%s5756_s4 + $0x3a0] sm:$0xff]  ;;  %v3773_v26 = vpack.c.bf16 %v2779_v0, %v2778_v17  ;;  %v2861_v0 = vld [vmem:[%s5756_s4 + $0x458] sm:$0xff] }
  0xe7   : > { %3758 = vmatprep.subr.bf16.mxu1 %v3757_v21  ;;  %3884 = vmatpush3.bf16.msra.mxu0 %v3881_v5  ;;  %v3765_v54 = vpack.c.bf16 %v2775_v7, %v2774_v33  ;;  %v5868_v5 = vld [vmem:[#allocation14_spill] sm:$0xff]  ;;  %v3777_v7 = vpack.c.bf16 %v2781_v4, %v2780_v14  ;;  %v2855_v17 = vld [vmem:[%s5756_s4 + $0x428] sm:$0xff]  ;;  %v5879_v14 = vld [vmem:[#allocation16_spill] sm:$0xff] }
  0xe8   : > { %3886 = vmatprep.subr.bf16.mxu0 %v3885_v2  ;;  %v5882_v4 = vld [vmem:[#allocation18_spill] sm:$0xff] }
  0xe9   : > { %3491 = vmatmul.mubr.f32.gmra.mrb[14].mxu0 %v5440_v41  ;;  %3302 = vmatmul.mubr.f32.vlgmr.msra.gmra.mrb[0].mxu1 %v5867_v19  ;;  %v2782_v19 = vld [vmem:[%s5756_s4 + $0x1e0] sm:$0xff] }
  0xea   : > { %3525 = vmatprep.mubr.f32.mxu0 %v4951_v57  ;;  %3304 = vmatprep.mubr.f32.mxu1 %v4880_v56  ;;  %v2839_v57 = vld [vmem:[%s5756_s4 + $0x3a8] sm:$0xff]  ;;  %v2776_v56 = vld [vmem:[%s5756_s4 + $0x1b0] sm:$0xff] }
  0xeb   : > { %3760 = vmatpush3.bf16.msra.mxu1 %v3757_v21  ;;  %v3893_v3 = vpack.c.bf16 %v2839_v57, %v2838_v22  ;;  %v3769_v21 = vpack.c.bf16 %v2777_v49, %v2776_v56  ;;  %v2785_v56 = vld [vmem:[%s5756_s4 + $0x1f8] sm:$0xff] }
  0xec   : > { %3762 = vmatprep.subr.bf16.mxu1 %v3761_v45 }
  0xed   : > { %3526 = vmatmul.mubr.f32.vlgmr.msra.gmra.mrb[0].mxu0 %v4978_v23  ;;  %3305 = vmatmul.mubr.f32.gmra.mrb[2].mxu1 %v5868_v5  ;;  %v2840_v23 = vld [vmem:[%s5756_s4 + $0x3b0] sm:$0xff] }
  0xee   : > { %3888 = vmatpush3.bf16.msra.mxu0 %v3885_v2  ;;  %3528 = vmatprep.mubr.f32.mxu0 %v4981_v36  ;;  %v2841_v36 = vld [vmem:[%s5756_s4 + $0x3b8] sm:$0xff] }
  0xef   : > { %3890 = vmatprep.subr.bf16.mxu0 %v3889_v42  ;;  %3307 = vmatprep.mubr.f32.mxu1 %v5869_v60  ;;  %v3897_v2 = vpack.c.bf16 %v2841_v36, %v2840_v23  ;;  %v2851_v23 = vld [vmem:[%s5756_s4 + $0x408] sm:$0xff] }
  0xf0   : > { %3764 = vmatpush3.bf16.msra.mxu1 %v3761_v45  ;;  %v5871_v45 = vld [vmem:[#allocation15_spill] sm:$0xff] }
  0xf1   : > { %3529 = vmatmul.mubr.f32.gmra.mrb[2].mxu0 %v5008_v40  ;;  %3766 = vmatprep.subr.bf16.mxu1 %v3765_v54  ;;  %v2842_v40 = vld [vmem:[%s5756_s4 + $0x3c0] sm:$0xff] }
  0xf2   : > { %3892 = vmatpush3.bf16.msra.mxu0 %v3889_v42  ;;  %3531 = vmatprep.mubr.f32.mxu0 %v5013_v32  ;;  %v2843_v32 = vld [vmem:[%s5756_s4 + $0x3c8] sm:$0xff] }
  0xf3   : > { %3308 = vmatmul.mubr.f32.gmra.mrb[4].mxu1 %v5870_v55  ;;  %3894 = vmatprep.subr.bf16.mxu0 %v3893_v3  ;;  %v3901_v33 = vpack.c.bf16 %v2843_v32, %v2842_v40  ;;  %v2783_v42 = vld [vmem:[%s5756_s4 + $0x1e8] sm:$0xff]  ;;  %v2864_v40 = vld [vmem:[%s5756_s4 + $0x470] sm:$0xff]  ;;  %v2865_v32 = vld [vmem:[%s5756_s4 + $0x478] sm:$0xff] }
  0xf4   : > { %3310 = vmatprep.mubr.f32.mxu1 %v4921_v37  ;;  %3768 = vmatpush3.bf16.msra.mxu1 %v3765_v54  ;;  %v3781_v57 = vpack.c.bf16 %v2783_v42, %v2782_v19  ;;  %v2784_v54 = vld [vmem:[%s5756_s4 + $0x1f0] sm:$0xff] }
  0xf5   : > { %3532 = vmatmul.mubr.f32.gmra.mrb[4].mxu0 %v5341_v47  ;;  %3770 = vmatprep.subr.bf16.mxu1 %v3769_v21  ;;  %v2844_v47 = vld [vmem:[%s5756_s4 + $0x3d0] sm:$0xff]  ;;  %v3785_v5 = vpack.c.bf16 %v2785_v56, %v2784_v54 }
  0xf6   : > { %3896 = vmatpush3.bf16.msra.mxu0 %v3893_v3  ;;  %3534 = vmatprep.mubr.f32.mxu0 %v5375_v29  ;;  %v2845_v29 = vld [vmem:[%s5756_s4 + $0x3d8] sm:$0xff]  ;;  %v2850_v3 = vld [vmem:[%s5756_s4 + $0x400] sm:$0xff] }
  0xf7   : > { %3311 = vmatmul.mubr.f32.gmra.mrb[6].mxu1 %v5871_v45  ;;  %3898 = vmatprep.subr.bf16.mxu0 %v3897_v2  ;;  %v3905_v22 = vpack.c.bf16 %v2845_v29, %v2844_v47  ;;  %v5886_v47 = vld [vmem:[#allocation22_spill] sm:$0xff]  ;;  %v5888_v29 = vld [vmem:[#allocation24_spill] sm:$0xff] }
  0xf8   : > { %3313 = vmatprep.mubr.f32.mxu1 %v5050_v9  ;;  %3772 = vmatpush3.bf16.msra.mxu1 %v3769_v21  ;;  %v2853_v21 = vld [vmem:[%s5756_s4 + $0x418] sm:$0xff] }
  0xf9   : > { %3535 = vmatmul.mubr.f32.gmra.mrb[6].mxu0 %v5391_v63  ;;  %3774 = vmatprep.subr.bf16.mxu1 %v3773_v26  ;;  %v2846_v63 = vld [vmem:[%s5756_s4 + $0x3e0] sm:$0xff] }
  0xfa   : > { %3900 = vmatpush3.bf16.msra.mxu0 %v3897_v2  ;;  %3537 = vmatprep.mubr.f32.mxu0 %v5404_v11  ;;  %v2847_v11 = vld [vmem:[%s5756_s4 + $0x3e8] sm:$0xff] }
  0xfb   : > { %3314 = vmatmul.mubr.f32.gmra.mrb[8].mxu1 %v5055_v61  ;;  %3902 = vmatprep.subr.bf16.mxu0 %v3901_v33  ;;  %v3909_v49 = vpack.c.bf16 %v2847_v11, %v2846_v63  ;;  %v2863_v2 = vld [vmem:[%s5756_s4 + $0x468] sm:$0xff] }
  0xfc   : > { %3316 = vmatprep.mubr.f32.mxu1 %v5060_v51  ;;  %3776 = vmatpush3.bf16.msra.mxu1 %v3773_v26  ;;  %v5878_v26 = vld [vmem:[#allocation7_spill] sm:$0xff] }
  0xfd   : > { %3538 = vmatmul.mubr.f32.gmra.mrb[8].mxu0 %v5416_v52  ;;  %3778 = vmatprep.subr.bf16.mxu1 %v3777_v7  ;;  %v2848_v52 = vld [vmem:[%s5756_s4 + $0x3f0] sm:$0xff] }
  0xfe   : > { %3904 = vmatpush3.bf16.msra.mxu0 %v3901_v33  ;;  %3540 = vmatprep.mubr.f32.mxu0 %v5427_v35  ;;  %v2849_v35 = vld [vmem:[%s5756_s4 + $0x3f8] sm:$0xff]  ;;  %v5884_v33 = vld [vmem:[#allocation20_spill] sm:$0xff] }
  0xff   : > { %3317 = vmatmul.mubr.f32.gmra.mrb[10].mxu1 %v5090_v15  ;;  %3906 = vmatprep.subr.bf16.mxu0 %v3905_v22  ;;  %v3913_v36 = vpack.c.bf16 %v2849_v35, %v2848_v52 }
 0x100   : > { %3319 = vmatprep.mubr.f32.mxu1 %v5093_v20  ;;  %3780 = vmatpush3.bf16.msra.mxu1 %v3777_v7 }
 0x101   : > { %3541 = vmatmul.mubr.f32.gmra.mrb[10].mxu0 %v5440_v41  ;;  %3782 = vmatprep.subr.bf16.mxu1 %v3781_v57  ;;  %v3917_v41 = vpack.c.bf16 %v2851_v23, %v2850_v3 }
 0x102   : > { %3908 = vmatpush3.bf16.msra.mxu0 %v3905_v22  ;;  %3543 = vmatprep.mubr.f32.mxu0 %v5115_v6  ;;  %v2852_v6 = vld [vmem:[%s5756_s4 + $0x410] sm:$0xff] }
 0x103   : > { %3320 = vmatmul.mubr.f32.gmra.mrb[12].mxu1 %v5096_v18  ;;  %3910 = vmatprep.subr.bf16.mxu0 %v3909_v49 }
 0x104   : > { %3322 = vmatprep.mubr.f32.mxu1 %v5118_v25  ;;  %3784 = vmatpush3.bf16.msra.mxu1 %v3781_v57 }
 0x105   : > { %3544 = vmatmul.mubr.f32.gmra.mrb[12].mxu0 %v5145_v24  ;;  %3786 = vmatprep.subr.bf16.mxu1 %v3785_v5  ;;  %v3921_v24 = vpack.c.bf16 %v2853_v21, %v2852_v6 }
 0x106   : > { %3912 = vmatpush3.bf16.msra.mxu0 %v3909_v49  ;;  %3546 = vmatprep.mubr.f32.mxu0 %v5148_v46  ;;  %v2854_v46 = vld [vmem:[%s5756_s4 + $0x420] sm:$0xff] }
 0x107   : > { %3323 = vmatmul.mubr.f32.gmra.mrb[14].mxu1 %v5134_v16  ;;  %3914 = vmatprep.subr.bf16.mxu0 %v3913_v36 }
 0x108   : > { %3788 = vmatpush3.bf16.msra.mxu1 %v3785_v5  ;;  %3357 = vmatprep.mubr.f32.mxu1 %v5869_v60  ;;  %v2857_v60 = vld [vmem:[%s5756_s4 + $0x438] sm:$0xff] }
 0x109   : > { %3547 = vmatmul.mubr.f32.gmra.mrb[14].mxu0 %v5181_v38  ;;  %3949 = vmatprep.subr.bf16.mxu1 %v3917_v41  ;;  %v3925_v38 = vpack.c.bf16 %v2855_v17, %v2854_v46 }
 0x10a   : > { %3916 = vmatpush3.bf16.msra.mxu0 %v3913_v36  ;;  %3581 = vmatprep.mubr.f32.mxu0 %v5137_v50  ;;  %v2856_v50 = vld [vmem:[%s5756_s4 + $0x430] sm:$0xff] }
 0x10b   : > { %3358 = vmatmul.mubr.f32.vlgmr.msra.gmra.mrb[0].mxu1 %v5870_v55  ;;  %3918 = vmatprep.subr.bf16.mxu0 %v3917_v41  ;;  %v2862_v55 = vld [vmem:[%s5756_s4 + $0x460] sm:$0xff] }
 0x10c   : > { %3360 = vmatprep.mubr.f32.mxu1 %v4921_v37  ;;  %3957 = vmatpush3.bf16.msra.mxu1 %v3917_v41  ;;  %v3929_v37 = vpack.c.bf16 %v2857_v60, %v2856_v50  ;;  %v5674_v60 = vld [vmem:[%s5757_s5] ss:$0 sm:$0xff] }
 0x10d   : > { %3582 = vmatmul.mubr.f32.vlgmr.msra.gmra.mrb[0].mxu0 %v5151_v58  ;;  %3950 = vmatprep.subr.bf16.mxu1 %v3921_v24  ;;  %v2858_v58 = vld [vmem:[%s5756_s4 + $0x440] sm:$0xff] }
 0x10e   : > { %3920 = vmatpush3.bf16.msra.mxu0 %v3917_v41  ;;  %3584 = vmatprep.mubr.f32.mxu0 %v5155_v13  ;;  %v2859_v13 = vld [vmem:[%s5756_s4 + $0x448] sm:$0xff] }
 0x10f   : > { %3361 = vmatmul.mubr.f32.gmra.mrb[2].mxu1 %v5871_v45  ;;  %3922 = vmatprep.subr.bf16.mxu0 %v3921_v24  ;;  %v5883_v45 = vld [vmem:[#allocation10_spill] sm:$0xff] }
 0x110   : > { %3363 = vmatprep.mubr.f32.mxu1 %v5050_v9  ;;  %3958 = vmatpush3.bf16.msra.mxu1 %v3921_v24  ;;  %v5872_v9 = vld [vmem:[#allocation3_spill] sm:$0xff] }
 0x111   : > { %3585 = vmatmul.mubr.f32.gmra.mrb[2].mxu0 %v5169_v34  ;;  %3951 = vmatprep.subr.bf16.mxu1 %v3925_v38  ;;  %v3933_v34 = vpack.c.bf16 %v2859_v13, %v2858_v58  ;;  %v2580_v13 = vld [vmem:[%s5667_s20 + $0x48] sm:$0xff] }
 0x112   : > { %3924 = vmatpush3.bf16.msra.mxu0 %v3921_v24  ;;  %3587 = vmatprep.mubr.f32.mxu0 %v5172_v27  ;;  %v2860_v27 = vld [vmem:[%s5756_s4 + $0x450] sm:$0xff] }
 0x113   : > { %3364 = vmatmul.mubr.f32.gmra.mrb[4].mxu1 %v5055_v61  ;;  %3926 = vmatprep.subr.bf16.mxu0 %v3925_v38  ;;  %v3937_v61 = vpack.c.bf16 %v2861_v0, %v2860_v27  ;;  %v2579_v0 = vld [vmem:[%s5667_s20 + $0x40] sm:$0xff] }
 0x114   : > { %3366 = vmatprep.mubr.f32.mxu1 %v5060_v51  ;;  %3959 = vmatpush3.bf16.msra.mxu1 %v3925_v38  ;;  %v5873_v51 = vld [vmem:[#allocation4_spill] sm:$0xff] }
 0x115   : > { %3588 = vmatmul.mubr.f32.gmra.mrb[4].mxu0 %v5872_v9  ;;  %3952 = vmatprep.subr.bf16.mxu1 %v3929_v37 }
 0x116   : > { %3928 = vmatpush3.bf16.msra.mxu0 %v3925_v38  ;;  %3590 = vmatprep.mubr.f32.mxu0 %v5184_v48  ;;  %v5874_v48 = vld [vmem:[#allocation2_spill] sm:$0xff] }
 0x117   : > { %3367 = vmatmul.mubr.f32.gmra.mrb[6].mxu1 %v5090_v15  ;;  %3930 = vmatprep.subr.bf16.mxu0 %v3929_v37  ;;  %v5875_v15 = vld [vmem:[#allocation5_spill] sm:$0xff] }
 0x118   : > { %3369 = vmatprep.mubr.f32.mxu1 %v5093_v20  ;;  %3960 = vmatpush3.bf16.msra.mxu1 %v3929_v37  ;;  %v3941_v20 = vpack.c.bf16 %v2863_v2, %v2862_v55  ;;  %v2572_v55 = vld [vmem:[%s5667_s20 + $0x8] sm:$0xff] }
 0x119   : > { %3591 = vmatmul.mubr.f32.gmra.mrb[6].mxu0 %v5873_v51  ;;  %3953 = vmatprep.subr.bf16.mxu1 %v3933_v34 }
 0x11a   : > { %3932 = vmatpush3.bf16.msra.mxu0 %v3929_v37  ;;  %3593 = vmatprep.mubr.f32.mxu0 %v5874_v48 }
 0x11b   : > { %3370 = vmatmul.mubr.f32.gmra.mrb[8].mxu1 %v5096_v18  ;;  %3934 = vmatprep.subr.bf16.mxu0 %v3933_v34  ;;  %v5876_v18 = vld [vmem:[#allocation6_spill] sm:$0xff] }
 0x11c   : > { %3372 = vmatprep.mubr.f32.mxu1 %v5118_v25  ;;  %3961 = vmatpush3.bf16.msra.mxu1 %v3933_v34  ;;  %v3945_v25 = vpack.c.bf16 %v2865_v32, %v2864_v40  ;;  %v2571_v32 = vld [vmem:[%s5667_s20] sm:$0xff] }
 0x11d   : > { %3594 = vmatmul.mubr.f32.gmra.mrb[8].mxu0 %v5875_v15  ;;  %3954 = vmatprep.subr.bf16.mxu1 %v3937_v61 }
 0x11e   : > { %3936 = vmatpush3.bf16.msra.mxu0 %v3933_v34  ;;  %3596 = vmatprep.mubr.f32.mxu0 %v5209_v43  ;;  %v5877_v43 = vld [vmem:[#allocation9_spill] sm:$0xff] }
 0x11f   : > { %3373 = vmatmul.mubr.f32.gmra.mrb[10].mxu1 %v5134_v16  ;;  %3938 = vmatprep.subr.bf16.mxu0 %v3937_v61  ;;  %v5880_v16 = vld [vmem:[#allocation17_spill] sm:$0xff] }
 0x120   : > { %3375 = vmatprep.mubr.f32.mxu1 %v5214_v59  ;;  %3962 = vmatpush3.bf16.msra.mxu1 %v3937_v61  ;;  %v5881_v59 = vld [vmem:[#allocation19_spill] sm:$0xff] }
 0x121   : > { %3597 = vmatmul.mubr.f32.gmra.mrb[10].mxu0 %v5876_v18  ;;  %3955 = vmatprep.subr.bf16.mxu1 %v3941_v20 }
 0x122   : > { %3940 = vmatpush3.bf16.msra.mxu0 %v3937_v61  ;;  %3599 = vmatprep.mubr.f32.mxu0 %v5877_v43 }
 0x123   : > { %3376 = vmatmul.mubr.f32.gmra.mrb[12].mxu1 %v5878_v26  ;;  %3942 = vmatprep.subr.bf16.mxu0 %v3941_v20 }
 0x124   : > { %3378 = vmatprep.mubr.f32.mxu1 %v5879_v14  ;;  %3963 = vmatpush3.bf16.msra.mxu1 %v3941_v20  ;;  %v2582_v14 = vld [vmem:[%s5667_s20 + $0x58] sm:$0xff] }
 0x125   : > { %3600 = vmatmul.mubr.f32.gmra.mrb[12].mxu0 %v5241_v28  ;;  %3956 = vmatprep.subr.bf16.mxu1 %v3945_v25  ;;  %v5885_v28 = vld [vmem:[#allocation21_spill] sm:$0xff] }
 0x126   : > { %3944 = vmatpush3.bf16.msra.mxu0 %v3941_v20  ;;  %3602 = vmatprep.mubr.f32.mxu0 %v5251_v31  ;;  %v5887_v31 = vld [vmem:[#allocation23_spill] sm:$0xff] }
 0x127   : > { %3379 = vmatmul.mubr.f32.gmra.mrb[14].mxu1 %v5880_v16  ;;  %3946 = vmatprep.subr.bf16.mxu0 %v3945_v25 }
 0x128   : > { %3964 = vmatpush3.bf16.msra.mxu1 %v3945_v25  ;;  %3649 = vmatprep.mubr.f32.mxu1 %v5881_v59 }
 0x129   : > { %3603 = vmatmul.mubr.f32.gmra.mrb[14].mxu0 %v5882_v4 }
 0x12a   : > { %3948 = vmatpush3.bf16.msra.mxu0 %v3945_v25  ;;  %3637 = vmatprep.mubr.f32.mxu0 %v5275_v10 }
 0x12b   : > { %3650 = vmatmul.mubr.f32.vlgmr.msra.gmra.mrb[16].mxu1 %v5883_v45 }
 0x12c   : > { %3652 = vmatprep.mubr.f32.mxu1 %v5884_v33  ;;  %v2581_v33 = vld [vmem:[%s5667_s20 + $0x50] sm:$0xff] }
 0x12d   : > { %3638 = vmatmul.mubr.f32.vlgmr.msra.gmra.mrb[0].mxu0 %v5885_v28 }
 0x12e   : > { %3640 = vmatprep.mubr.f32.mxu0 %v5886_v47 }
 0x12f   : > { %3653 = vmatmul.mubr.f32.gmra.mrb[18].mxu1 %v5887_v31 }
 0x130   : > { %3655 = vmatprep.mubr.f32.mxu1 %v5308_v8 }
 0x131   : > { %3641 = vmatmul.mubr.f32.gmra.mrb[2].mxu0 %v5888_v29 }
 0x132   : > { %3643 = vmatprep.mubr.f32.mxu0 %v5317_v53 }
 0x133   : > { %3656 = vmatmul.mubr.f32.gmra.mrb[20].mxu1 %v5324_v30 }
 0x134   : > { %3658 = vmatprep.mubr.f32.mxu1 %v5331_v1 }
 0x135   : > { %3644 = vmatmul.mubr.f32.gmra.mrb[4].mxu0 %v5345_v62 }
 0x136   : > { %3646 = vmatprep.mubr.f32.mxu0 %v5363_v39 }
 0x137   : > { %3659 = vmatmul.mubr.f32.gmra.mrb[22].mxu1 %v5352_v44 }
 0x139   : > { %3647 = vmatmul.mubr.f32.gmra.mrb[6].mxu0 %v5366_v12 }
 0x1de   : > { %v3359_v10 = vpop.f32.mrb[0].mxu1 }
 0x1df   : > { %v1347_v7 = vpop.f32.mrb[1].mxu1 }
 0x1e2   : > { %v5648_v8 = vpop.f32.mrb[2].mxu1 }
 0x1e3   : > { %v5650_v19 = vpop.f32.mrb[3].mxu1 }
 0x1e6   : > { %v5652_v53 = vpop.f32.mrb[4].mxu1 }
 0x1e7   : > { %v5654_v30 = vpop.f32.mrb[5].mxu1 }
 0x1ea   : > { %v5656_v1 = vpop.f32.mrb[6].mxu1 }
 0x1eb   : > { %v5658_v62 = vpop.f32.mrb[7].mxu1 }
 0x1ee   : > { %v3371_v39 = vpop.f32.mrb[8].mxu1 }
 0x1ef   : > { %v1387_v44 = vpop.f32.mrb[9].mxu1 }
 0x1f0   : > { %v3595_v12 = vpop.f32.mrb[8].mxu0 }
 0x1f1   : > { %v3973_v42 = vadd.f32 %v3595_v12, %v3371_v39  ;;  %v2265_v22 = vpop.f32.mrb[9].mxu0 }
 0x1f2   : > { %v3374_v63 = vpop.f32.mrb[10].mxu1  ;;  %v3975_v11 = vadd.f32 %v2265_v22, %v1387_v44 }
 0x1f3   : > { %v1397_v57 = vpop.f32.mrb[11].mxu1 }
 0x1f4   : > { %v3598_v54 = vpop.f32.mrb[10].mxu0 }
 0x1f5   : > { %v3977_v56 = vadd.f32 %v3598_v54, %v3374_v63  ;;  %v2275_v49 = vpop.f32.mrb[11].mxu0 }
 0x1f6   : > { %v3377_v52 = vpop.f32.mrb[12].mxu1  ;;  %v3979_v35 = vadd.f32 %v2275_v49, %v1397_v57  ;;  %v2584_v57 = vld [vmem:[%s5667_s20 + $0x68] sm:$0xff] }
 0x1f7   : > { %v1407_v5 = vpop.f32.mrb[13].mxu1 }
 0x1f8   : > { %v3601_v3 = vpop.f32.mrb[12].mxu0 }
 0x1f9   : > { %v3981_v23 = vadd.f32 %v3601_v3, %v3377_v52  ;;  %v2285_v36 = vpop.f32.mrb[13].mxu0  ;;  %v2583_v52 = vld [vmem:[%s5667_s20 + $0x60] sm:$0xff] }
 0x1fa   : > { %v3380_v41 = vpop.f32.mrb[14].mxu1  ;;  %v3983_v6 = vadd.f32 %v2285_v36, %v1407_v5  ;;  %v2576_v36 = vld [vmem:[%s5667_s20 + $0x28] sm:$0xff] }
 0x1fb   : > { %v1417_v21 = vpop.f32.mrb[15].mxu1 }
 0x1fc   : > { %v3604_v24 = vpop.f32.mrb[14].mxu0 }
 0x1fd   : > { %v5662_v46 = vadd.f32 %v3604_v24, %v3380_v41  ;;  %v2295_v17 = vpop.f32.mrb[15].mxu0 }
 0x1fe   : > { %v5669_v38 = vadd.f32 %v2295_v17, %v1417_v21  ;;  %v3651_v50 = vpop.f32.mrb[16].mxu1  ;;  %v2575_v17 = vld [vmem:[%s5667_s20 + $0x20] sm:$0xff] }
 0x1ff   : > { %v3974_v37 = vadd.f32 %v3973_v42, %v3651_v50  ;;  %v2493_v58 = vpop.f32.mrb[17].mxu1  ;;  %v2573_v42 = vld [vmem:[%s5667_s20 + $0x10] sm:$0xff] }
 0x200   : > { %v3976_v9 = vadd.f32 %v3975_v11, %v2493_v58  ;;  %v3639_v34 = vpop.f32.mrb[0].mxu0 }
 0x201   : > { %v2564_v27 = vadd.f32 %v3974_v37, %v5674_v60  ;;  %v3965_v51 = vadd.f32 %v3639_v34, %v3359_v10  ;;  %v2453_v61 = vpop.f32.mrb[1].mxu0  ;;  %v2574_v10 = vld [vmem:[%s5667_s20 + $0x18] sm:$0xff] }
 0x202   : > { %v2563_v48 = vadd.f32 %v3976_v9, %v5674_v60  ;;  %v3966_v2 = vadd.f32 %v2453_v61, %v1347_v7  ;;  %v3654_v15 = vpop.f32.mrb[18].mxu1 }
 0x203   : > { %v2596_v20 = vadd.f32 %v2580_v13, %v2564_v27  ;;  %v2556_v40 = vadd.f32 %v3965_v51, %v5674_v60  ;;  %v3978_v18 = vadd.f32 %v3977_v56, %v3654_v15  ;;  %v2503_v25 = vpop.f32.mrb[19].mxu1  ;;  %v2586_v13 = vld [vmem:[%s5667_s20 + $0x78] sm:$0xff] }
 0x204   : > { %v2595_v43 = vadd.f32 %v2579_v0, %v2563_v48  ;;  %v2555_v26 = vadd.f32 %v3966_v2, %v5674_v60  ;;  %v3980_v16 = vadd.f32 %v3979_v35, %v2503_v25  ;;  %v3642_v59 = vpop.f32.mrb[2].mxu0  ;;  %v2585_v0 = vld [vmem:[%s5667_s20 + $0x70] sm:$0xff] }
 0x205   : > { %2612 = vst [vmem:[%s5682_s22 + $0x48] sm:$0xff] %v2596_v20  ;;  %v2588_v4 = vadd.f32 %v2572_v55, %v2556_v40  ;;  %v2566_v45 = vadd.f32 %v3978_v18, %v5674_v60  ;;  %v3967_v28 = vadd.f32 %v3642_v59, %v5648_v8  ;;  %v2463_v47 = vpop.f32.mrb[3].mxu0  ;;  %v2577_v20 = vld [vmem:[%s5667_s20 + $0x30] sm:$0xff] }
 0x206   : > { %2611 = vst [vmem:[%s5682_s22 + $0x40] sm:$0xff] %v2595_v43  ;;  %v2587_v31 = vadd.f32 %v2571_v32, %v2555_v26  ;;  %v2565_v29 = vadd.f32 %v3980_v16, %v5674_v60  ;;  %v3968_v7 = vadd.f32 %v2463_v47, %v5650_v19  ;;  %v3657_v39 = vpop.f32.mrb[20].mxu1 }
 0x207   : > { %2604 = vst [vmem:[%s5682_s22 + $0x8] sm:$0xff] %v2588_v4  ;;  %v2598_v44 = vadd.f32 %v2582_v14, %v2566_v45  ;;  %v2558_v12 = vadd.f32 %v3967_v28, %v5674_v60  ;;  %v3982_v22 = vadd.f32 %v3981_v23, %v3657_v39  ;;  %v2513_v8 = vpop.f32.mrb[21].mxu1 }
 0x208   : > { %2603 = vst [vmem:[%s5682_s22] sm:$0xff] %v2587_v31  ;;  %v2597_v63 = vadd.f32 %v2581_v33, %v2565_v29  ;;  %v2557_v11 = vadd.f32 %v3968_v7, %v5674_v60  ;;  %v3984_v54 = vadd.f32 %v3983_v6, %v2513_v8  ;;  %v3645_v56 = vpop.f32.mrb[4].mxu0 }
 0x209   : > { %2614 = vst [vmem:[%s5682_s22 + $0x58] sm:$0xff] %v2598_v44  ;;  %v2590_v19 = vadd.f32 %v2574_v10, %v2558_v12  ;;  %v2568_v49 = vadd.f32 %v3982_v22, %v5674_v60  ;;  %v3969_v35 = vadd.f32 %v3645_v56, %v5652_v53  ;;  %v2473_v5 = vpop.f32.mrb[5].mxu0 }
 0x20a   : > { %2613 = vst [vmem:[%s5682_s22 + $0x50] sm:$0xff] %v2597_v63  ;;  %v2589_v3 = vadd.f32 %v2573_v42, %v2557_v11  ;;  %v2567_v23 = vadd.f32 %v3984_v54, %v5674_v60  ;;  %v3970_v41 = vadd.f32 %v2473_v5, %v5654_v30  ;;  %v3660_v6 = vpop.f32.mrb[22].mxu1 }
 0x20b   : > { %2606 = vst [vmem:[%s5682_s22 + $0x18] sm:$0xff] %v2590_v19  ;;  %v2600_v21 = vadd.f32 %v2584_v57, %v2568_v49  ;;  %v2560_v24 = vadd.f32 %v3969_v35, %v5674_v60  ;;  %v3986_v53 = vadd.f32 %v5662_v46, %v3660_v6  ;;  %v2523_v50 = vpop.f32.mrb[23].mxu1 }
 0x20c   : > { %2605 = vst [vmem:[%s5682_s22 + $0x10] sm:$0xff] %v2589_v3  ;;  %v2599_v37 = vadd.f32 %v2583_v52, %v2567_v23  ;;  %v2559_v58 = vadd.f32 %v3970_v41, %v5674_v60  ;;  %v3988_v30 = vadd.f32 %v5669_v38, %v2523_v50  ;;  %v3648_v9 = vpop.f32.mrb[6].mxu0  ;;  %v2578_v38 = vld [vmem:[%s5667_s20 + $0x38] sm:$0xff] }
 0x20d   : > { %2616 = vst [vmem:[%s5682_s22 + $0x68] sm:$0xff] %v2600_v21  ;;  %v2592_v34 = vadd.f32 %v2576_v36, %v2560_v24  ;;  %v2570_v27 = vadd.f32 %v3986_v53, %v5674_v60  ;;  %v3971_v46 = vadd.f32 %v3648_v9, %v5656_v1  ;;  %v2483_v51 = vpop.f32.mrb[7].mxu0 }
 0x20e   : > { %2615 = vst [vmem:[%s5682_s22 + $0x60] sm:$0xff] %v2599_v37  ;;  %v2591_v61 = vadd.f32 %v2575_v17, %v2559_v58  ;;  %v2569_v48 = vadd.f32 %v3988_v30, %v5674_v60  ;;  %v3972_v55 = vadd.f32 %v2483_v51, %v5658_v62 }
 0x20f   : > { %2608 = vst [vmem:[%s5682_s22 + $0x28] sm:$0xff] %v2592_v34  ;;  %v2602_v2 = vadd.f32 %v2586_v13, %v2570_v27  ;;  %v2562_v15 = vadd.f32 %v3971_v46, %v5674_v60 }
 0x210   : > { %2607 = vst [vmem:[%s5682_s22 + $0x20] sm:$0xff] %v2591_v61  ;;  %v2601_v40 = vadd.f32 %v2585_v0, %v2569_v48  ;;  %v2561_v1 = vadd.f32 %v3972_v55, %v5674_v60 }
 0x211   : > { %2618 = vst [vmem:[%s5682_s22 + $0x78] sm:$0xff] %v2602_v2  ;;  %v2594_v32 = vadd.f32 %v2578_v38, %v2562_v15 }
 0x212   : > { %2617 = vst [vmem:[%s5682_s22 + $0x70] sm:$0xff] %v2601_v40  ;;  %v2593_v18 = vadd.f32 %v2577_v20, %v2561_v1 }
 0x213   : > { %2610 = vst [vmem:[%s5682_s22 + $0x38] sm:$0xff] %v2594_v32 }
 0x214   : > { %2609 = vst [vmem:[%s5682_s22 + $0x30] sm:$0xff] %v2593_v18 }
 0x215 PF: > { %s17_s28 = sadd.s32 1, %s4176_s28   ;;  %s5889_s24 = smov %s4168_s26 }
 0x216   : > { %p14_p7 = scmp.ge.s32.totalorder %s17_s28, 22   ;;  %s5890_s25 = smov %s4172_s27 }
 0x217   : > { %s5891_s26 = smov %s5894_s29  ;;  %s5892_s27 = smov %s5898_s30 }
 0x218   :  { %16 = sbr.rel (!%p14_p7) target bundleno = 3 (0x3), region = 91 }

</bundles_post_ra>
